<compile_context>
chip_gen: v6e
topology: v6e:2x2x1
jax: 0.10.0
libtpu: 0.0.40
codegen_flags: <defaults>
</compile_context>

<pallas_src>
import functools

import jax
import jax.numpy as jnp
from jax.experimental import pallas as pl
from jax.experimental.pallas import tpu as pltpu

_EPS = 0.0001  # same constant as the PyTorch module


# --------------------------- shifted-difference helpers ------------------------

def _shift_next(x, axis, mode):
    """Zero-padded next-element shift along `axis` of a 2-D (H, W) array.

    out[..., i, ...] = x[..., i+1, ...] for i < n-1 and 0 at i = n-1, i.e. the
    zero-padded tensor p (one trailing row/col of zeros) sampled at i+1.
      "roll_jnp" : pltpu.roll with jnp.roll convention  (out[i] = x[(i-s) % n])
      "roll_opp" : pltpu.roll with the opposite convention
      "concat"   : slice + concatenate-with-zeros fallback
    """
    n = x.shape[axis]
    if mode == "concat":
        if axis == 0:
            pad = jnp.zeros((1, x.shape[1]), x.dtype)
            return jnp.concatenate([x[1:, :], pad], axis=0)
        pad = jnp.zeros((x.shape[0], 1), x.dtype)
        return jnp.concatenate([x[:, 1:], pad], axis=1)
    shift = (n - 1) if mode == "roll_jnp" else 1
    rolled = pltpu.roll(x, shift, axis=axis)
    idx = jax.lax.broadcasted_iota(jnp.int32, x.shape, axis)
    return jnp.where(idx == n - 1, jnp.zeros_like(rolled), rolled)


def _grad(x, direction, mode):
    """|conv2d(zero-pad(x), k_dir)| on the full (H, W) grid.

    k_x = [[0,0],[-1,1]] -> |p[i+1,j+1] - p[i+1,j]|
    k_y = [[0,-1],[0,1]] -> |p[i+1,j+1] - p[i,j+1]|
    The zero-padded bottom row / right column stays inside the map exactly as
    in the PyTorch module (this also guarantees grad_min == 0).
    """
    if direction == 0:                      # 'x'
        a = _shift_next(x, 0, mode)         # p[i+1, j]
        b = _shift_next(a, 1, mode)         # p[i+1, j+1]
    else:                                   # 'y'
        a = _shift_next(x, 1, mode)         # p[i,   j+1]
        b = _shift_next(a, 0, mode)         # p[i+1, j+1]
    return jnp.abs(b - a)


# ---------------------------------- pass 1 -------------------------------------
# Gradient-tensor ordering shared by the two passes:
#   k = 2*src + dir, src in (il1, il2, gray_low, gray_high), dir in (x, y).

def _make_stage1_kernel(mode):
    def stage1(r1_ref, r2_ref, il1_ref, il2_ref, img_ref, tgt_ref,
               sum_ref, max_ref, gray_ref):
        il1 = il1_ref[0, 0]
        il2 = il2_ref[0, 0]

        # recon_low + recon_high + 0.01*equal_R: one elementwise accumulator,
        # a single sum reduction (shared 1/(3NHW) denominator applied in glue).
        acc = None
        for c in range(3):
            t = (jnp.abs(r1_ref[0, c] * il1 - img_ref[0, c])
                 + jnp.abs(r2_ref[0, c] * il2 - tgt_ref[0, c])
                 + 0.01 * jnp.abs(r1_ref[0, c] - r2_ref[0, c]))
            acc = t if acc is None else acc + t
        sum_ref[0] = jnp.broadcast_to(jnp.sum(acc), (8, 128))

        # Gray maps, written out so pass 2 never re-reads the RGB planes.
        gray_lo = (0.299 * img_ref[0, 0] + 0.587 * img_ref[0, 1]
                   + 0.114 * img_ref[0, 2])
        gray_hi = (0.299 * tgt_ref[0, 0] + 0.587 * tgt_ref[0, 1]
                   + 0.114 * tgt_ref[0, 2])
        gray_ref[0, 0] = gray_lo
        gray_ref[0, 1] = gray_hi

        # Per-gradient-tensor maxima, one gradient map live at a time
        # (gmin == 0 exactly, so no min reductions).
        row = jax.lax.broadcasted_iota(jnp.int32, (8, 128), 0)
        blk = jnp.zeros((8, 128), jnp.float32)
        k = 0
        for src in (il1, il2, gray_lo, gray_hi):
            for d in (0, 1):
                blk = jnp.where(row == k, jnp.max(_grad(src, d, mode)), blk)
                k += 1
        max_ref[0] = blk

    return stage1


# ---------------------------------- pass 2 -------------------------------------

def _make_stage2_kernel(mode):
    def stage2(inv_ref, il1_ref, il2_ref, gray_ref, out_ref):
        il1 = il1_ref[0, 0]
        il2 = il2_ref[0, 0]
        gray_lo = gray_ref[0, 0]
        gray_hi = gray_ref[0, 1]

        total = None
        # x-direction terms fully reduced before the y-direction terms: only 4
        # normalized gradient maps are live at any time.
        for d in (0, 1):
            l1 = _grad(il1, d, mode) * inv_ref[0 + d]
            l2 = _grad(il2, d, mode) * inv_ref[2 + d]
            s = l1 + l2
            mutual = s * jnp.exp(-10.0 * s)
            gl = _grad(gray_lo, d, mode) * inv_ref[4 + d]
            gh = _grad(gray_hi, d, mode) * inv_ref[6 + d]
            # All operands are nonnegative, so the reference abs() is a no-op;
            # the divide becomes an EUP approx reciprocal.
            inp_lo = l1 * pl.reciprocal(jnp.maximum(gl, 0.01), approx=True)
            inp_hi = l2 * pl.reciprocal(jnp.maximum(gh, 0.01), approx=True)
            part = jnp.sum(0.2 * mutual + 0.15 * inp_hi + 0.15 * inp_lo)
            total = part if total is None else total + part
        out_ref[0] = jnp.broadcast_to(total, (8, 128))

    return stage2


# --------------------------------- wrapper -------------------------------------

_VMEM_LIMIT = None


def _vmem_limit_bytes():
    """Generation-aware scoped-VMEM limit (~3/4 of physical, capped at 112 MiB):
    48 MiB on v7x (64 MiB VMEM), 96 MiB on v5e/v6e (128 MiB).  Falls back to a
    conservative 48 MiB if the hardware query is unavailable."""
    global _VMEM_LIMIT
    if _VMEM_LIMIT is None:
        limit = 48 * 1024 * 1024
        try:
            cap = getattr(pltpu.get_tpu_info(), "vmem_capacity_bytes", None)
            if cap:
                limit = min(int(cap) * 3 // 4, 112 * 1024 * 1024)
        except Exception:
            pass
        _VMEM_LIMIT = limit
    return _VMEM_LIMIT


def _compiler_params():
    return pltpu.CompilerParams(
        dimension_semantics=("parallel",),   # batch axis -> both TCs on v7x
        vmem_limit_bytes=_vmem_limit_bytes(),
    )


@functools.partial(jax.jit, static_argnames=("shift_mode",))
def _kind_decom_loss_impl(reflect_1, reflect_2, illumin_1, illumin_2,
                          image, target, *, shift_mode):
    N, _, H, W = reflect_1.shape
    f32 = jnp.float32
    r1 = reflect_1.astype(f32)
    r2 = reflect_2.astype(f32)
    il1 = illumin_1.astype(f32)
    il2 = illumin_2.astype(f32)
    # torch `image.transpose(1, 3)`: (N, H, W, 3) -> (N, 3, W, H).
    # TODO(synk): fuse into the producer of image/target (extra HBM round trip).
    img_t = jnp.transpose(image, (0, 3, 2, 1)).astype(f32)
    tgt_t = jnp.transpose(target, (0, 3, 2, 1)).astype(f32)

    grid = (N,)
    spec_c3 = pl.BlockSpec((1, 3, H, W), lambda i: (i, 0, 0, 0))
    spec_c2 = pl.BlockSpec((1, 2, H, W), lambda i: (i, 0, 0, 0))
    spec_c1 = pl.BlockSpec((1, 1, H, W), lambda i: (i, 0, 0, 0))
    spec_out = pl.BlockSpec((1, 8, 128), lambda i: (i, 0, 0))
    params = _compiler_params()

    # ---- pass 1: recon partial sums + gray maps + per-gradient maxima --------
    sum1, maxblk, grays = pl.pallas_call(
        _make_stage1_kernel(shift_mode),
        grid=grid,
        in_specs=[spec_c3, spec_c3, spec_c1, spec_c1, spec_c3, spec_c3],
        out_specs=[spec_out, spec_out, spec_c2],
        out_shape=[jax.ShapeDtypeStruct((N, 8, 128), f32),
                   jax.ShapeDtypeStruct((N, 8, 128), f32),
                   jax.ShapeDtypeStruct((N, 2, H, W), f32)],
        compiler_params=params,
    )(r1, r2, il1, il2, img_t, tgt_t)

    # Tiny cross-batch glue: global maxima -> 8 scalar normalizers for pass 2
    # (gmin == 0 exactly, so norm = g / (gmax + eps)).
    recon_sum = jnp.sum(sum1[:, 0, 0])
    gmax = jnp.max(maxblk[:, :, 0], axis=0)            # (8,)
    inv = (1.0 / (gmax + _EPS)).astype(f32)            # (8,) -> SMEM in pass 2

    # ---- pass 2: normalized-gradient loss terms -------------------------------
    sum2 = pl.pallas_call(
        _make_stage2_kernel(shift_mode),
        grid=grid,
        in_specs=[pl.BlockSpec(memory_space=pltpu.MemorySpace.SMEM),
                  spec_c1, spec_c1, spec_c2],
        out_specs=spec_out,
        out_shape=jax.ShapeDtypeStruct((N, 8, 128), f32),
        compiler_params=params,
    )(inv, il1, il2, grays)
    grad_sum = jnp.sum(sum2[:, 0, 0])

    # recon_sum / (3NHW) == recon_low + recon_high + 0.01*equal_R
    # grad_sum  / (NHW)  == 0.2*i_mutual + 0.15*input_high + 0.15*input_low
    return recon_sum / (N * 3 * H * W) + grad_sum / (N * H * W)


_SHIFT_MODE = None   # decided on the first call: "roll_jnp" / "roll_opp" / "concat"


def _probe_roll_convention():
    """Probe pltpu.roll's rotation direction once with a tiny kernel so the
    shifted-difference math can never be silently flipped."""
    def kernel(x_ref, o_ref):
        o_ref[...] = pltpu.roll(x_ref[...], 1, axis=1)

    x = jnp.broadcast_to(jnp.arange(128, dtype=jnp.float32), (8, 128))
    out = pl.pallas_call(
        kernel, out_shape=jax.ShapeDtypeStruct((8, 128), jnp.float32))(x)
    v = int(jax.device_get(out)[0, 0])
    if v == 127:
        return "roll_jnp"   # out[i] = x[(i - shift) % n]  (matches jnp.roll)
    if v == 1:
        return "roll_opp"   # out[i] = x[(i + shift) % n]
    raise RuntimeError(f"unexpected pltpu.roll probe result: {v}")


def kind_decom_loss(reflect_1, reflect_2, illumin_1, illumin_2, image, target):
    N, C, H, W = reflect_1.shape
    if C != 3:
        raise ValueError("reflectance must have 3 channels")
    if H != W:
        raise ValueError("KinDLoss_decom requires H == W (NCHW reflectance is "
                         "subtracted from the transposed NHWC image)")

    global _SHIFT_MODE
    args = (reflect_1, reflect_2, illumin_1, illumin_2, image, target)
    if _SHIFT_MODE is None:
        try:
            mode = _probe_roll_convention()
            out = jax.block_until_ready(
                _kind_decom_loss_impl(*args, shift_mode=mode))
            _SHIFT_MODE = mode
            return out
        except Exception:
            # pltpu.roll unusable for this shape/toolchain -> concat fallback.
            _SHIFT_MODE = "concat"
    return _kind_decom_loss_impl(*args, shift_mode=_SHIFT_MODE)


# ------------------------ pure-JAX reference (for check) ----------------------

def _reference_loss(reflect_1, reflect_2, illumin_1, illumin_2, image, target):
    def gradient(x, direction):
        p = jnp.pad(x, ((0, 0), (0, 0), (0, 1), (0, 1)))
        if direction == 'x':
            g = p[:, :, 1:, 1:] - p[:, :, 1:, :-1]
        else:
            g = p[:, :, 1:, 1:] - p[:, :, :-1, 1:]
        g = jnp.abs(g)
        return (g - g.min()) / (g.max() - g.min() + _EPS)

    def mutual_i_input(il, im):
        gray = (0.299 * im[:, 0] + 0.587 * im[:, 1] + 0.114 * im[:, 2])[:, None]
        xl = jnp.abs(gradient(il, 'x') / jnp.maximum(gradient(gray, 'x'), 0.01))
        yl = jnp.abs(gradient(il, 'y') / jnp.maximum(gradient(gray, 'y'), 0.01))
        return jnp.mean(xl + yl)

    def mutual_i(il, ih):
        sx = gradient(il, 'x') + gradient(ih, 'x')
        sy = gradient(il, 'y') + gradient(ih, 'y')
        return jnp.mean(sx * jnp.exp(-10.0 * sx) + sy * jnp.exp(-10.0 * sy))

    img_t = jnp.transpose(image, (0, 3, 2, 1))
    tgt_t = jnp.transpose(target, (0, 3, 2, 1))
    recon_low = jnp.mean(jnp.abs(reflect_1 * illumin_1 - img_t))
    recon_high = jnp.mean(jnp.abs(reflect_2 * illumin_2 - tgt_t))
    equal_R = jnp.mean(jnp.abs(reflect_1 - reflect_2))
    return (recon_high + recon_low + 0.01 * equal_R
            + 0.2 * mutual_i(illumin_1, illumin_2)
            + 0.15 * mutual_i_input(illumin_2, tgt_t)
            + 0.15 * mutual_i_input(illumin_1, img_t))


if __name__ == "__main__":
    key = jax.random.PRNGKey(0)
    # H == W is required by the module; 128 keeps the lane dim native.
    N, H, W = 2, 128, 128
    ks = jax.random.split(key, 6)
    reflect_1 = jax.random.uniform(ks[0], (N, 3, H, W), jnp.float32)
    reflect_2 = jax.random.uniform(ks[1], (N, 3, H, W), jnp.float32)
    illumin_1 = jax.random.uniform(ks[2], (N, 1, H, W), jnp.float32)
    illumin_2 = jax.random.uniform(ks[3], (N, 1, H, W), jnp.float32)
    image = jax.random.uniform(ks[4], (N, H, W, 3), jnp.float32)
    target = jax.random.uniform(ks[5], (N, H, W, 3), jnp.float32)

    loss = kind_decom_loss(reflect_1, reflect_2, illumin_1, illumin_2,
                           image, target)
    loss = jax.block_until_ready(loss)

    ref = float(jax.block_until_ready(
        _reference_loss(reflect_1, reflect_2, illumin_1, illumin_2,
                        image, target)))
    # 2e-3 rel tolerance: approx reciprocal (~2e-4 rel) in the mutual_i_input
    # terms plus f32 reduction-order differences over ~10^5-element sums.
    if abs(float(loss) - ref) > 2e-3 * max(1.0, abs(ref)):
        raise AssertionError(f"mismatch: pallas={float(loss)} ref={ref}")

    print("KERNEL_OK")
</pallas_src>

<mosaic_0001>
module attributes {stable_mosaic.version = 11 : i64} {
  func.func @kernel(%arg0: memref<8x128xf32, #tpu.memory_space<vmem>>, %arg1: memref<8x128xf32, #tpu.memory_space<vmem>>) attributes {dimension_semantics = [], scalar_prefetch = 0 : i64, scratch_operands = 0 : i64, tpu.core_type = #tpu.core_type<tc>} {
    %c0 = arith.constant 0 : index
    %c0_0 = arith.constant 0 : index
    %0 = vector.load %arg0[%c0, %c0_0] : memref<8x128xf32, #tpu.memory_space<vmem>>, vector<8x128xf32>
    %c1_i32 = arith.constant 1 : i32
    %1 = tpu.dynamic_rotate %0 by %c1_i32 dim 1 : vector<8x128xf32>, i32 -> vector<8x128xf32>
    %c0_1 = arith.constant 0 : index
    %c0_2 = arith.constant 0 : index
    %2 = vector.load %arg1[%c0_1, %c0_2] : memref<8x128xf32, #tpu.memory_space<vmem>>, vector<8x128xf32>
    tpu.vector_store %arg1[%c0_1, %c0_2], %1 {strides = array<i32>} : memref<8x128xf32, #tpu.memory_space<vmem>>, vector<8x128xf32>,
    return
  }
}

module attributes {stable_mosaic.version = 11 : i64} {
  func.func @stage1(%arg0: i32, %arg1: memref<1x3x128x128xf32, #tpu.memory_space<vmem>>, %arg2: memref<1x3x128x128xf32, #tpu.memory_space<vmem>>, %arg3: memref<1x1x128x128xf32, #tpu.memory_space<vmem>>, %arg4: memref<1x1x128x128xf32, #tpu.memory_space<vmem>>, %arg5: memref<1x3x128x128xf32, #tpu.memory_space<vmem>>, %arg6: memref<1x3x128x128xf32, #tpu.memory_space<vmem>>, %arg7: memref<1x8x128xf32, #tpu.memory_space<vmem>>, %arg8: memref<1x8x128xf32, #tpu.memory_space<vmem>>, %arg9: memref<1x2x128x128xf32, #tpu.memory_space<vmem>>) attributes {dimension_semantics = [#tpu.dimension_semantics<parallel>], iteration_bounds = array<i64: 2>, scalar_prefetch = 0 : i64, scratch_operands = 0 : i64, tpu.core_type = #tpu.core_type<tc>, window_params = [{transform_indices = @transform_0, window_bounds = array<i64: 1, 3, 128, 128>}, {transform_indices = @transform_1, window_bounds = array<i64: 1, 3, 128, 128>}, {transform_indices = @transform_2, window_bounds = array<i64: 1, 1, 128, 128>}, {transform_indices = @transform_3, window_bounds = array<i64: 1, 1, 128, 128>}, {transform_indices = @transform_4, window_bounds = array<i64: 1, 3, 128, 128>}, {transform_indices = @transform_5, window_bounds = array<i64: 1, 3, 128, 128>}, {transform_indices = @transform_6, window_bounds = array<i64: 1, 8, 128>}, {transform_indices = @transform_7, window_bounds = array<i64: 1, 8, 128>}, {transform_indices = @transform_8, window_bounds = array<i64: 1, 2, 128, 128>}]} {
    %c0 = arith.constant 0 : index
    %c0_0 = arith.constant 0 : index
    %c0_1 = arith.constant 0 : index
    %c0_2 = arith.constant 0 : index
    %0 = vector.load %arg3[%c0, %c0_0, %c0_1, %c0_2] : memref<1x1x128x128xf32, #tpu.memory_space<vmem>>, vector<1x1x128x128xf32>
    %1 = vector.shape_cast %0 : vector<1x1x128x128xf32> to vector<128x128xf32>
    %c0_3 = arith.constant 0 : index
    %c0_4 = arith.constant 0 : index
    %c0_5 = arith.constant 0 : index
    %c0_6 = arith.constant 0 : index
    %2 = vector.load %arg4[%c0_3, %c0_4, %c0_5, %c0_6] : memref<1x1x128x128xf32, #tpu.memory_space<vmem>>, vector<1x1x128x128xf32>
    %3 = vector.shape_cast %2 : vector<1x1x128x128xf32> to vector<128x128xf32>
    %c0_7 = arith.constant 0 : index
    %c0_8 = arith.constant 0 : index
    %c0_9 = arith.constant 0 : index
    %c0_10 = arith.constant 0 : index
    %4 = vector.load %arg1[%c0_7, %c0_8, %c0_9, %c0_10] : memref<1x3x128x128xf32, #tpu.memory_space<vmem>>, vector<1x1x128x128xf32>
    %5 = vector.shape_cast %4 : vector<1x1x128x128xf32> to vector<128x128xf32>
    %6 = arith.mulf %5, %1 : vector<128x128xf32>
    %c0_11 = arith.constant 0 : index
    %c0_12 = arith.constant 0 : index
    %c0_13 = arith.constant 0 : index
    %c0_14 = arith.constant 0 : index
    %7 = vector.load %arg5[%c0_11, %c0_12, %c0_13, %c0_14] : memref<1x3x128x128xf32, #tpu.memory_space<vmem>>, vector<1x1x128x128xf32>
    %8 = vector.shape_cast %7 : vector<1x1x128x128xf32> to vector<128x128xf32>
    %9 = arith.subf %6, %8 : vector<128x128xf32>
    %10 = math.absf %9 : vector<128x128xf32>
    %c0_15 = arith.constant 0 : index
    %c0_16 = arith.constant 0 : index
    %c0_17 = arith.constant 0 : index
    %c0_18 = arith.constant 0 : index
    %11 = vector.load %arg2[%c0_15, %c0_16, %c0_17, %c0_18] : memref<1x3x128x128xf32, #tpu.memory_space<vmem>>, vector<1x1x128x128xf32>
    %12 = vector.shape_cast %11 : vector<1x1x128x128xf32> to vector<128x128xf32>
    %13 = arith.mulf %12, %3 : vector<128x128xf32>
    %c0_19 = arith.constant 0 : index
    %c0_20 = arith.constant 0 : index
    %c0_21 = arith.constant 0 : index
    %c0_22 = arith.constant 0 : index
    %14 = vector.load %arg6[%c0_19, %c0_20, %c0_21, %c0_22] : memref<1x3x128x128xf32, #tpu.memory_space<vmem>>, vector<1x1x128x128xf32>
    %15 = vector.shape_cast %14 : vector<1x1x128x128xf32> to vector<128x128xf32>
    %16 = arith.subf %13, %15 : vector<128x128xf32>
    %17 = math.absf %16 : vector<128x128xf32>
    %18 = arith.addf %10, %17 : vector<128x128xf32>
    %c0_23 = arith.constant 0 : index
    %c0_24 = arith.constant 0 : index
    %c0_25 = arith.constant 0 : index
    %c0_26 = arith.constant 0 : index
    %19 = vector.load %arg1[%c0_23, %c0_24, %c0_25, %c0_26] : memref<1x3x128x128xf32, #tpu.memory_space<vmem>>, vector<1x1x128x128xf32>
    %20 = vector.shape_cast %19 : vector<1x1x128x128xf32> to vector<128x128xf32>
    %c0_27 = arith.constant 0 : index
    %c0_28 = arith.constant 0 : index
    %c0_29 = arith.constant 0 : index
    %c0_30 = arith.constant 0 : index
    %21 = vector.load %arg2[%c0_27, %c0_28, %c0_29, %c0_30] : memref<1x3x128x128xf32, #tpu.memory_space<vmem>>, vector<1x1x128x128xf32>
    %22 = vector.shape_cast %21 : vector<1x1x128x128xf32> to vector<128x128xf32>
    %23 = arith.subf %20, %22 : vector<128x128xf32>
    %24 = math.absf %23 : vector<128x128xf32>
    %cst = arith.constant 0.00999999977 : f32
    %25 = vector.broadcast %cst : f32 to vector<128x128xf32>
    %26 = arith.mulf %25, %24 : vector<128x128xf32>
    %27 = arith.addf %18, %26 : vector<128x128xf32>
    %c0_31 = arith.constant 0 : index
    %c1 = arith.constant 1 : index
    %c0_32 = arith.constant 0 : index
    %c0_33 = arith.constant 0 : index
    %28 = vector.load %arg1[%c0_31, %c1, %c0_32, %c0_33] : memref<1x3x128x128xf32, #tpu.memory_space<vmem>>, vector<1x1x128x128xf32>
    %29 = vector.shape_cast %28 : vector<1x1x128x128xf32> to vector<128x128xf32>
    %30 = arith.mulf %29, %1 : vector<128x128xf32>
    %c0_34 = arith.constant 0 : index
    %c1_35 = arith.constant 1 : index
    %c0_36 = arith.constant 0 : index
    %c0_37 = arith.constant 0 : index
    %31 = vector.load %arg5[%c0_34, %c1_35, %c0_36, %c0_37] : memref<1x3x128x128xf32, #tpu.memory_space<vmem>>, vector<1x1x128x128xf32>
    %32 = vector.shape_cast %31 : vector<1x1x128x128xf32> to vector<128x128xf32>
    %33 = arith.subf %30, %32 : vector<128x128xf32>
    %34 = math.absf %33 : vector<128x128xf32>
    %c0_38 = arith.constant 0 : index
    %c1_39 = arith.constant 1 : index
    %c0_40 = arith.constant 0 : index
    %c0_41 = arith.constant 0 : index
    %35 = vector.load %arg2[%c0_38, %c1_39, %c0_40, %c0_41] : memref<1x3x128x128xf32, #tpu.memory_space<vmem>>, vector<1x1x128x128xf32>
    %36 = vector.shape_cast %35 : vector<1x1x128x128xf32> to vector<128x128xf32>
    %37 = arith.mulf %36, %3 : vector<128x128xf32>
    %c0_42 = arith.constant 0 : index
    %c1_43 = arith.constant 1 : index
    %c0_44 = arith.constant 0 : index
    %c0_45 = arith.constant 0 : index
    %38 = vector.load %arg6[%c0_42, %c1_43, %c0_44, %c0_45] : memref<1x3x128x128xf32, #tpu.memory_space<vmem>>, vector<1x1x128x128xf32>
    %39 = vector.shape_cast %38 : vector<1x1x128x128xf32> to vector<128x128xf32>
    %40 = arith.subf %37, %39 : vector<128x128xf32>
    %41 = math.absf %40 : vector<128x128xf32>
    %42 = arith.addf %34, %41 : vector<128x128xf32>
    %c0_46 = arith.constant 0 : index
    %c1_47 = arith.constant 1 : index
    %c0_48 = arith.constant 0 : index
    %c0_49 = arith.constant 0 : index
    %43 = vector.load %arg1[%c0_46, %c1_47, %c0_48, %c0_49] : memref<1x3x128x128xf32, #tpu.memory_space<vmem>>, vector<1x1x128x128xf32>
    %44 = vector.shape_cast %43 : vector<1x1x128x128xf32> to vector<128x128xf32>
    %c0_50 = arith.constant 0 : index
    %c1_51 = arith.constant 1 : index
    %c0_52 = arith.constant 0 : index
    %c0_53 = arith.constant 0 : index
    %45 = vector.load %arg2[%c0_50, %c1_51, %c0_52, %c0_53] : memref<1x3x128x128xf32, #tpu.memory_space<vmem>>, vector<1x1x128x128xf32>
    %46 = vector.shape_cast %45 : vector<1x1x128x128xf32> to vector<128x128xf32>
    %47 = arith.subf %44, %46 : vector<128x128xf32>
    %48 = math.absf %47 : vector<128x128xf32>
    %cst_54 = arith.constant 0.00999999977 : f32
    %49 = vector.broadcast %cst_54 : f32 to vector<128x128xf32>
    %50 = arith.mulf %49, %48 : vector<128x128xf32>
    %51 = arith.addf %42, %50 : vector<128x128xf32>
    %52 = arith.addf %27, %51 : vector<128x128xf32>
    %c0_55 = arith.constant 0 : index
    %c2 = arith.constant 2 : index
    %c0_56 = arith.constant 0 : index
    %c0_57 = arith.constant 0 : index
    %53 = vector.load %arg1[%c0_55, %c2, %c0_56, %c0_57] : memref<1x3x128x128xf32, #tpu.memory_space<vmem>>, vector<1x1x128x128xf32>
    %54 = vector.shape_cast %53 : vector<1x1x128x128xf32> to vector<128x128xf32>
    %55 = arith.mulf %54, %1 : vector<128x128xf32>
    %c0_58 = arith.constant 0 : index
    %c2_59 = arith.constant 2 : index
    %c0_60 = arith.constant 0 : index
    %c0_61 = arith.constant 0 : index
    %56 = vector.load %arg5[%c0_58, %c2_59, %c0_60, %c0_61] : memref<1x3x128x128xf32, #tpu.memory_space<vmem>>, vector<1x1x128x128xf32>
    %57 = vector.shape_cast %56 : vector<1x1x128x128xf32> to vector<128x128xf32>
    %58 = arith.subf %55, %57 : vector<128x128xf32>
    %59 = math.absf %58 : vector<128x128xf32>
    %c0_62 = arith.constant 0 : index
    %c2_63 = arith.constant 2 : index
    %c0_64 = arith.constant 0 : index
    %c0_65 = arith.constant 0 : index
    %60 = vector.load %arg2[%c0_62, %c2_63, %c0_64, %c0_65] : memref<1x3x128x128xf32, #tpu.memory_space<vmem>>, vector<1x1x128x128xf32>
    %61 = vector.shape_cast %60 : vector<1x1x128x128xf32> to vector<128x128xf32>
    %62 = arith.mulf %61, %3 : vector<128x128xf32>
    %c0_66 = arith.constant 0 : index
    %c2_67 = arith.constant 2 : index
    %c0_68 = arith.constant 0 : index
    %c0_69 = arith.constant 0 : index
    %63 = vector.load %arg6[%c0_66, %c2_67, %c0_68, %c0_69] : memref<1x3x128x128xf32, #tpu.memory_space<vmem>>, vector<1x1x128x128xf32>
    %64 = vector.shape_cast %63 : vector<1x1x128x128xf32> to vector<128x128xf32>
    %65 = arith.subf %62, %64 : vector<128x128xf32>
    %66 = math.absf %65 : vector<128x128xf32>
    %67 = arith.addf %59, %66 : vector<128x128xf32>
    %c0_70 = arith.constant 0 : index
    %c2_71 = arith.constant 2 : index
    %c0_72 = arith.constant 0 : index
    %c0_73 = arith.constant 0 : index
    %68 = vector.load %arg1[%c0_70, %c2_71, %c0_72, %c0_73] : memref<1x3x128x128xf32, #tpu.memory_space<vmem>>, vector<1x1x128x128xf32>
    %69 = vector.shape_cast %68 : vector<1x1x128x128xf32> to vector<128x128xf32>
    %c0_74 = arith.constant 0 : index
    %c2_75 = arith.constant 2 : index
    %c0_76 = arith.constant 0 : index
    %c0_77 = arith.constant 0 : index
    %70 = vector.load %arg2[%c0_74, %c2_75, %c0_76, %c0_77] : memref<1x3x128x128xf32, #tpu.memory_space<vmem>>, vector<1x1x128x128xf32>
    %71 = vector.shape_cast %70 : vector<1x1x128x128xf32> to vector<128x128xf32>
    %72 = arith.subf %69, %71 : vector<128x128xf32>
    %73 = math.absf %72 : vector<128x128xf32>
    %cst_78 = arith.constant 0.00999999977 : f32
    %74 = vector.broadcast %cst_78 : f32 to vector<128x128xf32>
    %75 = arith.mulf %74, %73 : vector<128x128xf32>
    %76 = arith.addf %67, %75 : vector<128x128xf32>
    %77 = arith.addf %52, %76 : vector<128x128xf32>
    %78 = vector.shape_cast %77 : vector<128x128xf32> to vector<1x128x128xf32>
    %cst_79 = arith.constant dense<0.000000e+00> : vector<1xf32>
    %79 = vector.multi_reduction <add>, %78, %cst_79 [1, 2] : vector<1x128x128xf32> to vector<1xf32>
    %80 = vector.shape_cast %79 : vector<1xf32> to vector<1x1x1xf32>
    %81 = vector.extract %80[0, 0, 0] : f32 from vector<1x1x1xf32>
    %82 = vector.broadcast %81 : f32 to vector<8x128xf32>
    %c0_80 = arith.constant 0 : index
    %c0_81 = arith.constant 0 : index
    %c0_82 = arith.constant 0 : index
    %83 = vector.load %arg7[%c0_80, %c0_81, %c0_82] : memref<1x8x128xf32, #tpu.memory_space<vmem>>, vector<1x8x128xf32>
    %84 = vector.shape_cast %83 : vector<1x8x128xf32> to vector<8x128xf32>
    %85 = vector.shape_cast %82 : vector<8x128xf32> to vector<1x8x128xf32>
    tpu.vector_store %arg7[%c0_80, %c0_81, %c0_82], %85 {strides = array<i32>} : memref<1x8x128xf32, #tpu.memory_space<vmem>>, vector<1x8x128xf32>,
    %c0_83 = arith.constant 0 : index
    %c0_84 = arith.constant 0 : index
    %c0_85 = arith.constant 0 : index
    %c0_86 = arith.constant 0 : index
    %86 = vector.load %arg5[%c0_83, %c0_84, %c0_85, %c0_86] : memref<1x3x128x128xf32, #tpu.memory_space<vmem>>, vector<1x1x128x128xf32>
    %87 = vector.shape_cast %86 : vector<1x1x128x128xf32> to vector<128x128xf32>
    %cst_87 = arith.constant 2.990000e-01 : f32
    %88 = vector.broadcast %cst_87 : f32 to vector<128x128xf32>
    %89 = arith.mulf %88, %87 : vector<128x128xf32>
    %c0_88 = arith.constant 0 : index
    %c1_89 = arith.constant 1 : index
    %c0_90 = arith.constant 0 : index
    %c0_91 = arith.constant 0 : index
    %90 = vector.load %arg5[%c0_88, %c1_89, %c0_90, %c0_91] : memref<1x3x128x128xf32, #tpu.memory_space<vmem>>, vector<1x1x128x128xf32>
    %91 = vector.shape_cast %90 : vector<1x1x128x128xf32> to vector<128x128xf32>
    %cst_92 = arith.constant 5.870000e-01 : f32
    %92 = vector.broadcast %cst_92 : f32 to vector<128x128xf32>
    %93 = arith.mulf %92, %91 : vector<128x128xf32>
    %94 = arith.addf %89, %93 : vector<128x128xf32>
    %c0_93 = arith.constant 0 : index
    %c2_94 = arith.constant 2 : index
    %c0_95 = arith.constant 0 : index
    %c0_96 = arith.constant 0 : index
    %95 = vector.load %arg5[%c0_93, %c2_94, %c0_95, %c0_96] : memref<1x3x128x128xf32, #tpu.memory_space<vmem>>, vector<1x1x128x128xf32>
    %96 = vector.shape_cast %95 : vector<1x1x128x128xf32> to vector<128x128xf32>
    %cst_97 = arith.constant 1.140000e-01 : f32
    %97 = vector.broadcast %cst_97 : f32 to vector<128x128xf32>
    %98 = arith.mulf %97, %96 : vector<128x128xf32>
    %99 = arith.addf %94, %98 : vector<128x128xf32>
    %c0_98 = arith.constant 0 : index
    %c0_99 = arith.constant 0 : index
    %c0_100 = arith.constant 0 : index
    %c0_101 = arith.constant 0 : index
    %100 = vector.load %arg6[%c0_98, %c0_99, %c0_100, %c0_101] : memref<1x3x128x128xf32, #tpu.memory_space<vmem>>, vector<1x1x128x128xf32>
    %101 = vector.shape_cast %100 : vector<1x1x128x128xf32> to vector<128x128xf32>
    %cst_102 = arith.constant 2.990000e-01 : f32
    %102 = vector.broadcast %cst_102 : f32 to vector<128x128xf32>
    %103 = arith.mulf %102, %101 : vector<128x128xf32>
    %c0_103 = arith.constant 0 : index
    %c1_104 = arith.constant 1 : index
    %c0_105 = arith.constant 0 : index
    %c0_106 = arith.constant 0 : index
    %104 = vector.load %arg6[%c0_103, %c1_104, %c0_105, %c0_106] : memref<1x3x128x128xf32, #tpu.memory_space<vmem>>, vector<1x1x128x128xf32>
    %105 = vector.shape_cast %104 : vector<1x1x128x128xf32> to vector<128x128xf32>
    %cst_107 = arith.constant 5.870000e-01 : f32
    %106 = vector.broadcast %cst_107 : f32 to vector<128x128xf32>
    %107 = arith.mulf %106, %105 : vector<128x128xf32>
    %108 = arith.addf %103, %107 : vector<128x128xf32>
    %c0_108 = arith.constant 0 : index
    %c2_109 = arith.constant 2 : index
    %c0_110 = arith.constant 0 : index
    %c0_111 = arith.constant 0 : index
    %109 = vector.load %arg6[%c0_108, %c2_109, %c0_110, %c0_111] : memref<1x3x128x128xf32, #tpu.memory_space<vmem>>, vector<1x1x128x128xf32>
    %110 = vector.shape_cast %109 : vector<1x1x128x128xf32> to vector<128x128xf32>
    %cst_112 = arith.constant 1.140000e-01 : f32
    %111 = vector.broadcast %cst_112 : f32 to vector<128x128xf32>
    %112 = arith.mulf %111, %110 : vector<128x128xf32>
    %113 = arith.addf %108, %112 : vector<128x128xf32>
    %c0_113 = arith.constant 0 : index
    %c0_114 = arith.constant 0 : index
    %c0_115 = arith.constant 0 : index
    %c0_116 = arith.constant 0 : index
    %114 = vector.load %arg9[%c0_113, %c0_114, %c0_115, %c0_116] : memref<1x2x128x128xf32, #tpu.memory_space<vmem>>, vector<1x1x128x128xf32>
    %115 = vector.shape_cast %114 : vector<1x1x128x128xf32> to vector<128x128xf32>
    %116 = vector.shape_cast %99 : vector<128x128xf32> to vector<1x1x128x128xf32>
    tpu.vector_store %arg9[%c0_113, %c0_114, %c0_115, %c0_116], %116 {strides = array<i32>} : memref<1x2x128x128xf32, #tpu.memory_space<vmem>>, vector<1x1x128x128xf32>,
    %c0_117 = arith.constant 0 : index
    %c1_118 = arith.constant 1 : index
    %c0_119 = arith.constant 0 : index
    %c0_120 = arith.constant 0 : index
    %117 = vector.load %arg9[%c0_117, %c1_118, %c0_119, %c0_120] : memref<1x2x128x128xf32, #tpu.memory_space<vmem>>, vector<1x1x128x128xf32>
    %118 = vector.shape_cast %117 : vector<1x1x128x128xf32> to vector<128x128xf32>
    %119 = vector.shape_cast %113 : vector<128x128xf32> to vector<1x1x128x128xf32>
    tpu.vector_store %arg9[%c0_117, %c1_118, %c0_119, %c0_120], %119 {strides = array<i32>} : memref<1x2x128x128xf32, #tpu.memory_space<vmem>>, vector<1x1x128x128xf32>,
    %120 = tpu.iota {dimensions = array<i32: 0>} : vector<8x128xi32>
    %cst_121 = arith.constant 0.000000e+00 : f32
    %121 = vector.broadcast %cst_121 : f32 to vector<8x128xf32>
    %c0_i32 = arith.constant 0 : i32
    %122 = vector.broadcast %c0_i32 : i32 to vector<8x128xi32>
    %123 = arith.cmpi eq, %120, %122 : vector<8x128xi32>
    %cst_122 = arith.constant 0.000000e+00 : f32
    %124 = vector.broadcast %cst_122 : f32 to vector<1x128xf32>
    %125 = vector.extract_strided_slice %1 {offsets = [1, 0], sizes = [127, 128], strides = [1, 1]} : vector<128x128xf32> to vector<127x128xf32>
    %126 = tpu.concatenate %125, %124 in 0 : vector<127x128xf32>, vector<1x128xf32> -> vector<128x128xf32>
    %cst_123 = arith.constant 0.000000e+00 : f32
    %127 = vector.broadcast %cst_123 : f32 to vector<128x1xf32>
    %128 = vector.extract_strided_slice %126 {offsets = [0, 1], sizes = [128, 127], strides = [1, 1]} : vector<128x128xf32> to vector<128x127xf32>
    %129 = tpu.concatenate %128, %127 in 1 : vector<128x127xf32>, vector<128x1xf32> -> vector<128x128xf32>
    %130 = arith.subf %129, %126 : vector<128x128xf32>
    %131 = math.absf %130 : vector<128x128xf32>
    %132 = vector.shape_cast %131 : vector<128x128xf32> to vector<1x128x128xf32>
    %cst_124 = arith.constant dense<0xFF800000> : vector<1xf32>
    %133 = vector.multi_reduction <maximumf>, %132, %cst_124 [1, 2] : vector<1x128x128xf32> to vector<1xf32>
    %134 = vector.shape_cast %133 : vector<1xf32> to vector<1x1x1xf32>
    %135 = vector.extract %134[0, 0, 0] : f32 from vector<1x1x1xf32>
    %136 = vector.broadcast %135 : f32 to vector<8x128xf32>
    %137 = arith.select %123, %136, %121 : vector<8x128xi1>, vector<8x128xf32>
    %c1_i32 = arith.constant 1 : i32
    %138 = vector.broadcast %c1_i32 : i32 to vector<8x128xi32>
    %139 = arith.cmpi eq, %120, %138 : vector<8x128xi32>
    %cst_125 = arith.constant 0.000000e+00 : f32
    %140 = vector.broadcast %cst_125 : f32 to vector<128x1xf32>
    %141 = vector.extract_strided_slice %1 {offsets = [0, 1], sizes = [128, 127], strides = [1, 1]} : vector<128x128xf32> to vector<128x127xf32>
    %142 = tpu.concatenate %141, %140 in 1 : vector<128x127xf32>, vector<128x1xf32> -> vector<128x128xf32>
    %cst_126 = arith.constant 0.000000e+00 : f32
    %143 = vector.broadcast %cst_126 : f32 to vector<1x128xf32>
    %144 = vector.extract_strided_slice %142 {offsets = [1, 0], sizes = [127, 128], strides = [1, 1]} : vector<128x128xf32> to vector<127x128xf32>
    %145 = tpu.concatenate %144, %143 in 0 : vector<127x128xf32>, vector<1x128xf32> -> vector<128x128xf32>
    %146 = arith.subf %145, %142 : vector<128x128xf32>
    %147 = math.absf %146 : vector<128x128xf32>
    %148 = vector.shape_cast %147 : vector<128x128xf32> to vector<1x128x128xf32>
    %cst_127 = arith.constant dense<0xFF800000> : vector<1xf32>
    %149 = vector.multi_reduction <maximumf>, %148, %cst_127 [1, 2] : vector<1x128x128xf32> to vector<1xf32>
    %150 = vector.shape_cast %149 : vector<1xf32> to vector<1x1x1xf32>
    %151 = vector.extract %150[0, 0, 0] : f32 from vector<1x1x1xf32>
    %152 = vector.broadcast %151 : f32 to vector<8x128xf32>
    %153 = arith.select %139, %152, %137 : vector<8x128xi1>, vector<8x128xf32>
    %c2_i32 = arith.constant 2 : i32
    %154 = vector.broadcast %c2_i32 : i32 to vector<8x128xi32>
    %155 = arith.cmpi eq, %120, %154 : vector<8x128xi32>
    %cst_128 = arith.constant 0.000000e+00 : f32
    %156 = vector.broadcast %cst_128 : f32 to vector<1x128xf32>
    %157 = vector.extract_strided_slice %3 {offsets = [1, 0], sizes = [127, 128], strides = [1, 1]} : vector<128x128xf32> to vector<127x128xf32>
    %158 = tpu.concatenate %157, %156 in 0 : vector<127x128xf32>, vector<1x128xf32> -> vector<128x128xf32>
    %cst_129 = arith.constant 0.000000e+00 : f32
    %159 = vector.broadcast %cst_129 : f32 to vector<128x1xf32>
    %160 = vector.extract_strided_slice %158 {offsets = [0, 1], sizes = [128, 127], strides = [1, 1]} : vector<128x128xf32> to vector<128x127xf32>
    %161 = tpu.concatenate %160, %159 in 1 : vector<128x127xf32>, vector<128x1xf32> -> vector<128x128xf32>
    %162 = arith.subf %161, %158 : vector<128x128xf32>
    %163 = math.absf %162 : vector<128x128xf32>
    %164 = vector.shape_cast %163 : vector<128x128xf32> to vector<1x128x128xf32>
    %cst_130 = arith.constant dense<0xFF800000> : vector<1xf32>
    %165 = vector.multi_reduction <maximumf>, %164, %cst_130 [1, 2] : vector<1x128x128xf32> to vector<1xf32>
    %166 = vector.shape_cast %165 : vector<1xf32> to vector<1x1x1xf32>
    %167 = vector.extract %166[0, 0, 0] : f32 from vector<1x1x1xf32>
    %168 = vector.broadcast %167 : f32 to vector<8x128xf32>
    %169 = arith.select %155, %168, %153 : vector<8x128xi1>, vector<8x128xf32>
    %c3_i32 = arith.constant 3 : i32
    %170 = vector.broadcast %c3_i32 : i32 to vector<8x128xi32>
    %171 = arith.cmpi eq, %120, %170 : vector<8x128xi32>
    %cst_131 = arith.constant 0.000000e+00 : f32
    %172 = vector.broadcast %cst_131 : f32 to vector<128x1xf32>
    %173 = vector.extract_strided_slice %3 {offsets = [0, 1], sizes = [128, 127], strides = [1, 1]} : vector<128x128xf32> to vector<128x127xf32>
    %174 = tpu.concatenate %173, %172 in 1 : vector<128x127xf32>, vector<128x1xf32> -> vector<128x128xf32>
    %cst_132 = arith.constant 0.000000e+00 : f32
    %175 = vector.broadcast %cst_132 : f32 to vector<1x128xf32>
    %176 = vector.extract_strided_slice %174 {offsets = [1, 0], sizes = [127, 128], strides = [1, 1]} : vector<128x128xf32> to vector<127x128xf32>
    %177 = tpu.concatenate %176, %175 in 0 : vector<127x128xf32>, vector<1x128xf32> -> vector<128x128xf32>
    %178 = arith.subf %177, %174 : vector<128x128xf32>
    %179 = math.absf %178 : vector<128x128xf32>
    %180 = vector.shape_cast %179 : vector<128x128xf32> to vector<1x128x128xf32>
    %cst_133 = arith.constant dense<0xFF800000> : vector<1xf32>
    %181 = vector.multi_reduction <maximumf>, %180, %cst_133 [1, 2] : vector<1x128x128xf32> to vector<1xf32>
    %182 = vector.shape_cast %181 : vector<1xf32> to vector<1x1x1xf32>
    %183 = vector.extract %182[0, 0, 0] : f32 from vector<1x1x1xf32>
    %184 = vector.broadcast %183 : f32 to vector<8x128xf32>
    %185 = arith.select %171, %184, %169 : vector<8x128xi1>, vector<8x128xf32>
    %c4_i32 = arith.constant 4 : i32
    %186 = vector.broadcast %c4_i32 : i32 to vector<8x128xi32>
    %187 = arith.cmpi eq, %120, %186 : vector<8x128xi32>
    %cst_134 = arith.constant 0.000000e+00 : f32
    %188 = vector.broadcast %cst_134 : f32 to vector<1x128xf32>
    %189 = vector.extract_strided_slice %99 {offsets = [1, 0], sizes = [127, 128], strides = [1, 1]} : vector<128x128xf32> to vector<127x128xf32>
    %190 = tpu.concatenate %189, %188 in 0 : vector<127x128xf32>, vector<1x128xf32> -> vector<128x128xf32>
    %cst_135 = arith.constant 0.000000e+00 : f32
    %191 = vector.broadcast %cst_135 : f32 to vector<128x1xf32>
    %192 = vector.extract_strided_slice %190 {offsets = [0, 1], sizes = [128, 127], strides = [1, 1]} : vector<128x128xf32> to vector<128x127xf32>
    %193 = tpu.concatenate %192, %191 in 1 : vector<128x127xf32>, vector<128x1xf32> -> vector<128x128xf32>
    %194 = arith.subf %193, %190 : vector<128x128xf32>
    %195 = math.absf %194 : vector<128x128xf32>
    %196 = vector.shape_cast %195 : vector<128x128xf32> to vector<1x128x128xf32>
    %cst_136 = arith.constant dense<0xFF800000> : vector<1xf32>
    %197 = vector.multi_reduction <maximumf>, %196, %cst_136 [1, 2] : vector<1x128x128xf32> to vector<1xf32>
    %198 = vector.shape_cast %197 : vector<1xf32> to vector<1x1x1xf32>
    %199 = vector.extract %198[0, 0, 0] : f32 from vector<1x1x1xf32>
    %200 = vector.broadcast %199 : f32 to vector<8x128xf32>
    %201 = arith.select %187, %200, %185 : vector<8x128xi1>, vector<8x128xf32>
    %c5_i32 = arith.constant 5 : i32
    %202 = vector.broadcast %c5_i32 : i32 to vector<8x128xi32>
    %203 = arith.cmpi eq, %120, %202 : vector<8x128xi32>
    %cst_137 = arith.constant 0.000000e+00 : f32
    %204 = vector.broadcast %cst_137 : f32 to vector<128x1xf32>
    %205 = vector.extract_strided_slice %99 {offsets = [0, 1], sizes = [128, 127], strides = [1, 1]} : vector<128x128xf32> to vector<128x127xf32>
    %206 = tpu.concatenate %205, %204 in 1 : vector<128x127xf32>, vector<128x1xf32> -> vector<128x128xf32>
    %cst_138 = arith.constant 0.000000e+00 : f32
    %207 = vector.broadcast %cst_138 : f32 to vector<1x128xf32>
    %208 = vector.extract_strided_slice %206 {offsets = [1, 0], sizes = [127, 128], strides = [1, 1]} : vector<128x128xf32> to vector<127x128xf32>
    %209 = tpu.concatenate %208, %207 in 0 : vector<127x128xf32>, vector<1x128xf32> -> vector<128x128xf32>
    %210 = arith.subf %209, %206 : vector<128x128xf32>
    %211 = math.absf %210 : vector<128x128xf32>
    %212 = vector.shape_cast %211 : vector<128x128xf32> to vector<1x128x128xf32>
    %cst_139 = arith.constant dense<0xFF800000> : vector<1xf32>
    %213 = vector.multi_reduction <maximumf>, %212, %cst_139 [1, 2] : vector<1x128x128xf32> to vector<1xf32>
    %214 = vector.shape_cast %213 : vector<1xf32> to vector<1x1x1xf32>
    %215 = vector.extract %214[0, 0, 0] : f32 from vector<1x1x1xf32>
    %216 = vector.broadcast %215 : f32 to vector<8x128xf32>
    %217 = arith.select %203, %216, %201 : vector<8x128xi1>, vector<8x128xf32>
    %c6_i32 = arith.constant 6 : i32
    %218 = vector.broadcast %c6_i32 : i32 to vector<8x128xi32>
    %219 = arith.cmpi eq, %120, %218 : vector<8x128xi32>
    %cst_140 = arith.constant 0.000000e+00 : f32
    %220 = vector.broadcast %cst_140 : f32 to vector<1x128xf32>
    %221 = vector.extract_strided_slice %113 {offsets = [1, 0], sizes = [127, 128], strides = [1, 1]} : vector<128x128xf32> to vector<127x128xf32>
    %222 = tpu.concatenate %221, %220 in 0 : vector<127x128xf32>, vector<1x128xf32> -> vector<128x128xf32>
    %cst_141 = arith.constant 0.000000e+00 : f32
    %223 = vector.broadcast %cst_141 : f32 to vector<128x1xf32>
    %224 = vector.extract_strided_slice %222 {offsets = [0, 1], sizes = [128, 127], strides = [1, 1]} : vector<128x128xf32> to vector<128x127xf32>
    %225 = tpu.concatenate %224, %223 in 1 : vector<128x127xf32>, vector<128x1xf32> -> vector<128x128xf32>
    %226 = arith.subf %225, %222 : vector<128x128xf32>
    %227 = math.absf %226 : vector<128x128xf32>
    %228 = vector.shape_cast %227 : vector<128x128xf32> to vector<1x128x128xf32>
    %cst_142 = arith.constant dense<0xFF800000> : vector<1xf32>
    %229 = vector.multi_reduction <maximumf>, %228, %cst_142 [1, 2] : vector<1x128x128xf32> to vector<1xf32>
    %230 = vector.shape_cast %229 : vector<1xf32> to vector<1x1x1xf32>
    %231 = vector.extract %230[0, 0, 0] : f32 from vector<1x1x1xf32>
    %232 = vector.broadcast %231 : f32 to vector<8x128xf32>
    %233 = arith.select %219, %232, %217 : vector<8x128xi1>, vector<8x128xf32>
    %c7_i32 = arith.constant 7 : i32
    %234 = vector.broadcast %c7_i32 : i32 to vector<8x128xi32>
    %235 = arith.cmpi eq, %120, %234 : vector<8x128xi32>
    %cst_143 = arith.constant 0.000000e+00 : f32
    %236 = vector.broadcast %cst_143 : f32 to vector<128x1xf32>
    %237 = vector.extract_strided_slice %113 {offsets = [0, 1], sizes = [128, 127], strides = [1, 1]} : vector<128x128xf32> to vector<128x127xf32>
    %238 = tpu.concatenate %237, %236 in 1 : vector<128x127xf32>, vector<128x1xf32> -> vector<128x128xf32>
    %cst_144 = arith.constant 0.000000e+00 : f32
    %239 = vector.broadcast %cst_144 : f32 to vector<1x128xf32>
    %240 = vector.extract_strided_slice %238 {offsets = [1, 0], sizes = [127, 128], strides = [1, 1]} : vector<128x128xf32> to vector<127x128xf32>
    %241 = tpu.concatenate %240, %239 in 0 : vector<127x128xf32>, vector<1x128xf32> -> vector<128x128xf32>
    %242 = arith.subf %241, %238 : vector<128x128xf32>
    %243 = math.absf %242 : vector<128x128xf32>
    %244 = vector.shape_cast %243 : vector<128x128xf32> to vector<1x128x128xf32>
    %cst_145 = arith.constant dense<0xFF800000> : vector<1xf32>
    %245 = vector.multi_reduction <maximumf>, %244, %cst_145 [1, 2] : vector<1x128x128xf32> to vector<1xf32>
    %246 = vector.shape_cast %245 : vector<1xf32> to vector<1x1x1xf32>
    %247 = vector.extract %246[0, 0, 0] : f32 from vector<1x1x1xf32>
    %248 = vector.broadcast %247 : f32 to vector<8x128xf32>
    %249 = arith.select %235, %248, %233 : vector<8x128xi1>, vector<8x128xf32>
    %c0_146 = arith.constant 0 : index
    %c0_147 = arith.constant 0 : index
    %c0_148 = arith.constant 0 : index
    %250 = vector.load %arg8[%c0_146, %c0_147, %c0_148] : memref<1x8x128xf32, #tpu.memory_space<vmem>>, vector<1x8x128xf32>
    %251 = vector.shape_cast %250 : vector<1x8x128xf32> to vector<8x128xf32>
    %252 = vector.shape_cast %249 : vector<8x128xf32> to vector<1x8x128xf32>
    tpu.vector_store %arg8[%c0_146, %c0_147, %c0_148], %252 {strides = array<i32>} : memref<1x8x128xf32, #tpu.memory_space<vmem>>, vector<1x8x128xf32>,
    return
  }
  func.func @transform_0(%arg0: i32) -> (i32, i32, i32, i32) {
    %c0_i32 = arith.constant 0 : i32
    %c0_i32_0 = arith.constant 0 : i32
    %c0_i32_1 = arith.constant 0 : i32
    %c0_i32_2 = arith.constant 0 : i32
    return %arg0, %c0_i32, %c0_i32_0, %c0_i32_1 : i32, i32, i32, i32
  }
  func.func @transform_1(%arg0: i32) -> (i32, i32, i32, i32) {
    %c0_i32 = arith.constant 0 : i32
    %c0_i32_0 = arith.constant 0 : i32
    %c0_i32_1 = arith.constant 0 : i32
    %c0_i32_2 = arith.constant 0 : i32
    return %arg0, %c0_i32, %c0_i32_0, %c0_i32_1 : i32, i32, i32, i32
  }
  func.func @transform_2(%arg0: i32) -> (i32, i32, i32, i32) {
    %c0_i32 = arith.constant 0 : i32
    %c0_i32_0 = arith.constant 0 : i32
    %c0_i32_1 = arith.constant 0 : i32
    %c0_i32_2 = arith.constant 0 : i32
    return %arg0, %c0_i32, %c0_i32_0, %c0_i32_1 : i32, i32, i32, i32
  }
  func.func @transform_3(%arg0: i32) -> (i32, i32, i32, i32) {
    %c0_i32 = arith.constant 0 : i32
    %c0_i32_0 = arith.constant 0 : i32
    %c0_i32_1 = arith.constant 0 : i32
    %c0_i32_2 = arith.constant 0 : i32
    return %arg0, %c0_i32, %c0_i32_0, %c0_i32_1 : i32, i32, i32, i32
  }
  func.func @transform_4(%arg0: i32) -> (i32, i32, i32, i32) {
    %c0_i32 = arith.constant 0 : i32
    %c0_i32_0 = arith.constant 0 : i32
    %c0_i32_1 = arith.constant 0 : i32
    %c0_i32_2 = arith.constant 0 : i32
    return %arg0, %c0_i32, %c0_i32_0, %c0_i32_1 : i32, i32, i32, i32
  }
  func.func @transform_5(%arg0: i32) -> (i32, i32, i32, i32) {
    %c0_i32 = arith.constant 0 : i32
    %c0_i32_0 = arith.constant 0 : i32
    %c0_i32_1 = arith.constant 0 : i32
    %c0_i32_2 = arith.constant 0 : i32
    return %arg0, %c0_i32, %c0_i32_0, %c0_i32_1 : i32, i32, i32, i32
  }
  func.func @transform_6(%arg0: i32) -> (i32, i32, i32) {
    %c0_i32 = arith.constant 0 : i32
    %c0_i32_0 = arith.constant 0 : i32
    %c0_i32_1 = arith.constant 0 : i32
    return %arg0, %c0_i32, %c0_i32_0 : i32, i32, i32
  }
  func.func @transform_7(%arg0: i32) -> (i32, i32, i32) {
    %c0_i32 = arith.constant 0 : i32
    %c0_i32_0 = arith.constant 0 : i32
    %c0_i32_1 = arith.constant 0 : i32
    return %arg0, %c0_i32, %c0_i32_0 : i32, i32, i32
  }
  func.func @transform_8(%arg0: i32) -> (i32, i32, i32, i32) {
    %c0_i32 = arith.constant 0 : i32
    %c0_i32_0 = arith.constant 0 : i32
    %c0_i32_1 = arith.constant 0 : i32
    %c0_i32_2 = arith.constant 0 : i32
    return %arg0, %c0_i32, %c0_i32_0, %c0_i32_1 : i32, i32, i32, i32
  }
}

module attributes {stable_mosaic.version = 11 : i64} {
  func.func @stage2(%arg0: i32, %arg1: memref<8xf32, #tpu.memory_space<smem>>, %arg2: memref<1x1x128x128xf32, #tpu.memory_space<vmem>>, %arg3: memref<1x1x128x128xf32, #tpu.memory_space<vmem>>, %arg4: memref<1x2x128x128xf32, #tpu.memory_space<vmem>>, %arg5: memref<1x8x128xf32, #tpu.memory_space<vmem>>) attributes {dimension_semantics = [#tpu.dimension_semantics<parallel>], iteration_bounds = array<i64: 2>, scalar_prefetch = 0 : i64, scratch_operands = 0 : i64, tpu.core_type = #tpu.core_type<tc>, window_params = [{transform_indices = @transform_0, window_bounds = array<i64: 8>}, {transform_indices = @transform_1, window_bounds = array<i64: 1, 1, 128, 128>}, {transform_indices = @transform_2, window_bounds = array<i64: 1, 1, 128, 128>}, {transform_indices = @transform_3, window_bounds = array<i64: 1, 2, 128, 128>}, {transform_indices = @transform_4, window_bounds = array<i64: 1, 8, 128>}]} {
    %c0 = arith.constant 0 : index
    %c0_0 = arith.constant 0 : index
    %c0_1 = arith.constant 0 : index
    %c0_2 = arith.constant 0 : index
    %0 = vector.load %arg2[%c0, %c0_0, %c0_1, %c0_2] : memref<1x1x128x128xf32, #tpu.memory_space<vmem>>, vector<1x1x128x128xf32>
    %1 = vector.shape_cast %0 : vector<1x1x128x128xf32> to vector<128x128xf32>
    %c0_3 = arith.constant 0 : index
    %c0_4 = arith.constant 0 : index
    %c0_5 = arith.constant 0 : index
    %c0_6 = arith.constant 0 : index
    %2 = vector.load %arg3[%c0_3, %c0_4, %c0_5, %c0_6] : memref<1x1x128x128xf32, #tpu.memory_space<vmem>>, vector<1x1x128x128xf32>
    %3 = vector.shape_cast %2 : vector<1x1x128x128xf32> to vector<128x128xf32>
    %c0_7 = arith.constant 0 : index
    %c0_8 = arith.constant 0 : index
    %c0_9 = arith.constant 0 : index
    %c0_10 = arith.constant 0 : index
    %4 = vector.load %arg4[%c0_7, %c0_8, %c0_9, %c0_10] : memref<1x2x128x128xf32, #tpu.memory_space<vmem>>, vector<1x1x128x128xf32>
    %5 = vector.shape_cast %4 : vector<1x1x128x128xf32> to vector<128x128xf32>
    %c0_11 = arith.constant 0 : index
    %c1 = arith.constant 1 : index
    %c0_12 = arith.constant 0 : index
    %c0_13 = arith.constant 0 : index
    %6 = vector.load %arg4[%c0_11, %c1, %c0_12, %c0_13] : memref<1x2x128x128xf32, #tpu.memory_space<vmem>>, vector<1x1x128x128xf32>
    %7 = vector.shape_cast %6 : vector<1x1x128x128xf32> to vector<128x128xf32>
    %cst = arith.constant 0.000000e+00 : f32
    %8 = vector.broadcast %cst : f32 to vector<1x128xf32>
    %9 = vector.extract_strided_slice %1 {offsets = [1, 0], sizes = [127, 128], strides = [1, 1]} : vector<128x128xf32> to vector<127x128xf32>
    %10 = tpu.concatenate %9, %8 in 0 : vector<127x128xf32>, vector<1x128xf32> -> vector<128x128xf32>
    %cst_14 = arith.constant 0.000000e+00 : f32
    %11 = vector.broadcast %cst_14 : f32 to vector<128x1xf32>
    %12 = vector.extract_strided_slice %10 {offsets = [0, 1], sizes = [128, 127], strides = [1, 1]} : vector<128x128xf32> to vector<128x127xf32>
    %13 = tpu.concatenate %12, %11 in 1 : vector<128x127xf32>, vector<128x1xf32> -> vector<128x128xf32>
    %14 = arith.subf %13, %10 : vector<128x128xf32>
    %15 = math.absf %14 : vector<128x128xf32>
    %c0_15 = arith.constant 0 : index
    %16 = memref.load %arg1[%c0_15] : memref<8xf32, #tpu.memory_space<smem>>
    %17 = vector.broadcast %16 : f32 to vector<128x128xf32>
    %18 = arith.mulf %15, %17 : vector<128x128xf32>
    %cst_16 = arith.constant 0.000000e+00 : f32
    %19 = vector.broadcast %cst_16 : f32 to vector<1x128xf32>
    %20 = vector.extract_strided_slice %3 {offsets = [1, 0], sizes = [127, 128], strides = [1, 1]} : vector<128x128xf32> to vector<127x128xf32>
    %21 = tpu.concatenate %20, %19 in 0 : vector<127x128xf32>, vector<1x128xf32> -> vector<128x128xf32>
    %cst_17 = arith.constant 0.000000e+00 : f32
    %22 = vector.broadcast %cst_17 : f32 to vector<128x1xf32>
    %23 = vector.extract_strided_slice %21 {offsets = [0, 1], sizes = [128, 127], strides = [1, 1]} : vector<128x128xf32> to vector<128x127xf32>
    %24 = tpu.concatenate %23, %22 in 1 : vector<128x127xf32>, vector<128x1xf32> -> vector<128x128xf32>
    %25 = arith.subf %24, %21 : vector<128x128xf32>
    %26 = math.absf %25 : vector<128x128xf32>
    %c2 = arith.constant 2 : index
    %27 = memref.load %arg1[%c2] : memref<8xf32, #tpu.memory_space<smem>>
    %28 = vector.broadcast %27 : f32 to vector<128x128xf32>
    %29 = arith.mulf %26, %28 : vector<128x128xf32>
    %30 = arith.addf %18, %29 : vector<128x128xf32>
    %cst_18 = arith.constant -1.000000e+01 : f32
    %31 = vector.broadcast %cst_18 : f32 to vector<128x128xf32>
    %32 = arith.mulf %31, %30 : vector<128x128xf32>
    %33 = math.exp %32 : vector<128x128xf32>
    %34 = arith.mulf %30, %33 : vector<128x128xf32>
    %cst_19 = arith.constant 0.000000e+00 : f32
    %35 = vector.broadcast %cst_19 : f32 to vector<1x128xf32>
    %36 = vector.extract_strided_slice %5 {offsets = [1, 0], sizes = [127, 128], strides = [1, 1]} : vector<128x128xf32> to vector<127x128xf32>
    %37 = tpu.concatenate %36, %35 in 0 : vector<127x128xf32>, vector<1x128xf32> -> vector<128x128xf32>
    %cst_20 = arith.constant 0.000000e+00 : f32
    %38 = vector.broadcast %cst_20 : f32 to vector<128x1xf32>
    %39 = vector.extract_strided_slice %37 {offsets = [0, 1], sizes = [128, 127], strides = [1, 1]} : vector<128x128xf32> to vector<128x127xf32>
    %40 = tpu.concatenate %39, %38 in 1 : vector<128x127xf32>, vector<128x1xf32> -> vector<128x128xf32>
    %41 = arith.subf %40, %37 : vector<128x128xf32>
    %42 = math.absf %41 : vector<128x128xf32>
    %c4 = arith.constant 4 : index
    %43 = memref.load %arg1[%c4] : memref<8xf32, #tpu.memory_space<smem>>
    %44 = vector.broadcast %43 : f32 to vector<128x128xf32>
    %45 = arith.mulf %42, %44 : vector<128x128xf32>
    %cst_21 = arith.constant 0.000000e+00 : f32
    %46 = vector.broadcast %cst_21 : f32 to vector<1x128xf32>
    %47 = vector.extract_strided_slice %7 {offsets = [1, 0], sizes = [127, 128], strides = [1, 1]} : vector<128x128xf32> to vector<127x128xf32>
    %48 = tpu.concatenate %47, %46 in 0 : vector<127x128xf32>, vector<1x128xf32> -> vector<128x128xf32>
    %cst_22 = arith.constant 0.000000e+00 : f32
    %49 = vector.broadcast %cst_22 : f32 to vector<128x1xf32>
    %50 = vector.extract_strided_slice %48 {offsets = [0, 1], sizes = [128, 127], strides = [1, 1]} : vector<128x128xf32> to vector<128x127xf32>
    %51 = tpu.concatenate %50, %49 in 1 : vector<128x127xf32>, vector<128x1xf32> -> vector<128x128xf32>
    %52 = arith.subf %51, %48 : vector<128x128xf32>
    %53 = math.absf %52 : vector<128x128xf32>
    %c6 = arith.constant 6 : index
    %54 = memref.load %arg1[%c6] : memref<8xf32, #tpu.memory_space<smem>>
    %55 = vector.broadcast %54 : f32 to vector<128x128xf32>
    %56 = arith.mulf %53, %55 : vector<128x128xf32>
    %cst_23 = arith.constant 0.00999999977 : f32
    %57 = vector.broadcast %cst_23 : f32 to vector<128x128xf32>
    %58 = arith.maximumf %45, %57 : vector<128x128xf32>
    %59 = tpu.reciprocal %58 {approx = true} : vector<128x128xf32> -> vector<128x128xf32>
    %60 = arith.mulf %18, %59 : vector<128x128xf32>
    %cst_24 = arith.constant 0.00999999977 : f32
    %61 = vector.broadcast %cst_24 : f32 to vector<128x128xf32>
    %62 = arith.maximumf %56, %61 : vector<128x128xf32>
    %63 = tpu.reciprocal %62 {approx = true} : vector<128x128xf32> -> vector<128x128xf32>
    %64 = arith.mulf %29, %63 : vector<128x128xf32>
    %cst_25 = arith.constant 2.000000e-01 : f32
    %65 = vector.broadcast %cst_25 : f32 to vector<128x128xf32>
    %66 = arith.mulf %65, %34 : vector<128x128xf32>
    %cst_26 = arith.constant 1.500000e-01 : f32
    %67 = vector.broadcast %cst_26 : f32 to vector<128x128xf32>
    %68 = arith.mulf %67, %64 : vector<128x128xf32>
    %69 = arith.addf %66, %68 : vector<128x128xf32>
    %cst_27 = arith.constant 1.500000e-01 : f32
    %70 = vector.broadcast %cst_27 : f32 to vector<128x128xf32>
    %71 = arith.mulf %70, %60 : vector<128x128xf32>
    %72 = arith.addf %69, %71 : vector<128x128xf32>
    %73 = vector.shape_cast %72 : vector<128x128xf32> to vector<1x128x128xf32>
    %cst_28 = arith.constant dense<0.000000e+00> : vector<1xf32>
    %74 = vector.multi_reduction <add>, %73, %cst_28 [1, 2] : vector<1x128x128xf32> to vector<1xf32>
    %75 = vector.shape_cast %74 : vector<1xf32> to vector<1x1x1xf32>
    %76 = vector.extract %75[0, 0, 0] : f32 from vector<1x1x1xf32>
    %cst_29 = arith.constant 0.000000e+00 : f32
    %77 = vector.broadcast %cst_29 : f32 to vector<128x1xf32>
    %78 = vector.extract_strided_slice %1 {offsets = [0, 1], sizes = [128, 127], strides = [1, 1]} : vector<128x128xf32> to vector<128x127xf32>
    %79 = tpu.concatenate %78, %77 in 1 : vector<128x127xf32>, vector<128x1xf32> -> vector<128x128xf32>
    %cst_30 = arith.constant 0.000000e+00 : f32
    %80 = vector.broadcast %cst_30 : f32 to vector<1x128xf32>
    %81 = vector.extract_strided_slice %79 {offsets = [1, 0], sizes = [127, 128], strides = [1, 1]} : vector<128x128xf32> to vector<127x128xf32>
    %82 = tpu.concatenate %81, %80 in 0 : vector<127x128xf32>, vector<1x128xf32> -> vector<128x128xf32>
    %83 = arith.subf %82, %79 : vector<128x128xf32>
    %84 = math.absf %83 : vector<128x128xf32>
    %c1_31 = arith.constant 1 : index
    %85 = memref.load %arg1[%c1_31] : memref<8xf32, #tpu.memory_space<smem>>
    %86 = vector.broadcast %85 : f32 to vector<128x128xf32>
    %87 = arith.mulf %84, %86 : vector<128x128xf32>
    %cst_32 = arith.constant 0.000000e+00 : f32
    %88 = vector.broadcast %cst_32 : f32 to vector<128x1xf32>
    %89 = vector.extract_strided_slice %3 {offsets = [0, 1], sizes = [128, 127], strides = [1, 1]} : vector<128x128xf32> to vector<128x127xf32>
    %90 = tpu.concatenate %89, %88 in 1 : vector<128x127xf32>, vector<128x1xf32> -> vector<128x128xf32>
    %cst_33 = arith.constant 0.000000e+00 : f32
    %91 = vector.broadcast %cst_33 : f32 to vector<1x128xf32>
    %92 = vector.extract_strided_slice %90 {offsets = [1, 0], sizes = [127, 128], strides = [1, 1]} : vector<128x128xf32> to vector<127x128xf32>
    %93 = tpu.concatenate %92, %91 in 0 : vector<127x128xf32>, vector<1x128xf32> -> vector<128x128xf32>
    %94 = arith.subf %93, %90 : vector<128x128xf32>
    %95 = math.absf %94 : vector<128x128xf32>
    %c3 = arith.constant 3 : index
    %96 = memref.load %arg1[%c3] : memref<8xf32, #tpu.memory_space<smem>>
    %97 = vector.broadcast %96 : f32 to vector<128x128xf32>
    %98 = arith.mulf %95, %97 : vector<128x128xf32>
    %99 = arith.addf %87, %98 : vector<128x128xf32>
    %cst_34 = arith.constant -1.000000e+01 : f32
    %100 = vector.broadcast %cst_34 : f32 to vector<128x128xf32>
    %101 = arith.mulf %100, %99 : vector<128x128xf32>
    %102 = math.exp %101 : vector<128x128xf32>
    %103 = arith.mulf %99, %102 : vector<128x128xf32>
    %cst_35 = arith.constant 0.000000e+00 : f32
    %104 = vector.broadcast %cst_35 : f32 to vector<128x1xf32>
    %105 = vector.extract_strided_slice %5 {offsets = [0, 1], sizes = [128, 127], strides = [1, 1]} : vector<128x128xf32> to vector<128x127xf32>
    %106 = tpu.concatenate %105, %104 in 1 : vector<128x127xf32>, vector<128x1xf32> -> vector<128x128xf32>
    %cst_36 = arith.constant 0.000000e+00 : f32
    %107 = vector.broadcast %cst_36 : f32 to vector<1x128xf32>
    %108 = vector.extract_strided_slice %106 {offsets = [1, 0], sizes = [127, 128], strides = [1, 1]} : vector<128x128xf32> to vector<127x128xf32>
    %109 = tpu.concatenate %108, %107 in 0 : vector<127x128xf32>, vector<1x128xf32> -> vector<128x128xf32>
    %110 = arith.subf %109, %106 : vector<128x128xf32>
    %111 = math.absf %110 : vector<128x128xf32>
    %c5 = arith.constant 5 : index
    %112 = memref.load %arg1[%c5] : memref<8xf32, #tpu.memory_space<smem>>
    %113 = vector.broadcast %112 : f32 to vector<128x128xf32>
    %114 = arith.mulf %111, %113 : vector<128x128xf32>
    %cst_37 = arith.constant 0.000000e+00 : f32
    %115 = vector.broadcast %cst_37 : f32 to vector<128x1xf32>
    %116 = vector.extract_strided_slice %7 {offsets = [0, 1], sizes = [128, 127], strides = [1, 1]} : vector<128x128xf32> to vector<128x127xf32>
    %117 = tpu.concatenate %116, %115 in 1 : vector<128x127xf32>, vector<128x1xf32> -> vector<128x128xf32>
    %cst_38 = arith.constant 0.000000e+00 : f32
    %118 = vector.broadcast %cst_38 : f32 to vector<1x128xf32>
    %119 = vector.extract_strided_slice %117 {offsets = [1, 0], sizes = [127, 128], strides = [1, 1]} : vector<128x128xf32> to vector<127x128xf32>
    %120 = tpu.concatenate %119, %118 in 0 : vector<127x128xf32>, vector<1x128xf32> -> vector<128x128xf32>
    %121 = arith.subf %120, %117 : vector<128x128xf32>
    %122 = math.absf %121 : vector<128x128xf32>
    %c7 = arith.constant 7 : index
    %123 = memref.load %arg1[%c7] : memref<8xf32, #tpu.memory_space<smem>>
    %124 = vector.broadcast %123 : f32 to vector<128x128xf32>
    %125 = arith.mulf %122, %124 : vector<128x128xf32>
    %cst_39 = arith.constant 0.00999999977 : f32
    %126 = vector.broadcast %cst_39 : f32 to vector<128x128xf32>
    %127 = arith.maximumf %114, %126 : vector<128x128xf32>
    %128 = tpu.reciprocal %127 {approx = true} : vector<128x128xf32> -> vector<128x128xf32>
    %129 = arith.mulf %87, %128 : vector<128x128xf32>
    %cst_40 = arith.constant 0.00999999977 : f32
    %130 = vector.broadcast %cst_40 : f32 to vector<128x128xf32>
    %131 = arith.maximumf %125, %130 : vector<128x128xf32>
    %132 = tpu.reciprocal %131 {approx = true} : vector<128x128xf32> -> vector<128x128xf32>
    %133 = arith.mulf %98, %132 : vector<128x128xf32>
    %cst_41 = arith.constant 2.000000e-01 : f32
    %134 = vector.broadcast %cst_41 : f32 to vector<128x128xf32>
    %135 = arith.mulf %134, %103 : vector<128x128xf32>
    %cst_42 = arith.constant 1.500000e-01 : f32
    %136 = vector.broadcast %cst_42 : f32 to vector<128x128xf32>
    %137 = arith.mulf %136, %133 : vector<128x128xf32>
    %138 = arith.addf %135, %137 : vector<128x128xf32>
    %cst_43 = arith.constant 1.500000e-01 : f32
    %139 = vector.broadcast %cst_43 : f32 to vector<128x128xf32>
    %140 = arith.mulf %139, %129 : vector<128x128xf32>
    %141 = arith.addf %138, %140 : vector<128x128xf32>
    %142 = vector.shape_cast %141 : vector<128x128xf32> to vector<1x128x128xf32>
    %cst_44 = arith.constant dense<0.000000e+00> : vector<1xf32>
    %143 = vector.multi_reduction <add>, %142, %cst_44 [1, 2] : vector<1x128x128xf32> to vector<1xf32>
    %144 = vector.shape_cast %143 : vector<1xf32> to vector<1x1x1xf32>
    %145 = vector.extract %144[0, 0, 0] : f32 from vector<1x1x1xf32>
    %146 = arith.addf %76, %145 : f32
    %147 = vector.broadcast %146 : f32 to vector<8x128xf32>
    %c0_45 = arith.constant 0 : index
    %c0_46 = arith.constant 0 : index
    %c0_47 = arith.constant 0 : index
    %148 = vector.load %arg5[%c0_45, %c0_46, %c0_47] : memref<1x8x128xf32, #tpu.memory_space<vmem>>, vector<1x8x128xf32>
    %149 = vector.shape_cast %148 : vector<1x8x128xf32> to vector<8x128xf32>
    %150 = vector.shape_cast %147 : vector<8x128xf32> to vector<1x8x128xf32>
    tpu.vector_store %arg5[%c0_45, %c0_46, %c0_47], %150 {strides = array<i32>} : memref<1x8x128xf32, #tpu.memory_space<vmem>>, vector<1x8x128xf32>,
    return
  }
  func.func @transform_0(%arg0: i32) -> i32 {
    %c0_i32 = arith.constant 0 : i32
    %c0_i32_0 = arith.constant 0 : i32
    return %c0_i32 : i32
  }
  func.func @transform_1(%arg0: i32) -> (i32, i32, i32, i32) {
    %c0_i32 = arith.constant 0 : i32
    %c0_i32_0 = arith.constant 0 : i32
    %c0_i32_1 = arith.constant 0 : i32
    %c0_i32_2 = arith.constant 0 : i32
    return %arg0, %c0_i32, %c0_i32_0, %c0_i32_1 : i32, i32, i32, i32
  }
  func.func @transform_2(%arg0: i32) -> (i32, i32, i32, i32) {
    %c0_i32 = arith.constant 0 : i32
    %c0_i32_0 = arith.constant 0 : i32
    %c0_i32_1 = arith.constant 0 : i32
    %c0_i32_2 = arith.constant 0 : i32
    return %arg0, %c0_i32, %c0_i32_0, %c0_i32_1 : i32, i32, i32, i32
  }
  func.func @transform_3(%arg0: i32) -> (i32, i32, i32, i32) {
    %c0_i32 = arith.constant 0 : i32
    %c0_i32_0 = arith.constant 0 : i32
    %c0_i32_1 = arith.constant 0 : i32
    %c0_i32_2 = arith.constant 0 : i32
    return %arg0, %c0_i32, %c0_i32_0, %c0_i32_1 : i32, i32, i32, i32
  }
  func.func @transform_4(%arg0: i32) -> (i32, i32, i32) {
    %c0_i32 = arith.constant 0 : i32
    %c0_i32_0 = arith.constant 0 : i32
    %c0_i32_1 = arith.constant 0 : i32
    return %arg0, %c0_i32, %c0_i32_0 : i32, i32, i32
  }
}

</mosaic_0001>

<bundles_post_ra>
// kernel: tpu_custom_call.1
= control target key start
LH: loop header
LB: loop body
LE: loop exit
PB: predicated region body
PF: predicated region fallthrough
CT: control target
= control target key end

     0   :  { %6 = vsyncpa [#allocation3], 0  ;;  %s106_s0 = inlined_call_operand.hbm [shape: f32[8,128], index: 0, kind: input, shape index: {}]   ;;  %s107_s1 = inlined_call_operand.hbm [shape: f32[8,128], index: 1, kind: output, shape index: {}]  }
   0x1   :  { %7 = vsyncpa [#allocation4], 0  ;;  %s87_s6 = smov [#allocation2]  }
   0x2   :  { %s14_s7 = sshll.u32 %s87_s6, 4  ;;  %s15_s7 = int_to_ptr.vmem [resolvable:$true] %s14_s7 }
   0x3   :  { %s51_s8 = scalar_lea.vmem %s15_s7, 128  ;;  %p56_p1 = scmp.lt.s32.totalorder %s15_s7, %s15_s7 }
   0x4   :  { %p52_p0 = scmp.ne.s32.totalorder %s15_s7, %s51_s8  ;;  %p57_p2 = scmp.lt.s32.totalorder %s51_s8, %s51_s8 }
   0x6   :  { %p58_p3 = por %p57_p2, %p56_p1 }
   0x8   :  { %p59_p4 = pnand %p58_p3, %p52_p0 }
   0xa   :  { %62 = shalt.err (!%p59_p4)
}
   0xb   :  { %17 = dma.hbm_to_vmem [thread:$0]  %s106_s0, 128, %s15_s7, [#allocation3]  }
   0xc   :  { %83 = dma.done.wait [#allocation3], 128  }
   0xd   :  { %84 = vsyncadd [#allocation3], 4294967168  ;;  %v21_v0 = vld [vmem:[#allocation2] sm:$0xff]  ;;  %s88_s11 = smov 1   ;;  %s89_s12 = smov [#allocation5]  }
   0xe   :  { %22 = vrot.lane.b32.xlu0 %v21_v0, %s88_s11  ;;  %s31_s13 = sshll.u32 %s89_s12, 4  ;;  %s32_s13 = int_to_ptr.vmem [resolvable:$true] %s31_s13 }
   0xf   :  { %s63_s14 = scalar_lea.vmem %s32_s13, 128  ;;  %p68_p6 = scmp.lt.s32.totalorder %s32_s13, %s32_s13 }
  0x10   :  { %p64_p5 = scmp.ne.s32.totalorder %s32_s13, %s63_s14  ;;  %p69_p7 = scmp.lt.s32.totalorder %s63_s14, %s63_s14 }
  0x12   :  { %p70_p8 = por %p69_p7, %p68_p6 }
  0x14   :  { %p71_p9 = pnand %p70_p8, %p64_p5 }
  0x80   :  { %v23_v1 = vpop.permute.xlu0 %22 }
  0x81   :  { %24 = vst [vmem:[#allocation5] sm:$0xff] %v23_v1 }
  0x82   :  { %74 = shalt.err (!%p71_p9)
}
  0x83   :  { %34 = dma.vmem_to_hbm [thread:$0]  %s32_s13, 128, %s107_s1, [#allocation4]  }
  0x84   :  { %85 = dma.done.wait [#allocation4], 128  }
  0x85   :  { %86 = vsyncadd [#allocation4], 4294967168 }
  0x86   :  { %38 = vsyncpa [#allocation3], 1 }
  0x87   :  { %39 = vsyncpa [#allocation4], 1 }

// kernel: _kind_decom_loss_impl.3
= control target key start
LH: loop header
LB: loop body
LE: loop exit
PB: predicated region body
PF: predicated region fallthrough
CT: control target
= control target key end

     0   :  { %9 = vsyncpa [#allocation3], 0  ;;  %s2710_s15 = smov 0   ;;  %s5114_s0 = inlined_call_operand.vmem [shape: f32[8], index: 0, kind: input, shape index: {}]   ;;  %s5115_s1 = inlined_call_operand.vmem [shape: f32[2,1,128,128], index: 1, kind: input, shape index: {}]   ;;  %s5116_s2 = inlined_call_operand.vmem [shape: f32[2,1,128,128], index: 2, kind: input, shape index: {}]   ;;  %s5117_s3 = inlined_call_operand.vmem [shape: f32[2,2,128,128], index: 3, kind: input, shape index: {}]   ;;  %s5118_s4 = inlined_call_operand.vmem [shape: f32[2,8,128], index: 4, kind: output, shape index: {}]  }
   0x1 LB: > { %s2397_s16 = sadd.s32 4294967295, %s2681_s15   ;;  %p2399_p0 = scmp.ge.s32.totalorder %s2681_s15, 1  ;;  %s2681_s15 = sphi %s2710_s15, %s15_s15  }
   0x2   : > { %p145_p1 = scmp.lt.s32.totalorder %s2681_s15, 3  ;;  %s158_s19 = sshll.u32 %s5114_s0, 4  ;;  %s159_s19 = int_to_ptr.vmem [resolvable:$true] %s158_s19 }
   0x3   : > { %p2451_p3 = scmp.eq.s32.totalorder %s2397_s16, 0  ;;  %s2656_s21 = scalar_lea.vmem %s159_s19, 16 }
   0x4   : > { %p2721_p2 = pnand %p2399_p0, %p145_p1  ;;  %p2657_p6 = scmp.ne.s32.totalorder %s159_s19, %s2656_s21 }
   0x5   : > { %p2664_p10 = scmp.lt.s32.totalorder %s159_s19, %s159_s19  ;;  %p2665_p11 = scmp.lt.s32.totalorder %s2656_s21, %s2656_s21 }
   0x6   : > { %p2447_p4 = pneg %p2721_p2 }
   0x7   : > { %p2666_p12 = por %p2665_p11, %p2664_p10 }
   0x8   : > { %p2448_p5 = pnand %p2451_p3, %p2447_p4 }
   0xa   : > { %p2658_p7 = pneg %p2448_p5 }
   0xc   : > { %p2659_p8 = pnand %p2658_p7, %p2657_p6 }
   0xe   : > { %p2660_p9 = pneg %p2659_p8 }
  0x10   : > { %p2667_p13 = pnand %p2666_p12, %p2660_p9 }
  0x12   : > { %2670 = shalt.err (!%p2667_p13)
}
  0x13   : > { %s2683_s22 = smov [#allocation2]   ;;  %195 = sbr.rel (%p2721_p2) target bundleno = 707 (0x2c3), region = 36 }
  0x14   : > { %2450 = dma.vmem_to_smem (!%p2448_p5), %s159_s19, 16, %s2683_s22, [#allocation3]  }
  0x18   : > { %2676 = dma.done.wait (%p2451_p3), [#allocation3], 16  }
  0x19   : > { %2678 = vsyncadd (%p2451_p3), [#allocation3], 4294967280 }
  0x1a   : > { %201 = sfence }
  0x1b   : > { %p231_p0 = scmp.lt.s32.totalorder %s2397_s16, 1  ;;  %vm331_vm0 = vcmask 1046528   ;;  %s2684_s27 = smov 127   ;;  %vm429_vm1 = vcmask 1039360  }
  0x1c   : > { %s3069_s9 = sld [smem:[#allocation2]] }
  0x1d   : > { %s5629_s16 = smov (!%p231_p0, %s2397_s16), 1  ;;  %s3077_s10 = sld [smem:[#allocation2 + $0x2]] }
  0x1e   : > { %s2436_s23 = sshll.u32 %s5629_s16, 7  ;;  %s2438_s5 = sshll.u32 %s5629_s16, 8 }
  0x1f   : > { %s2740_s26 = scalar_lea.vmem %s5115_s1, %s2436_s23  ;;  %s2864_s30 = scalar_lea.vmem %s5116_s2, %s2436_s23 }
  0x20   : > { %v2743_v0 = vld [vmem:[%s2740_s26 + $0x10] sm:$0xff]  ;;  %v2746_v1 = vld [vmem:[%s2740_s26 + $0x18] sm:$0xff]  ;;  %v2749_v2 = vld [vmem:[%s2740_s26] sm:$0xff]  ;;  %s2921_s8 = scalar_lea.vmem %s5117_s3, %s2438_s5  ;;  %s3082_s11 = sld [smem:[#allocation2 + $0x1]] }
  0x21   : > { %v335_v3 = vrot.slane %v2743_v0, 1  ;;  %v337_v4 = vrot.slane %v2746_v1, 1  ;;  %v2754_v5 = vld [vmem:[%s2740_s26 + $0x8] sm:$0xff]  ;;  %v332_v6 = vrot.slane %v2749_v2, 1  ;;  %v2758_v7 = vld [vmem:[%s2740_s26 + $0x20] sm:$0xff]  ;;  %v2766_v11 = vld [vmem:[%s2740_s26 + $0x30] sm:$0xff] }
  0x22   : > { %v333_v8 = vrot.slane %v2754_v5, 1  ;;  %v339_v9 = vrot.slane %v2758_v7, 1  ;;  %v2763_v10 = vld [vmem:[%s2740_s26 + $0x28] sm:$0xff]  ;;  %v343_v16 = vrot.slane %v2766_v11, 1  ;;  %v2787_v18 = vld [vmem:[%s2740_s26 + $0x38] sm:$0xff]  ;;  %v2790_v19 = vld [vmem:[%s2740_s26 + $0x40] sm:$0xff] }
  0x23   : > { %v2769_v12 = vsel %vm331_vm0, %v335_v3, %v337_v4  ;;  %v341_v15 = vrot.slane %v2763_v10, 1  ;;  %v345_v21 = vrot.slane %v2787_v18, 1  ;;  %v347_v22 = vrot.slane %v2790_v19, 1  ;;  %v2805_v24 = vld [vmem:[%s2740_s26 + $0x48] sm:$0xff]  ;;  %v2808_v25 = vld [vmem:[%s2740_s26 + $0x50] sm:$0xff]  ;;  %v2823_v30 = vld [vmem:[%s2740_s26 + $0x58] sm:$0xff] }
  0x24   : > { %385 = vrot.lane.b32.xlu1 %v2769_v12, %s2684_s27  ;;  %v2774_v13 = vsel %vm331_vm0, %v332_v6, %v333_v8  ;;  %v2779_v14 = vsel %vm331_vm0, %v337_v4, %v339_v9  ;;  %v2784_v17 = vsel %vm331_vm0, %v333_v8, %v335_v3  ;;  %v349_v27 = vrot.slane %v2805_v24, 1  ;;  %v2826_v31 = vld [vmem:[%s2740_s26 + $0x60] sm:$0xff]  ;;  %v2841_v36 = vld [vmem:[%s2740_s26 + $0x68] sm:$0xff]  ;;  %v2844_v37 = vld [vmem:[%s2740_s26 + $0x70] sm:$0xff]  ;;  %s3086_s12 = sld [smem:[#allocation2 + $0x3]]  ;;  %s2410_s19 = sshll.u32 %s5629_s16, 3 }
  0x25   : > { %381 = vrot.lane.b32.xlu0 %v2774_v13, %s2684_s27  ;;  %v2797_v20 = vsel %vm331_vm0, %v341_v15, %v343_v16  ;;  %v2802_v23 = vsel %vm331_vm0, %v339_v9, %v341_v15  ;;  %v2815_v26 = vsel %vm331_vm0, %v345_v21, %v347_v22  ;;  %v351_v28 = vrot.slane %v2808_v25, 1  ;;  %5275 = vst [vmem:[#allocation5_spill] sm:$0xff] %v2841_v36  ;;  %v265_v42 = vld [vmem:[%s2740_s26 + $0x78] sm:$0xff]  ;;  %v267_v46 = vld [vmem:[%s2864_s30 + $0x8] sm:$0xff]  ;;  %v268_v47 = vld [vmem:[%s2864_s30 + $0x10] sm:$0xff]  ;;  %s3090_s13 = sld [smem:[#allocation2 + $0x7]]  ;;  %s249_s24 = scalar_lea.vmem %s5118_s4, %s2410_s19 }
  0x26   : > { %v2820_v29 = vsel %vm331_vm0, %v343_v16, %v345_v21  ;;  %v353_v33 = vrot.slane %v2823_v30, 1  ;;  %v355_v34 = vrot.slane %v2826_v31, 1  ;;  %v2838_v35 = vsel %vm331_vm0, %v347_v22, %v349_v27  ;;  %5276 = vst [vmem:[#allocation6_spill] sm:$0xff] %v2844_v37  ;;  %v266_v48 = vld [vmem:[%s2864_s30] sm:$0xff]  ;;  %v269_v56 = vld [vmem:[%s2864_s30 + $0x18] sm:$0xff]  ;;  %v2412_v59 = vld [vmem:[%s2921_s8 + $0x88] sm:$0xff] }
  0x27   : > { %v2833_v32 = vsel %vm331_vm0, %v349_v27, %v351_v28  ;;  %v357_v39 = vrot.slane %v2841_v36, 1  ;;  %v359_v40 = vrot.slane %v2844_v37, 1  ;;  %v361_v44 = vrot.slane %v265_v42, 1  ;;  %v270_v57 = vld [vmem:[%s2864_s30 + $0x20] sm:$0xff]  ;;  %v2413_v62 = vld [vmem:[%s2921_s8 + $0x90] sm:$0xff]  ;;  %v271_v63 = vld [vmem:[%s2864_s30 + $0x28] sm:$0xff] }
  0x28   : > { %387 = vrot.lane.b32.xlu1 %v2779_v14, %s2684_s27  ;;  %v2851_v38 = vsel %vm331_vm0, %v353_v33, %v355_v34  ;;  %v2856_v41 = vsel %vm331_vm0, %v351_v28, %v353_v33  ;;  %v513_v50 = vrot.slane %v267_v46, 1  ;;  %v515_v51 = vrot.slane %v268_v47, 1  ;;  %v2411_v60 = vld [vmem:[%s2921_s8 + $0x80] sm:$0xff]  ;;  %v2414_v4 = vld [vmem:[%s2921_s8 + $0x98] sm:$0xff]  ;;  %v284_v6 = vld [vmem:[%s2921_s8 + $0x10] sm:$0xff]  ;;  %s3097_s14 = sld [smem:[#allocation2 + $0x5]] }
  0x29   : > { %383 = vrot.lane.b32.xlu0 %v2784_v17, %s2684_s27  ;;  %v2871_v43 = vsel %vm331_vm0, %v357_v39, %v359_v40  ;;  %v2874_v45 = vsel %vm331_vm0, %v355_v34, %v357_v39  ;;  %v2884_v49 = vsel %vm331_vm0, %v361_v44, 0.0  ;;  %v2887_v52 = vsel %vm331_vm0, %v359_v40, %v361_v44  ;;  %v285_v16 = vld [vmem:[%s2921_s8 + $0x18] sm:$0xff]  ;;  %v272_v21 = vld [vmem:[%s2864_s30 + $0x30] sm:$0xff]  ;;  %v2415_v34 = vld [vmem:[%s2921_s8 + $0xa0] sm:$0xff]  ;;  %s3111_s17 = sld [smem:[#allocation2 + $0x6]] }
  0x2a   : > { %5277 = vst [vmem:[#allocation7_spill] sm:$0xff] %v2871_v43  ;;  %5278 = vst [vmem:[#allocation8_spill] sm:$0xff] %v2874_v45  ;;  %v512_v53 = vrot.slane %v266_v48, 1  ;;  %v2894_v54 = vsel %vm331_vm0, %v513_v50, %v515_v51  ;;  %v517_v58 = vrot.slane %v269_v56, 1  ;;  %v950_v3 = vrot.slane %v2411_v60, 1  ;;  %s3193_s18 = sld [smem:[#allocation2 + $0x4]] }
  0x2b   : > { %5279 = vst [vmem:[#allocation9_spill] sm:$0xff] %v2884_v49  ;;  %5280 = vst [vmem:[#allocation10_spill] sm:$0xff] %v2887_v52  ;;  %v953_v8 = vrot.slane %v2413_v62, 1  ;;  %v521_v15 = vrot.slane %v271_v63, 1  ;;  %v774_v27 = vrot.slane %v284_v6, 1  ;;  %v955_v39 = vrot.slane %v2414_v4, 1 }
  0x2c   : > { %391 = vrot.lane.b32.xlu1 %v2797_v20, %s2684_s27  ;;  %v2897_v55 = vsel %vm331_vm0, %v512_v53, %v513_v50  ;;  %v2931_v61 = vsel %vm331_vm0, %v515_v51, %v517_v58  ;;  %v523_v44 = vrot.slane %v272_v21, 1  ;;  %v2416_v51 = vld [vmem:[%s2921_s8 + $0xa8] sm:$0xff]  ;;  %v3167_v37 = vstv %s3086_s12 }
  0x2d   : > { %389 = vrot.lane.b32.xlu0 %v2802_v23, %s2684_s27  ;;  %5281 = vst [vmem:[#allocation11_spill] sm:$0xff] %v2931_v61  ;;  %v2988_v42 = vsel %vm331_vm0, %v953_v8, %v955_v39 }
  0x2e   : > { %5288 = vst [vmem:[#allocation18_spill] sm:$0xff] %v2988_v42  ;;  %v3002_v50 = vsel %vm331_vm0, %v521_v15, %v523_v44 }
  0x2f   : > { %5289 = vst [vmem:[#allocation19_spill] sm:$0xff] %v3002_v50 }
  0x30   : > { %395 = vrot.lane.b32.xlu1 %v2815_v26, %s2684_s27 }
  0x31   : > { %393 = vrot.lane.b32.xlu0 %v2820_v29, %s2684_s27 }
  0x34   : > { %399 = vrot.lane.b32.xlu1 %v2833_v32, %s2684_s27 }
  0x35   : > { %397 = vrot.lane.b32.xlu0 %v2838_v35, %s2684_s27 }
  0x38   : > { %403 = vrot.lane.b32.xlu1 %v2851_v38, %s2684_s27 }
  0x39   : > { %401 = vrot.lane.b32.xlu0 %v2856_v41, %s2684_s27 }
  0x3c   : > { %407 = vrot.lane.b32.xlu1 %v2871_v43, %s2684_s27 }
  0x3d   : > { %405 = vrot.lane.b32.xlu0 %v2874_v45, %s2684_s27 }
  0x40   : > { %411 = vrot.lane.b32.xlu1 %v2884_v49, %s2684_s27 }
  0x41   : > { %409 = vrot.lane.b32.xlu0 %v2887_v52, %s2684_s27 }
  0x44   : > { %563 = vrot.lane.b32.xlu1 %v2894_v54, %s2684_s27 }
  0x45   : > { %561 = vrot.lane.b32.xlu0 %v2897_v55, %s2684_s27 }
  0x48   : > { %1315 = vrot.lane.b32.xlu1 %v2754_v5, %s2684_s27  ;;  %v519_v5 = vrot.slane %v270_v57, 1 }
  0x49   : > { %1313 = vrot.lane.b32.xlu0 %v2749_v2, %s2684_s27  ;;  %v951_v2 = vrot.slane %v2412_v59, 1 }
  0x4a   : > { %v2953_v9 = vsel %vm331_vm0, %v517_v58, %v519_v5  ;;  %v2971_v28 = vsel %vm331_vm0, %v519_v5, %v521_v15 }
  0x4b   : > { %5283 = vst [vmem:[#allocation13_spill] sm:$0xff] %v2953_v9  ;;  %5285 = vst [vmem:[#allocation15_spill] sm:$0xff] %v2971_v28 }
  0x4c   : > { %1491 = vrot.lane.b32.xlu1 %v266_v48, %s2684_s27  ;;  %v957_v48 = vrot.slane %v2415_v34, 1 }
  0x4d   : > { %1317 = vrot.lane.b32.xlu0 %v2743_v0, %s2684_s27  ;;  %v283_v0 = vld [vmem:[%s2921_s8 + $0x8] sm:$0xff] }
  0x4e   : > { %v772_v22 = vrot.slane %v283_v0, 1  ;;  %v3009_v53 = vsel %vm331_vm0, %v955_v39, %v957_v48 }
  0x4f   : > { %5290 = vst [vmem:[#allocation20_spill] sm:$0xff] %v3009_v53 }
  0x50   : > { %1495 = vrot.lane.b32.xlu1 %v268_v47, %s2684_s27  ;;  %v273_v47 = vld [vmem:[%s2864_s30 + $0x38] sm:$0xff] }
  0x51   : > { %1493 = vrot.lane.b32.xlu0 %v267_v46, %s2684_s27  ;;  %v2995_v46 = vld [vmem:[%s2921_s8 + $0x20] sm:$0xff] }
  0x52   : > { %v778_v58 = vrot.slane %v2995_v46, 1 }
  0x54   : > { %1497 = vrot.lane.b32.xlu1 %v269_v56, %s2684_s27 }
  0x55   : > { %1319 = vrot.lane.b32.xlu0 %v2746_v1, %s2684_s27  ;;  %v282_v1 = vld [vmem:[%s2921_s8] sm:$0xff] }
  0x56   : > { %v771_v33 = vrot.slane %v282_v1, 1 }
  0x58   : > { %1499 = vrot.lane.b32.xlu1 %v270_v57, %s2684_s27  ;;  %v2981_v40 = vsel %vm331_vm0, %v771_v33, %v772_v22  ;;  %v3019_v57 = vld [vmem:[%s2864_s30 + $0x40] sm:$0xff] }
  0x59   : > { %1321 = vrot.lane.b32.xlu0 %v2758_v7, %s2684_s27  ;;  %v2950_v7 = vsel %vm331_vm0, %v950_v3, %v951_v2  ;;  %5287 = vst [vmem:[#allocation17_spill] sm:$0xff] %v2981_v40  ;;  %v527_v15 = vrot.slane %v3019_v57, 1 }
  0x5a   : > { %5282 = vst [vmem:[#allocation12_spill] sm:$0xff] %v2950_v7 }
  0x5c   : > { %1929 = vrot.lane.b32.xlu1 %v2412_v59, %s2684_s27  ;;  %v3027_v59 = vld [vmem:[%s2921_s8 + $0xb0] sm:$0xff] }
  0x5d   : > { %1927 = vrot.lane.b32.xlu0 %v2411_v60, %s2684_s27  ;;  %v525_v60 = vrot.slane %v273_v47, 1  ;;  %v961_v33 = vrot.slane %v3027_v59, 1 }
  0x5f   : > { %v3043_v3 = vsel %vm331_vm0, %v523_v44, %v525_v60  ;;  %v2418_v44 = vld [vmem:[%s2921_s8 + $0xb8] sm:$0xff] }
  0x60   : > { %565 = vrot.lane.b32.xlu1 %v2931_v61, %s2684_s27  ;;  %5293 = vst [vmem:[#allocation23_spill] sm:$0xff] %v3043_v3  ;;  %v3191_v61 = vld [vmem:[%s2864_s30 + $0x68] sm:$0xff] }
  0x61   : > { %1931 = vrot.lane.b32.xlu0 %v2413_v62, %s2684_s27  ;;  %5310 = vst [vmem:[#allocation40_spill] sm:$0xff] %v3191_v61 }
  0x64   : > { %1501 = vrot.lane.b32.xlu1 %v271_v63, %s2684_s27  ;;  %v287_v63 = vld [vmem:[%s2921_s8 + $0x28] sm:$0xff] }
  0x65   : > { %1323 = vrot.lane.b32.xlu0 %v2763_v10, %s2684_s27  ;;  %v2960_v10 = vsel %vm331_vm0, %v951_v2, %v953_v8  ;;  %v959_v2 = vrot.slane %v2416_v51, 1 }
  0x66   : > { %5284 = vst [vmem:[#allocation14_spill] sm:$0xff] %v2960_v10 }
  0x68   : > { %1751 = vrot.lane.b32.xlu1 %v283_v0, %s2684_s27 }
  0x69   : > { %1749 = vrot.lane.b32.xlu0 %v282_v1, %s2684_s27 }
  0x6c   : > { %1933 = vrot.lane.b32.xlu1 %v2414_v4, %s2684_s27 }
  0x6d   : > { %1753 = vrot.lane.b32.xlu0 %v284_v6, %s2684_s27  ;;  %v3054_v6 = vsel %vm331_vm0, %v957_v48, %v959_v2 }
  0x6e   : > { %5294 = vst [vmem:[#allocation24_spill] sm:$0xff] %v3054_v6 }
  0x70   : > { %999 = vrot.lane.b32.xlu1 %v2950_v7, %s2684_s27 }
  0x71   : > { %567 = vrot.lane.b32.xlu0 %v2953_v9, %s2684_s27 }
  0x74   : > { %1325 = vrot.lane.b32.xlu1 %v2766_v11, %s2684_s27  ;;  %v2978_v11 = vsel %vm331_vm0, %v772_v22, %v774_v27  ;;  %v275_v22 = vld [vmem:[%s2864_s30 + $0x48] sm:$0xff] }
  0x75   : > { %1001 = vrot.lane.b32.xlu0 %v2960_v10, %s2684_s27  ;;  %5286 = vst [vmem:[#allocation16_spill] sm:$0xff] %v2978_v11  ;;  %v529_v48 = vrot.slane %v275_v22, 1 }
  0x77   : > { %v3129_v45 = vsel %vm331_vm0, %v527_v15, %v529_v48 }
  0x78   : > { %1755 = vrot.lane.b32.xlu1 %v285_v16, %s2684_s27  ;;  %5300 = vst [vmem:[#allocation30_spill] sm:$0xff] %v3129_v45 }
  0x79   : > { %1503 = vrot.lane.b32.xlu0 %v272_v21, %s2684_s27 }
  0x7c   : > { %569 = vrot.lane.b32.xlu1 %v2971_v28, %s2684_s27  ;;  %v3157_v28 = vstv %s3082_s11 }
  0x7d   : > { %1935 = vrot.lane.b32.xlu0 %v2415_v34, %s2684_s27  ;;  %v780_v34 = vrot.slane %v287_v63, 1 }
  0x80   : > { %822 = vrot.lane.b32.xlu1 %v2978_v11, %s2684_s27 }
  0x81   : > { %820 = vrot.lane.b32.xlu0 %v2981_v40, %s2684_s27  ;;  %v3152_v40 = vld [vmem:[%s2921_s8 + $0x48] sm:$0xff] }
  0x84   : > { %1327 = vrot.lane.b32.xlu1 %v2787_v18, %s2684_s27  ;;  %v776_v18 = vrot.slane %v285_v16, 1  ;;  %v288_v16 = vld [vmem:[%s2921_s8 + $0x30] sm:$0xff] }
  0x85   : > { %1003 = vrot.lane.b32.xlu0 %v2988_v42, %s2684_s27  ;;  %v3149_v42 = vld [vmem:[%s2921_s8 + $0xd0] sm:$0xff] }
  0x86   : > { %v3012_v56 = vsel %vm331_vm0, %v774_v27, %v776_v18  ;;  %v3038_v1 = vsel %vm331_vm0, %v776_v18, %v778_v58  ;;  %v963_v18 = vrot.slane %v2418_v44, 1  ;;  %v969_v10 = vrot.slane %v3149_v42, 1 }
  0x87   : > { %5291 = vst [vmem:[#allocation21_spill] sm:$0xff] %v3012_v56  ;;  %5292 = vst [vmem:[#allocation22_spill] sm:$0xff] %v3038_v1 }
  0x88   : > { %1757 = vrot.lane.b32.xlu1 %v2995_v46, %s2684_s27 }
  0x89   : > { %1505 = vrot.lane.b32.xlu0 %v273_v47, %s2684_s27  ;;  %v782_v47 = vrot.slane %v288_v16, 1 }
  0x8c   : > { %571 = vrot.lane.b32.xlu1 %v3002_v50, %s2684_s27  ;;  %v3133_v50 = vld [vmem:[%s2921_s8 + $0xc8] sm:$0xff] }
  0x8d   : > { %1937 = vrot.lane.b32.xlu0 %v2416_v51, %s2684_s27  ;;  %v3094_v51 = vsel %vm331_vm0, %v959_v2, %v961_v33 }
  0x8e   : > { %5296 = vst [vmem:[#allocation26_spill] sm:$0xff] %v3094_v51 }
  0x90   : > { %1005 = vrot.lane.b32.xlu1 %v3009_v53, %s2684_s27  ;;  %v3141_v53 = vstv %s3077_s10 }
  0x91   : > { %824 = vrot.lane.b32.xlu0 %v3012_v56, %s2684_s27  ;;  %v3136_v56 = vld [vmem:[%s2864_s30 + $0x60] sm:$0xff] }
  0x94   : > { %1507 = vrot.lane.b32.xlu1 %v3019_v57, %s2684_s27  ;;  %v276_v57 = vld [vmem:[%s2864_s30 + $0x50] sm:$0xff] }
  0x95   : > { %1329 = vrot.lane.b32.xlu0 %v2790_v19, %s2684_s27 }
  0x96   : > { %v3029_v62 = vpop.permute.xlu1 %385 }
  0x97   : > { %v3032_v0 = vpop.permute.xlu0 %381  ;;  %v432_v36 = vsel %vm429_vm1, %v3029_v62, 0.0 }
  0x98   : > { %1939 = vrot.lane.b32.xlu1 %v3027_v59, %s2684_s27 }
  0x99   : > { %1759 = vrot.lane.b32.xlu0 %v287_v63, %s2684_s27  ;;  %v531_v63 = vrot.slane %v276_v57, 1 }
  0x9a   : > { %v3040_v19 = vpop.permute.xlu1 %387 }
  0x9b   : > { %v3045_v4 = vpop.permute.xlu0 %383 }
  0x9c   : > { %826 = vrot.lane.b32.xlu1 %v3038_v1, %s2684_s27 }
  0x9d   : > { %573 = vrot.lane.b32.xlu0 %v3043_v3, %s2684_s27  ;;  %v3121_v3 = vstv %s3069_s9 }
  0x9e   : > { %v3051_v5 = vpop.permute.xlu1 %391  ;;  %5298 = vst [vmem:[#allocation28_spill] sm:$0xff] %v3121_v3 }
  0x9f   : > { %v3056_v8 = vpop.permute.xlu0 %389 }
  0xa0   : > { %1331 = vrot.lane.b32.xlu1 %v2805_v24, %s2684_s27  ;;  %v3075_v24 = vsel %vm331_vm0, %v525_v60, %v527_v15  ;;  %v3102_v60 = vsel %vm331_vm0, %v778_v58, %v780_v34  ;;  %v535_v15 = vrot.slane %v3136_v56, 1 }
  0xa1   : > { %1007 = vrot.lane.b32.xlu0 %v3054_v6, %s2684_s27  ;;  %5295 = vst [vmem:[#allocation25_spill] sm:$0xff] %v3075_v24  ;;  %5297 = vst [vmem:[#allocation27_spill] sm:$0xff] %v3102_v60  ;;  %v3126_v6 = vsel %vm331_vm0, %v780_v34, %v782_v47  ;;  %v967_v34 = vrot.slane %v3133_v50, 1 }
  0xa2   : > { %v3064_v21 = vpop.permute.xlu1 %395  ;;  %5299 = vst [vmem:[#allocation29_spill] sm:$0xff] %v3126_v6 }
  0xa3   : > { %v3067_v27 = vpop.permute.xlu0 %393 }
  0xa4   : > { %1761 = vrot.lane.b32.xlu1 %v288_v16, %s2684_s27  ;;  %v2419_v16 = vld [vmem:[%s2921_s8 + $0xc0] sm:$0xff] }
  0xa5   : > { %1509 = vrot.lane.b32.xlu0 %v275_v22, %s2684_s27  ;;  %v3106_v22 = vld [vmem:[%s2921_s8 + $0x38] sm:$0xff]  ;;  %v965_v52 = vrot.slane %v2419_v16, 1 }
  0xa6   : > { %v3079_v39 = vpop.permute.xlu1 %399  ;;  %v784_v49 = vrot.slane %v3106_v22, 1 }
  0xa7   : > { %v3084_v46 = vpop.permute.xlu0 %397  ;;  %v3170_v9 = vsel %vm331_vm0, %v963_v18, %v965_v52  ;;  %v3201_v62 = vsel %vm331_vm0, %v965_v52, %v967_v34 }
  0xa8   : > { %575 = vrot.lane.b32.xlu1 %v3075_v24, %s2684_s27  ;;  %v3118_v24 = vld [vmem:[%s2864_s30 + $0x58] sm:$0xff]  ;;  %5305 = vst [vmem:[#allocation35_spill] sm:$0xff] %v3170_v9  ;;  %v3173_v7 = vsel %vm331_vm0, %v782_v47, %v784_v49  ;;  %5312 = vst [vmem:[#allocation42_spill] sm:$0xff] %v3201_v62 }
  0xa9   : > { %1941 = vrot.lane.b32.xlu0 %v2418_v44, %s2684_s27  ;;  %v3109_v44 = vld [vmem:[%s2921_s8 + $0x40] sm:$0xff]  ;;  %v533_v1 = vrot.slane %v3118_v24, 1  ;;  %5306 = vst [vmem:[#allocation36_spill] sm:$0xff] %v3173_v7 }
  0xaa   : > { %v3099_v59 = vpop.permute.xlu1 %403  ;;  %v786_v58 = vrot.slane %v3109_v44, 1 }
  0xab   : > { %v3113_v2 = vpop.permute.xlu0 %401 }
  0xac   : > { %1009 = vrot.lane.b32.xlu1 %v3094_v51, %s2684_s27  ;;  %v3144_v51 = vsel %vm331_vm0, %v961_v33, %v963_v18  ;;  %v788_v33 = vrot.slane %v3152_v40, 1  ;;  %v3187_v18 = vsel %vm331_vm0, %v531_v63, %v533_v1 }
  0xad   : > { %828 = vrot.lane.b32.xlu0 %v3102_v60, %s2684_s27  ;;  %5301 = vst [vmem:[#allocation31_spill] sm:$0xff] %v3144_v51  ;;  %v3160_v60 = vsel %vm331_vm0, %v529_v48, %v531_v63  ;;  %v3179_v48 = vld [vmem:[%s2921_s8 + $0x50] sm:$0xff]  ;;  %5309 = vst [vmem:[#allocation39_spill] sm:$0xff] %v3187_v18  ;;  %v3213_v18 = vld [vmem:[%s2921_s8 + $0xd8] sm:$0xff] }
  0xae   : > { %v3154_v11 = vpop.permute.xlu1 %407  ;;  %5303 = vst [vmem:[#allocation33_spill] sm:$0xff] %v3160_v60  ;;  %5308 = vst [vmem:[#allocation38_spill] sm:$0xff] %v3179_v48  ;;  %v790_v47 = vrot.slane %v3179_v48, 1  ;;  %v3210_v48 = vstv %s3097_s14  ;;  %v3222_v52 = vsel %vm331_vm0, %v786_v58, %v788_v33 }
  0xaf   : > { %5302 = vst [vmem:[#allocation32_spill] sm:$0xff] %v3154_v11  ;;  %v3164_v43 = vpop.permute.xlu0 %405  ;;  %v3176_v11 = vsel %vm331_vm0, %v784_v49, %v786_v58  ;;  %v3198_v49 = vstv %s3090_s13  ;;  %5315 = vst [vmem:[#allocation45_spill] sm:$0xff] %v3210_v48  ;;  %v431_v58 = vsel %vm429_vm1, %v3045_v4, 0.0 }
  0xb0   : > { %5304 = vst [vmem:[#allocation34_spill] sm:$0xff] %v3164_v43  ;;  %5307 = vst [vmem:[#allocation37_spill] sm:$0xff] %v3176_v11  ;;  %v430_v43 = vsel %vm429_vm1, %v3032_v0, 0.0  ;;  %1511 = vrot.lane.b32.xlu1 %v276_v57, %s2684_s27  ;;  %v537_v0 = vrot.slane %v3191_v61, 1  ;;  %v3205_v57 = vsel %vm331_vm0, %v533_v1, %v535_v15  ;;  %v448_v61 = vsub.f32 %v432_v36, %v2769_v12  ;;  %v3243_v36 = vld [vmem:[%s2921_s8 + $0x58] sm:$0xff] }
  0xb1   : > { %1333 = vrot.lane.b32.xlu0 %v2808_v25, %s2684_s27  ;;  %5311 = vst [vmem:[#allocation41_spill] sm:$0xff] %v3198_v49  ;;  %5313 = vst [vmem:[#allocation43_spill] sm:$0xff] %v3205_v57  ;;  %v3216_v25 = vstv %s3111_s17  ;;  %v3219_v49 = vsel %vm331_vm0, %v967_v34, %v969_v10  ;;  %v446_v1 = vsub.f32 %v430_v43, %v2774_v13  ;;  %v971_v57 = vrot.slane %v3213_v18, 1  ;;  %v3235_v34 = vld [vmem:[%s2921_s8 + $0xe0] sm:$0xff] }
  0xb2   : > { %v3207_v63 = vpop.permute.xlu1 %411  ;;  %5316 = vst [vmem:[#allocation46_spill] sm:$0xff] %v3213_v18  ;;  %5317 = vst [vmem:[#allocation47_spill] sm:$0xff] %v3216_v25  ;;  %v3232_v25 = vld [vmem:[%s2864_s30 + $0x70] sm:$0xff]  ;;  %v973_v13 = vrot.slane %v3235_v34, 1  ;;  %v3246_v43 = vsel %vm331_vm0, %v788_v33, %v790_v47  ;;  %v792_v4 = vrot.slane %v3243_v36, 1  ;;  %v3264_v33 = vld [vmem:[%s2921_s8 + $0xe8] sm:$0xff] }
  0xb3   : > { %5314 = vst [vmem:[#allocation44_spill] sm:$0xff] %v3207_v63  ;;  %5318 = vst [vmem:[#allocation48_spill] sm:$0xff] %v3219_v49  ;;  %v433_v63 = vsel %vm429_vm1, %v3040_v19, 0.0  ;;  %v3228_v48 = vpop.permute.xlu0 %409  ;;  %v539_v12 = vrot.slane %v3232_v25, 1  ;;  %v3249_v19 = vld [vmem:[%s2921_s8 + $0x60] sm:$0xff] }
  0xb4   : > { %5319 = vst [vmem:[#allocation49_spill] sm:$0xff] %v3222_v52  ;;  %5320 = vst [vmem:[#allocation50_spill] sm:$0xff] %v3228_v48  ;;  %1943 = vrot.lane.b32.xlu1 %v2419_v16, %s2684_s27  ;;  %v435_v48 = vsel %vm429_vm1, %v3051_v5, 0.0  ;;  %v3257_v16 = vsel %vm331_vm0, %v535_v15, %v537_v0  ;;  %v434_v5 = vsel %vm429_vm1, %v3056_v8, 0.0  ;;  %v464_v49 = vand.u32 2147483647, %v448_v61 }
  0xb5   : > { %5321 = vst [vmem:[#allocation51_spill] sm:$0xff] %v3232_v25  ;;  %5322 = vst [vmem:[#allocation52_spill] sm:$0xff] %v3235_v34  ;;  %1763 = vrot.lane.b32.xlu0 %v3106_v22, %s2684_s27  ;;  %v3261_v25 = vld [vmem:[%s2864_s30 + $0x78] sm:$0xff]  ;;  %v462_v15 = vand.u32 2147483647, %v446_v1  ;;  %v3273_v34 = vsel %vm331_vm0, %v969_v10, %v971_v57  ;;  %v451_v62 = vsub.f32 %v435_v48, %v2797_v20  ;;  %v5330_v10 = vrot.slane %v3249_v19, 1 }
  0xb6   : > { %5323 = vst [vmem:[#allocation53_spill] sm:$0xff] %v3243_v36  ;;  %5324 = vst [vmem:[#allocation54_spill] sm:$0xff] %v3246_v43  ;;  %v449_v43 = vsub.f32 %v433_v63, %v2779_v14  ;;  %v564_v52 = vpop.permute.xlu1 %563  ;;  %v541_v22 = vrot.slane %v3261_v25, 1  ;;  %v5161_v36 = vrot.slane %v3264_v33, 1  ;;  %v3279_v14 = vstv %s3193_s18 }
  0xb7   : > { %5325 = vst [vmem:[#allocation55_spill] sm:$0xff] %v3257_v16  ;;  %v447_v16 = vsub.f32 %v431_v58, %v2784_v17  ;;  %v562_v18 = vpop.permute.xlu0 %561  ;;  %5326 = vst [vmem:[#allocation56_spill] sm:$0xff] %v3273_v34  ;;  %v3282_v8 = vsel %vm331_vm0, %v537_v0, %v539_v12  ;;  %v3285_v63 = vsel %vm331_vm0, %v971_v57, %v973_v13  ;;  %v437_v17 = vsel %vm429_vm1, %v3064_v21, 0.0 }
  0xb8   : > { %830 = vrot.lane.b32.xlu1 %v3126_v6, %s2684_s27  ;;  %5327 = vst [vmem:[#allocation57_spill] sm:$0xff] %v3282_v8  ;;  %5328 = vst [vmem:[#allocation58_spill] sm:$0xff] %v3285_v63  ;;  %v450_v61 = vsub.f32 %v434_v5, %v2802_v23  ;;  %v3293_v20 = vsel %vm331_vm0, %v790_v47, %v792_v4  ;;  %v3298_v48 = vsel %vm331_vm0, %v792_v4, %v5330_v10 }
  0xb9   : > { %577 = vrot.lane.b32.xlu0 %v3129_v45, %s2684_s27  ;;  %5329 = vst [vmem:[#allocation59_spill] sm:$0xff] %v3293_v20  ;;  %5331 = vst [vmem:[#allocation60_spill] sm:$0xff] %v3298_v48  ;;  %v465_v0 = vand.u32 2147483647, %v449_v43  ;;  %v436_v23 = vsel %vm429_vm1, %v3067_v27, 0.0  ;;  %v3303_v21 = vsel %vm331_vm0, %v539_v12, %v541_v22  ;;  %v3308_v47 = vsel %vm331_vm0, %v973_v13, %v5161_v36  ;;  %v3330_v13 = vld [vmem:[%s2921_s8 + $0x68] sm:$0xff] }
  0xba   : > { %v1316_v57 = vpop.permute.xlu1 %1315  ;;  %5332 = vst [vmem:[#allocation61_spill] sm:$0xff] %v3303_v21  ;;  %5333 = vst [vmem:[#allocation62_spill] sm:$0xff] %v3308_v47  ;;  %v3311_v1 = vmul.f32 %v3121_v3, %v464_v49  ;;  %v3314_v58 = vmul.f32 %v3121_v3, %v462_v15  ;;  %v463_v43 = vand.u32 2147483647, %v447_v16  ;;  %v610_v4 = vsel %vm429_vm1, %v564_v52, 0.0  ;;  %v3327_v49 = vld [vmem:[%s2921_s8 + $0xf0] sm:$0xff] }
  0xbb   : > { %v1314_v5 = vpop.permute.xlu0 %1313  ;;  %v467_v27 = vand.u32 2147483647, %v451_v62  ;;  %v453_v10 = vsub.f32 %v437_v17, %v2815_v26  ;;  %v3319_v12 = vsel %vm429_vm1, %v1316_v57, 0.0  ;;  %v466_v16 = vand.u32 2147483647, %v450_v61  ;;  %v3353_v26 = vld [vmem:[%s2921_s8 + $0x70] sm:$0xff] }
  0xbc   : > { %5334 = vst [vmem:[#allocation63_spill] sm:$0xff] %v3311_v1  ;;  %5335 = vst [vmem:[#allocation64_spill] sm:$0xff] %v3314_v58  ;;  %v3322_v45 = vsel %vm429_vm1, %v1314_v5, 0.0  ;;  %1335 = vrot.lane.b32.xlu1 %v2823_v30, %s2684_s27  ;;  %v452_v52 = vsub.f32 %v436_v23, %v2820_v29  ;;  %v796_v62 = vrot.slane %v3330_v13, 1  ;;  %v3338_v15 = vmul.f32 %v3121_v3, %v465_v0  ;;  %v5380_v48 = vld [vmem:[#allocation45_spill] sm:$0xff] }
  0xbd   : > { %1011 = vrot.lane.b32.xlu0 %v3144_v51, %s2684_s27  ;;  %v626_v30 = vsub.f32 %v610_v4, %v2894_v54  ;;  %v609_v17 = vsel %vm429_vm1, %v562_v18, 0.0  ;;  %v3343_v5 = vsel %vm331_vm0, %v541_v22, 0.0  ;;  %v3346_v29 = vmul.f32 %v3121_v3, %v463_v43  ;;  %5338 = vst [vmem:[#allocation67_spill] sm:$0xff] %v3353_v26 }
  0xbe   : > { %v1492_v57 = vpop.permute.xlu1 %1491  ;;  %5336 = vst [vmem:[#allocation65_spill] sm:$0xff] %v3343_v5  ;;  %v439_v61 = vsel %vm429_vm1, %v3079_v39, 0.0  ;;  %v1394_v23 = vrot.slane %v3319_v12, 1  ;;  %v1393_v36 = vrot.slane %v3322_v45, 1  ;;  %v3356_v54 = vmul.f32 %v3121_v3, %v467_v27 }
  0xbf   : > { %5337 = vst [vmem:[#allocation66_spill] sm:$0xff] %v3346_v29  ;;  %v1318_v0 = vpop.permute.xlu0 %1317  ;;  %v469_v18 = vand.u32 2147483647, %v453_v10  ;;  %v3365_v39 = vmul.f32 %v3121_v3, %v466_v16  ;;  %v468_v4 = vand.u32 2147483647, %v452_v52  ;;  %v625_v51 = vsub.f32 %v609_v17, %v2897_v55 }
  0xc0   : > { %5339 = vst [vmem:[#allocation68_spill] sm:$0xff] %v3356_v54  ;;  %v3359_v22 = vsel %vm429_vm1, %v1318_v0, 0.0  ;;  %1765 = vrot.lane.b32.xlu1 %v3109_v44, %s2684_s27  ;;  %v455_v27 = vsub.f32 %v439_v61, %v2833_v32  ;;  %v438_v10 = vsel %vm429_vm1, %v3084_v46, 0.0  ;;  %v642_v44 = vand.u32 2147483647, %v626_v30  ;;  %v3388_v30 = vld [vmem:[%s2921_s8 + $0xf8] sm:$0xff] }
  0xc1   : > { %v1396_v6 = vrot.slane %v3359_v22, 1  ;;  %1513 = vrot.lane.b32.xlu0 %v3118_v24, %s2684_s27  ;;  %v5340_v43 = vrot.slane %v3327_v49, 1  ;;  %v5341_v16 = vrot.slane %v3264_v33, 1  ;;  %v1395_v55 = vsel %vm331_vm0, %v1393_v36, %v1394_v23  ;;  %5343 = vst [vmem:[#allocation70_spill] sm:$0xff] %v3388_v30 }
  0xc2   : > { %v1496_v0 = vpop.permute.xlu1 %1495  ;;  %v1539_v17 = vsel %vm429_vm1, %v1492_v57, 0.0  ;;  %v3391_v61 = vmul.f32 %v3121_v3, %v469_v18  ;;  %v5345_v57 = vrot.slane %v3249_v19, 1  ;;  %v1441_v36 = vsub.f32 %v1395_v55, %v3322_v45 }
  0xc3   : > { %v3379_v52 = vsel %vm331_vm0, %v5341_v16, %v5340_v43  ;;  %v1397_v24 = vsel %vm331_vm0, %v1394_v23, %v1396_v6  ;;  %v3385_v32 = vsel %vm429_vm1, %v1496_v0, 0.0  ;;  %v1494_v46 = vpop.permute.xlu0 %1493  ;;  %v3403_v43 = vmul.f32 %v3121_v3, %v468_v4 }
  0xc4   : > { %5342 = vst [vmem:[#allocation69_spill] sm:$0xff] %v3379_v52  ;;  %5344 = vst [vmem:[#allocation71_spill] sm:$0xff] %v3391_v61  ;;  %v1574_v54 = vrot.slane %v3385_v32, 1  ;;  %579 = vrot.lane.b32.xlu1 %v3160_v60, %s2684_s27  ;;  %v3400_v23 = vsel %vm331_vm0, %v5345_v57, %v796_v62  ;;  %v454_v0 = vsub.f32 %v438_v10, %v2838_v35  ;;  %v641_v16 = vand.u32 2147483647, %v625_v51  ;;  %v3410_v61 = vld [vmem:[%s2921_s8 + $0x78] sm:$0xff] }
  0xc5   : > { %5346 = vst [vmem:[#allocation72_spill] sm:$0xff] %v3400_v23  ;;  %5347 = vst [vmem:[#allocation73_spill] sm:$0xff] %v3403_v43  ;;  %v1540_v18 = vsel %vm429_vm1, %v1494_v46, 0.0  ;;  %1945 = vrot.lane.b32.xlu0 %v3133_v50, %s2684_s27  ;;  %v1571_v60 = vrot.slane %v1539_v17, 1  ;;  %v1442_v52 = vsub.f32 %v1397_v24, %v3319_v12  ;;  %v471_v5 = vand.u32 2147483647, %v455_v27 }
  0xc6   : > { %v1572_v57 = vrot.slane %v1540_v18, 1  ;;  %v1498_v23 = vpop.permute.xlu1 %1497  ;;  %v3415_v4 = vmul.f32 %v3141_v53, %v642_v44  ;;  %v5348_v10 = vrot.slane %v3353_v26, 1  ;;  %v3432_v44 = vmul.f32 %v3141_v53, %v641_v16 }
  0xc7   : > { %v3418_v35 = vsel %vm429_vm1, %v1498_v23, 0.0  ;;  %v1320_v51 = vpop.permute.xlu0 %1319  ;;  %v5354_v43 = vrot.slane %v3353_v26, 1 }
  0xc8   : > { %v3423_v50 = vsel %vm331_vm0, %v796_v62, %v5348_v10  ;;  %v1573_v45 = vsel %vm331_vm0, %v1571_v60, %v1572_v57  ;;  %v1575_v55 = vsel %vm331_vm0, %v1572_v57, %v1574_v54  ;;  %v1576_v12 = vrot.slane %v3418_v35, 1  ;;  %1013 = vrot.lane.b32.xlu1 %v3170_v9, %s2684_s27  ;;  %5350 = vst [vmem:[#allocation75_spill] sm:$0xff] %v3432_v44 }
  0xc9   : > { %5349 = vst [vmem:[#allocation74_spill] sm:$0xff] %v3423_v50  ;;  %v1619_v24 = vsub.f32 %v1573_v45, %v1539_v17  ;;  %v1620_v46 = vsub.f32 %v1575_v55, %v1540_v18  ;;  %v3435_v23 = vsel %vm429_vm1, %v1320_v51, 0.0  ;;  %832 = vrot.lane.b32.xlu0 %v3173_v7, %s2684_s27  ;;  %v1457_v60 = vand.u32 2147483647, %v1441_v36 }
  0xca   : > { %v1458_v62 = vand.u32 2147483647, %v1442_v52  ;;  %v1577_v57 = vsel %vm331_vm0, %v1574_v54, %v1576_v12  ;;  %v1398_v10 = vrot.slane %v3435_v23, 1  ;;  %v1500_v9 = vpop.permute.xlu1 %1499  ;;  %v3443_v27 = vadd.f32 %v3415_v4, %v3346_v29 }
  0xcb   : > { %v1635_v16 = vand.u32 2147483647, %v1619_v24  ;;  %v1636_v17 = vand.u32 2147483647, %v1620_v46  ;;  %v3446_v18 = vsel %vm429_vm1, %v1500_v9, 0.0  ;;  %v1322_v51 = vpop.permute.xlu0 %1321  ;;  %v3457_v36 = vadd.f32 %v3432_v44, %v3314_v58 }
  0xcc   : > { %v470_v45 = vand.u32 2147483647, %v454_v0  ;;  %v1399_v55 = vsel %vm331_vm0, %v1396_v6, %v1398_v10  ;;  %v5171_v52 = vrot.slane %v3446_v18, 1  ;;  %v3451_v54 = vsel %vm429_vm1, %v1322_v51, 0.0  ;;  %1515 = vrot.lane.b32.xlu1 %v3136_v56, %s2684_s27 }
  0xcd   : > { %v3460_v24 = vmul.f32 %v3167_v37, %v1635_v16  ;;  %v1621_v9 = vsub.f32 %v1577_v57, %v3385_v32  ;;  %v1443_v0 = vsub.f32 %v1399_v55, %v3359_v22  ;;  %1337 = vrot.lane.b32.xlu0 %v2826_v31, %s2684_s27  ;;  %v3468_v6 = vsel %vm429_vm1, %v3099_v59, 0.0 }
  0xce   : > { %v3471_v56 = vmul.f32 %v3157_v28, %v1457_v60  ;;  %v3474_v46 = vmul.f32 %v3167_v37, %v1636_v17  ;;  %v5173_v16 = vrot.slane %v3451_v54, 1  ;;  %v1930_v51 = vpop.permute.xlu1 %1929  ;;  %v3478_v32 = vmul.f32 %v3121_v3, %v471_v5 }
  0xcf   : > { %v692_v22 = vmul.f32 -10.0, %v3443_v27  ;;  %v3482_v31 = vmul.f32 %v3157_v28, %v1458_v62  ;;  %v1579_v59 = vsel %vm331_vm0, %v1576_v12, %v5171_v52  ;;  %v1928_v60 = vpop.permute.xlu0 %1927  ;;  %v1976_v5 = vsel %vm429_vm1, %v1930_v51, 0.0 }
  0xd0   : > { %5351 = vst [vmem:[#allocation76_spill] sm:$0xff] %v3478_v32  ;;  %v3489_v57 = vadd.f32 %v3460_v24, %v3471_v56  ;;  %v1401_v17 = vsel %vm331_vm0, %v1398_v10, %v5173_v16  ;;  %v1975_v55 = vsel %vm429_vm1, %v1928_v60, 0.0  ;;  %1947 = vrot.lane.b32.xlu1 %v3149_v42, %s2684_s27  ;;  %v3500_v62 = vsel %vm429_vm1, %v3113_v2, 0.0 }
  0xd1   : > { %v691_v12 = vmul.f32 -10.0, %v3457_v36  ;;  %v1637_v52 = vand.u32 2147483647, %v1621_v9  ;;  %v1459_v32 = vand.u32 2147483647, %v1443_v0  ;;  %1767 = vrot.lane.b32.xlu0 %v3152_v40, %s2684_s27  ;;  %v3507_v10 = vadd.f32 %v3474_v46, %v3482_v31 }
  0xd2   : > { %v1622_v51 = vsub.f32 %v1579_v59, %v3418_v35  ;;  %v2008_v60 = vrot.slane %v1976_v5, 1  ;;  %v2007_v16 = vrot.slane %v1975_v55, 1  ;;  %v566_v42 = vpop.permute.xlu1 %565  ;;  %v3511_v7 = vmul.f32 %v3121_v3, %v470_v45 }
  0xd3   : > { %v1444_v9 = vsub.f32 %v1401_v17, %v3435_v23  ;;  %v1932_v0 = vpop.permute.xlu0 %1931  ;;  %v5353_v40 = vrot.slane %v3410_v61, 1  ;;  %v709_v59 = vmul.f32 1.442695, %v692_v22  ;;  %v1685_v45 = vmul.f32 -10.0, %v3489_v57 }
  0xd4   : > { %5352 = vst [vmem:[#allocation77_spill] sm:$0xff] %v3511_v7  ;;  %v2009_v7 = vsel %vm331_vm0, %v2007_v16, %v2008_v60  ;;  %834 = vrot.lane.b32.xlu1 %v3176_v11, %s2684_s27  ;;  %v707_v23 = vmul.f32 1.442695, %v691_v12  ;;  %v3530_v17 = vmul.f32 %v3167_v37, %v1637_v52  ;;  %v3533_v2 = vmul.f32 %v3157_v28, %v1459_v32  ;;  %v5358_v52 = vld [vmem:[#allocation11_spill] sm:$0xff] }
  0xd5   : > { %v3521_v50 = vsel %vm331_vm0, %v5354_v43, %v5353_v40  ;;  %v2055_v43 = vsub.f32 %v2009_v7, %v1975_v55  ;;  %v5357_v40 = vld [vmem:[#allocation39_spill] sm:$0xff]  ;;  %v1686_v22 = vmul.f32 -10.0, %v3507_v10  ;;  %v1638_v35 = vand.u32 2147483647, %v1622_v51 }
  0xd6   : > { %5355 = vst [vmem:[#allocation78_spill] sm:$0xff] %v3521_v50  ;;  %5356 = vst [vmem:[#allocation79_spill] sm:$0xff] %v3533_v2  ;;  %581 = vrot.lane.b32.xlu0 %v5357_v40, %s2684_s27  ;;  %v611_v50 = vsel %vm429_vm1, %v566_v42, 0.0  ;;  %v3540_v16 = vsel %vm429_vm1, %v1932_v0, 0.0  ;;  %v1502_v11 = vpop.permute.xlu1 %1501  ;;  %v1460_v12 = vand.u32 2147483647, %v1444_v9  ;;  %2463 = vpow2.f32 %v709_v59 }
  0xd7   : > { %v2071_v58 = vand.u32 2147483647, %v2055_v43  ;;  %v627_v47 = vsub.f32 %v611_v50, %v5358_v52  ;;  %v5184_v32 = vrot.slane %v3540_v16, 1  ;;  %v1324_v29 = vpop.permute.xlu0 %1323  ;;  %v1701_v7 = vmul.f32 1.442695, %v1685_v45  ;;  %v5359_v42 = vld [vmem:[#allocation5_spill] sm:$0xff] }
  0xd8   : > { %v3545_v55 = vsel %vm429_vm1, %v1502_v11, 0.0  ;;  %v3548_v51 = vsel %vm429_vm1, %v1324_v29, 0.0  ;;  %1339 = vrot.lane.b32.xlu1 %v5359_v42, %s2684_s27  ;;  %2465 = vpow2.f32 %v707_v23  ;;  %v3554_v9 = vadd.f32 %v3530_v17, %v3533_v2  ;;  %v5360_v50 = vld [vmem:[#allocation41_spill] sm:$0xff]  ;;  %v5361_v11 = vld [vmem:[#allocation42_spill] sm:$0xff] }
  0xd9   : > { %v2089_v0 = vmul.f32 %v5360_v50, %v2071_v58  ;;  %v2011_v59 = vsel %vm331_vm0, %v2008_v60, %v5184_v32  ;;  %v643_v45 = vand.u32 2147483647, %v627_v47  ;;  %v5185_v43 = vrot.slane %v3545_v55, 1  ;;  %v5378_v2 = vld [vmem:[#allocation49_spill] sm:$0xff] }
  0xda   : > { %1015 = vrot.lane.b32.xlu0 %v5361_v11, %s2684_s27  ;;  %v2056_v29 = vsub.f32 %v2011_v59, %v1976_v5  ;;  %v5187_v52 = vrot.slane %v3548_v51, 1  ;;  %v1752_v23 = vpop.permute.xlu1 %1751  ;;  %v1703_v42 = vmul.f32 1.442695, %v1686_v22  ;;  %v3565_v40 = vmul.f32 %v3167_v37, %v1638_v35  ;;  %v5367_v11 = vld [vmem:[#allocation40_spill] sm:$0xff] }
  0xdb   : > { %v3568_v58 = vmul.f32 %v3157_v28, %v1460_v12  ;;  %v1798_v26 = vsel %vm429_vm1, %v1752_v23, 0.0  ;;  %v1750_v60 = vpop.permute.xlu0 %1749  ;;  %2467 = vpow2.f32 %v1701_v7  ;;  %v5364_v47 = vrot.slane %v3446_v18, 1  ;;  %v5366_v12 = vld [vmem:[#allocation38_spill] sm:$0xff] }
  0xdc   : > { %5362 = vst [vmem:[#allocation11_spill] sm:$0xff] %v3565_v40  ;;  %v2072_v32 = vand.u32 2147483647, %v2056_v29  ;;  %v5365_v22 = vrot.slane %v3451_v54, 1  ;;  %1769 = vrot.lane.b32.xlu1 %v5366_v12, %s2684_s27  ;;  %v1687_v59 = vmul.f32 -10.0, %v3554_v9  ;;  %v1830_v21 = vrot.slane %v1798_v26, 1 }
  0xdd   : > { %5363 = vst [vmem:[#allocation5_spill] sm:$0xff] %v3568_v58  ;;  %v1581_v5 = vsel %vm331_vm0, %v5364_v47, %v5185_v43  ;;  %v2153_v23 = vmax.f32 %v2089_v0, 0.01  ;;  %v3589_v47 = vmul.f32 %v3141_v53, %v643_v45  ;;  %v3595_v12 = vadd.f32 %v3565_v40, %v3568_v58 }
  0xde   : > { %v1403_v35 = vsel %vm331_vm0, %v5365_v22, %v5187_v52  ;;  %v1623_v7 = vsub.f32 %v1581_v5, %v3446_v18  ;;  %1517 = vrot.lane.b32.xlu0 %v5367_v11, %s2684_s27  ;;  %v2090_v43 = vmul.f32 %v5360_v50, %v2072_v32  ;;  %v1797_v22 = vsel %vm429_vm1, %v1750_v60, 0.0  ;;  %v1934_v52 = vpop.permute.xlu1 %1933  ;;  %v5369_v32 = vld [vmem:[#allocation43_spill] sm:$0xff] }
  0xdf   : > { %v1445_v29 = vsub.f32 %v1403_v35, %v3451_v54  ;;  %5368 = vst [vmem:[#allocation41_spill] sm:$0xff] %v3589_v47  ;;  %v1829_v5 = vrot.slane %v1797_v22, 1  ;;  %v1754_v54 = vpop.permute.xlu0 %1753  ;;  %2469 = vpow2.f32 %v1703_v42  ;;  %v3598_v11 = vsel %vm429_vm1, %v1934_v52, 0.0 }
  0xe0   : > { %v1639_v0 = vand.u32 2147483647, %v1623_v7  ;;  %v2154_v35 = vmax.f32 %v2090_v43, 0.01  ;;  %v3601_v45 = vsel %vm429_vm1, %v1754_v54, 0.0  ;;  %583 = vrot.lane.b32.xlu1 %v5369_v32, %s2684_s27  ;;  %2471 = vrcp.f32 %v2153_v23  ;;  %v5372_v43 = vld [vmem:[#allocation46_spill] sm:$0xff] }
  0xe1   : > { %v1461_v18 = vand.u32 2147483647, %v1445_v29  ;;  %v1831_v29 = vsel %vm331_vm0, %v1829_v5, %v1830_v21  ;;  %v3616_v52 = vadd.f32 %v3589_v47, %v3311_v1  ;;  %v5194_v54 = vrot.slane %v3598_v11, 1 }
  0xe2   : > { %v3606_v60 = vmul.f32 %v3167_v37, %v1639_v0  ;;  %1949 = vrot.lane.b32.xlu0 %v5372_v43, %s2684_s27  ;;  %v1877_v42 = vsub.f32 %v1831_v29, %v1797_v22  ;;  %v5196_v23 = vrot.slane %v3601_v45, 1  ;;  %v1000_v32 = vpop.permute.xlu1 %999  ;;  %v1705_v0 = vmul.f32 1.442695, %v1687_v59 }
  0xe3   : > { %v3609_v7 = vmul.f32 %v3157_v28, %v1461_v18  ;;  %5373 = vst [vmem:[#allocation46_spill] sm:$0xff] %v3616_v52  ;;  %v1688_v58 = vmul.f32 -10.0, %v3595_v12  ;;  %2473 = vrcp.f32 %v2154_v35  ;;  %v568_v5 = vpop.permute.xlu0 %567  ;;  %v5374_v1 = vrot.slane %v3540_v16, 1  ;;  %v5375_v35 = vld [vmem:[#allocation48_spill] sm:$0xff]  ;;  %v2464_v47 = vpop.eup %2463 }
  0xe4   : > { %5370 = vst [vmem:[#allocation38_spill] sm:$0xff] %v3606_v60  ;;  %v1893_v43 = vand.u32 2147483647, %v1877_v42  ;;  %v1833_v29 = vsel %vm331_vm0, %v1830_v21, %v5196_v23  ;;  %v1047_v59 = vsel %vm429_vm1, %v1000_v32, 0.0  ;;  %1017 = vrot.lane.b32.xlu1 %v5375_v35, %s2684_s27  ;;  %v5379_v32 = vld [vmem:[#allocation32_spill] sm:$0xff]  ;;  %v693_v35 = vmul.f32 -10.0, %v3616_v52 }
  0xe5   : > { %5371 = vst [vmem:[#allocation40_spill] sm:$0xff] %v3609_v7  ;;  %v3623_v18 = vadd.f32 %v3606_v60, %v3609_v7  ;;  %v2013_v22 = vsel %vm331_vm0, %v5374_v1, %v5194_v54  ;;  %v5376_v7 = vsub.f32 %v3468_v6, %v2851_v38  ;;  %v5377_v60 = vsub.f32 %v3500_v62, %v2856_v41  ;;  %v2466_v21 = vpop.eup %2465  ;;  %v5383_v52 = vld [vmem:[#allocation51_spill] sm:$0xff] }
  0xe6   : > { %v2057_v1 = vsub.f32 %v2013_v22, %v3540_v16  ;;  %v1878_v54 = vsub.f32 %v1833_v29, %v1798_v26  ;;  %836 = vrot.lane.b32.xlu0 %v5378_v2, %s2684_s27  ;;  %v3647_v23 = vsel %vm429_vm1, %v5379_v32, 0.0  ;;  %v1911_v38 = vmul.f32 %v5380_v48, %v1893_v43  ;;  %v5381_v16 = vld [vmem:[#allocation12_spill] sm:$0xff]  ;;  %v5382_v2 = vld [vmem:[#allocation13_spill] sm:$0xff] }
  0xe7   : > { %v473_v42 = vand.u32 2147483647, %v5376_v7  ;;  %v472_v40 = vand.u32 2147483647, %v5377_v60  ;;  %v612_v6 = vsel %vm429_vm1, %v568_v5, 0.0  ;;  %v1326_v7 = vpop.permute.xlu1 %1325  ;;  %2475 = vpow2.f32 %v1705_v0  ;;  %v1002_v60 = vpop.permute.xlu0 %1001 }
  0xe8   : > { %v2073_v41 = vand.u32 2147483647, %v2057_v1  ;;  %v1894_v62 = vand.u32 2147483647, %v1878_v54  ;;  %v1063_v26 = vsub.f32 %v1047_v59, %v5381_v16  ;;  %v1707_v22 = vmul.f32 1.442695, %v1688_v58  ;;  %1519 = vrot.lane.b32.xlu1 %v5383_v52, %s2684_s27  ;;  %v2468_v43 = vpop.eup %2467 }
  0xe9   : > { %v2105_v29 = vmax.f32 %v1911_v38, 0.01  ;;  %v628_v44 = vsub.f32 %v612_v6, %v5382_v2  ;;  %v3655_v32 = vsel %vm429_vm1, %v1326_v7, 0.0  ;;  %v3660_v5 = vmul.f32 %v3121_v3, %v473_v42  ;;  %v5385_v59 = vld [vmem:[#allocation6_spill] sm:$0xff]  ;;  %v5394_v52 = vld [vmem:[#allocation52_spill] sm:$0xff] }
  0xea   : > { %v2091_v0 = vmul.f32 %v5360_v50, %v2073_v41  ;;  %v1912_v54 = vmul.f32 %v5380_v48, %v1894_v62  ;;  %1341 = vrot.lane.b32.xlu0 %v5385_v59, %s2684_s27  ;;  %v5386_v58 = vrot.slane %v3388_v30, 1  ;;  %v5387_v2 = vrot.slane %v3327_v49, 1  ;;  %v5390_v41 = vld [vmem:[#allocation34_spill] sm:$0xff] }
  0xeb   : > { %5384 = vst [vmem:[#allocation32_spill] sm:$0xff] %v3660_v5  ;;  %v711_v6 = vmul.f32 1.442695, %v693_v35  ;;  %2477 = vrcp.f32 %v2105_v29  ;;  %v5205_v42 = vrot.slane %v3655_v32, 1  ;;  %v1756_v7 = vpop.permute.xlu1 %1755  ;;  %v3678_v62 = vsel %vm429_vm1, %v5390_v41, 0.0  ;;  %v1504_v30 = vpop.permute.xlu0 %1503 }
  0xec   : > { %v3671_v1 = vsel %vm331_vm0, %v5387_v2, %v5386_v58  ;;  %5391 = vst [vmem:[#allocation12_spill] sm:$0xff] %v3678_v62  ;;  %v2106_v16 = vmax.f32 %v1912_v54, 0.01  ;;  %v1079_v59 = vand.u32 2147483647, %v1063_v26  ;;  %v1048_v5 = vsel %vm429_vm1, %v1002_v60, 0.0  ;;  %1951 = vrot.lane.b32.xlu1 %v5394_v52, %s2684_s27  ;;  %v2470_v41 = vpop.eup %2469 }
  0xed   : > { %5388 = vst [vmem:[#allocation45_spill] sm:$0xff] %v3671_v1  ;;  %v3682_v58 = vmul.f32 %v3121_v3, %v472_v40  ;;  %2479 = vpow2.f32 %v1707_v22  ;;  %v644_v2 = vand.u32 2147483647, %v628_v44  ;;  %v5393_v35 = vrot.slane %v3548_v51, 1  ;;  %v5395_v62 = vld [vmem:[#allocation14_spill] sm:$0xff]  ;;  %v5396_v22 = vld [vmem:[#allocation53_spill] sm:$0xff]  ;;  %v2472_v44 = vpop.eup %2471 }
  0xee   : > { %v1733_v26 = vmul.f32 %v2468_v43, %v3489_v57  ;;  %v2155_v54 = vmax.f32 %v2091_v0, 0.01  ;;  %v1064_v40 = vsub.f32 %v1048_v5, %v5395_v62  ;;  %1771 = vrot.lane.b32.xlu0 %v5396_v22, %s2684_s27  ;;  %2481 = vrcp.f32 %v2106_v16  ;;  %v5399_v43 = vld [vmem:[#allocation47_spill] sm:$0xff] }
  0xef   : > { %5392 = vst [vmem:[#allocation13_spill] sm:$0xff] %v3682_v58  ;;  %v1405_v29 = vsel %vm331_vm0, %v5393_v35, %v5205_v42  ;;  %v3697_v58 = vmul.f32 %v2464_v47, %v3443_v27  ;;  %v3700_v35 = vsel %vm429_vm1, %v1756_v7, 0.0  ;;  %v570_v52 = vpop.permute.xlu1 %569  ;;  %v5397_v42 = vrot.slane %v3410_v61, 1  ;;  %v1936_v62 = vpop.permute.xlu0 %1935 }
  0xf0   : > { %v1446_v60 = vsub.f32 %v1405_v29, %v3548_v51  ;;  %v3708_v51 = vmul.f32 %v2466_v21, %v3457_v36  ;;  %2483 = vpow2.f32 %v711_v6  ;;  %v1097_v5 = vmul.f32 %v5399_v43, %v1079_v59  ;;  %v2474_v27 = vpop.eup %2473  ;;  %v5400_v36 = vld [vmem:[#allocation54_spill] sm:$0xff] }
  0xf1   : > { %v3705_v57 = vsel %vm331_vm0, %v5397_v42, 0.0  ;;  %v1080_v0 = vand.u32 2147483647, %v1064_v40  ;;  %v3712_v47 = vmul.f32 %v2470_v41, %v3507_v10  ;;  %v3715_v7 = vmul.f32 %v3141_v53, %v644_v2  ;;  %838 = vrot.lane.b32.xlu1 %v5400_v36, %s2684_s27  ;;  %v5401_v10 = vld [vmem:[#allocation55_spill] sm:$0xff] }
  0xf2   : > { %5398 = vst [vmem:[#allocation51_spill] sm:$0xff] %v3705_v57  ;;  %v5208_v16 = vrot.slane %v3700_v35, 1  ;;  %v3719_v42 = vsel %vm429_vm1, %v1504_v30, 0.0  ;;  %v3723_v21 = vmul.f32 0.2, %v1733_v26  ;;  %2485 = vrcp.f32 %v2155_v54  ;;  %585 = vrot.lane.b32.xlu0 %v5401_v10, %s2684_s27 }
  0xf3   : > { %v1098_v6 = vmul.f32 %v5399_v43, %v1080_v0  ;;  %v5209_v59 = vrot.slane %v3719_v42, 1  ;;  %v2185_v2 = vmul.f32 %v2472_v44, %v3460_v24  ;;  %v1689_v29 = vmul.f32 -10.0, %v3623_v18  ;;  %v823_v54 = vpop.permute.xlu1 %822  ;;  %v821_v44 = vpop.permute.xlu0 %820 }
  0xf4   : > { %v5402_v30 = vrot.slane %v3601_v45, 1  ;;  %v613_v26 = vsel %vm429_vm1, %v570_v52, 0.0  ;;  %v1161_v40 = vmax.f32 %v1097_v5, 0.01  ;;  %v5403_v10 = vrot.slane %v3545_v55, 1  ;;  %v2476_v36 = vpop.eup %2475 }
  0xf5   : > { %v1162_v22 = vmax.f32 %v1098_v6, 0.01  ;;  %v2186_v3 = vmul.f32 %v2474_v27, %v3474_v46  ;;  %v1462_v52 = vand.u32 2147483647, %v1446_v60  ;;  %v2655_v6 = vld [vmem:[%s2740_s26 + $0x78] sm:$0xff]  ;;  %v3753_v38 = vsel %vm429_vm1, %v1936_v62, 0.0 }
  0xf6   : > { %v1835_v41 = vsel %vm331_vm0, %v5402_v30, %v5208_v16  ;;  %v1583_v24 = vsel %vm331_vm0, %v5403_v10, %v5209_v59  ;;  %v3746_v30 = vadd.f32 %v3715_v7, %v3338_v15  ;;  %1343 = vrot.lane.b32.xlu1 %v2655_v6, %s2684_s27  ;;  %v869_v10 = vsel %vm429_vm1, %v823_v54, 0.0  ;;  %1019 = vrot.lane.b32.xlu0 %v3273_v34, %s2684_s27  ;;  %v5405_v27 = vld [vmem:[#allocation16_spill] sm:$0xff] }
  0xf7   : > { %v1879_v0 = vsub.f32 %v1835_v41, %v3601_v45  ;;  %v1624_v5 = vsub.f32 %v1583_v24, %v3545_v55  ;;  %v5404_v41 = vld [vmem:[#allocation15_spill] sm:$0xff]  ;;  %2487 = vrcp.f32 %v1162_v22  ;;  %v5210_v60 = vrot.slane %v3753_v38, 1  ;;  %v1328_v24 = vpop.permute.xlu1 %1327 }
  0xf8   : > { %v629_v16 = vsub.f32 %v613_v26, %v5404_v41  ;;  %v885_v55 = vsub.f32 %v869_v10, %v5405_v27  ;;  %v2478_v59 = vpop.eup %2477  ;;  %v2217_v6 = vmul.f32 0.15, %v2185_v2  ;;  %2489 = vrcp.f32 %v1161_v40  ;;  %v1004_v26 = vpop.permute.xlu0 %1003 }
  0xf9   : > { %v1895_v45 = vand.u32 2147483647, %v1879_v0  ;;  %v1640_v46 = vand.u32 2147483647, %v1624_v5  ;;  %v1735_v0 = vmul.f32 %v2476_v36, %v3554_v9  ;;  %v2137_v54 = vmul.f32 %v2478_v59, %v3471_v56 }
  0xfa   : > { %v3764_v41 = vmul.f32 %v3157_v28, %v1462_v52  ;;  %v5406_v5 = vrot.slane %v3598_v11, 1  ;;  %1773 = vrot.lane.b32.xlu1 %v3249_v19, %s2684_s27  ;;  %v3776_v9 = vpop.eup %2479  ;;  %v901_v59 = vand.u32 2147483647, %v885_v55  ;;  %v868_v2 = vsel %vm429_vm1, %v821_v44, 0.0  ;;  %1521 = vrot.lane.b32.xlu0 %v3261_v25, %s2684_s27 }
  0xfb   : > { %v1913_v62 = vmul.f32 %v5380_v48, %v1895_v45  ;;  %v3767_v22 = vmul.f32 %v3167_v37, %v1640_v46  ;;  %v2218_v40 = vmul.f32 0.15, %v2186_v3  ;;  %v694_v52 = vmul.f32 -10.0, %v3746_v30  ;;  %v1758_v19 = vpop.permute.xlu1 %1757  ;;  %v2482_v27 = vpop.eup %2481 }
  0xfc   : > { %v2015_v10 = vsel %vm331_vm0, %v5406_v5, %v5210_v60  ;;  %v645_v46 = vand.u32 2147483647, %v629_v16  ;;  %v2249_v5 = vmul.f32 0.15, %v2137_v54  ;;  %v1506_v55 = vpop.permute.xlu0 %1505  ;;  %v2202_v25 = vmul.f32 0.2, %v3712_v47 }
  0xfd   : > { %v2107_v36 = vmax.f32 %v1913_v62, 0.01  ;;  %v2058_v56 = vsub.f32 %v2015_v10, %v3598_v11  ;;  %v3785_v45 = vadd.f32 %v3767_v22, %v3764_v41  ;;  %v919_v11 = vmul.f32 %v3279_v14, %v901_v59  ;;  %v3788_v44 = vpop.eup %2483  ;;  %v5407_v60 = vld [vmem:[#allocation17_spill] sm:$0xff] }
  0xfe   : > { %v1709_v3 = vmul.f32 1.442695, %v1689_v29  ;;  %v2138_v10 = vmul.f32 %v2482_v27, %v3482_v31  ;;  %v884_v34 = vsub.f32 %v868_v2, %v5407_v60  ;;  %587 = vrot.lane.b32.xlu1 %v3282_v8, %s2684_s27  ;;  %v2233_v16 = vadd.f32 %v2217_v6, %v3723_v21  ;;  %1953 = vrot.lane.b32.xlu0 %v3264_v33, %s2684_s27 }
  0xff   : > { %2491 = vrcp.f32 %v2107_v36  ;;  %v2074_v62 = vand.u32 2147483647, %v2058_v56  ;;  %v1114_v36 = vmax.f32 %v919_v11, 0.01  ;;  %v3798_v56 = vsel %vm429_vm1, %v1328_v24, 0.0  ;;  %v2486_v47 = vpop.eup %2485  ;;  %v3805_v2 = vpop.permute.xlu1 %571 }
 0x100   : > { %v2234_v29 = vadd.f32 %v2218_v40, %v2202_v25  ;;  %v2250_v59 = vmul.f32 0.15, %v2138_v10  ;;  %v713_v31 = vmul.f32 1.442695, %v694_v52  ;;  %v3803_v60 = vmul.f32 %v3141_v53, %v645_v46  ;;  %v1938_v24 = vpop.permute.xlu0 %1937 }
 0x101   : > { %v2092_v54 = vmul.f32 %v5360_v50, %v2074_v62  ;;  %v3808_v21 = vmul.f32 0.2, %v3697_v58  ;;  %v2203_v6 = vmul.f32 0.2, %v1735_v0  ;;  %v2265_v27 = vadd.f32 %v2249_v5, %v2233_v16 }
 0x102   : > { %2493 = vrcp.f32 %v1114_v36  ;;  %v2266_v62 = vadd.f32 %v2250_v59, %v2234_v29  ;;  %v900_v8 = vand.u32 2147483647, %v884_v34  ;;  %v5214_v33 = vrot.slane %v3798_v56, 1  ;;  %1021 = vrot.lane.b32.xlu1 %v3285_v63, %s2684_s27  ;;  %840 = vrot.lane.b32.xlu0 %v3293_v20, %s2684_s27 }
 0x103   : > { %v2156_v11 = vmax.f32 %v2092_v54, 0.01  ;;  %2495 = vpow2.f32 %v1709_v3  ;;  %v2187_v40 = vmul.f32 %v2486_v47, %v3530_v17  ;;  %v1049_v52 = vsel %vm429_vm1, %v1004_v26, 0.0  ;;  %v1006_v5 = vpop.permute.xlu1 %1005  ;;  %v5409_v3 = vld [vmem:[#allocation18_spill] sm:$0xff] }
 0x104   : > { %v3816_v58 = vsel %vm429_vm1, %v1758_v19, 0.0  ;;  %v3820_v0 = vadd.f32 %v2266_v62, %v2265_v27  ;;  %2497 = vpow2.f32 %v713_v31  ;;  %v3824_v34 = vadd.f32 %v3803_v60, %v3365_v39  ;;  %v2488_v25 = vpop.eup %2487  ;;  %v825_v54 = vpop.permute.xlu0 %824 }
 0x105   : > { %v918_v46 = vmul.f32 %v3279_v14, %v900_v8  ;;  %v1690_v17 = vmul.f32 -10.0, %v3785_v45  ;;  %v5408_v26 = vrot.slane %v3655_v32, 1  ;;  %v1065_v10 = vsub.f32 %v1049_v52, %v5409_v3  ;;  %v2490_v36 = vpop.eup %2489 }
 0x106   : > { %v5213_v16 = vrot.slane %v3816_v58, 1  ;;  %2499 = vrcp.f32 %v2156_v11  ;;  %v3837_v29 = vsel %vm429_vm1, %v1506_v55, 0.0  ;;  %1955 = vrot.lane.b32.xlu1 %v3327_v49, %s2684_s27  ;;  %v2219_v59 = vmul.f32 0.15, %v2187_v40  ;;  %1775 = vrot.lane.b32.xlu0 %v3330_v13, %s2684_s27 }
 0x107   : > { %v1407_v19 = vsel %vm331_vm0, %v5408_v26, %v5214_v33  ;;  %v1113_v47 = vmax.f32 %v918_v46, 0.01  ;;  %v1081_v31 = vand.u32 2147483647, %v1065_v10  ;;  %v5410_v27 = vrot.slane %v3700_v35, 1  ;;  %v3853_v11 = vpop.permute.xlu1 %1507 }
 0x108   : > { %v1447_v8 = vsub.f32 %v1407_v19, %v3655_v32  ;;  %v5215_v52 = vrot.slane %v3837_v29, 1  ;;  %v1736_v32 = vmul.f32 %v3776_v9, %v3595_v12  ;;  %v1194_v55 = vmul.f32 %v2488_v25, %v3415_v4  ;;  %v3862_v3 = vpop.permute.xlu0 %1329  ;;  %v5412_v4 = vld [vmem:[#allocation75_spill] sm:$0xff] }
 0x109   : > { %v1837_v62 = vsel %vm331_vm0, %v5410_v27, %v5213_v16  ;;  %2501 = vrcp.f32 %v1113_v47  ;;  %v695_v40 = vmul.f32 -10.0, %v3824_v34  ;;  %v1099_v26 = vmul.f32 %v5399_v43, %v1081_v31  ;;  %v5413_v47 = vld [vmem:[#allocation60_spill] sm:$0xff]  ;;  %v5414_v31 = vld [vmem:[#allocation79_spill] sm:$0xff]  ;;  %v5415_v16 = vld [vmem:[#allocation61_spill] sm:$0xff] }
 0x10a   : > { %v1880_v49 = vsub.f32 %v1837_v62, %v3700_v35  ;;  %v1463_v46 = vand.u32 2147483647, %v1447_v8  ;;  %v5411_v19 = vrot.slane %v3719_v42, 1  ;;  %v1193_v9 = vmul.f32 %v2490_v36, %v5412_v4  ;;  %842 = vrot.lane.b32.xlu1 %v5413_v47, %s2684_s27  ;;  %589 = vrot.lane.b32.xlu0 %v5415_v16, %s2684_s27  ;;  %v5419_v47 = vld [vmem:[#allocation20_spill] sm:$0xff] }
 0x10b   : > { %v3867_v10 = vsel %vm429_vm1, %v1938_v24, 0.0  ;;  %v2235_v8 = vadd.f32 %v2219_v59, %v2203_v6  ;;  %v1711_v62 = vmul.f32 1.442695, %v1690_v17  ;;  %v1226_v33 = vmul.f32 0.15, %v1194_v55  ;;  %v3877_v24 = vpop.permute.xlu1 %1939 }
 0x10c   : > { %v1585_v13 = vsel %vm331_vm0, %v5411_v19, %v5215_v52  ;;  %v2492_v12 = vpop.eup %2491  ;;  %v1896_v25 = vand.u32 2147483647, %v1880_v49  ;;  %v5216_v19 = vrot.slane %v3867_v10, 1  ;;  %v3880_v4 = vmul.f32 %v3157_v28, %v1463_v46  ;;  %v5417_v46 = vld [vmem:[#allocation67_spill] sm:$0xff]  ;;  %v5418_v52 = vld [vmem:[#allocation66_spill] sm:$0xff] }
 0x10d   : > { %v1625_v35 = vsub.f32 %v1585_v13, %v3719_v42  ;;  %v2139_v27 = vmul.f32 %v2492_v12, %v5414_v31  ;;  %v1050_v42 = vsel %vm429_vm1, %v1006_v5, 0.0  ;;  %v1163_v6 = vmax.f32 %v1099_v26, 0.01  ;;  %v3887_v12 = vpop.permute.xlu0 %1759 }
 0x10e   : > { %v1914_v36 = vmul.f32 %v5380_v48, %v1896_v25  ;;  %v5416_v17 = vrot.slane %v3753_v38, 1  ;;  %v870_v31 = vsel %vm429_vm1, %v825_v54, 0.0  ;;  %1777 = vrot.lane.b32.xlu1 %v5417_v46, %s2684_s27 }
 0x10f   : > { %v1641_v49 = vand.u32 2147483647, %v1625_v35  ;;  %v2251_v13 = vmul.f32 0.15, %v2139_v27  ;;  %v2494_v55 = vpop.eup %2493  ;;  %v715_v27 = vmul.f32 1.442695, %v695_v40  ;;  %v1242_v40 = vadd.f32 %v1226_v33, %v3808_v21 }
 0x110   : > { %v2017_v59 = vsel %vm331_vm0, %v5416_v17, %v5216_v19  ;;  %v2108_v25 = vmax.f32 %v1914_v36, 0.01  ;;  %v1146_v16 = vmul.f32 %v2494_v55, %v5418_v52  ;;  %v1066_v17 = vsub.f32 %v1050_v42, %v5419_v47  ;;  %v5420_v19 = vld [vmem:[#allocation62_spill] sm:$0xff]  ;;  %v3900_v36 = vpop.eup %2495 }
 0x111   : > { %v3890_v35 = vmul.f32 %v3167_v37, %v1641_v49  ;;  %v2059_v5 = vsub.f32 %v2017_v59, %v3753_v38  ;;  %v2267_v26 = vadd.f32 %v2251_v13, %v2235_v8  ;;  %1023 = vrot.lane.b32.xlu0 %v5420_v19, %s2684_s27  ;;  %v1225_v49 = vmul.f32 0.15, %v1193_v9  ;;  %v827_v59 = vpop.permute.xlu1 %826  ;;  %v3906_v46 = vpop.eup %2497  ;;  %v5422_v8 = vld [vmem:[#allocation21_spill] sm:$0xff] }
 0x112   : > { %2503 = vrcp.f32 %v2108_v25  ;;  %v1258_v47 = vmul.f32 0.15, %v1146_v16  ;;  %v886_v42 = vsub.f32 %v870_v31, %v5422_v8  ;;  %v3913_v13 = vpop.permute.xlu0 %573  ;;  %v1209_v9 = vmul.f32 0.2, %v3708_v51  ;;  %v5423_v25 = vld [vmem:[#allocation65_spill] sm:$0xff]  ;;  %v5427_v51 = vld [vmem:[#allocation46_spill] sm:$0xff] }
 0x113   : > { %v3904_v38 = vadd.f32 %v3890_v35, %v3880_v4  ;;  %v2075_v54 = vand.u32 2147483647, %v2059_v5  ;;  %v3910_v52 = vadd.f32 %v3820_v0, %v2267_v26  ;;  %2505 = vrcp.f32 %v1163_v6  ;;  %591 = vrot.lane.b32.xlu1 %v5423_v25, %s2684_s27  ;;  %v5424_v5 = vld [vmem:[#allocation70_spill] sm:$0xff]  ;;  %v2500_v33 = vpop.eup %2499  ;;  %v5429_v25 = vld [vmem:[#allocation64_spill] sm:$0xff] }
 0x114   : > { %v5425_v19 = vrot.slane %v5424_v5, 1  ;;  %v3924_v0 = vmul.f32 0.2, %v1736_v32  ;;  %v1274_v16 = vadd.f32 %v1258_v47, %v1242_v40  ;;  %v614_v31 = vsel %vm429_vm1, %v3805_v2, 0.0  ;;  %v5428_v47 = vld [vmem:[#allocation11_spill] sm:$0xff] }
 0x115   : > { %5421 = vst [vmem:[#allocation6_spill] sm:$0xff] %v3910_v52  ;;  %v2093_v55 = vmul.f32 %v5360_v50, %v2075_v54  ;;  %v1082_v26 = vand.u32 2147483647, %v1066_v17  ;;  %1957 = vrot.lane.b32.xlu0 %v5424_v5, %s2684_s27  ;;  %v3932_v6 = vmul.f32 %v3788_v44, %v5427_v51  ;;  %v1241_v54 = vadd.f32 %v1225_v49, %v1209_v9  ;;  %v5430_v51 = vld [vmem:[#allocation19_spill] sm:$0xff]  ;;  %v5431_v9 = vld [vmem:[#allocation69_spill] sm:$0xff] }
 0x116   : > { %v3922_v21 = vsel %vm331_vm0, %v5425_v19, 0.0  ;;  %2507 = vpow2.f32 %v1711_v62  ;;  %v1332_v19 = vpop.permute.xlu1 %1331  ;;  %v2502_v52 = vpop.eup %2501  ;;  %v902_v40 = vand.u32 2147483647, %v886_v42  ;;  %v3937_v2 = vsel %vm429_vm1, %v3853_v11, 0.0 }
 0x117   : > { %5426 = vst [vmem:[#allocation34_spill] sm:$0xff] %v3922_v21  ;;  %v2157_v8 = vmax.f32 %v2093_v55, 0.01  ;;  %2509 = vpow2.f32 %v715_v27  ;;  %v1100_v32 = vmul.f32 %v5399_v43, %v1082_v26  ;;  %v3939_v17 = vpop.permute.xlu0 %1007  ;;  %v2188_v5 = vmul.f32 %v2500_v33, %v5428_v47  ;;  %1025 = vrot.lane.b32.xlu1 %v5431_v9, %s2684_s27  ;;  %v5432_v55 = vld [vmem:[#allocation72_spill] sm:$0xff] }
 0x118   : > { %v1145_v44 = vmul.f32 %v2502_v52, %v5429_v25  ;;  %v630_v49 = vsub.f32 %v614_v31, %v5430_v51  ;;  %v5217_v62 = vrot.slane %v3937_v2, 1  ;;  %v920_v42 = vmul.f32 %v3279_v14, %v902_v40 }
 0x119   : > { %2511 = vrcp.f32 %v2157_v8  ;;  %v1164_v27 = vmax.f32 %v1100_v32, 0.01  ;;  %v3950_v11 = vsel %vm429_vm1, %v3862_v3, 0.0  ;;  %844 = vrot.lane.b32.xlu0 %v5432_v55, %s2684_s27  ;;  %v5433_v52 = vrot.slane %v3837_v29, 1 }
 0x11a   : > { %v1257_v33 = vmul.f32 0.15, %v1145_v44  ;;  %v5218_v31 = vrot.slane %v3950_v11, 1  ;;  %v3962_v26 = vsel %vm429_vm1, %v3877_v24, 0.0  ;;  %v3964_v8 = vpop.permute.xlu1 %1761  ;;  %v1115_v3 = vmax.f32 %v920_v42, 0.01 }
 0x11b   : > { %v1587_v25 = vsel %vm331_vm0, %v5433_v52, %v5217_v62  ;;  %2513 = vrcp.f32 %v1164_v27  ;;  %v5219_v40 = vrot.slane %v3962_v26, 1  ;;  %v3968_v47 = vpop.permute.xlu0 %1509  ;;  %v5434_v51 = vrot.slane %v3798_v56, 1  ;;  %v5435_v42 = vld [vmem:[#allocation74_spill] sm:$0xff] }
 0x11c   : > { %v1626_v32 = vsub.f32 %v1587_v25, %v3837_v29  ;;  %v1273_v44 = vadd.f32 %v1257_v33, %v1241_v54  ;;  %v3977_v24 = vsel %vm429_vm1, %v3887_v12, 0.0  ;;  %v871_v27 = vsel %vm429_vm1, %v827_v59, 0.0  ;;  %846 = vrot.lane.b32.xlu1 %v5435_v42, %s2684_s27  ;;  %v5437_v62 = vld [vmem:[#allocation22_spill] sm:$0xff] }
 0x11d   : > { %v1409_v52 = vsel %vm331_vm0, %v5434_v51, %v5218_v31  ;;  %v2220_v29 = vmul.f32 0.15, %v2188_v5  ;;  %2515 = vrcp.f32 %v1115_v3  ;;  %1779 = vrot.lane.b32.xlu0 %v3410_v61, %s2684_s27  ;;  %v5436_v12 = vrot.slane %v3867_v10, 1 }
 0x11e   : > { %v1642_v25 = vand.u32 2147483647, %v1626_v32  ;;  %v1448_v54 = vsub.f32 %v1409_v52, %v3798_v56  ;;  %v3985_v33 = vadd.f32 %v1274_v16, %v1273_v44  ;;  %v5220_v59 = vrot.slane %v3977_v24, 1  ;;  %v3994_v5 = vpop.permute.xlu1 %575  ;;  %v5438_v52 = vld [vmem:[#allocation5_spill] sm:$0xff] }
 0x11f   : > { %v2019_v51 = vsel %vm331_vm0, %v5436_v12, %v5219_v40  ;;  %v887_v31 = vsub.f32 %v871_v27, %v5437_v62  ;;  %v2504_v3 = vpop.eup %2503  ;;  %v1737_v56 = vmul.f32 %v3900_v36, %v3623_v18  ;;  %v4002_v44 = vpop.permute.xlu0 %1941  ;;  %v646_v40 = vand.u32 2147483647, %v630_v49  ;;  %v5440_v18 = vld [vmem:[#allocation78_spill] sm:$0xff] }
 0x120   : > { %v3999_v61 = vmul.f32 %v3167_v37, %v1642_v25  ;;  %v1464_v16 = vand.u32 2147483647, %v1448_v54  ;;  %v2060_v32 = vsub.f32 %v2019_v51, %v3867_v10  ;;  %v2140_v12 = vmul.f32 %v2504_v3, %v5438_v52  ;;  %848 = vrot.lane.b32.xlu1 %v5440_v18, %s2684_s27  ;;  %v2506_v36 = vpop.eup %2505 }
 0x121   : > { %v5439_v62 = vrot.slane %v3816_v58, 1  ;;  %v903_v42 = vand.u32 2147483647, %v887_v31  ;;  %v742_v25 = vmul.f32 %v3906_v46, %v3746_v30  ;;  %1027 = vrot.lane.b32.xlu0 %v3671_v1, %s2684_s27  ;;  %v2236_v51 = vadd.f32 %v2220_v29, %v3924_v0  ;;  %v5442_v29 = vld [vmem:[#allocation41_spill] sm:$0xff]  ;;  %v5447_v1 = vld [vmem:[#allocation12_spill] sm:$0xff] }
 0x122   : > { %v4015_v10 = vmul.f32 %v3157_v28, %v1464_v16  ;;  %v2076_v54 = vand.u32 2147483647, %v2060_v32  ;;  %v2252_v3 = vmul.f32 0.15, %v2140_v12  ;;  %v4023_v52 = vsel %vm429_vm1, %v1332_v19, 0.0  ;;  %v5446_v32 = vld [vmem:[#allocation8_spill] sm:$0xff] }
 0x123   : > { %v1839_v27 = vsel %vm331_vm0, %v5439_v62, %v5220_v59  ;;  %v921_v31 = vmul.f32 %v3279_v14, %v903_v42  ;;  %v4025_v62 = vpop.permute.xlu1 %1009  ;;  %v2508_v30 = vpop.eup %2507  ;;  %v1195_v42 = vmul.f32 %v2506_v36, %v5442_v29  ;;  %v4039_v19 = vmul.f32 %v3141_v53, %v646_v40 }
 0x124   : > { %5441 = vst [vmem:[#allocation52_spill] sm:$0xff] %v4015_v10  ;;  %v1881_v49 = vsub.f32 %v1839_v27, %v3816_v58  ;;  %v4029_v46 = vadd.f32 %v3999_v61, %v4015_v10  ;;  %v2094_v58 = vmul.f32 %v5360_v50, %v2076_v54  ;;  %v4033_v27 = vpop.permute.xlu0 %828  ;;  %v2510_v0 = vpop.eup %2509  ;;  %v4036_v12 = vadd.f32 %v2252_v3, %v2236_v51  ;;  %v5444_v10 = vld [vmem:[#allocation7_spill] sm:$0xff] }
 0x125   : > { %v1116_v59 = vmax.f32 %v921_v31, 0.01  ;;  %850 = vrot.lane.b32.xlu1 %v3705_v57, %s2684_s27  ;;  %v5445_v54 = vsub.f32 %v3647_v23, %v5444_v10  ;;  %1029 = vrot.lane.b32.xlu0 %v3922_v21, %s2684_s27  ;;  %v1211_v51 = vmul.f32 0.2, %v3932_v6  ;;  %v5448_v3 = vrot.slane %v4023_v52, 1  ;;  %v5451_v57 = vld [vmem:[#allocation68_spill] sm:$0xff] }
 0x126   : > { %v1897_v16 = vand.u32 2147483647, %v1881_v49  ;;  %5443 = vst [vmem:[#allocation14_spill] sm:$0xff] %v4036_v12  ;;  %v2158_v55 = vmax.f32 %v2094_v58, 0.01  ;;  %v2512_v40 = vpop.eup %2511  ;;  %v5449_v31 = vrot.slane %v3950_v11, 1  ;;  %v4068_v21 = vadd.f32 %v4039_v19, %v5451_v57 }
 0x127   : > { %v4046_v49 = vand.u32 2147483647, %v5445_v54  ;;  %2517 = vrcp.f32 %v1116_v59  ;;  %v1051_v10 = vsel %vm429_vm1, %v3939_v17, 0.0  ;;  %v4061_v29 = vpop.permute.xlu1 %1511  ;;  %v2205_v58 = vmul.f32 0.2, %v1737_v56  ;;  %v5450_v54 = vld [vmem:[#allocation38_spill] sm:$0xff] }
 0x128   : > { %v1915_v36 = vmul.f32 %v5380_v48, %v1897_v16  ;;  %v1411_v23 = vsel %vm331_vm0, %v5449_v31, %v5448_v3  ;;  %v1212_v16 = vmul.f32 0.2, %v742_v25  ;;  %v2189_v18 = vmul.f32 %v2512_v40, %v5450_v54  ;;  %v4064_v12 = vpop.permute.xlu0 %1333  ;;  %v2514_v6 = vpop.eup %2513  ;;  %v5452_v25 = vld [vmem:[#allocation24_spill] sm:$0xff] }
 0x129   : > { %2519 = vrcp.f32 %v2158_v55  ;;  %v1227_v59 = vmul.f32 0.15, %v1195_v42  ;;  %v1449_v3 = vsub.f32 %v1411_v23, %v3950_v11  ;;  %v1738_v17 = vmul.f32 %v2508_v30, %v3785_v45 }
 0x12a   : > { %v2109_v9 = vmax.f32 %v1915_v36, 0.01  ;;  %v2221_v31 = vmul.f32 0.15, %v2189_v18  ;;  %v1196_v56 = vmul.f32 %v2514_v6, %v3715_v7  ;;  %v1067_v20 = vsub.f32 %v1051_v10, %v5452_v25  ;;  %v2516_v40 = vpop.eup %2515  ;;  %v5453_v7 = vld [vmem:[#allocation63_spill] sm:$0xff] }
 0x12b   : > { %v4075_v55 = vmul.f32 %v2510_v0, %v3824_v34  ;;  %v615_v42 = vsel %vm429_vm1, %v3913_v13, 0.0  ;;  %v4081_v36 = vsel %vm429_vm1, %v3964_v8, 0.0  ;;  %v4083_v11 = vpop.permute.xlu1 %1943  ;;  %v1147_v30 = vmul.f32 %v2516_v40, %v5453_v7 }
 0x12c   : > { %2521 = vrcp.f32 %v2109_v9  ;;  %v4085_v45 = vadd.f32 %v2221_v31, %v2205_v58  ;;  %v1228_v18 = vmul.f32 0.15, %v1196_v56  ;;  %v1083_v23 = vand.u32 2147483647, %v1067_v20  ;;  %v4088_v10 = vpop.permute.xlu0 %1763  ;;  %v5454_v56 = vld [vmem:[#allocation23_spill] sm:$0xff] }
 0x12d   : > { %v1243_v34 = vadd.f32 %v1227_v59, %v1211_v51  ;;  %v696_v9 = vmul.f32 -10.0, %v4068_v21  ;;  %v5226_v0 = vrot.slane %v4081_v36, 1  ;;  %v4094_v13 = vsel %vm429_vm1, %v3968_v47, 0.0 }
 0x12e   : > { %v1244_v8 = vadd.f32 %v1228_v18, %v1212_v16  ;;  %v1259_v54 = vmul.f32 0.15, %v1147_v30  ;;  %v1101_v58 = vmul.f32 %v5399_v43, %v1083_v23  ;;  %v5228_v6 = vrot.slane %v4094_v13, 1 }
 0x12f   : > { %v2206_v31 = vmul.f32 0.2, %v1738_v17  ;;  %v631_v20 = vsub.f32 %v615_v42, %v5454_v56  ;;  %v5455_v51 = vrot.slane %v3977_v24, 1  ;;  %v4106_v25 = vsel %vm429_vm1, %v4002_v44, 0.0  ;;  %v4108_v47 = vpop.permute.xlu1 %830 }
 0x130   : > { %v1275_v16 = vadd.f32 %v1259_v54, %v1243_v34  ;;  %v1165_v40 = vmax.f32 %v1101_v58, 0.01  ;;  %v5456_v17 = vrot.slane %v3937_v2, 1  ;;  %v4116_v7 = vpop.permute.xlu0 %577  ;;  %v1465_v30 = vand.u32 2147483647, %v1449_v3  ;;  %v5457_v54 = vld [vmem:[#allocation26_spill] sm:$0xff] }
 0x131   : > { %v1841_v59 = vsel %vm331_vm0, %v5455_v51, %v5226_v0  ;;  %v5227_v44 = vrot.slane %v4106_v25, 1  ;;  %v1052_v56 = vsel %vm429_vm1, %v4025_v62, 0.0  ;;  %v647_v51 = vand.u32 2147483647, %v631_v20 }
 0x132   : > { %v1882_v18 = vsub.f32 %v1841_v59, %v3977_v24  ;;  %v1589_v42 = vsel %vm331_vm0, %v5456_v17, %v5228_v6  ;;  %v1290_v34 = vadd.f32 %v3985_v33, %v1275_v16  ;;  %2523 = vrcp.f32 %v1165_v40 }
 0x133   : > { %v1627_v23 = vsub.f32 %v1589_v42, %v3937_v2  ;;  %v1068_v58 = vsub.f32 %v1052_v56, %v5457_v54  ;;  %v5458_v17 = vrot.slane %v3962_v26, 1  ;;  %v872_v2 = vsel %vm429_vm1, %v4033_v27, 0.0  ;;  %v4131_v42 = vpop.permute.xlu1 %1335 }
 0x134   : > { %v1898_v24 = vand.u32 2147483647, %v1882_v18  ;;  %v2518_v62 = vpop.eup %2517  ;;  %v5459_v18 = vld [vmem:[#allocation27_spill] sm:$0xff]  ;;  %v717_v54 = vmul.f32 1.442695, %v696_v9 }
 0x135   : > { %v1643_v59 = vand.u32 2147483647, %v1627_v23  ;;  %v2021_v3 = vsel %vm331_vm0, %v5458_v17, %v5227_v44  ;;  %v1084_v40 = vand.u32 2147483647, %v1068_v58  ;;  %v888_v20 = vsub.f32 %v872_v2, %v5459_v18  ;;  %v4136_v23 = vpop.permute.xlu0 %1011 }
 0x136   : > { %v1916_v33 = vmul.f32 %v5380_v48, %v1898_v24  ;;  %v2061_v16 = vsub.f32 %v2021_v3, %v3962_v26  ;;  %v2520_v56 = vpop.eup %2519  ;;  %v1148_v0 = vmul.f32 %v2518_v62, %v3338_v15  ;;  %v4140_v17 = vmul.f32 %v3157_v28, %v1465_v30 }
 0x137   : > { %v4143_v27 = vmul.f32 %v3167_v37, %v1643_v59  ;;  %v1691_v44 = vmul.f32 -10.0, %v3904_v38  ;;  %v2190_v24 = vmul.f32 %v2520_v56, %v3767_v22  ;;  %v4148_v2 = vmul.f32 %v3141_v53, %v647_v51  ;;  %v4155_v30 = vpop.permute.xlu1 %1765 }
 0x138   : > { %5460 = vst [vmem:[#allocation53_spill] sm:$0xff] %v4140_v17  ;;  %v2110_v26 = vmax.f32 %v1916_v33, 0.01  ;;  %v2077_v58 = vand.u32 2147483647, %v2061_v16  ;;  %v1102_v15 = vmul.f32 %v5399_v43, %v1084_v40  ;;  %v4163_v56 = vsel %vm429_vm1, %v4061_v29, 0.0 }
 0x139   : > { %5461 = vst [vmem:[#allocation47_spill] sm:$0xff] %v4143_v27  ;;  %v1260_v3 = vmul.f32 0.15, %v1148_v0  ;;  %v4152_v9 = vadd.f32 %v4143_v27, %v4140_v17  ;;  %v2522_v59 = vpop.eup %2521  ;;  %v2222_v62 = vmul.f32 0.15, %v2190_v24  ;;  %v4158_v33 = vpop.permute.xlu0 %1513  ;;  %v5462_v0 = vld [vmem:[#allocation40_spill] sm:$0xff] }
 0x13a   : > { %2525 = vrcp.f32 %v2110_v26  ;;  %v2095_v18 = vmul.f32 %v5360_v50, %v2077_v58  ;;  %v904_v22 = vand.u32 2147483647, %v888_v20  ;;  %v2141_v51 = vmul.f32 %v2522_v59, %v5462_v0  ;;  %v5464_v27 = vld [vmem:[#allocation73_spill] sm:$0xff] }
 0x13b   : > { %2527 = vpow2.f32 %v717_v54  ;;  %v1276_v16 = vadd.f32 %v1260_v3, %v1244_v8  ;;  %v1213_v40 = vmul.f32 0.2, %v4075_v55  ;;  %v4166_v6 = vadd.f32 %v2222_v62, %v2206_v31  ;;  %v4176_v3 = vpop.permute.xlu1 %579  ;;  %v5466_v62 = vld [vmem:[#allocation25_spill] sm:$0xff] }
 0x13c   : > { %v616_v24 = vsel %vm429_vm1, %v3994_v5, 0.0  ;;  %v2159_v26 = vmax.f32 %v2095_v18, 0.01  ;;  %v2253_v58 = vmul.f32 0.15, %v2141_v51  ;;  %v4174_v54 = vadd.f32 %v4148_v2, %v5464_v27 }
 0x13d   : > { %5463 = vst [vmem:[#allocation15_spill] sm:$0xff] %v4166_v6  ;;  %v4170_v20 = vadd.f32 %v1290_v34, %v1276_v16  ;;  %v1166_v8 = vmax.f32 %v1102_v15, 0.01  ;;  %v922_v29 = vmul.f32 %v3279_v14, %v904_v22  ;;  %v5230_v55 = vrot.slane %v4163_v56, 1  ;;  %v4184_v5 = vpop.permute.xlu0 %1945 }
 0x13e   : > { %2529 = vrcp.f32 %v2159_v26  ;;  %v4182_v31 = vsel %vm429_vm1, %v4064_v12, 0.0  ;;  %v1713_v34 = vmul.f32 1.442695, %v1691_v44  ;;  %v4187_v59 = vadd.f32 %v2253_v58, %v4085_v45 }
 0x13f   : > { %v632_v18 = vsub.f32 %v616_v24, %v5466_v62  ;;  %v1412_v15 = vrot.slane %v4182_v31, 1  ;;  %v1692_v0 = vmul.f32 -10.0, %v4029_v46  ;;  %v1117_v51 = vmax.f32 %v922_v29, 0.01  ;;  %v2524_v44 = vpop.eup %2523  ;;  %v4206_v29 = vpop.permute.xlu1 %1013 }
 0x140   : > { %5465 = vst [vmem:[#allocation16_spill] sm:$0xff] %v4187_v59  ;;  %v5467_v22 = vrot.slane %v4094_v13, 1  ;;  %v4199_v16 = vsel %vm429_vm1, %v4083_v11, 0.0  ;;  %v697_v45 = vmul.f32 -10.0, %v4174_v54  ;;  %2531 = vrcp.f32 %v1166_v8 }
 0x141   : > { %v5468_v26 = vrot.slane %v4023_v52, 1  ;;  %v1197_v62 = vmul.f32 %v2524_v44, %v3803_v60  ;;  %2533 = vrcp.f32 %v1117_v51  ;;  %v5232_v11 = vrot.slane %v4199_v16, 1 }
 0x142   : > { %v1591_v12 = vsel %vm331_vm0, %v5467_v22, %v5230_v55  ;;  %v4211_v55 = vpop.permute.xlu0 %832  ;;  %v648_v59 = vand.u32 2147483647, %v632_v18  ;;  %v873_v8 = vsel %vm429_vm1, %v4108_v47, 0.0  ;;  %v5469_v60 = vrot.slane %v4106_v25, 1 }
 0x143   : > { %v1628_v24 = vsub.f32 %v1591_v12, %v4094_v13  ;;  %v1413_v58 = vsel %vm331_vm0, %v5468_v26, %v1412_v15  ;;  %v4215_v13 = vsel %vm429_vm1, %v4088_v10, 0.0  ;;  %v1229_v12 = vmul.f32 0.15, %v1197_v62  ;;  %v4230_v17 = vpop.permute.xlu1 %1515 }
 0x144   : > { %v1450_v22 = vsub.f32 %v1413_v58, %v4023_v52  ;;  %v2023_v52 = vsel %vm331_vm0, %v5469_v60, %v5232_v11  ;;  %v5233_v51 = vrot.slane %v4215_v13, 1  ;;  %v719_v44 = vmul.f32 1.442695, %v697_v45 }
 0x145   : > { %v1644_v6 = vand.u32 2147483647, %v1628_v24  ;;  %v2062_v10 = vsub.f32 %v2023_v52, %v4106_v25  ;;  %v5471_v24 = vld [vmem:[#allocation29_spill] sm:$0xff]  ;;  %v4232_v47 = vadd.f32 %v1229_v12, %v1213_v40  ;;  %v4249_v60 = vmul.f32 %v3141_v53, %v648_v59 }
 0x146   : > { %v1466_v26 = vand.u32 2147483647, %v1450_v22  ;;  %v889_v58 = vsub.f32 %v873_v8, %v5471_v24  ;;  %v5473_v22 = vrot.slane %v4081_v36, 1  ;;  %v4246_v25 = vpop.permute.xlu0 %1337  ;;  %v1053_v11 = vsel %vm429_vm1, %v4136_v23, 0.0 }
 0x147   : > { %v4226_v18 = vmul.f32 %v3167_v37, %v1644_v6  ;;  %v4244_v6 = vsel %vm429_vm1, %v4131_v42, 0.0  ;;  %v2526_v8 = vpop.eup %2525  ;;  %v2078_v40 = vand.u32 2147483647, %v2062_v10  ;;  %2535 = vpow2.f32 %v1713_v34 }
 0x148   : > { %v4235_v62 = vmul.f32 %v3157_v28, %v1466_v26  ;;  %v1843_v45 = vsel %vm331_vm0, %v5473_v22, %v5233_v51  ;;  %v905_v26 = vand.u32 2147483647, %v889_v58  ;;  %v2528_v52 = vpop.eup %2527  ;;  %v4253_v24 = vmul.f32 %v2526_v8, %v3764_v41  ;;  %v5474_v51 = vld [vmem:[#allocation44_spill] sm:$0xff]  ;;  %v4268_v41 = vpop.permute.xlu1 %1947 }
 0x149   : > { %5470 = vst [vmem:[#allocation17_spill] sm:$0xff] %v4226_v18  ;;  %v1883_v12 = vsub.f32 %v1843_v45, %v4081_v36  ;;  %v5237_v42 = vrot.slane %v4244_v6, 1  ;;  %v4264_v59 = vsel %vm429_vm1, %v5474_v51, 0.0  ;;  %v2096_v36 = vmul.f32 %v5360_v50, %v2078_v40 }
 0x14a   : > { %5472 = vst [vmem:[#allocation18_spill] sm:$0xff] %v4235_v62  ;;  %v4257_v22 = vadd.f32 %v4226_v18, %v4235_v62  ;;  %v923_v58 = vmul.f32 %v3279_v14, %v905_v26  ;;  %v1715_v45 = vmul.f32 1.442695, %v1692_v0  ;;  %v5475_v62 = vld [vmem:[#allocation31_spill] sm:$0xff]  ;;  %v4274_v23 = vpop.permute.xlu0 %1767  ;;  %v744_v51 = vmul.f32 %v2528_v52, %v4068_v21  ;;  %v5477_v52 = vld [vmem:[#allocation28_spill] sm:$0xff] }
 0x14b   : > { %v1899_v10 = vand.u32 2147483647, %v1883_v12  ;;  %v1415_v8 = vsel %vm331_vm0, %v1412_v15, %v5237_v42  ;;  %v1069_v18 = vsub.f32 %v1053_v11, %v5475_v62  ;;  %v2530_v63 = vpop.eup %2529  ;;  %2537 = vpow2.f32 %v719_v44  ;;  %v5476_v26 = vld [vmem:[#allocation71_spill] sm:$0xff] }
 0x14c   : > { %v2160_v40 = vmax.f32 %v2096_v36, 0.01  ;;  %v4280_v27 = vadd.f32 %v4249_v60, %v5476_v26  ;;  %v4283_v34 = vmul.f32 %v2530_v63, %v3890_v35  ;;  %v1118_v0 = vmax.f32 %v923_v58, 0.01  ;;  %v4287_v21 = vpop.permute.xlu1 %834  ;;  %v5480_v35 = vld [vmem:[#allocation9_spill] sm:$0xff] }
 0x14d   : > { %v1917_v12 = vmul.f32 %v5380_v48, %v1899_v10  ;;  %v1451_v15 = vsub.f32 %v1415_v8, %v4182_v31  ;;  %v1693_v11 = vmul.f32 -10.0, %v4152_v9  ;;  %v1085_v42 = vand.u32 2147483647, %v1069_v18  ;;  %v2532_v44 = vpop.eup %2531  ;;  %v5481_v18 = vld [vmem:[#allocation50_spill] sm:$0xff] }
 0x14e   : > { %2539 = vrcp.f32 %v2160_v40  ;;  %v4291_v36 = vmul.f32 %v5477_v52, %v4046_v49  ;;  %v5479_v10 = vsub.f32 %v5447_v1, %v5446_v32  ;;  %v461_v31 = vsub.f32 %v4264_v59, %v5480_v35  ;;  %v4300_v58 = vpop.permute.xlu0 %581  ;;  %v2534_v8 = vpop.eup %2533 }
 0x14f   : > { %v2111_v62 = vmax.f32 %v1917_v12, 0.01  ;;  %2541 = vpow2.f32 %v1715_v45  ;;  %v4304_v40 = vsel %vm429_vm1, %v5481_v18, 0.0  ;;  %v1198_v12 = vmul.f32 %v2532_v44, %v4039_v19 }
 0x150   : > { %5478 = vst [vmem:[#allocation75_spill] sm:$0xff] %v4291_v36  ;;  %v4296_v63 = vand.u32 2147483647, %v5479_v10  ;;  %v617_v49 = vsel %vm429_vm1, %v4116_v7, 0.0  ;;  %v1214_v1 = vmul.f32 0.2, %v744_v51  ;;  %v1149_v10 = vmul.f32 %v2534_v8, %v3365_v39  ;;  %v4316_v26 = vpop.permute.xlu1 %1339 }
 0x151   : > { %2543 = vrcp.f32 %v2111_v62  ;;  %v698_v32 = vmul.f32 -10.0, %v4280_v27  ;;  %v1717_v59 = vmul.f32 1.442695, %v1693_v11  ;;  %v1230_v45 = vmul.f32 0.15, %v1198_v12  ;;  %v5482_v62 = vld [vmem:[#allocation30_spill] sm:$0xff] }
 0x152   : > { %2545 = vrcp.f32 %v1118_v0  ;;  %v1103_v35 = vmul.f32 %v5399_v43, %v1085_v42  ;;  %v4314_v18 = vsel %vm429_vm1, %v4155_v30, 0.0  ;;  %v1261_v19 = vmul.f32 0.15, %v1149_v10  ;;  %v4324_v39 = vpop.permute.xlu0 %1015 }
 0x153   : > { %v633_v44 = vsub.f32 %v617_v49, %v5482_v62  ;;  %v5238_v7 = vrot.slane %v4314_v18, 1  ;;  %v4322_v51 = vsel %vm429_vm1, %v4158_v33, 0.0  ;;  %v4326_v0 = vadd.f32 %v1230_v45, %v1214_v1  ;;  %v5486_v62 = vld [vmem:[#allocation35_spill] sm:$0xff] }
 0x154   : > { %v1467_v42 = vand.u32 2147483647, %v1451_v15  ;;  %v1167_v11 = vmax.f32 %v1103_v35, 0.01  ;;  %v5239_v30 = vrot.slane %v4322_v51, 1  ;;  %v1277_v8 = vadd.f32 %v1261_v19, %v4232_v47  ;;  %v4352_v35 = vpop.permute.xlu1 %1769 }
 0x155   : > { %v5483_v12 = vrot.slane %v4215_v13, 1  ;;  %v4339_v33 = vsel %vm429_vm1, %v4184_v5, 0.0  ;;  %v1054_v1 = vsel %vm429_vm1, %v4206_v29, 0.0  ;;  %v5484_v47 = vrot.slane %v4163_v56, 1  ;;  %5485 = vst [vmem:[#allocation79_spill] sm:$0xff] %v4352_v35 }
 0x156   : > { %2547 = vrcp.f32 %v1167_v11  ;;  %v618_v45 = vsel %vm429_vm1, %v4176_v3, 0.0  ;;  %v4355_v5 = vadd.f32 %v4170_v20, %v1277_v8  ;;  %v5241_v19 = vrot.slane %v4339_v33, 1 }
 0x157   : > { %v4335_v49 = vsel %vm331_vm0, %v5483_v12, %v5238_v7  ;;  %v1593_v10 = vsel %vm331_vm0, %v5484_v47, %v5239_v30  ;;  %v1070_v11 = vsub.f32 %v1054_v1, %v5486_v62  ;;  %v4360_v12 = vpop.permute.xlu0 %1517  ;;  %v2536_v7 = vpop.eup %2535  ;;  %2549 = vpow2.f32 %v1717_v59  ;;  %v5489_v1 = vld [vmem:[#allocation36_spill] sm:$0xff]  ;;  %v5490_v62 = vld [vmem:[#allocation10_spill] sm:$0xff] }
 0x158   : > { %v1629_v29 = vsub.f32 %v1593_v10, %v4163_v56  ;;  %5487 = vst [vmem:[#allocation67_spill] sm:$0xff] %v4360_v12  ;;  %v721_v15 = vmul.f32 1.442695, %v698_v32  ;;  %v649_v47 = vand.u32 2147483647, %v633_v44  ;;  %v874_v3 = vsel %vm429_vm1, %v4211_v55, 0.0  ;;  %v2538_v30 = vpop.eup %2537  ;;  %v4380_v12 = vpop.permute.xlu1 %583 }
 0x159   : > { %v5488_v20 = vrot.slane %v4199_v16, 1  ;;  %v1086_v8 = vand.u32 2147483647, %v1070_v11  ;;  %v890_v10 = vsub.f32 %v874_v3, %v5489_v1  ;;  %v460_v59 = vsub.f32 %v4304_v40, %v5490_v62  ;;  %v5492_v44 = vld [vmem:[#allocation33_spill] sm:$0xff] }
 0x15a   : > { %v1645_v36 = vand.u32 2147483647, %v1629_v29  ;;  %v4375_v32 = vmul.f32 %v3157_v28, %v1467_v42  ;;  %v634_v55 = vsub.f32 %v618_v45, %v5492_v44  ;;  %v4388_v40 = vsel %vm429_vm1, %v4230_v17, 0.0 }
 0x15b   : > { %v4369_v56 = vsel %vm331_vm0, %v5488_v20, %v5241_v19  ;;  %v2540_v35 = vpop.eup %2539  ;;  %v1104_v11 = vmul.f32 %v5399_v43, %v1086_v8  ;;  %v906_v3 = vand.u32 2147483647, %v890_v10  ;;  %v4390_v42 = vpop.permute.xlu0 %1949  ;;  %v477_v45 = vand.u32 2147483647, %v461_v31 }
 0x15c   : > { %5491 = vst [vmem:[#allocation66_spill] sm:$0xff] %v4375_v32  ;;  %v4383_v20 = vmul.f32 %v3167_v37, %v1645_v36  ;;  %v2542_v1 = vpop.eup %2541  ;;  %v745_v62 = vmul.f32 %v2538_v30, %v4174_v54  ;;  %2551 = vpow2.f32 %v721_v15  ;;  %v4394_v44 = vmul.f32 %v2540_v35, %v3999_v61 }
 0x15d   : > { %v4397_v36 = vmul.f32 %v3141_v53, %v649_v47  ;;  %v1168_v17 = vmax.f32 %v1104_v11, 0.01  ;;  %v924_v10 = vmul.f32 %v3279_v14, %v906_v3  ;;  %v4406_v31 = vmul.f32 %v5477_v52, %v4296_v63  ;;  %v4420_v3 = vpop.permute.xlu1 %1017 }
 0x15e   : > { %5493 = vst [vmem:[#allocation20_spill] sm:$0xff] %v4383_v20  ;;  %v2544_v29 = vpop.eup %2543  ;;  %v4401_v8 = vadd.f32 %v4383_v20, %v4375_v32  ;;  %v650_v61 = vand.u32 2147483647, %v634_v55  ;;  %v4412_v15 = vand.u32 2147483647, %v460_v59  ;;  %v1694_v35 = vmul.f32 -10.0, %v4257_v22 }
 0x15f   : > { %v2546_v19 = vpop.eup %2545  ;;  %5494 = vst [vmem:[#allocation21_spill] sm:$0xff] %v4406_v31  ;;  %v4409_v54 = vmul.f32 %v2544_v29, %v3880_v4  ;;  %v4418_v11 = vsel %vm429_vm1, %v4246_v25, 0.0  ;;  %v4422_v63 = vpop.permute.xlu0 %836  ;;  %v4425_v4 = vmul.f32 %v5477_v52, %v477_v45  ;;  %v1739_v55 = vmul.f32 %v2536_v7, %v3904_v38  ;;  %v5496_v20 = vld [vmem:[#allocation77_spill] sm:$0xff] }
 0x160   : > { %v1150_v47 = vmul.f32 %v2546_v19, %v5451_v57  ;;  %v1740_v59 = vmul.f32 %v2542_v1, %v4029_v46  ;;  %v1119_v29 = vmax.f32 %v924_v10, 0.01  ;;  %v1215_v30 = vmul.f32 0.2, %v745_v62 }
 0x161   : > { %5495 = vst [vmem:[#allocation70_spill] sm:$0xff] %v4425_v4  ;;  %v4431_v57 = vadd.f32 %v4397_v36, %v5496_v20  ;;  %2553 = vrcp.f32 %v1168_v17  ;;  %v4434_v25 = vmul.f32 %v3141_v53, %v650_v61  ;;  %v5497_v19 = vrot.slane %v4388_v40, 1 }
 0x162   : > { %v1262_v32 = vmul.f32 0.15, %v1150_v47  ;;  %2555 = vrcp.f32 %v1119_v29  ;;  %v5498_v45 = vrot.slane %v4322_v51, 1  ;;  %v5244_v46 = vrot.slane %v4418_v11, 1 }
 0x163   : > { %v2548_v7 = vpop.eup %2547  ;;  %v1719_v1 = vmul.f32 1.442695, %v1694_v35  ;;  %v4446_v17 = vsel %vm429_vm1, %v4268_v41, 0.0  ;;  %v5499_v47 = vsub.f32 %v4335_v49, %v4215_v13  ;;  %v4466_v13 = vpop.permute.xlu1 %1519  ;;  %v4489_v20 = vmul.f32 0.2, %v1740_v59 }
 0x164   : > { %v1595_v38 = vsel %vm331_vm0, %v5498_v45, %v5497_v19  ;;  %v1278_v62 = vadd.f32 %v1262_v32, %v4326_v0  ;;  %v1199_v61 = vmul.f32 %v2548_v7, %v4148_v2  ;;  %v5500_v19 = vrot.slane %v4244_v6, 1  ;;  %v2550_v32 = vpop.eup %2549  ;;  %v4468_v49 = vpop.permute.xlu0 %1341 }
 0x165   : > { %v1630_v10 = vsub.f32 %v1595_v38, %v4322_v51  ;;  %v1900_v29 = vand.u32 2147483647, %v5499_v47  ;;  %v5245_v0 = vrot.slane %v4446_v17, 1  ;;  %v4464_v2 = vsel %vm429_vm1, %v4274_v23, 0.0  ;;  %v5502_v47 = vld [vmem:[#allocation76_spill] sm:$0xff]  ;;  %5506 = vst [vmem:[#allocation19_spill] sm:$0xff] %v4489_v20 }
 0x166   : > { %v1417_v35 = vsel %vm331_vm0, %v5500_v19, %v5244_v46  ;;  %v4459_v51 = vadd.f32 %v4355_v5, %v1278_v62  ;;  %v699_v38 = vmul.f32 -10.0, %v4431_v57  ;;  %v1231_v7 = vmul.f32 0.15, %v1199_v61 }
 0x167   : > { %v1646_v41 = vand.u32 2147483647, %v1630_v10  ;;  %v1452_v45 = vsub.f32 %v1417_v35, %v4244_v6  ;;  %v4473_v19 = vadd.f32 %v4434_v25, %v5502_v47  ;;  %v5503_v5 = vrot.slane %v4339_v33, 1 }
 0x168   : > { %5501 = vst [vmem:[#allocation46_spill] sm:$0xff] %v4459_v51  ;;  %2557 = vpow2.f32 %v1719_v1  ;;  %v5246_v10 = vrot.slane %v4464_v2, 1  ;;  %v4484_v35 = vmul.f32 0.2, %v1739_v55  ;;  %v1247_v61 = vadd.f32 %v1231_v7, %v1215_v30 }
 0x169   : > { %v2027_v6 = vsel %vm331_vm0, %v5503_v5, %v5245_v0  ;;  %v4481_v23 = vmul.f32 %v3167_v37, %v1646_v41  ;;  %v1468_v62 = vand.u32 2147483647, %v1452_v45  ;;  %v1918_v46 = vmul.f32 %v5380_v48, %v1900_v29  ;;  %v2552_v47 = vpop.eup %2551 }
 0x16a   : > { %5505 = vst [vmem:[#allocation64_spill] sm:$0xff] %v4484_v35  ;;  %v875_v51 = vsel %vm429_vm1, %v4287_v21, 0.0  ;;  %v1741_v5 = vmul.f32 %v2550_v32, %v4152_v9  ;;  %v2064_v41 = vsub.f32 %v2027_v6, %v4339_v33  ;;  %v723_v45 = vmul.f32 1.442695, %v699_v38  ;;  %v5510_v33 = vld [vmem:[#allocation37_spill] sm:$0xff]  ;;  %v4513_v6 = vpop.permute.xlu1 %1951 }
 0x16b   : > { %5504 = vst [vmem:[#allocation11_spill] sm:$0xff] %v4481_v23  ;;  %v4493_v1 = vmul.f32 %v3157_v28, %v1468_v62  ;;  %v1695_v55 = vmul.f32 -10.0, %v4401_v8  ;;  %v700_v30 = vmul.f32 -10.0, %v4473_v19  ;;  %v5508_v29 = vsub.f32 %v4369_v56, %v4199_v16  ;;  %v4515_v62 = vpop.permute.xlu0 %1771 }
 0x16c   : > { %v5509_v9 = vrot.slane %v4314_v18, 1  ;;  %v891_v32 = vsub.f32 %v875_v51, %v5510_v33  ;;  %v619_v38 = vsel %vm429_vm1, %v4300_v58, 0.0  ;;  %v4518_v16 = vmul.f32 0.15, %v4253_v24 }
 0x16d   : > { %5507 = vst [vmem:[#allocation22_spill] sm:$0xff] %v4493_v1  ;;  %v2079_v7 = vand.u32 2147483647, %v5508_v29  ;;  %v4503_v21 = vadd.f32 %v4481_v23, %v4493_v1  ;;  %v746_v56 = vmul.f32 %v2552_v47, %v4280_v27  ;;  %v4522_v29 = vmul.f32 0.15, %v4283_v34  ;;  %v5515_v47 = vld [vmem:[#allocation39_spill] sm:$0xff] }
 0x16e   : > { %v1847_v59 = vsel %vm331_vm0, %v5509_v9, %v5246_v10  ;;  %5511 = vst [vmem:[#allocation5_spill] sm:$0xff] %v4518_v16  ;;  %v2112_v0 = vmax.f32 %v1918_v46, 0.01  ;;  %v4526_v9 = vmul.f32 %v5477_v52, %v4412_v15  ;;  %v4528_v51 = vmul.f32 0.2, %v1741_v5  ;;  %v2554_v10 = vpop.eup %2553 }
 0x16f   : > { %5512 = vst [vmem:[#allocation41_spill] sm:$0xff] %v4522_v29  ;;  %v2080_v58 = vand.u32 2147483647, %v2064_v41  ;;  %v4532_v33 = vsel %vm429_vm1, %v4316_v26, 0.0  ;;  %2559 = vpow2.f32 %v723_v45  ;;  %v725_v24 = vmul.f32 1.442695, %v700_v30  ;;  %v2556_v16 = vpop.eup %2555 }
 0x170   : > { %5513 = vst [vmem:[#allocation7_spill] sm:$0xff] %v4526_v9  ;;  %5514 = vst [vmem:[#allocation8_spill] sm:$0xff] %v4528_v51  ;;  %v1885_v27 = vsub.f32 %v1847_v59, %v4314_v18  ;;  %v635_v34 = vsub.f32 %v619_v38, %v5515_v47  ;;  %v1721_v46 = vmul.f32 1.442695, %v1695_v55  ;;  %v2097_v1 = vmul.f32 %v5360_v50, %v2079_v7  ;;  %v5516_v41 = vld [vmem:[#allocation73_spill] sm:$0xff]  ;;  %v5517_v30 = vld [vmem:[#allocation79_spill] sm:$0xff]  ;;  %v4547_v7 = vpop.permute.xlu1 %838 }
 0x171   : > { %v1200_v52 = vmul.f32 %v2554_v10, %v4249_v60  ;;  %v907_v15 = vand.u32 2147483647, %v891_v32  ;;  %v1216_v5 = vmul.f32 0.2, %v746_v56  ;;  %2561 = vrcp.f32 %v2112_v0  ;;  %v4549_v60 = vpop.permute.xlu0 %585 }
 0x172   : > { %v1151_v51 = vmul.f32 %v2556_v16, %v5516_v41  ;;  %v5249_v26 = vrot.slane %v4532_v33, 1  ;;  %v2098_v45 = vmul.f32 %v5360_v50, %v2080_v58  ;;  %v1055_v18 = vsel %vm429_vm1, %v4324_v39, 0.0 }
 0x173   : > { %v1232_v20 = vmul.f32 0.15, %v1200_v52  ;;  %v4545_v55 = vsel %vm429_vm1, %v5517_v30, 0.0  ;;  %2563 = vpow2.f32 %v725_v24  ;;  %v1901_v10 = vand.u32 2147483647, %v1885_v27  ;;  %v5520_v52 = vld [vmem:[#allocation42_spill] sm:$0xff] }
 0x174   : > { %v1263_v0 = vmul.f32 0.15, %v1151_v51  ;;  %v651_v59 = vand.u32 2147483647, %v635_v34  ;;  %2565 = vpow2.f32 %v1721_v46  ;;  %v2161_v32 = vmax.f32 %v2097_v1, 0.01 }
 0x175   : > { %v4551_v38 = vadd.f32 %v1232_v20, %v1216_v5  ;;  %v925_v16 = vmul.f32 %v3279_v14, %v907_v15  ;;  %v2558_v56 = vpop.eup %2557  ;;  %v5519_v58 = vrot.slane %v4418_v11, 1  ;;  %v1071_v24 = vsub.f32 %v1055_v18, %v5520_v52  ;;  %v5521_v20 = vld [vmem:[#allocation67_spill] sm:$0xff]  ;;  %v4580_v52 = vpop.permute.xlu0 %1019 }
 0x176   : > { %v4554_v39 = vadd.f32 %v1263_v0, %v1247_v61  ;;  %v5248_v51 = vrot.slane %v4545_v55, 1  ;;  %v1696_v27 = vmul.f32 -10.0, %v4503_v21  ;;  %v2162_v1 = vmax.f32 %v2098_v45, 0.01  ;;  %v5523_v30 = vld [vmem:[#allocation43_spill] sm:$0xff] }
 0x177   : > { %v1419_v47 = vsel %vm331_vm0, %v5519_v58, %v5249_v26  ;;  %v1552_v34 = vsel %vm429_vm1, %v5521_v20, 0.0  ;;  %v620_v61 = vsel %vm429_vm1, %v4380_v12, 0.0  ;;  %v1919_v46 = vmul.f32 %v5380_v48, %v1901_v10  ;;  %v4578_v58 = vpop.permute.xlu1 %1343 }
 0x178   : > { %5518 = vst [vmem:[#allocation12_spill] sm:$0xff] %v4554_v39  ;;  %v4570_v15 = vmul.f32 %v3141_v53, %v651_v59  ;;  %v1596_v5 = vrot.slane %v1552_v34, 1  ;;  %v4574_v41 = vsel %vm429_vm1, %v4390_v42, 0.0  ;;  %v1742_v18 = vmul.f32 %v2558_v56, %v4257_v22 }
 0x179   : > { %2567 = vrcp.f32 %v2161_v32  ;;  %v1120_v45 = vmax.f32 %v925_v16, 0.01  ;;  %v636_v0 = vsub.f32 %v620_v61, %v5523_v30  ;;  %v1453_v12 = vsub.f32 %v1419_v47, %v4418_v11  ;;  %v5526_v61 = vld [vmem:[#allocation13_spill] sm:$0xff] }
 0x17a   : > { %5522 = vst [vmem:[#allocation38_spill] sm:$0xff] %v4570_v15  ;;  %v1087_v10 = vand.u32 2147483647, %v1071_v24  ;;  %v5524_v59 = vrot.slane %v4464_v2, 1  ;;  %v5525_v20 = vrot.slane %v4388_v40, 1  ;;  %v2028_v16 = vrot.slane %v4574_v41, 1 }
 0x17b   : > { %v1056_v56 = vsel %vm429_vm1, %v4420_v3, 0.0  ;;  %v4597_v11 = vsel %vm429_vm1, %v4466_v13, 0.0  ;;  %v1723_v47 = vmul.f32 1.442695, %v1696_v27  ;;  %2569 = vrcp.f32 %v2162_v1  ;;  %v5527_v1 = vld [vmem:[#allocation48_spill] sm:$0xff] }
 0x17c   : > { %v1849_v42 = vsel %vm331_vm0, %v5524_v59, %v5248_v51  ;;  %v1597_v22 = vsel %vm331_vm0, %v5525_v20, %v1596_v5  ;;  %v2113_v24 = vmax.f32 %v1919_v46, 0.01  ;;  %v4601_v30 = vadd.f32 %v4570_v15, %v5526_v61  ;;  %v4603_v59 = vpop.eup %2559  ;;  %v4623_v61 = vpop.permute.xlu1 %1773 }
 0x17d   : > { %v1631_v32 = vsub.f32 %v1597_v22, %v4388_v40  ;;  %v652_v20 = vand.u32 2147483647, %v636_v0  ;;  %v876_v40 = vsel %vm429_vm1, %v4422_v63, 0.0  ;;  %v5250_v22 = vrot.slane %v4597_v11, 1 }
 0x17e   : > { %v4610_v3 = vsel %vm429_vm1, %v4468_v49, 0.0  ;;  %2571 = vrcp.f32 %v1120_v45  ;;  %v1469_v13 = vand.u32 2147483647, %v1453_v12  ;;  %v1886_v27 = vsub.f32 %v1849_v42, %v4464_v2  ;;  %v4614_v51 = vpop.eup %2561  ;;  %v4625_v45 = vpop.permute.xlu0 %1521  ;;  %v5531_v42 = vld [vmem:[#allocation49_spill] sm:$0xff] }
 0x17f   : > { %v1072_v46 = vsub.f32 %v1056_v56, %v5527_v1  ;;  %v1647_v26 = vand.u32 2147483647, %v1631_v32  ;;  %v5528_v0 = vrot.slane %v4446_v17, 1  ;;  %v1599_v63 = vsel %vm331_vm0, %v1596_v5, %v5250_v22 }
 0x180   : > { %v4627_v2 = vmul.f32 0.2, %v1742_v18  ;;  %v4630_v12 = vmul.f32 0.15, %v4394_v44  ;;  %2573 = vpow2.f32 %v1723_v47  ;;  %v892_v32 = vsub.f32 %v876_v40, %v5531_v42  ;;  %v2564_v56 = vpop.eup %2563 }
 0x181   : > { %v2029_v39 = vsel %vm331_vm0, %v5528_v0, %v2028_v16  ;;  %v701_v1 = vmul.f32 -10.0, %v4601_v30  ;;  %v1105_v0 = vmul.f32 %v5399_v43, %v1087_v10  ;;  %v4636_v5 = vmul.f32 %v3141_v53, %v652_v20  ;;  %v2566_v49 = vpop.eup %2565 }
 0x182   : > { %5529 = vst [vmem:[#allocation68_spill] sm:$0xff] %v4627_v2  ;;  %5530 = vst [vmem:[#allocation24_spill] sm:$0xff] %v4630_v12  ;;  %v1632_v22 = vsub.f32 %v1599_v63, %v1552_v34  ;;  %v4639_v15 = vmul.f32 0.15, %v4409_v54  ;;  %2575 = vrcp.f32 %v2113_v24  ;;  %v1902_v18 = vand.u32 2147483647, %v1886_v27  ;;  %v4665_v2 = vpop.permute.xlu0 %1953 }
 0x183   : > { %5532 = vst [vmem:[#allocation63_spill] sm:$0xff] %v4636_v5  ;;  %v2065_v44 = vsub.f32 %v2029_v39, %v4446_v17  ;;  %v4643_v47 = vmul.f32 %v3157_v28, %v1469_v13  ;;  %v4646_v40 = vmul.f32 %v3167_v37, %v1647_v26  ;;  %v1088_v42 = vand.u32 2147483647, %v1072_v46  ;;  %v5538_v27 = vld [vmem:[#allocation32_spill] sm:$0xff] }
 0x184   : > { %5533 = vst [vmem:[#allocation23_spill] sm:$0xff] %v4639_v15  ;;  %v5536_v10 = vrot.slane %v4610_v3, 1  ;;  %v5537_v20 = vrot.slane %v4532_v33, 1  ;;  %v908_v63 = vand.u32 2147483647, %v892_v32  ;;  %v4656_v17 = vsel %vm429_vm1, %v4513_v6, 0.0  ;;  %v4663_v15 = vpop.permute.xlu1 %587 }
 0x185   : > { %5534 = vst [vmem:[#allocation26_spill] sm:$0xff] %v4643_v47  ;;  %5535 = vst [vmem:[#allocation27_spill] sm:$0xff] %v4646_v40  ;;  %v1648_v54 = vand.u32 2147483647, %v1632_v22  ;;  %v727_v39 = vmul.f32 1.442695, %v701_v1  ;;  %v4660_v26 = vadd.f32 %v4636_v5, %v5538_v27  ;;  %v4676_v1 = vadd.f32 %v4646_v40, %v4643_v47 }
 0x186   : > { %v1421_v34 = vsel %vm331_vm0, %v5537_v20, %v5536_v10  ;;  %v1169_v13 = vmax.f32 %v1105_v0, 0.01  ;;  %v5252_v46 = vrot.slane %v4656_v17, 1  ;;  %v4667_v32 = vpop.eup %2567  ;;  %v2081_v22 = vand.u32 2147483647, %v2065_v44  ;;  %v5542_v47 = vld [vmem:[#allocation54_spill] sm:$0xff]  ;;  %v4713_v12 = vpop.permute.xlu0 %840 }
 0x187   : > { %v1454_v24 = vsub.f32 %v1421_v34, %v4532_v33  ;;  %v1920_v33 = vmul.f32 %v5380_v48, %v1902_v18  ;;  %v4672_v6 = vsel %vm429_vm1, %v4515_v62, 0.0  ;;  %v1106_v0 = vmul.f32 %v5399_v43, %v1088_v42 }
 0x188   : > { %v2031_v20 = vsel %vm331_vm0, %v2028_v16, %v5252_v46  ;;  %v5256_v34 = vrot.slane %v4672_v6, 1  ;;  %v926_v18 = vmul.f32 %v3279_v14, %v908_v63  ;;  %v4685_v44 = vmul.f32 %v3167_v37, %v1648_v54  ;;  %v4692_v27 = vpop.eup %2569 }
 0x189   : > { %v1470_v10 = vand.u32 2147483647, %v1454_v24  ;;  %v877_v24 = vsel %vm429_vm1, %v4547_v7, 0.0  ;;  %2577 = vpow2.f32 %v727_v39  ;;  %v702_v42 = vmul.f32 -10.0, %v4660_v26 }
 0x18a   : > { %5539 = vst [vmem:[#allocation40_spill] sm:$0xff] %v4685_v44  ;;  %v2066_v16 = vsub.f32 %v2031_v20, %v4574_v41  ;;  %v621_v46 = vsel %vm429_vm1, %v4549_v60, 0.0  ;;  %v2114_v63 = vmax.f32 %v1920_v33, 0.01  ;;  %v2099_v54 = vmul.f32 %v5360_v50, %v2081_v22  ;;  %v5543_v33 = vld [vmem:[#allocation55_spill] sm:$0xff]  ;;  %v1022_v22 = vpop.permute.xlu1 %1021 }
 0x18b   : > { %v4688_v62 = vmul.f32 %v3157_v28, %v1470_v10  ;;  %v5541_v10 = vrot.slane %v4545_v55, 1  ;;  %v4706_v7 = vsel %vm429_vm1, %v4578_v58, 0.0  ;;  %v4708_v39 = vpop.eup %2571  ;;  %v1697_v41 = vmul.f32 -10.0, %v4676_v1 }
 0x18c   : > { %v1170_v20 = vmax.f32 %v1106_v0, 0.01  ;;  %v893_v60 = vsub.f32 %v877_v24, %v5542_v47  ;;  %v637_v40 = vsub.f32 %v621_v46, %v5543_v33  ;;  %v747_v29 = vmul.f32 %v4603_v59, %v4431_v57 }
 0x18d   : > { %5540 = vst [vmem:[#allocation25_spill] sm:$0xff] %v4688_v62  ;;  %v1851_v5 = vsel %vm331_vm0, %v5541_v10, %v5256_v34  ;;  %2579 = vrcp.f32 %v1169_v13  ;;  %v1121_v10 = vmax.f32 %v926_v18, 0.01  ;;  %v4719_v58 = vadd.f32 %v4685_v44, %v4688_v62  ;;  %v4721_v34 = vpop.eup %2573 }
 0x18e   : > { %v729_v35 = vmul.f32 1.442695, %v702_v42  ;;  %v2082_v0 = vand.u32 2147483647, %v2066_v16  ;;  %v1887_v47 = vsub.f32 %v1851_v5, %v4545_v55  ;;  %v1422_v46 = vrot.slane %v4706_v7, 1 }
 0x18f   : > { %5544 = vst [vmem:[#allocation29_spill] sm:$0xff] %v4719_v58  ;;  %v748_v24 = vmul.f32 %v2564_v56, %v4473_v19  ;;  %2581 = vrcp.f32 %v2114_v63  ;;  %v2163_v33 = vmax.f32 %v2099_v54, 0.01  ;;  %v653_v23 = vand.u32 2147483647, %v637_v40  ;;  %v4726_v57 = vpop.eup %2575  ;;  %v4740_v40 = vpop.permute.xlu0 %1775  ;;  %v5549_v54 = vld [vmem:[#allocation56_spill] sm:$0xff] }
 0x190   : > { %v1743_v59 = vmul.f32 %v2566_v49, %v4401_v8  ;;  %v1725_v13 = vmul.f32 1.442695, %v1697_v41  ;;  %2583 = vrcp.f32 %v1170_v20  ;;  %v909_v18 = vand.u32 2147483647, %v893_v60  ;;  %v1956_v49 = vpop.permute.xlu1 %1955 }
 0x191   : > { %v4729_v62 = vmul.f32 0.2, %v747_v29  ;;  %2585 = vrcp.f32 %v1121_v10  ;;  %v1698_v42 = vmul.f32 -10.0, %v4719_v58  ;;  %v1057_v55 = vsel %vm429_vm1, %v4580_v52, 0.0 }
 0x192   : > { %2587 = vpow2.f32 %v729_v35  ;;  %v4735_v19 = vmul.f32 %v5360_v50, %v2082_v0  ;;  %v1903_v56 = vand.u32 2147483647, %v1887_v47  ;;  %v5545_v5 = vrot.slane %v4610_v3, 1 }
 0x193   : > { %v4742_v29 = vmul.f32 0.2, %v748_v24  ;;  %2589 = vrcp.f32 %v2163_v33  ;;  %v4745_v16 = vmul.f32 %v3141_v53, %v653_v23  ;;  %v1440_v52 = vsel %vm331_vm0, %v1422_v46, 0.0 }
 0x194   : > { %v1423_v8 = vsel %vm331_vm0, %v5545_v5, %v1422_v46  ;;  %v4748_v35 = vmul.f32 0.2, %v1743_v59  ;;  %2591 = vpow2.f32 %v1725_v13  ;;  %v4751_v63 = vmul.f32 %v3279_v14, %v909_v18  ;;  %v4786_v5 = vpop.permute.xlu0 %589 }
 0x195   : > { %5546 = vst [vmem:[#allocation44_spill] sm:$0xff] %v4742_v29  ;;  %5547 = vst [vmem:[#allocation31_spill] sm:$0xff] %v4745_v16  ;;  %v1073_v41 = vsub.f32 %v1057_v55, %v5549_v54  ;;  %v1727_v20 = vmul.f32 1.442695, %v1698_v42  ;;  %v1455_v60 = vsub.f32 %v1423_v8, %v4610_v3  ;;  %v4757_v10 = vsel %vm429_vm1, %v4623_v61, 0.0  ;;  %v5552_v42 = vld [vmem:[#allocation57_spill] sm:$0xff] }
 0x196   : > { %5548 = vst [vmem:[#allocation28_spill] sm:$0xff] %v4748_v35  ;;  %v1554_v23 = vsel %vm429_vm1, %v4625_v45, 0.0  ;;  %v2164_v0 = vmax.f32 %v4735_v19, 0.01  ;;  %v1921_v47 = vmul.f32 %v5380_v48, %v1903_v56  ;;  %v1456_v46 = vsub.f32 %v1440_v52, %v4706_v7  ;;  %v4765_v33 = vpop.eup %2577  ;;  %v4784_v56 = vpop.permute.xlu1 %842 }
 0x197   : > { %v5259_v24 = vrot.slane %v4757_v10, 1  ;;  %v4769_v3 = vadd.f32 %v4745_v16, %v4406_v31  ;;  %v1600_v59 = vrot.slane %v1554_v23, 1  ;;  %v622_v61 = vsel %vm429_vm1, %v4663_v15, 0.0 }
 0x198   : > { %v4775_v45 = vsel %vm429_vm1, %v4665_v2, 0.0  ;;  %v1089_v13 = vand.u32 2147483647, %v1073_v41  ;;  %v5551_v7 = vrot.slane %v4672_v6, 1  ;;  %v638_v55 = vsub.f32 %v622_v61, %v5552_v42  ;;  %v1024_v58 = vpop.permute.xlu0 %1023 }
 0x199   : > { %5550 = vst [vmem:[#allocation9_spill] sm:$0xff] %v4769_v3  ;;  %v1058_v19 = vsel %vm429_vm1, %v1022_v22, 0.0  ;;  %v1471_v15 = vand.u32 2147483647, %v1455_v60  ;;  %v5553_v2 = vrot.slane %v4597_v11, 1  ;;  %v1618_v54 = vsel %vm331_vm0, %v1600_v59, 0.0 }
 0x19a   : > { %v1853_v18 = vsel %vm331_vm0, %v5551_v7, %v5259_v24  ;;  %v4793_v41 = vpop.eup %2579  ;;  %v1634_v61 = vsub.f32 %v1618_v54, %v1554_v23  ;;  %v654_v42 = vand.u32 2147483647, %v638_v55  ;;  %v2032_v22 = vrot.slane %v4775_v45, 1  ;;  %v5554_v60 = vld [vmem:[#allocation58_spill] sm:$0xff] }
 0x19b   : > { %v1888_v8 = vsub.f32 %v1853_v18, %v4672_v6  ;;  %v1601_v52 = vsel %vm331_vm0, %v5553_v2, %v1600_v59  ;;  %v703_v24 = vmul.f32 -10.0, %v4769_v3  ;;  %v1074_v31 = vsub.f32 %v1058_v19, %v5554_v60  ;;  %v1778_v60 = vpop.permute.xlu1 %1777 }
 0x19c   : > { %v1633_v7 = vsub.f32 %v1601_v52, %v4597_v11  ;;  %v4800_v6 = vsel %vm429_vm1, %v1956_v49, 0.0  ;;  %v4802_v18 = vpop.eup %2581  ;;  %v1650_v59 = vand.u32 2147483647, %v1634_v61  ;;  %v4805_v16 = vmul.f32 %v3141_v53, %v654_v42 }
 0x19d   : > { %v1904_v29 = vand.u32 2147483647, %v1888_v8  ;;  %v5556_v11 = vrot.slane %v4656_v17, 1  ;;  %v4810_v55 = vpop.eup %2583  ;;  %2593 = vpow2.f32 %v1727_v20  ;;  %v2115_v8 = vmax.f32 %v1921_v47, 0.01 }
 0x19e   : > { %v1649_v2 = vand.u32 2147483647, %v1633_v7  ;;  %5555 = vst [vmem:[#allocation50_spill] sm:$0xff] %v4805_v16  ;;  %v1090_v52 = vand.u32 2147483647, %v1074_v31  ;;  %v4813_v49 = vpop.eup %2585  ;;  %v1107_v7 = vmul.f32 %v5399_v43, %v1089_v13  ;;  %v878_v61 = vsel %vm429_vm1, %v4713_v12, 0.0 }
 0x19f   : > { %v2033_v23 = vsel %vm331_vm0, %v5556_v11, %v2032_v22  ;;  %v1472_v54 = vand.u32 2147483647, %v1456_v46  ;;  %v4819_v11 = vpop.eup %2587  ;;  %2595 = vrcp.f32 %v2164_v0  ;;  %v1122_v20 = vmax.f32 %v4751_v63, 0.01 }
 0x1a0   : > { %v2067_v19 = vsub.f32 %v2033_v23, %v4656_v17  ;;  %v1922_v17 = vmul.f32 %v5380_v48, %v1904_v29  ;;  %v4824_v31 = vmul.f32 %v3167_v37, %v1649_v2  ;;  %v4826_v47 = vpop.eup %2589  ;;  %v731_v46 = vmul.f32 1.442695, %v703_v24  ;;  %v5559_v23 = vld [vmem:[#allocation75_spill] sm:$0xff] }
 0x1a1   : > { %v4829_v13 = vmul.f32 %v3157_v28, %v1471_v15  ;;  %v4832_v12 = vmul.f32 %v3167_v37, %v1650_v59  ;;  %v4836_v42 = vadd.f32 %v4805_v16, %v5559_v23  ;;  %v4838_v0 = vpop.eup %2591  ;;  %v1108_v29 = vmul.f32 %v5399_v43, %v1090_v52  ;;  %v5560_v2 = vld [vmem:[#allocation59_spill] sm:$0xff] }
 0x1a2   : > { %v2083_v63 = vand.u32 2147483647, %v2067_v19  ;;  %v894_v44 = vsub.f32 %v878_v61, %v5560_v2  ;;  %v5561_v3 = vrot.slane %v4800_v6, 1  ;;  %v5562_v15 = vld [vmem:[#allocation71_spill] sm:$0xff]  ;;  %2597 = vrcp.f32 %v2115_v8  ;;  %v5566_v2 = vld [vmem:[#allocation60_spill] sm:$0xff] }
 0x1a3   : > { %5557 = vst [vmem:[#allocation30_spill] sm:$0xff] %v4829_v13  ;;  %5558 = vst [vmem:[#allocation35_spill] sm:$0xff] %v4832_v12  ;;  %v1152_v35 = vmul.f32 %v4708_v39, %v5562_v15  ;;  %v4848_v37 = vmul.f32 %v3157_v28, %v1472_v54  ;;  %v1171_v59 = vmax.f32 %v1107_v7, 0.01  ;;  %2599 = vrcp.f32 %v1122_v20 }
 0x1a4   : > { %v2035_v24 = vsel %vm331_vm0, %v2032_v22, %v5561_v3  ;;  %v2116_v16 = vmax.f32 %v1922_v17, 0.01  ;;  %v4852_v19 = vadd.f32 %v4824_v31, %v4829_v13  ;;  %v4857_v61 = vmul.f32 %v4721_v34, %v4503_v21  ;;  %v592_v3 = vpop.permute.xlu1 %591  ;;  %v1958_v22 = vpop.permute.xlu0 %1957  ;;  %v5569_v13 = vld [vmem:[#allocation62_spill] sm:$0xff] }
 0x1a5   : > { %5563 = vst [vmem:[#allocation36_spill] sm:$0xff] %v4848_v37  ;;  %v2068_v52 = vsub.f32 %v2035_v24, %v4775_v45  ;;  %2601 = vpow2.f32 %v731_v46  ;;  %v4861_v39 = vadd.f32 %v4832_v12, %v4848_v37  ;;  %v704_v28 = vmul.f32 -10.0, %v4836_v42 }
 0x1a6   : > { %5564 = vst [vmem:[#allocation10_spill] sm:$0xff] %v4852_v19  ;;  %v2101_v8 = vmul.f32 %v5360_v50, %v2083_v63  ;;  %v1172_v54 = vmax.f32 %v1108_v29, 0.01  ;;  %v910_v7 = vand.u32 2147483647, %v894_v44  ;;  %v1810_v45 = vsel %vm429_vm1, %v4740_v40, 0.0 }
 0x1a7   : > { %5565 = vst [vmem:[#allocation33_spill] sm:$0xff] %v4861_v39  ;;  %v1264_v20 = vmul.f32 0.15, %v1152_v35  ;;  %2603 = vrcp.f32 %v1171_v59  ;;  %v1854_v21 = vrot.slane %v1810_v45, 1  ;;  %v879_v34 = vsel %vm429_vm1, %v4784_v56, 0.0 }
 0x1a8   : > { %2605 = vrcp.f32 %v2116_v16  ;;  %v1699_v17 = vmul.f32 -10.0, %v4852_v19  ;;  %v2084_v46 = vand.u32 2147483647, %v2068_v52  ;;  %v895_v24 = vsub.f32 %v879_v34, %v5566_v2  ;;  %v5568_v52 = vld [vmem:[#allocation61_spill] sm:$0xff]  ;;  %v1026_v23 = vpop.permute.xlu1 %1025  ;;  %v845_v37 = vpop.permute.xlu0 %844 }
 0x1a9   : > { %v1700_v15 = vmul.f32 -10.0, %v4861_v39  ;;  %v733_v63 = vmul.f32 1.442695, %v704_v28  ;;  %v5567_v44 = vrot.slane %v4757_v10, 1  ;;  %v623_v40 = vsel %vm429_vm1, %v4786_v5, 0.0 }
 0x1aa   : > { %v2165_v35 = vmax.f32 %v2101_v8, 0.01  ;;  %2607 = vrcp.f32 %v1172_v54  ;;  %v928_v56 = vmul.f32 %v3279_v14, %v910_v7  ;;  %v4879_v59 = vpop.eup %2593  ;;  %v639_v34 = vsub.f32 %v623_v40, %v5568_v52  ;;  %v5570_v52 = vld [vmem:[#allocation65_spill] sm:$0xff] }
 0x1ab   : > { %v1855_v29 = vsel %vm331_vm0, %v5567_v44, %v1854_v21  ;;  %v4883_v2 = vsel %vm429_vm1, %v1778_v60, 0.0  ;;  %v1059_v28 = vsel %vm429_vm1, %v1024_v58, 0.0  ;;  %v624_v44 = vsel %vm429_vm1, %v592_v3, 0.0 }
 0x1ac   : > { %v1889_v16 = vsub.f32 %v1855_v29, %v4757_v10  ;;  %v1729_v5 = vmul.f32 1.442695, %v1699_v17  ;;  %v2102_v8 = vmul.f32 %v5360_v50, %v2084_v46  ;;  %v911_v54 = vand.u32 2147483647, %v895_v24  ;;  %v4889_v10 = vpop.eup %2595 }
 0x1ad   : > { %v5271_v7 = vrot.slane %v4883_v2, 1  ;;  %v655_v29 = vand.u32 2147483647, %v639_v34  ;;  %v1075_v40 = vsub.f32 %v1059_v28, %v5569_v13  ;;  %v640_v60 = vsub.f32 %v624_v44, %v5570_v52  ;;  %v847_v44 = vpop.permute.xlu1 %846 }
 0x1ae   : > { %v1990_v12 = vsel %vm429_vm1, %v1958_v22, 0.0  ;;  %v1731_v58 = vmul.f32 1.442695, %v1700_v15  ;;  %v1905_v19 = vand.u32 2147483647, %v1889_v16  ;;  %2609 = vpow2.f32 %v733_v63 }
 0x1af   : > { %v1857_v3 = vsel %vm331_vm0, %v1854_v21, %v5271_v7  ;;  %v2036_v17 = vrot.slane %v1990_v12, 1  ;;  %v4898_v46 = vmul.f32 %v3141_v53, %v655_v29  ;;  %v656_v39 = vand.u32 2147483647, %v640_v60  ;;  %v4900_v34 = vpop.eup %2597  ;;  %v5574_v7 = vld [vmem:[#allocation74_spill] sm:$0xff] }
 0x1b0   : > { %v1890_v24 = vsub.f32 %v1857_v3, %v1810_v45  ;;  %v1201_v13 = vmul.f32 %v4793_v41, %v4397_v36  ;;  %2611 = vrcp.f32 %v2165_v35  ;;  %v1123_v22 = vmax.f32 %v928_v56, 0.01  ;;  %v4905_v16 = vpop.eup %2599  ;;  %v1780_v45 = vpop.permute.xlu0 %1779 }
 0x1b1   : > { %v929_v15 = vmul.f32 %v3279_v14, %v911_v54  ;;  %v749_v21 = vmul.f32 %v4765_v33, %v4601_v30  ;;  %2613 = vpow2.f32 %v1729_v5  ;;  %v2166_v63 = vmax.f32 %v2102_v8, 0.01 }
 0x1b2   : > { %v1091_v28 = vand.u32 2147483647, %v1075_v40  ;;  %v4909_v29 = vpop.eup %2601  ;;  %v1923_v52 = vmul.f32 %v5380_v48, %v1905_v19  ;;  %v4913_v36 = vmul.f32 %v3141_v53, %v656_v39  ;;  %v5571_v41 = vrot.slane %v4800_v6, 1 }
 0x1b3   : > { %v2054_v56 = vsel %vm331_vm0, %v2036_v17, 0.0  ;;  %v4920_v30 = vmul.f32 0.2, %v4857_v61  ;;  %2615 = vpow2.f32 %v1731_v58  ;;  %v4924_v33 = vadd.f32 %v4898_v46, %v4526_v9 }
 0x1b4   : > { %v2037_v35 = vsel %vm331_vm0, %v5571_v41, %v2036_v17  ;;  %v1906_v5 = vand.u32 2147483647, %v1890_v24  ;;  %v4926_v8 = vpop.eup %2603  ;;  %v4929_v53 = vadd.f32 %v1264_v20, %v4551_v38  ;;  %v1233_v19 = vmul.f32 0.15, %v1201_v13 }
 0x1b5   : > { %2617 = vrcp.f32 %v1123_v22  ;;  %v1124_v39 = vmax.f32 %v929_v15, 0.01  ;;  %v4931_v54 = vpop.eup %2605  ;;  %v1109_v40 = vmul.f32 %v5399_v43, %v1091_v28  ;;  %v2069_v61 = vsub.f32 %v2037_v35, %v4800_v6 }
 0x1b6   : > { %v2070_v60 = vsub.f32 %v2054_v56, %v1990_v12  ;;  %v1060_v58 = vsel %vm429_vm1, %v1026_v23, 0.0  ;;  %v4936_v3 = vmul.f32 0.2, %v749_v21  ;;  %2619 = vrcp.f32 %v2166_v63  ;;  %v849_v12 = vpop.permute.xlu1 %848  ;;  %v1028_v23 = vpop.permute.xlu0 %1027  ;;  %v5572_v63 = vld [vmem:[#allocation69_spill] sm:$0xff]  ;;  %v5573_v56 = vld [vmem:[#allocation72_spill] sm:$0xff] }
 0x1b7   : > { %v2117_v17 = vmax.f32 %v1923_v52, 0.01  ;;  %v4940_v38 = vadd.f32 %v4913_v36, %v4425_v4  ;;  %v4942_v20 = vpop.eup %2607  ;;  %v705_v24 = vmul.f32 -10.0, %v4924_v33  ;;  %v1924_v13 = vmul.f32 %v5380_v48, %v1906_v5 }
 0x1b8   : > { %v880_v22 = vsel %vm429_vm1, %v845_v37, 0.0  ;;  %v881_v6 = vsel %vm429_vm1, %v847_v44, 0.0  ;;  %v4949_v15 = vadd.f32 %v1233_v19, %v4729_v62  ;;  %v1202_v21 = vmul.f32 %v4810_v55, %v4434_v25  ;;  %v5575_v19 = vld [vmem:[#allocation77_spill] sm:$0xff] }
 0x1b9   : > { %2621 = vrcp.f32 %v1124_v39  ;;  %v1076_v28 = vsub.f32 %v1060_v58, %v5572_v63  ;;  %v1173_v52 = vmax.f32 %v1109_v40, 0.01  ;;  %v2085_v41 = vand.u32 2147483647, %v2069_v61 }
 0x1ba   : > { %v2086_v35 = vand.u32 2147483647, %v2070_v60  ;;  %v896_v5 = vsub.f32 %v880_v22, %v5573_v56  ;;  %v706_v37 = vmul.f32 -10.0, %v4940_v38  ;;  %v897_v44 = vsub.f32 %v881_v6, %v5574_v7  ;;  %v5576_v60 = vld [vmem:[#allocation78_spill] sm:$0xff] }
 0x1bb   : > { %v1812_v4 = vsel %vm429_vm1, %v1780_v45, 0.0  ;;  %v882_v62 = vsel %vm429_vm1, %v849_v12, 0.0  ;;  %v1153_v9 = vmul.f32 %v4813_v49, %v5575_v19  ;;  %2623 = vrcp.f32 %v2117_v17  ;;  %v4961_v39 = vpop.eup %2609  ;;  %v1030_v49 = vpop.permute.xlu0 %1029  ;;  %v5578_v19 = vld [vmem:[#allocation45_spill] sm:$0xff] }
 0x1bc   : > { %v735_v25 = vmul.f32 1.442695, %v705_v24  ;;  %v2118_v55 = vmax.f32 %v1924_v13, 0.01  ;;  %v1092_v40 = vand.u32 2147483647, %v1076_v28  ;;  %v898_v58 = vsub.f32 %v882_v62, %v5576_v60 }
 0x1bd   : > { %v1858_v61 = vrot.slane %v1812_v4, 1  ;;  %v1061_v22 = vsel %vm429_vm1, %v1028_v23, 0.0  ;;  %v4965_v63 = vpop.eup %2611  ;;  %2625 = vrcp.f32 %v1173_v52  ;;  %v2103_v7 = vmul.f32 %v5360_v50, %v2085_v41 }
 0x1be   : > { %v2104_v45 = vmul.f32 %v5360_v50, %v2086_v35  ;;  %v912_v6 = vand.u32 2147483647, %v896_v5  ;;  %v4969_v17 = vpop.eup %2613  ;;  %v737_v24 = vmul.f32 1.442695, %v706_v37  ;;  %v913_v13 = vand.u32 2147483647, %v897_v44 }
 0x1bf   : > { %v5577_v12 = vrot.slane %v4883_v2, 1  ;;  %v1876_v56 = vsel %vm331_vm0, %v1858_v61, 0.0  ;;  %v914_v52 = vand.u32 2147483647, %v898_v58  ;;  %v1077_v41 = vsub.f32 %v1061_v22, %v5578_v19 }
 0x1c0   : > { %v1892_v62 = vsub.f32 %v1876_v56, %v1812_v4  ;;  %v4977_v60 = vpop.eup %2615  ;;  %v750_v50 = vmul.f32 %v4819_v11, %v4660_v26  ;;  %2627 = vpow2.f32 %v735_v25  ;;  %v1110_v35 = vmul.f32 %v5399_v43, %v1092_v40  ;;  %v5579_v26 = vld [vmem:[#allocation34_spill] sm:$0xff] }
 0x1c1   : > { %v1859_v28 = vsel %vm331_vm0, %v5577_v12, %v1858_v61  ;;  %v1062_v5 = vsel %vm429_vm1, %v1030_v49, 0.0  ;;  %v1745_v44 = vmul.f32 %v4838_v0, %v4676_v1  ;;  %2629 = vrcp.f32 %v2118_v55  ;;  %v851_v61 = vpop.permute.xlu1 %850  ;;  %v5580_v0 = vld [vmem:[#allocation52_spill] sm:$0xff] }
 0x1c2   : > { %v1891_v23 = vsub.f32 %v1859_v28, %v4883_v2  ;;  %v4983_v37 = vpop.eup %2617  ;;  %v2167_v4 = vmax.f32 %v2103_v7, 0.01  ;;  %v930_v2 = vmul.f32 %v3279_v14, %v912_v6  ;;  %v2168_v58 = vmax.f32 %v2104_v45, 0.01  ;;  %v5581_v7 = vld [vmem:[#allocation53_spill] sm:$0xff] }
 0x1c3   : > { %v931_v22 = vmul.f32 %v3279_v14, %v913_v13  ;;  %v1078_v11 = vsub.f32 %v1062_v5, %v5579_v26  ;;  %v4990_v25 = vpop.eup %2619  ;;  %2631 = vpow2.f32 %v737_v24  ;;  %v1908_v40 = vand.u32 2147483647, %v1892_v62  ;;  %v5582_v5 = vld [vmem:[#allocation51_spill] sm:$0xff] }
 0x1c4   : > { %v1907_v12 = vand.u32 2147483647, %v1891_v23  ;;  %v932_v49 = vmul.f32 %v3279_v14, %v914_v52  ;;  %v1093_v28 = vand.u32 2147483647, %v1077_v41  ;;  %v1174_v56 = vmax.f32 %v1110_v35, 0.01 }
 0x1c5   : > { %v883_v1 = vsel %vm429_vm1, %v851_v61, 0.0  ;;  %v2144_v55 = vmul.f32 %v4614_v51, %v5580_v0  ;;  %v2145_v45 = vmul.f32 %v4726_v57, %v5581_v7  ;;  %v5000_v13 = vmul.f32 0.15, %v1202_v21 }
 0x1c6   : > { %v4998_v6 = vpop.eup %2621  ;;  %v5002_v23 = vmul.f32 0.15, %v1153_v9  ;;  %2633 = vrcp.f32 %v2167_v4  ;;  %v1125_v24 = vmax.f32 %v930_v2, 0.01  ;;  %v1126_v62 = vmax.f32 %v931_v22, 0.01 }
 0x1c7   : > { %2635 = vrcp.f32 %v2168_v58  ;;  %v1925_v52 = vmul.f32 %v5380_v48, %v1907_v12  ;;  %v1094_v19 = vand.u32 2147483647, %v1078_v11  ;;  %v1926_v41 = vmul.f32 %v5380_v48, %v1908_v40  ;;  %v5583_v9 = vld [vmem:[#allocation76_spill] sm:$0xff]  ;;  %v5584_v2 = vld [vmem:[#allocation47_spill] sm:$0xff]  ;;  %v5585_v22 = vld [vmem:[#allocation17_spill] sm:$0xff] }
 0x1c8   : > { %v1127_v35 = vmax.f32 %v932_v49, 0.01  ;;  %v1111_v51 = vmul.f32 %v5399_v43, %v1093_v28  ;;  %v899_v57 = vsub.f32 %v883_v1, %v5582_v5  ;;  %v2624_v61 = vpop.eup %2623  ;;  %v5008_v26 = vmul.f32 0.2, %v1745_v44  ;;  %v5586_v12 = vld [vmem:[#allocation20_spill] sm:$0xff]  ;;  %v5587_v49 = vld [vmem:[#allocation11_spill] sm:$0xff] }
 0x1c9   : > { %v5010_v21 = vmul.f32 0.2, %v750_v50  ;;  %v1154_v4 = vmul.f32 %v4905_v16, %v5583_v9  ;;  %2637 = vrcp.f32 %v1174_v56  ;;  %v2193_v58 = vmul.f32 %v4667_v32, %v5584_v2  ;;  %v5588_v32 = vld [vmem:[#allocation18_spill] sm:$0xff]  ;;  %v5592_v2 = vld [vmem:[#allocation19_spill] sm:$0xff] }
 0x1ca   : > { %2639 = vrcp.f32 %v1125_v24  ;;  %v2194_v48 = vmul.f32 %v4692_v27, %v5585_v22  ;;  %v2195_v11 = vmul.f32 %v4826_v47, %v5586_v12  ;;  %v5020_v40 = vpop.eup %2625  ;;  %v2119_v44 = vmax.f32 %v1925_v52, 0.01  ;;  %v5589_v24 = vld [vmem:[#allocation64_spill] sm:$0xff]  ;;  %v5590_v47 = vld [vmem:[#allocation41_spill] sm:$0xff] }
 0x1cb   : > { %2641 = vrcp.f32 %v1126_v62  ;;  %v1112_v50 = vmul.f32 %v5399_v43, %v1094_v19  ;;  %v2196_v16 = vmul.f32 %v4889_v10, %v5587_v49  ;;  %v2120_v28 = vmax.f32 %v1926_v41, 0.01  ;;  %v5591_v62 = vld [vmem:[#allocation66_spill] sm:$0xff]  ;;  %v5593_v10 = vld [vmem:[#allocation24_spill] sm:$0xff] }
 0x1cc   : > { %2643 = vrcp.f32 %v1127_v35  ;;  %v1175_v56 = vmax.f32 %v1111_v51, 0.01  ;;  %v915_v1 = vand.u32 2147483647, %v899_v57  ;;  %v2146_v0 = vmul.f32 %v4802_v18, %v5588_v32  ;;  %v5594_v57 = vld [vmem:[#allocation22_spill] sm:$0xff]  ;;  %v5597_v49 = vld [vmem:[#allocation28_spill] sm:$0xff] }
 0x1cd   : > { %v2225_v27 = vmul.f32 0.15, %v2193_v58  ;;  %v2226_v7 = vmul.f32 0.15, %v2194_v48  ;;  %v2239_v5 = vadd.f32 %v5590_v47, %v5589_v24  ;;  %v2628_v9 = vpop.eup %2627  ;;  %v2147_v52 = vmul.f32 %v4900_v34, %v5591_v62  ;;  %v5595_v58 = vld [vmem:[#allocation8_spill] sm:$0xff] }
 0x1ce   : > { %v2227_v43 = vmul.f32 0.15, %v2195_v11  ;;  %v2228_v19 = vmul.f32 0.15, %v2196_v16  ;;  %v2240_v41 = vadd.f32 %v5593_v10, %v5592_v2  ;;  %v2630_v35 = vpop.eup %2629  ;;  %2645 = vrcp.f32 %v2119_v44  ;;  %v5596_v48 = vld [vmem:[#allocation68_spill] sm:$0xff]  ;;  %v5598_v16 = vld [vmem:[#allocation9_spill] sm:$0xff] }
 0x1cf   : > { %v1176_v51 = vmax.f32 %v1112_v50, 0.01  ;;  %v2148_v18 = vmul.f32 %v4931_v54, %v5594_v57  ;;  %v2241_v22 = vadd.f32 %v2225_v27, %v5595_v58  ;;  %2647 = vrcp.f32 %v2120_v28  ;;  %v5599_v2 = vld [vmem:[#allocation15_spill] sm:$0xff]  ;;  %v5600_v27 = vld [vmem:[#allocation5_spill] sm:$0xff] }
 0x1d0   : > { %v2242_v12 = vadd.f32 %v2226_v7, %v5596_v48  ;;  %v2243_v32 = vadd.f32 %v2227_v43, %v5597_v49  ;;  %v2244_v34 = vadd.f32 %v2228_v19, %v4920_v30  ;;  %v2632_v11 = vpop.eup %2631  ;;  %v751_v24 = vmul.f32 %v4909_v29, %v5598_v16  ;;  %v5601_v7 = vld [vmem:[#allocation27_spill] sm:$0xff] }
 0x1d1   : > { %2649 = vrcp.f32 %v1175_v56  ;;  %v933_v44 = vmul.f32 %v3279_v14, %v915_v1  ;;  %v2256_v50 = vmul.f32 0.15, %v2144_v55  ;;  %v2257_v47 = vmul.f32 0.15, %v2145_v45  ;;  %v5602_v19 = vld [vmem:[#allocation23_spill] sm:$0xff]  ;;  %v5603_v45 = vld [vmem:[#allocation40_spill] sm:$0xff] }
 0x1d2   : > { %v2258_v62 = vmul.f32 0.15, %v2146_v0  ;;  %v2259_v54 = vmul.f32 0.15, %v2147_v52  ;;  %v2270_v28 = vadd.f32 %v5600_v27, %v5599_v2  ;;  %2651 = vrcp.f32 %v1176_v51  ;;  %v5604_v52 = vld [vmem:[#allocation14_spill] sm:$0xff]  ;;  %v5611_v27 = vld [vmem:[#allocation33_spill] sm:$0xff] }
 0x1d3   : > { %v2634_v10 = vpop.eup %2633  ;;  %v2197_v43 = vmul.f32 %v4965_v63, %v5601_v7  ;;  %v2260_v30 = vmul.f32 0.15, %v2148_v18  ;;  %v2271_v57 = vadd.f32 %v5602_v19, %v2239_v5  ;;  %v2272_v29 = vadd.f32 %v2256_v50, %v2240_v41  ;;  %v5605_v51 = vld [vmem:[#allocation6_spill] sm:$0xff]  ;;  %v5606_v63 = vld [vmem:[#allocation29_spill] sm:$0xff] }
 0x1d4   : > { %v2636_v58 = vpop.eup %2635  ;;  %v2273_v56 = vadd.f32 %v2257_v47, %v2241_v22  ;;  %v2274_v48 = vadd.f32 %v2258_v62, %v2242_v12  ;;  %v5047_v14 = vadd.f32 %v2259_v54, %v2243_v32  ;;  %v1128_v55 = vmax.f32 %v933_v44, 0.01  ;;  %v5607_v5 = vld [vmem:[#allocation38_spill] sm:$0xff]  ;;  %v5610_v62 = vld [vmem:[#allocation16_spill] sm:$0xff] }
 0x1d5   : > { %v2198_v1 = vmul.f32 %v4990_v25, %v5603_v45  ;;  %v5051_v0 = vadd.f32 %v2260_v30, %v2244_v34  ;;  %v2283_v49 = vadd.f32 %v5605_v51, %v5604_v52  ;;  %v1746_v18 = vmul.f32 %v4879_v59, %v5606_v63  ;;  %v5608_v22 = vld [vmem:[#allocation26_spill] sm:$0xff]  ;;  %v5609_v34 = vld [vmem:[#allocation25_spill] sm:$0xff] }
 0x1d6   : > { %v2638_v16 = vpop.eup %2637  ;;  %v1203_v41 = vmul.f32 %v4926_v8, %v5607_v5  ;;  %v2149_v12 = vmul.f32 %v2624_v61, %v5608_v22  ;;  %v2199_v32 = vmul.f32 %v2634_v10, %v4824_v31  ;;  %v1266_v50 = vmul.f32 0.15, %v1154_v4  ;;  %v5612_v8 = vld [vmem:[#allocation10_spill] sm:$0xff] }
 0x1d7   : > { %v2640_v44 = vpop.eup %2639  ;;  %v752_v25 = vmul.f32 %v4961_v39, %v4836_v42  ;;  %v2150_v47 = vmul.f32 %v2630_v35, %v5609_v34  ;;  %v2284_v54 = vadd.f32 %v2283_v49, %v5610_v62  ;;  %v1748_v59 = vmul.f32 %v4977_v60, %v5611_v27  ;;  %v5613_v35 = vld [vmem:[#allocation35_spill] sm:$0xff]  ;;  %v5616_v34 = vld [vmem:[#allocation30_spill] sm:$0xff] }
 0x1d8   : > { %v2642_v2 = vpop.eup %2641  ;;  %v753_v7 = vmul.f32 %v2628_v9, %v4924_v33  ;;  %v1747_v61 = vmul.f32 %v4969_v17, %v5612_v8  ;;  %v2229_v30 = vmul.f32 0.15, %v2197_v43  ;;  %v5070_v10 = vmul.f32 0.2, %v751_v24 }
 0x1d9   : > { %v2644_v31 = vpop.eup %2643  ;;  %2653 = vrcp.f32 %v1128_v55  ;;  %v2230_v4 = vmul.f32 0.15, %v2198_v1  ;;  %v2285_v42 = vadd.f32 %v2284_v54, %v2270_v28  ;;  %v1235_v39 = vmul.f32 0.15, %v1203_v41  ;;  %v5614_v41 = vld [vmem:[#allocation63_spill] sm:$0xff] }
 0x1da   : > { %v2200_v19 = vmul.f32 %v2636_v58, %v5613_v35  ;;  %v2231_v45 = vmul.f32 0.15, %v2199_v32  ;;  %v2261_v52 = vmul.f32 0.15, %v2149_v12  ;;  %v5073_v51 = vmul.f32 0.2, %v752_v25 }
 0x1db   : > { %v2214_v60 = vmul.f32 0.2, %v1746_v18  ;;  %v2262_v49 = vmul.f32 0.15, %v2150_v47  ;;  %v2286_v33 = vadd.f32 %v2285_v42, %v2271_v57  ;;  %v2646_v9 = vpop.eup %2645  ;;  %v2216_v63 = vmul.f32 0.2, %v1748_v59 }
 0x1dc   : > { %v1223_v17 = vmul.f32 0.2, %v753_v7  ;;  %v2215_v43 = vmul.f32 0.2, %v1747_v61  ;;  %v2245_v24 = vadd.f32 %v2229_v30, %v5008_v26  ;;  %v2648_v5 = vpop.eup %2647  ;;  %v754_v55 = vmul.f32 %v2632_v11, %v4940_v38  ;;  %v5615_v25 = vld [vmem:[#allocation13_spill] sm:$0xff]  ;;  %v5617_v26 = vld [vmem:[#allocation31_spill] sm:$0xff] }
 0x1dd   : > { %v2246_v28 = vadd.f32 %v2230_v4, %v2214_v60  ;;  %v2287_v1 = vadd.f32 %v2286_v33, %v2272_v29  ;;  %v1204_v58 = vmul.f32 %v4942_v20, %v5614_v41  ;;  %v2232_v12 = vmul.f32 0.15, %v2200_v19  ;;  %v5618_v11 = vld [vmem:[#allocation36_spill] sm:$0xff]  ;;  %v5620_v7 = vld [vmem:[#allocation21_spill] sm:$0xff]  ;;  %v5621_v61 = vld [vmem:[#allocation75_spill] sm:$0xff] }
 0x1de   : > { %v2650_v22 = vpop.eup %2649  ;;  %v2247_v32 = vadd.f32 %v2231_v45, %v2215_v43  ;;  %v2277_v18 = vadd.f32 %v2261_v52, %v2245_v24  ;;  %v1155_v57 = vmul.f32 %v4983_v37, %v5615_v25  ;;  %v2151_v47 = vmul.f32 %v2646_v9, %v5616_v34  ;;  %v5619_v59 = vld [vmem:[#allocation32_spill] sm:$0xff]  ;;  %v5622_v42 = vld [vmem:[#allocation50_spill] sm:$0xff]  ;;  %v5626_v24 = vld [vmem:[#allocation7_spill] sm:$0xff] }
 0x1df   : > { %v2278_v62 = vadd.f32 %v2262_v49, %v2246_v28  ;;  %v2288_v54 = vadd.f32 %v2287_v1, %v2273_v56  ;;  %v1205_v27 = vmul.f32 %v5020_v40, %v5617_v26  ;;  %v2652_v38 = vpop.eup %2651  ;;  %v2152_v29 = vmul.f32 %v2648_v5, %v5618_v11  ;;  %v5623_v56 = vld [vmem:[#allocation44_spill] sm:$0xff]  ;;  %v5625_v49 = vld [vmem:[#allocation46_spill] sm:$0xff] }
 0x1e0   : > { %v1156_v20 = vmul.f32 %v4998_v6, %v5619_v59  ;;  %v1157_v8 = vmul.f32 %v2640_v44, %v5620_v7  ;;  %v1158_v30 = vmul.f32 %v2642_v2, %v5621_v61  ;;  %v1206_v37 = vmul.f32 %v2638_v16, %v5622_v42  ;;  %v5624_v60 = vld [vmem:[#allocation12_spill] sm:$0xff] }
 0x1e1   : > { %v2289_v4 = vadd.f32 %v2288_v54, %v2274_v48  ;;  %v1207_v35 = vmul.f32 %v2650_v22, %v4898_v46  ;;  %v1236_v19 = vmul.f32 0.15, %v1204_v58  ;;  %v1250_v45 = vadd.f32 %v5000_v13, %v5623_v56 }
 0x1e2   : > { %v1267_v40 = vmul.f32 0.15, %v1155_v57  ;;  %v1281_v52 = vadd.f32 %v5002_v23, %v4949_v15  ;;  %v1294_v6 = vadd.f32 %v5625_v49, %v5624_v60  ;;  %v2263_v33 = vmul.f32 0.15, %v2151_v47  ;;  %v5627_v47 = vld [vmem:[#allocation70_spill] sm:$0xff] }
 0x1e3   : > { %v2290_v44 = vadd.f32 %v2289_v4, %v5047_v14  ;;  %v1208_v48 = vmul.f32 %v2652_v38, %v4913_v36  ;;  %v1237_v2 = vmul.f32 0.15, %v1205_v27  ;;  %v1251_v16 = vadd.f32 %v1235_v39, %v4936_v3 }
 0x1e4   : > { %v1268_v46 = vmul.f32 0.15, %v1156_v20  ;;  %v1282_v9 = vadd.f32 %v1266_v50, %v1250_v45  ;;  %v1295_v43 = vadd.f32 %v1294_v6, %v4929_v53  ;;  %v1159_v5 = vmul.f32 %v2644_v31, %v5626_v24 }
 0x1e5   : > { %v2291_v13 = vadd.f32 %v2290_v44, %v5051_v0  ;;  %v1238_v15 = vmul.f32 0.15, %v1206_v37  ;;  %v1239_v23 = vmul.f32 0.15, %v1207_v35  ;;  %v1252_v1 = vadd.f32 %v1236_v19, %v5010_v21 }
 0x1e6   : > { %v2654_v28 = vpop.eup %2653  ;;  %v1269_v41 = vmul.f32 0.15, %v1157_v8  ;;  %v1283_v14 = vadd.f32 %v1267_v40, %v1251_v16  ;;  %v1296_v58 = vadd.f32 %v1295_v43, %v1281_v52  ;;  %v2264_v36 = vmul.f32 0.15, %v2152_v29 }
 0x1e7   : > { %v2279_v22 = vadd.f32 %v2263_v33, %v2247_v32  ;;  %v2292_v25 = vadd.f32 %v2291_v13, %v2277_v18  ;;  %v1240_v3 = vmul.f32 0.15, %v1208_v48  ;;  %v1253_v50 = vadd.f32 %v1237_v2, %v5070_v10 }
 0x1e8   : > { %v1270_v39 = vmul.f32 0.15, %v1158_v30  ;;  %v1284_v53 = vadd.f32 %v1268_v46, %v1252_v1  ;;  %v1297_v57 = vadd.f32 %v1296_v58, %v1282_v9  ;;  %v1224_v0 = vmul.f32 0.2, %v754_v55 }
 0x1e9   : > { %v2248_v34 = vadd.f32 %v2232_v12, %v2216_v63  ;;  %v2293_v31 = vadd.f32 %v2292_v25, %v2278_v62  ;;  %v1160_v54 = vmul.f32 %v2654_v28, %v5627_v47  ;;  %v1254_v26 = vadd.f32 %v1238_v15, %v5073_v51 }
 0x1ea   : > { %v1255_v21 = vadd.f32 %v1239_v23, %v1223_v17  ;;  %v1285_v27 = vadd.f32 %v1269_v41, %v1253_v50  ;;  %v1298_v38 = vadd.f32 %v1297_v57, %v1283_v14  ;;  %v1256_v32 = vadd.f32 %v1240_v3, %v1224_v0 }
 0x1eb   : > { %v2280_v11 = vadd.f32 %v2264_v36, %v2248_v34  ;;  %v2294_v29 = vadd.f32 %v2293_v31, %v2279_v22  ;;  %v1271_v18 = vmul.f32 0.15, %v1159_v5  ;;  %v1286_v59 = vadd.f32 %v1270_v39, %v1254_v26 }
 0x1ec   : > { %v1299_v20 = vadd.f32 %v1298_v38, %v1284_v53  ;;  %v1272_v7 = vmul.f32 0.15, %v1160_v54 }
 0x1ed   : > { %v2295_v10 = vadd.f32 %v2294_v29, %v2280_v11  ;;  %v1287_v8 = vadd.f32 %v1271_v18, %v1255_v21 }
 0x1ee   : > { %v1300_v61 = vadd.f32 %v1299_v20, %v1285_v27  ;;  %v1288_v63 = vadd.f32 %v1272_v7, %v1256_v32 }
 0x1ef   : > { %2296 = vadd.xlane.f32.xlu1 %v2295_v10 }
 0x1f0   : > { %v1301_v55 = vadd.f32 %v1300_v61, %v1286_v59 }
 0x1f2   : > { %v1302_v12 = vadd.f32 %v1301_v55, %v1287_v8 }
 0x1f4   : > { %v1303_v62 = vadd.f32 %v1302_v12, %v1288_v63 }
 0x1f6   : > { %1304 = vadd.xlane.f32.xlu0 %v1303_v62 }
 0x278   : > { %v2297_v51 = vpop.xlane.xlu1 %2296 }
 0x279   : > { %v2298_v17 = vrot.slane %v2297_v51, 4 }
 0x27b   : > { %v2299_v30 = vadd.f32 %v2298_v17, %v2297_v51 }
 0x27d   : > { %v2300_v4 = vrot.slane %v2299_v30, 2 }
 0x27f   : > { %v1305_v42 = vpop.xlane.xlu0 %1304  ;;  %v2301_v19 = vadd.f32 %v2300_v4, %v2299_v30 }
 0x280   : > { %v1306_v37 = vrot.slane %v1305_v42, 4 }
 0x281   : > { %v2302_v40 = vrot.slane %v2301_v19, 1 }
 0x282   : > { %v1307_v35 = vadd.f32 %v1306_v37, %v1305_v42 }
 0x283   : > { %v2303_v49 = vadd.f32 %v2302_v40, %v2301_v19 }
 0x284   : > { %v1308_v56 = vrot.slane %v1307_v35, 2 }
 0x286   : > { %v1309_v45 = vadd.f32 %v1308_v56, %v1307_v35 }
 0x288   : > { %v1310_v52 = vrot.slane %v1309_v45, 1 }
 0x28a   : > { %v1311_v60 = vadd.f32 %v1310_v52, %v1309_v45 }
 0x28c   : > { %2439 = vpush %v1311_v60 }
 0x28d   : > { %2441 = vpush %v2303_v49 }
 0x2bd   : > { %s2440_s20 = spop %2439 }
 0x2be   : > { %s2442_s21 = spop %2441 }
 0x2bf   : > { %s2305_s25 = sadd.f32 %s2442_s21, %s2440_s20 }
 0x2c1   : > { %v2306_v6 = vstv %s2305_s25 }
 0x2c2   : > { %2307 = vst [vmem:[%s249_s24] sm:$0xff] %v2306_v6 }
 0x2c3 PF: > { %s15_s15 = sadd.s32 1, %s2681_s15  }
 0x2c4   : > { %p12_p1 = scmp.ge.s32.totalorder %s15_s15, 4  }
 0x2c6   :  { %14 = sbr.rel (!%p12_p1) target bundleno = 1 (0x1), region = 78 }
 0x2cb   :  { %2327 = vsyncpa [#allocation3], 1 }
 0x2cc   :  { %2329 = vsyncpa [#allocation3 + $0x1], 1 }

// kernel: _kind_decom_loss_impl.2
= control target key start
LH: loop header
LB: loop body
LE: loop exit
PB: predicated region body
PF: predicated region fallthrough
CT: control target
= control target key end

     0   :  { %s3555_s27 = smov 0   ;;  %s6009_s0 = inlined_call_operand.vmem [shape: f32[2,3,128,128], index: 0, kind: input, shape index: {}]   ;;  %s6010_s1 = inlined_call_operand.vmem [shape: f32[2,3,128,128], index: 1, kind: input, shape index: {}]   ;;  %s6011_s2 = inlined_call_operand.vmem [shape: f32[2,1,128,128], index: 2, kind: input, shape index: {}]   ;;  %s6012_s3 = inlined_call_operand.vmem [shape: f32[2,1,128,128], index: 3, kind: input, shape index: {}]   ;;  %s6013_s4 = inlined_call_operand.vmem [shape: f32[2,3,128,128], index: 4, kind: input, shape index: {}]   ;;  %s6014_s5 = inlined_call_operand.vmem [shape: f32[2,3,128,128], index: 5, kind: input, shape index: {}]   ;;  %s6015_s6 = inlined_call_operand.vmem [shape: f32[2,8,128], index: 6, kind: output, shape index: {0}]   ;;  %s6016_s7 = inlined_call_operand.vmem [shape: f32[2,8,128], index: 7, kind: output, shape index: {1}]   ;;  %s6017_s8 = inlined_call_operand.vmem [shape: f32[2,2,128,128], index: 8, kind: output, shape index: {2}]  }
   0x1 LB: > { %s3216_s28 = sadd.s32 4294967295, %s3507_s27   ;;  %p3220_p0 = scmp.ge.s32.totalorder %s3507_s27, 1  ;;  %s3507_s27 = sphi %s3555_s27, %s19_s27  }
   0x2   : > { %p317_p1 = scmp.lt.s32.totalorder %s3507_s27, 3 }
   0x4   : > { %p318_p2 = pnand %p3220_p0, %p317_p1 }
   0x6   : > { %321 = sbr.rel (%p318_p2) target bundleno = 1125 (0x465), region = 44 }
   0xb   : > { %p384_p3 = scmp.lt.s32.totalorder %s3216_s28, 1  ;;  %vm1553_vm0 = vcmask 1046528   ;;  %s3509_s21 = smov 127   ;;  %vm1651_vm1 = vcmask 1039360  }
   0xd   : > { %s6351_s28 = smov (!%p384_p3, %s3216_s28), 1 }
   0xe   : > { %s3443_s29 = sshll.u32 %s6351_s28, 7  ;;  %s3446_s11 = smul.u32 384, %s6351_s28 }
   0xf   : > { %s3569_s10 = scalar_lea.vmem %s6011_s2, %s3443_s29  ;;  %s3586_s14 = scalar_lea.vmem %s6012_s3, %s3443_s29 }
  0x10   : > { %v3572_v0 = vld [vmem:[%s3569_s10 + $0x8] sm:$0xff]  ;;  %v3575_v1 = vld [vmem:[%s3569_s10 + $0x10] sm:$0xff]  ;;  %v3581_v4 = vld [vmem:[%s3569_s10] sm:$0xff]  ;;  %s3598_s17 = scalar_lea.vmem %s6009_s0, %s3446_s11  ;;  %s3603_s20 = scalar_lea.vmem %s6010_s1, %s3446_s11 }
  0x11   : > { %v1555_v2 = vrot.slane %v3572_v0, 1  ;;  %v1557_v3 = vrot.slane %v3575_v1, 1  ;;  %v1554_v5 = vrot.slane %v3581_v4, 1  ;;  %v3590_v6 = vld [vmem:[%s3569_s10 + $0x18] sm:$0xff]  ;;  %v444_v11 = vld [vmem:[%s3586_s14 + $0x8] sm:$0xff]  ;;  %s3624_s24 = scalar_lea.vmem %s6013_s4, %s3446_s11  ;;  %s3629_s29 = scalar_lea.vmem %s6014_s5, %s3446_s11  ;;  %v3632_v14 = vld [vmem:[%s3586_s14 + $0x10] sm:$0xff] }
  0x12   : > { %v1559_v8 = vrot.slane %v3590_v6, 1  ;;  %v460_v12 = vld [vmem:[%s3598_s17 + $0x8] sm:$0xff]  ;;  %v461_v15 = vld [vmem:[%s3598_s17 + $0x10] sm:$0xff]  ;;  %v3665_v54 = vld [vmem:[%s3569_s10 + $0x40] sm:$0xff]  ;;  %s3229_s30 = sshll.u32 %s6351_s28, 3  ;;  %s3445_s13 = sshll.u32 %s6351_s28, 8 }
  0x13   : > { %v3593_v7 = vsel %vm1553_vm0, %v1555_v2, %v1557_v3  ;;  %v3609_v9 = vsel %vm1553_vm0, %v1554_v5, %v1555_v2  ;;  %v540_v13 = vld [vmem:[%s3603_s20 + $0x8] sm:$0xff]  ;;  %v541_v16 = vld [vmem:[%s3603_s20 + $0x10] sm:$0xff]  ;;  %v476_v17 = vmul.f32 %v460_v12, %v3572_v0  ;;  %v477_v21 = vmul.f32 %v461_v15, %v3575_v1  ;;  %s417_s11 = scalar_lea.vmem %s6015_s6, %s3229_s30  ;;  %s421_s26 = scalar_lea.vmem %s6016_s7, %s3229_s30 }
  0x14   : > { %6116 = vst [vmem:[#allocation2_spill] sm:$0xff] %v3593_v7  ;;  %1605 = vrot.lane.b32.xlu1 %v3593_v7, %s3509_s21  ;;  %6117 = vst [vmem:[#allocation3_spill] sm:$0xff] %v3609_v9  ;;  %v3614_v10 = vsel %vm1553_vm0, %v1557_v3, %v1559_v8  ;;  %1603 = vrot.lane.b32.xlu0 %v3609_v9, %s3509_s21  ;;  %v556_v18 = vmul.f32 %v540_v13, %v444_v11  ;;  %v492_v19 = vld [vmem:[%s3624_s24 + $0x8] sm:$0xff]  ;;  %v493_v23 = vld [vmem:[%s3624_s24 + $0x10] sm:$0xff] }
  0x15   : > { %6118 = vst [vmem:[#allocation4_spill] sm:$0xff] %v3614_v10  ;;  %v572_v20 = vld [vmem:[%s3629_s29 + $0x8] sm:$0xff]  ;;  %v557_v22 = vmul.f32 %v541_v16, %v3632_v14  ;;  %v573_v24 = vld [vmem:[%s3629_s29 + $0x10] sm:$0xff]  ;;  %v636_v25 = vsub.f32 %v460_v12, %v540_v13  ;;  %v508_v26 = vsub.f32 %v476_v17, %v492_v19  ;;  %v637_v29 = vsub.f32 %v461_v15, %v541_v16  ;;  %v443_v3 = vld [vmem:[%s3586_s14] sm:$0xff] }
  0x16   : > { %v588_v27 = vsub.f32 %v556_v18, %v572_v20  ;;  %v3234_v28 = vld [vmem:[%s3598_s17 + $0x88] sm:$0xff]  ;;  %v3235_v30 = vld [vmem:[%s3598_s17 + $0x90] sm:$0xff]  ;;  %v509_v31 = vsub.f32 %v477_v21, %v493_v23  ;;  %v459_v16 = vld [vmem:[%s3598_s17] sm:$0xff] }
  0x17   : > { %v589_v32 = vsub.f32 %v557_v22, %v573_v24  ;;  %v652_v33 = vand.u32 2147483647, %v636_v25  ;;  %v717_v34 = vmul.f32 %v3234_v28, %v3572_v0  ;;  %v3266_v35 = vld [vmem:[%s3603_s20 + $0x88] sm:$0xff]  ;;  %v524_v36 = vand.u32 2147483647, %v508_v26  ;;  %v3267_v40 = vld [vmem:[%s3603_s20 + $0x90] sm:$0xff] }
  0x18   : > { %1607 = vrot.lane.b32.xlu1 %v3614_v10, %s3509_s21  ;;  %v604_v37 = vand.u32 2147483647, %v588_v27  ;;  %v718_v38 = vmul.f32 %v3235_v30, %v3575_v1  ;;  %v3250_v39 = vld [vmem:[%s3624_s24 + $0x88] sm:$0xff]  ;;  %v653_v41 = vand.u32 2147483647, %v637_v29  ;;  %v3251_v42 = vld [vmem:[%s3624_s24 + $0x90] sm:$0xff]  ;;  %v799_v46 = vmul.f32 %v3266_v35, %v444_v11 }
  0x19   : > { %v3654_v43 = vld [vmem:[%s3598_s17 + $0x108] sm:$0xff]  ;;  %v525_v44 = vand.u32 2147483647, %v509_v31  ;;  %v605_v45 = vand.u32 2147483647, %v589_v32  ;;  %v3657_v47 = vld [vmem:[%s3598_s17 + $0x110] sm:$0xff]  ;;  %v750_v50 = vsub.f32 %v717_v34, %v3250_v39  ;;  %v800_v51 = vmul.f32 %v3267_v40, %v3632_v14 }
  0x1a   : > { %v3660_v48 = vld [vmem:[%s3603_s20 + $0x108] sm:$0xff]  ;;  %v668_v49 = vmul.f32 0.01, %v652_v33  ;;  %v880_v53 = vsub.f32 %v3234_v28, %v3266_v35  ;;  %v620_v55 = vadd.f32 %v604_v37, %v524_v36  ;;  %v751_v56 = vsub.f32 %v718_v38, %v3251_v42  ;;  %v3283_v57 = vld [vmem:[%s3629_s29 + $0x90] sm:$0xff]  ;;  %v539_v17 = vld [vmem:[%s3603_s20] sm:$0xff] }
  0x1b   : > { %v3282_v52 = vld [vmem:[%s3629_s29 + $0x88] sm:$0xff]  ;;  %v881_v58 = vsub.f32 %v3235_v30, %v3267_v40  ;;  %v977_v59 = vmul.f32 %v3654_v43, %v3572_v0  ;;  %v3331_v60 = vld [vmem:[%s3603_s20 + $0x110] sm:$0xff]  ;;  %v978_v61 = vmul.f32 %v3657_v47, %v3575_v1  ;;  %v1059_v2 = vmul.f32 %v3660_v48, %v444_v11  ;;  %v3683_v21 = vld [vmem:[%s3598_s17 + $0x80] sm:$0xff] }
  0x1c   : > { %v3314_v62 = vld [vmem:[%s3624_s24 + $0x108] sm:$0xff]  ;;  %v3315_v63 = vld [vmem:[%s3624_s24 + $0x110] sm:$0xff]  ;;  %v621_v5 = vadd.f32 %v605_v45, %v525_v44  ;;  %v669_v12 = vmul.f32 0.01, %v653_v41  ;;  %v832_v13 = vsub.f32 %v799_v46, %v3282_v52  ;;  %v6023_v0 = vrot.slane %v3665_v54, 1  ;;  %v3686_v11 = vld [vmem:[%s3603_s20 + $0x80] sm:$0xff] }
  0x1d   : > { %v3346_v15 = vld [vmem:[%s3629_s29 + $0x108] sm:$0xff]  ;;  %v766_v18 = vand.u32 2147483647, %v750_v50  ;;  %v833_v19 = vsub.f32 %v800_v51, %v3283_v57  ;;  %v896_v1 = vand.u32 2147483647, %v880_v53  ;;  %v1060_v20 = vmul.f32 %v3331_v60, %v3632_v14  ;;  %v3347_v26 = vld [vmem:[%s3629_s29 + $0x110] sm:$0xff] }
  0x1e   : > { %v3688_v22 = vadd.f32 %v668_v49, %v620_v55  ;;  %v767_v23 = vand.u32 2147483647, %v751_v56  ;;  %v897_v24 = vand.u32 2147483647, %v881_v58  ;;  %v1010_v25 = vsub.f32 %v977_v59, %v3314_v62  ;;  %v491_v32 = vld [vmem:[%s3624_s24] sm:$0xff]  ;;  %v446_v42 = vld [vmem:[%s3586_s14 + $0x18] sm:$0xff] }
  0x1f   : > { %v1011_v27 = vsub.f32 %v978_v61, %v3315_v63  ;;  %v1092_v28 = vsub.f32 %v1059_v2, %v3346_v15  ;;  %v475_v29 = vmul.f32 %v459_v16, %v3581_v4  ;;  %v555_v30 = vmul.f32 %v539_v17, %v443_v3  ;;  %v571_v33 = vld [vmem:[%s3629_s29] sm:$0xff]  ;;  %v462_v53 = vld [vmem:[%s3598_s17 + $0x18] sm:$0xff]  ;;  %v545_v10 = vld [vmem:[%s3603_s20 + $0x30] sm:$0xff] }
  0x20   : > { %v848_v31 = vand.u32 2147483647, %v832_v13  ;;  %v1140_v14 = vsub.f32 %v3654_v43, %v3660_v48  ;;  %v716_v34 = vmul.f32 %v3683_v21, %v3581_v4  ;;  %v798_v35 = vmul.f32 %v3686_v11, %v443_v3  ;;  %v3249_v40 = vld [vmem:[%s3624_s24 + $0x80] sm:$0xff]  ;;  %v542_v55 = vld [vmem:[%s3603_s20 + $0x18] sm:$0xff]  ;;  %v3318_v7 = vld [vmem:[%s3624_s24 + $0x128] sm:$0xff] }
  0x21   : > { %v849_v36 = vand.u32 2147483647, %v833_v19  ;;  %v3699_v37 = vmul.f32 0.01, %v896_v1  ;;  %v1093_v38 = vsub.f32 %v1060_v20, %v3347_v26  ;;  %v1141_v39 = vsub.f32 %v3657_v47, %v3331_v60  ;;  %v3281_v41 = vld [vmem:[%s3629_s29 + $0x80] sm:$0xff]  ;;  %v3236_v60 = vld [vmem:[%s3598_s17 + $0x98] sm:$0xff] }
  0x22   : > { %v3705_v43 = vadd.f32 %v669_v12, %v621_v5  ;;  %v3707_v44 = vmul.f32 0.01, %v897_v24  ;;  %v3709_v45 = vand.u32 2147483647, %v1010_v25  ;;  %v635_v46 = vsub.f32 %v459_v16, %v539_v17  ;;  %v3297_v48 = vld [vmem:[%s3598_s17 + $0x100] sm:$0xff]  ;;  %v3268_v61 = vld [vmem:[%s3603_s20 + $0x98] sm:$0xff] }
  0x23   : > { %v3329_v49 = vld [vmem:[%s3603_s20 + $0x100] sm:$0xff]  ;;  %v3713_v50 = vand.u32 2147483647, %v1011_v27  ;;  %v3715_v51 = vand.u32 2147483647, %v1092_v28  ;;  %v507_v47 = vsub.f32 %v475_v29, %v491_v32  ;;  %v587_v52 = vsub.f32 %v555_v30, %v571_v33  ;;  %v494_v19 = vld [vmem:[%s3624_s24 + $0x18] sm:$0xff] }
  0x24   : > { %v1156_v56 = vand.u32 2147483647, %v1140_v14  ;;  %v749_v57 = vsub.f32 %v716_v34, %v3249_v40  ;;  %v831_v58 = vsub.f32 %v798_v35, %v3281_v41  ;;  %v879_v59 = vsub.f32 %v3683_v21, %v3686_v11  ;;  %v3313_v5 = vld [vmem:[%s3624_s24 + $0x100] sm:$0xff]  ;;  %v574_v20 = vld [vmem:[%s3629_s29 + $0x18] sm:$0xff]  ;;  %v3734_v21 = vld [vmem:[%s3569_s10 + $0x48] sm:$0xff] }
  0x25   : > { %v3723_v62 = vand.u32 2147483647, %v1093_v38  ;;  %v3725_v63 = vand.u32 2147483647, %v1141_v39  ;;  %v976_v2 = vmul.f32 %v3297_v48, %v3581_v4  ;;  %v1058_v12 = vmul.f32 %v3329_v49, %v443_v3  ;;  %v3345_v13 = vld [vmem:[%s3629_s29 + $0x100] sm:$0xff]  ;;  %v3252_v4 = vld [vmem:[%s3624_s24 + $0x98] sm:$0xff] }
  0x26   : > { %v864_v15 = vadd.f32 %v848_v31, %v766_v18  ;;  %v651_v16 = vand.u32 2147483647, %v635_v46  ;;  %v478_v17 = vmul.f32 %v462_v53, %v3590_v6  ;;  %v558_v1 = vmul.f32 %v542_v55, %v446_v42  ;;  %v3284_v27 = vld [vmem:[%s3629_s29 + $0x98] sm:$0xff] }
  0x27   : > { %v523_v11 = vand.u32 2147483647, %v507_v47  ;;  %v603_v24 = vand.u32 2147483647, %v587_v52  ;;  %v719_v25 = vmul.f32 %v3236_v60, %v3590_v6  ;;  %v801_v26 = vmul.f32 %v3268_v61, %v446_v42  ;;  %v3300_v32 = vld [vmem:[%s3598_s17 + $0x118] sm:$0xff] }
  0x28   : > { %v865_v3 = vadd.f32 %v849_v36, %v767_v23  ;;  %v765_v28 = vand.u32 2147483647, %v749_v57  ;;  %v847_v18 = vand.u32 2147483647, %v831_v58  ;;  %v895_v29 = vand.u32 2147483647, %v879_v59 }
  0x29   : > { %v1009_v30 = vsub.f32 %v976_v2, %v3313_v5  ;;  %v1091_v31 = vsub.f32 %v1058_v12, %v3345_v13  ;;  %v1139_v14 = vsub.f32 %v3297_v48, %v3329_v49  ;;  %v3332_v33 = vld [vmem:[%s3603_s20 + $0x118] sm:$0xff]  ;;  %v6019_v34 = vrot.slane %v3734_v21, 1 }
  0x2a   : > { %v667_v35 = vmul.f32 0.01, %v651_v16  ;;  %v510_v38 = vsub.f32 %v478_v17, %v494_v19  ;;  %v590_v39 = vsub.f32 %v558_v1, %v574_v20  ;;  %v638_v40 = vsub.f32 %v462_v53, %v542_v55  ;;  %v3316_v52 = vld [vmem:[%s3624_s24 + $0x118] sm:$0xff] }
  0x2b   : > { %v752_v41 = vsub.f32 %v719_v25, %v3252_v4  ;;  %v834_v46 = vsub.f32 %v801_v26, %v3284_v27  ;;  %v882_v47 = vsub.f32 %v3236_v60, %v3268_v61  ;;  %v3747_v23 = vsel %vm1553_vm0, %v6023_v0, %v6019_v34  ;;  %v3348_v58 = vld [vmem:[%s3629_s29 + $0x118] sm:$0xff]  ;;  %v3763_v27 = vld [vmem:[%s3586_s14 + $0x40] sm:$0xff]  ;;  %v501_v34 = vld [vmem:[%s3624_s24 + $0x50] sm:$0xff] }
  0x2c   : > { %6119 = vst [vmem:[#allocation5_spill] sm:$0xff] %v3747_v23  ;;  %v619_v36 = vadd.f32 %v603_v24, %v523_v11  ;;  %v911_v48 = vmul.f32 0.01, %v895_v29  ;;  %v979_v49 = vmul.f32 %v3300_v32, %v3590_v6  ;;  %v1061_v57 = vmul.f32 %v3332_v33, %v446_v42  ;;  %1619 = vrot.lane.b32.xlu0 %v3747_v23, %s3509_s21 }
  0x2d   : > { %v863_v53 = vadd.f32 %v847_v18, %v765_v28  ;;  %v1025_v55 = vand.u32 2147483647, %v1009_v30  ;;  %v1107_v59 = vand.u32 2147483647, %v1091_v31  ;;  %v1155_v60 = vand.u32 2147483647, %v1139_v14 }
  0x2e   : > { %v928_v61 = vadd.f32 %v3699_v37, %v864_v15  ;;  %v526_v2 = vand.u32 2147483647, %v510_v38  ;;  %v606_v5 = vand.u32 2147483647, %v590_v39  ;;  %v654_v12 = vand.u32 2147483647, %v638_v40 }
  0x2f   : > { %v1124_v13 = vadd.f32 %v3715_v51, %v3709_v45  ;;  %v768_v16 = vand.u32 2147483647, %v752_v41  ;;  %v850_v42 = vand.u32 2147483647, %v834_v46  ;;  %v898_v17 = vand.u32 2147483647, %v882_v47 }
  0x30   : > { %v1172_v19 = vmul.f32 0.01, %v1156_v56  ;;  %v1012_v1 = vsub.f32 %v979_v49, %v3316_v52  ;;  %v1094_v20 = vsub.f32 %v1061_v57, %v3348_v58  ;;  %v1142_v11 = vsub.f32 %v3300_v32, %v3332_v33  ;;  %v467_v56 = vld [vmem:[%s3598_s17 + $0x40] sm:$0xff]  ;;  %v468_v28 = vld [vmem:[%s3598_s17 + $0x48] sm:$0xff] }
  0x31   : > { %v683_v24 = vadd.f32 %v667_v35, %v619_v36  ;;  %v927_v37 = vadd.f32 %v911_v48, %v863_v53  ;;  %v1123_v15 = vadd.f32 %v1107_v59, %v1025_v55  ;;  %v1171_v25 = vmul.f32 0.01, %v1155_v60  ;;  %v547_v14 = vld [vmem:[%s3603_s20 + $0x40] sm:$0xff]  ;;  %v500_v39 = vld [vmem:[%s3624_s24 + $0x48] sm:$0xff] }
  0x32   : > { %v929_v4 = vadd.f32 %v3707_v44, %v865_v3  ;;  %v944_v45 = vadd.f32 %v928_v61, %v3688_v22  ;;  %v1125_v51 = vadd.f32 %v3723_v62, %v3713_v50  ;;  %v1173_v26 = vmul.f32 0.01, %v3725_v63  ;;  %v3769_v32 = vld [vmem:[%s3569_s10 + $0x20] sm:$0xff]  ;;  %v548_v61 = vld [vmem:[%s3603_s20 + $0x48] sm:$0xff] }
  0x33   : > { %v622_v18 = vadd.f32 %v606_v5, %v526_v2  ;;  %v670_v29 = vmul.f32 0.01, %v654_v12  ;;  %v866_v30 = vadd.f32 %v850_v42, %v768_v16  ;;  %v914_v31 = vmul.f32 0.01, %v898_v17  ;;  %6120 = vst [vmem:[#allocation6_spill] sm:$0xff] %v3769_v32  ;;  %v499_v38 = vld [vmem:[%s3624_s24 + $0x40] sm:$0xff] }
  0x34   : > { %v1188_v44 = vadd.f32 %v1172_v19, %v1124_v13  ;;  %v1028_v22 = vand.u32 2147483647, %v1012_v1  ;;  %v1110_v3 = vand.u32 2147483647, %v1094_v20  ;;  %v1158_v50 = vand.u32 2147483647, %v1142_v11 }
  0x35   : > { %v943_v62 = vadd.f32 %v927_v37, %v683_v24  ;;  %v1187_v63 = vadd.f32 %v1171_v25, %v1123_v15  ;;  %v483_v33 = vmul.f32 %v467_v56, %v3665_v54  ;;  %v484_v35 = vmul.f32 %v468_v28, %v3734_v21  ;;  %v579_v49 = vld [vmem:[%s3629_s29 + $0x40] sm:$0xff]  ;;  %v3793_v5 = vld [vmem:[%s3586_s14 + $0x48] sm:$0xff]  ;;  %v3812_v15 = vld [vmem:[%s3569_s10 + $0x50] sm:$0xff] }
  0x36   : > { %v563_v40 = vmul.f32 %v547_v14, %v3763_v27  ;;  %v1561_v41 = vrot.slane %v3769_v32, 1  ;;  %v945_v46 = vadd.f32 %v929_v4, %v3705_v43  ;;  %v1189_v47 = vadd.f32 %v1173_v26, %v1125_v51  ;;  %v3788_v2 = vld [vmem:[%s3598_s17 + $0xc0] sm:$0xff]  ;;  %6122 = vst [vmem:[#allocation8_spill] sm:$0xff] %v3793_v5  ;;  %v3799_v16 = vld [vmem:[%s3598_s17 + $0xc8] sm:$0xff]  ;;  %v3815_v25 = vld [vmem:[%s3569_s10 + $0x58] sm:$0xff] }
  0x37   : > { %v686_v36 = vadd.f32 %v670_v29, %v622_v18  ;;  %v930_v48 = vadd.f32 %v914_v31, %v866_v30  ;;  %v1126_v52 = vadd.f32 %v1110_v3, %v1028_v22  ;;  %v1174_v57 = vmul.f32 0.01, %v1158_v50  ;;  %v463_v42 = vld [vmem:[%s3598_s17 + $0x20] sm:$0xff]  ;;  %6124 = vst [vmem:[#allocation10_spill] sm:$0xff] %v3815_v25 }
  0x38   : > { %v643_v58 = vsub.f32 %v467_v56, %v547_v14  ;;  %v3784_v53 = vsel %vm1553_vm0, %v1559_v8, %v1561_v41  ;;  %v1204_v43 = vadd.f32 %v1188_v44, %v944_v45  ;;  %v1203_v55 = vadd.f32 %v1187_v63, %v943_v62  ;;  %v447_v8 = vld [vmem:[%s3586_s14 + $0x20] sm:$0xff] }
  0x39   : > { %6121 = vst [vmem:[#allocation7_spill] sm:$0xff] %v3784_v53  ;;  %v515_v59 = vsub.f32 %v483_v33, %v499_v38  ;;  %v516_v60 = vsub.f32 %v484_v35, %v500_v39  ;;  %1609 = vrot.lane.b32.xlu1 %v3784_v53, %s3509_s21  ;;  %v595_v6 = vsub.f32 %v563_v40, %v579_v49  ;;  %v543_v17 = vld [vmem:[%s3603_s20 + $0x20] sm:$0xff]  ;;  %v6020_v63 = vrot.slane %v3812_v15, 1  ;;  %v3845_v35 = vld [vmem:[%s3569_s10 + $0x28] sm:$0xff] }
  0x3a   : > { %v644_v12 = vsub.f32 %v468_v28, %v548_v61  ;;  %v3796_v13 = vadd.f32 %v1189_v47, %v945_v46  ;;  %v3804_v19 = vld [vmem:[%s3598_s17 + $0xa0] sm:$0xff]  ;;  %v946_v1 = vadd.f32 %v930_v48, %v686_v36  ;;  %v1190_v20 = vadd.f32 %v1174_v57, %v1126_v52  ;;  %6126 = vst [vmem:[#allocation12_spill] sm:$0xff] %v3845_v35  ;;  %v3258_v48 = vld [vmem:[%s3624_s24 + $0xc8] sm:$0xff] }
  0x3b   : > { %v659_v11 = vand.u32 2147483647, %v643_v58  ;;  %v724_v24 = vmul.f32 %v3788_v2, %v3665_v54  ;;  %v3809_v37 = vld [vmem:[%s3603_s20 + $0xa0] sm:$0xff]  ;;  %v3817_v4 = vadd.f32 %v1204_v43, %v1203_v55  ;;  %v531_v45 = vand.u32 2147483647, %v515_v59 }
  0x3c   : > { %6123 = vst [vmem:[#allocation9_spill] sm:$0xff] %v3796_v13  ;;  %v3819_v51 = vand.u32 2147483647, %v516_v60  ;;  %v3822_v26 = vmul.f32 %v548_v61, %v3793_v5  ;;  %v3257_v56 = vld [vmem:[%s3624_s24 + $0xc0] sm:$0xff]  ;;  %v611_v18 = vand.u32 2147483647, %v595_v6  ;;  %v479_v30 = vmul.f32 %v463_v42, %v3769_v32 }
  0x3d   : > { %6125 = vst [vmem:[#allocation11_spill] sm:$0xff] %v3817_v4  ;;  %v3826_v28 = vld [vmem:[%s3603_s20 + $0xc0] sm:$0xff]  ;;  %v3828_v29 = vand.u32 2147483647, %v644_v12  ;;  %v559_v31 = vmul.f32 %v543_v17, %v447_v8  ;;  %v720_v50 = vmul.f32 %v3804_v19, %v3769_v32  ;;  %v802_v62 = vmul.f32 %v3809_v37, %v447_v8 }
  0x3e   : > { %v3832_v14 = vld [vmem:[%s3598_s17 + $0x120] sm:$0xff]  ;;  %v6018_v33 = vrot.slane %v3815_v25, 1  ;;  %v3847_v38 = vadd.f32 %v1190_v20, %v946_v1  ;;  %v3849_v39 = vmul.f32 0.01, %v659_v11  ;;  %v725_v40 = vmul.f32 %v3799_v16, %v3734_v21 }
  0x3f   : > { %v3835_v44 = vld [vmem:[%s3603_s20 + $0x120] sm:$0xff]  ;;  %v757_v46 = vsub.f32 %v724_v24, %v3257_v56  ;;  %v639_v49 = vsub.f32 %v463_v42, %v543_v17  ;;  %v980_v52 = vmul.f32 %v3832_v14, %v3769_v32  ;;  %v806_v43 = vmul.f32 %v3826_v28, %v3763_v27  ;;  %v3274_v42 = vld [vmem:[%s3603_s20 + $0xc8] sm:$0xff] }
  0x40   : > { %v495_v22 = vld [vmem:[%s3624_s24 + $0x20] sm:$0xff]  ;;  %6127 = vst [vmem:[#allocation13_spill] sm:$0xff] %v3847_v38  ;;  %v1062_v57 = vmul.f32 %v3835_v44, %v447_v8  ;;  %v3864_v58 = vsel %vm1553_vm0, %v6020_v63, %v6018_v33  ;;  %v1563_v12 = vrot.slane %v3845_v35, 1  ;;  %v3876_v8 = vadd.f32 %v611_v18, %v531_v45  ;;  %v3892_v18 = vld [vmem:[%s3598_s17 + $0x148] sm:$0xff]  ;;  %v3271_v38 = vld [vmem:[%s3603_s20 + $0xb0] sm:$0xff] }
  0x41   : > { %v575_v3 = vld [vmem:[%s3629_s29 + $0x20] sm:$0xff]  ;;  %6128 = vst [vmem:[#allocation14_spill] sm:$0xff] %v3864_v58  ;;  %v511_v59 = vsub.f32 %v479_v30, %v495_v22  ;;  %1623 = vrot.lane.b32.xlu0 %v3864_v58, %s3509_s21  ;;  %v883_v20 = vsub.f32 %v3804_v19, %v3809_v37  ;;  %v758_v11 = vsub.f32 %v725_v40, %v3258_v48  ;;  %v3881_v24 = vand.u32 2147483647, %v757_v46  ;;  %v3911_v46 = vld [vmem:[%s3569_s10 + $0x68] sm:$0xff] }
  0x42   : > { %v3253_v47 = vld [vmem:[%s3624_s24 + $0xa0] sm:$0xff]  ;;  %v591_v60 = vsub.f32 %v559_v31, %v575_v3  ;;  %v887_v30 = vsub.f32 %v3788_v2, %v3826_v28  ;;  %v3889_v45 = vsel %vm1553_vm0, %v1561_v41, %v1563_v12  ;;  %6130 = vst [vmem:[#allocation16_spill] sm:$0xff] %v3892_v18  ;;  %v655_v37 = vand.u32 2147483647, %v639_v49  ;;  %v544_v63 = vld [vmem:[%s3603_s20 + $0x28] sm:$0xff] }
  0x43   : > { %v3285_v36 = vld [vmem:[%s3629_s29 + $0xa0] sm:$0xff]  ;;  %v753_v17 = vsub.f32 %v720_v50, %v3253_v47  ;;  %6129 = vst [vmem:[#allocation15_spill] sm:$0xff] %v3889_v45  ;;  %v3898_v50 = vld [vmem:[%s3598_s17 + $0x50] sm:$0xff]  ;;  %1611 = vrot.lane.b32.xlu1 %v3889_v45, %s3509_s21  ;;  %v3903_v2 = vmul.f32 %v3274_v42, %v3793_v5  ;;  %v527_v41 = vand.u32 2147483647, %v511_v59  ;;  %v985_v59 = vmul.f32 %v3892_v18, %v3734_v21  ;;  %v3286_v58 = vld [vmem:[%s3629_s29 + $0xa8] sm:$0xff] }
  0x44   : > { %v3869_v55 = vld [vmem:[%s3598_s17 + $0x140] sm:$0xff]  ;;  %v835_v1 = vsub.f32 %v802_v62, %v3285_v36  ;;  %v607_v28 = vand.u32 2147483647, %v591_v60  ;;  %v1143_v62 = vsub.f32 %v3832_v14, %v3835_v44  ;;  %v899_v49 = vand.u32 2147483647, %v883_v20  ;;  %v3322_v14 = vld [vmem:[%s3624_s24 + $0x148] sm:$0xff] }
  0x45   : > { %v3317_v61 = vld [vmem:[%s3624_s24 + $0x120] sm:$0xff]  ;;  %v984_v31 = vmul.f32 %v3869_v55, %v3665_v54  ;;  %6131 = vst [vmem:[#allocation17_spill] sm:$0xff] %v3903_v2  ;;  %v769_v36 = vand.u32 2147483647, %v753_v17  ;;  %v3920_v44 = vld [vmem:[%s3569_s10 + $0x30] sm:$0xff]  ;;  %v6021_v20 = vrot.slane %v3911_v46, 1 }
  0x46   : > { %v3349_v6 = vld [vmem:[%s3629_s29 + $0x120] sm:$0xff]  ;;  %v1013_v22 = vsub.f32 %v980_v52, %v3317_v61  ;;  %v851_v48 = vand.u32 2147483647, %v835_v1  ;;  %v3913_v52 = vand.u32 2147483647, %v758_v11  ;;  %6133 = vst [vmem:[#allocation19_spill] sm:$0xff] %v3920_v44  ;;  %v623_v11 = vadd.f32 %v607_v28, %v527_v41 }
  0x47   : > { %v3289_v56 = vld [vmem:[%s3629_s29 + $0xc0] sm:$0xff]  ;;  %v1095_v3 = vsub.f32 %v1062_v57, %v3349_v6  ;;  %v888_v57 = vsub.f32 %v3799_v16, %v3274_v42  ;;  %v903_v61 = vand.u32 2147483647, %v887_v30  ;;  %v671_v6 = vmul.f32 0.01, %v655_v37  ;;  %v3255_v5 = vld [vmem:[%s3624_s24 + $0xb0] sm:$0xff] }
  0x48   : > { %v3321_v19 = vld [vmem:[%s3624_s24 + $0x140] sm:$0xff]  ;;  %v839_v47 = vsub.f32 %v806_v43, %v3289_v56  ;;  %6132 = vst [vmem:[#allocation18_spill] sm:$0xff] %v3913_v52  ;;  %v1029_v33 = vand.u32 2147483647, %v1013_v22  ;;  %v1159_v1 = vand.u32 2147483647, %v1143_v62  ;;  %v485_v16 = vmul.f32 %v3898_v50, %v3812_v15 }
  0x49   : > { %v3908_v40 = vld [vmem:[%s3569_s10 + $0x60] sm:$0xff]  ;;  %v1017_v60 = vsub.f32 %v984_v31, %v3321_v19  ;;  %v1111_v43 = vand.u32 2147483647, %v1095_v3  ;;  %v867_v56 = vadd.f32 %v851_v48, %v769_v36  ;;  %v915_v30 = vmul.f32 0.01, %v899_v49  ;;  %v3929_v31 = vld [vmem:[%s3598_s17 + $0x28] sm:$0xff] }
  0x4a   : > { %v3337_v17 = vld [vmem:[%s3603_s20 + $0x140] sm:$0xff]  ;;  %v6022_v42 = vrot.slane %v3908_v40, 1  ;;  %v6024_v19 = vrot.slane %v3920_v44, 1  ;;  %v855_v37 = vand.u32 2147483647, %v839_v47  ;;  %v1018_v22 = vsub.f32 %v985_v59, %v3322_v14  ;;  %v448_v62 = vld [vmem:[%s3586_s14 + $0x28] sm:$0xff] }
  0x4b   : > { %v1147_v3 = vsub.f32 %v3869_v55, %v3337_v17  ;;  %v3942_v28 = vand.u32 2147483647, %v888_v57  ;;  %v3944_v36 = vmul.f32 0.01, %v903_v61  ;;  %v3947_v47 = vmul.f32 %v3337_v17, %v3763_v27  ;;  %v3950_v55 = vld [vmem:[%s3598_s17 + $0x58] sm:$0xff]  ;;  %v3960_v59 = vld [vmem:[%s3598_s17 + $0xd0] sm:$0xff] }
  0x4c   : > { %v3940_v41 = vsel %vm1553_vm0, %v6022_v42, %v6021_v20  ;;  %v3957_v48 = vsel %vm1553_vm0, %v1563_v12, %v6024_v19  ;;  %v1127_v49 = vadd.f32 %v1111_v43, %v1029_v33  ;;  %v1175_v57 = vmul.f32 0.01, %v1159_v1  ;;  %6139 = vst [vmem:[#allocation25_spill] sm:$0xff] %v3960_v59  ;;  %v3238_v14 = vld [vmem:[%s3598_s17 + $0xa8] sm:$0xff]  ;;  %v3971_v33 = vld [vmem:[%s3598_s17 + $0xd8] sm:$0xff] }
  0x4d   : > { %6134 = vst [vmem:[#allocation20_spill] sm:$0xff] %v3940_v41  ;;  %6135 = vst [vmem:[#allocation21_spill] sm:$0xff] %v3942_v28  ;;  %1627 = vrot.lane.b32.xlu0 %v3940_v41, %s3509_s21  ;;  %v517_v61 = vsub.f32 %v485_v16, %v501_v34  ;;  %v480_v27 = vmul.f32 %v3929_v31, %v3845_v35  ;;  %v3270_v17 = vld [vmem:[%s3603_s20 + $0xa8] sm:$0xff]  ;;  %1613 = vrot.lane.b32.xlu1 %v3957_v48, %s3509_s21  ;;  %v3968_v20 = vand.u32 2147483647, %v1017_v60  ;;  %v3974_v34 = vld [vmem:[%s3598_s17 + $0x150] sm:$0xff] }
  0x4e   : > { %6136 = vst [vmem:[#allocation22_spill] sm:$0xff] %v3944_v36  ;;  %6137 = vst [vmem:[#allocation23_spill] sm:$0xff] %v3947_v47  ;;  %v687_v42 = vadd.f32 %v671_v6, %v623_v11  ;;  %v931_v12 = vadd.f32 %v915_v30, %v867_v56  ;;  %v496_v43 = vld [vmem:[%s3624_s24 + $0x28] sm:$0xff]  ;;  %v560_v1 = vmul.f32 %v544_v63, %v448_v62  ;;  %v3980_v0 = vand.u32 2147483647, %v1018_v22  ;;  %v3990_v11 = vld [vmem:[%s3569_s10 + $0x70] sm:$0xff] }
  0x4f   : > { %6138 = vst [vmem:[#allocation24_spill] sm:$0xff] %v3957_v48  ;;  %6140 = vst [vmem:[#allocation26_spill] sm:$0xff] %v3968_v20  ;;  %v3978_v16 = vadd.f32 %v855_v37, %v3881_v24  ;;  %v3982_v19 = vand.u32 2147483647, %v1147_v3  ;;  %v3986_v60 = vmul.f32 %v3950_v55, %v3815_v25  ;;  %v576_v6 = vld [vmem:[%s3629_s29 + $0x28] sm:$0xff]  ;;  %v3994_v56 = vmul.f32 %v3960_v59, %v3812_v15  ;;  %v4005_v41 = vld [vmem:[%s3569_s10 + $0x78] sm:$0xff] }
  0x50   : > { %6141 = vst [vmem:[#allocation27_spill] sm:$0xff] %v3971_v33  ;;  %6142 = vst [vmem:[#allocation28_spill] sm:$0xff] %v3974_v34  ;;  %v640_v24 = vsub.f32 %v3929_v31, %v544_v63  ;;  %v721_v30 = vmul.f32 %v3238_v14, %v3845_v35  ;;  %v803_v37 = vmul.f32 %v3270_v17, %v448_v62  ;;  %v3999_v22 = vld [vmem:[%s3598_s17 + $0x128] sm:$0xff]  ;;  %v4009_v53 = vand.u32 2147483647, %v517_v61  ;;  %v465_v61 = vld [vmem:[%s3598_s17 + $0x30] sm:$0xff] }
  0x51   : > { %6143 = vst [vmem:[#allocation29_spill] sm:$0xff] %v3978_v16  ;;  %6144 = vst [vmem:[#allocation30_spill] sm:$0xff] %v3980_v0  ;;  %v4002_v3 = vld [vmem:[%s3603_s20 + $0x128] sm:$0xff]  ;;  %v4007_v23 = vadd.f32 %v1175_v57, %v1127_v49  ;;  %v4013_v63 = vmul.f32 %v3971_v33, %v3815_v25  ;;  %v512_v31 = vsub.f32 %v480_v27, %v496_v43  ;;  %v4024_v57 = vld [vmem:[%s3586_s14 + $0x30] sm:$0xff]  ;;  %v6154_v20 = vrot.slane %v3990_v11, 1 }
  0x52   : > { %6145 = vst [vmem:[#allocation31_spill] sm:$0xff] %v3982_v19  ;;  %6146 = vst [vmem:[#allocation32_spill] sm:$0xff] %v3990_v11  ;;  %v3254_v48 = vld [vmem:[%s3624_s24 + $0xa8] sm:$0xff]  ;;  %v4017_v45 = vadd.f32 %v931_v12, %v687_v42  ;;  %v4021_v9 = vmul.f32 %v3974_v34, %v3812_v15  ;;  %v592_v49 = vsub.f32 %v560_v1, %v576_v6  ;;  %v3239_v12 = vld [vmem:[%s3598_s17 + $0xb0] sm:$0xff]  ;;  %v6036_v1 = vrot.slane %v4005_v41, 1 }
  0x53   : > { %6147 = vst [vmem:[#allocation33_spill] sm:$0xff] %v4005_v41  ;;  %6148 = vst [vmem:[#allocation34_spill] sm:$0xff] %v4007_v23  ;;  %v884_v27 = vsub.f32 %v3238_v14, %v3270_v17  ;;  %v981_v43 = vmul.f32 %v3999_v22, %v3845_v35  ;;  %v1063_v42 = vmul.f32 %v4002_v3, %v448_v62  ;;  %v4036_v6 = vld [vmem:[%s3569_s10 + $0x38] sm:$0xff]  ;;  %v4039_v0 = vld [vmem:[%s3624_s24 + $0xd0] sm:$0xff]  ;;  %v656_v4 = vand.u32 2147483647, %v640_v24 }
  0x54   : > { %6149 = vst [vmem:[#allocation35_spill] sm:$0xff] %v4013_v63  ;;  %6150 = vst [vmem:[#allocation36_spill] sm:$0xff] %v4017_v45  ;;  %v754_v13 = vsub.f32 %v721_v30, %v3254_v48  ;;  %v836_v23 = vsub.f32 %v803_v37, %v3286_v58  ;;  %v3350_v14 = vld [vmem:[%s3629_s29 + $0x128] sm:$0xff]  ;;  %v1567_v17 = vrot.slane %v4036_v6, 1  ;;  %v528_v45 = vand.u32 2147483647, %v512_v31 }
  0x55   : > { %6151 = vst [vmem:[#allocation37_spill] sm:$0xff] %v4021_v9  ;;  %6152 = vst [vmem:[#allocation38_spill] sm:$0xff] %v4024_v57  ;;  %v481_v62 = vmul.f32 %v465_v61, %v3920_v44  ;;  %v561_v19 = vmul.f32 %v545_v10, %v4024_v57  ;;  %v4051_v24 = vsel %vm1553_vm0, %v6154_v20, %v6036_v1  ;;  %v608_v58 = vand.u32 2147483647, %v592_v49  ;;  %v497_v48 = vld [vmem:[%s3624_s24 + $0x30] sm:$0xff]  ;;  %v4077_v28 = vld [vmem:[%s3586_s14 + $0x38] sm:$0xff] }
  0x56   : > { %6153 = vst [vmem:[#allocation39_spill] sm:$0xff] %v4036_v6  ;;  %6155 = vst [vmem:[#allocation40_spill] sm:$0xff] %v4051_v24  ;;  %v577_v30 = vld [vmem:[%s3629_s29 + $0x30] sm:$0xff]  ;;  %v722_v37 = vmul.f32 %v3239_v12, %v3920_v44  ;;  %v804_v31 = vmul.f32 %v3271_v38, %v4024_v57  ;;  %1631 = vrot.lane.b32.xlu0 %v4051_v24, %s3509_s21  ;;  %v6156_v34 = vrot.slane %v3920_v44, 1  ;;  %v900_v1 = vand.u32 2147483647, %v884_v27 }
  0x57   : > { %v1014_v49 = vsub.f32 %v981_v43, %v3318_v7  ;;  %v1096_v47 = vsub.f32 %v1063_v42, %v3350_v14  ;;  %v3287_v9 = vld [vmem:[%s3629_s29 + $0xb0] sm:$0xff]  ;;  %v4071_v24 = vmul.f32 0.01, %v656_v4  ;;  %v770_v16 = vand.u32 2147483647, %v754_v13  ;;  %6158 = vst [vmem:[#allocation42_spill] sm:$0xff] %v4077_v28 }
  0x58   : > { %v4062_v18 = vsel %vm1553_vm0, %v6156_v34, %v1567_v17  ;;  %v3303_v36 = vld [vmem:[%s3598_s17 + $0x130] sm:$0xff]  ;;  %v1144_v34 = vsub.f32 %v3999_v22, %v4002_v3  ;;  %v641_v20 = vsub.f32 %v465_v61, %v545_v10  ;;  %v852_v7 = vand.u32 2147483647, %v836_v23  ;;  %v466_v52 = vld [vmem:[%s3598_s17 + $0x38] sm:$0xff] }
  0x59   : > { %6157 = vst [vmem:[#allocation41_spill] sm:$0xff] %v4062_v18  ;;  %1615 = vrot.lane.b32.xlu1 %v4062_v18, %s3509_s21  ;;  %v3335_v27 = vld [vmem:[%s3603_s20 + $0x130] sm:$0xff]  ;;  %v513_v43 = vsub.f32 %v481_v62, %v497_v48  ;;  %v593_v42 = vsub.f32 %v561_v19, %v577_v30  ;;  %v885_v14 = vsub.f32 %v3239_v12, %v3271_v38  ;;  %v546_v35 = vld [vmem:[%s3603_s20 + $0x38] sm:$0xff]  ;;  %v1030_v22 = vand.u32 2147483647, %v1014_v49 }
  0x5a   : > { %v624_v4 = vadd.f32 %v608_v58, %v528_v45  ;;  %v755_v18 = vsub.f32 %v722_v37, %v3255_v5  ;;  %v837_v13 = vsub.f32 %v804_v31, %v3287_v9  ;;  %v982_v33 = vmul.f32 %v3303_v36, %v3920_v44  ;;  %v3319_v10 = vld [vmem:[%s3624_s24 + $0x130] sm:$0xff]  ;;  %v498_v45 = vld [vmem:[%s3624_s24 + $0x38] sm:$0xff] }
  0x5b   : > { %v1112_v3 = vand.u32 2147483647, %v1096_v47  ;;  %v1064_v61 = vmul.f32 %v3335_v27, %v4024_v57  ;;  %v3351_v23 = vld [vmem:[%s3629_s29 + $0x130] sm:$0xff]  ;;  %v6159_v19 = vrot.slane %v3665_v54, 1  ;;  %v1160_v12 = vand.u32 2147483647, %v1144_v34 }
  0x5c   : > { %v657_v62 = vand.u32 2147483647, %v641_v20  ;;  %v482_v48 = vmul.f32 %v466_v52, %v4036_v6  ;;  %v562_v9 = vmul.f32 %v546_v35, %v4077_v28  ;;  %v578_v5 = vld [vmem:[%s3629_s29 + $0x38] sm:$0xff]  ;;  %v529_v47 = vand.u32 2147483647, %v513_v43 }
  0x5d   : > { %v4088_v38 = vsel %vm1553_vm0, %v1567_v17, %v6159_v19  ;;  %v609_v58 = vand.u32 2147483647, %v593_v42  ;;  %v901_v30 = vand.u32 2147483647, %v885_v14  ;;  %v6161_v54 = vrot.slane %v3812_v15, 1  ;;  %v3240_v42 = vld [vmem:[%s3598_s17 + $0xb8] sm:$0xff] }
  0x5e   : > { %6160 = vst [vmem:[#allocation43_spill] sm:$0xff] %v4088_v38  ;;  %1617 = vrot.lane.b32.xlu1 %v4088_v38, %s3509_s21  ;;  %v6162_v17 = vrot.slane %v3734_v21, 1  ;;  %v771_v31 = vand.u32 2147483647, %v755_v18  ;;  %v853_v20 = vand.u32 2147483647, %v837_v13  ;;  %v1015_v49 = vsub.f32 %v982_v33, %v3319_v10 }
  0x5f   : > { %v1145_v34 = vsub.f32 %v3303_v36, %v3335_v27  ;;  %v868_v19 = vadd.f32 %v852_v7, %v770_v16  ;;  %v916_v57 = vmul.f32 0.01, %v900_v1  ;;  %v1097_v38 = vsub.f32 %v1064_v61, %v3351_v23  ;;  %v3272_v21 = vld [vmem:[%s3603_s20 + $0xb8] sm:$0xff] }
  0x60   : > { %v4101_v37 = vsel %vm1553_vm0, %v6162_v17, %v6161_v54  ;;  %v642_v43 = vsub.f32 %v466_v52, %v546_v35  ;;  %v1128_v44 = vadd.f32 %v1112_v3, %v1030_v22  ;;  %v1176_v14 = vmul.f32 0.01, %v1160_v12  ;;  %v4108_v36 = vld [vmem:[%s3598_s17 + $0x138] sm:$0xff] }
  0x61   : > { %6163 = vst [vmem:[#allocation44_spill] sm:$0xff] %v4101_v37  ;;  %v514_v32 = vsub.f32 %v482_v48, %v498_v45  ;;  %v594_v15 = vsub.f32 %v562_v9, %v578_v5  ;;  %v625_v18 = vadd.f32 %v609_v58, %v529_v47  ;;  %v673_v13 = vmul.f32 0.01, %v657_v62  ;;  %v4111_v16 = vld [vmem:[%s3603_s20 + $0x138] sm:$0xff] }
  0x62   : > { %1621 = vrot.lane.b32.xlu1 %v4101_v37, %s3509_s21  ;;  %v917_v33 = vmul.f32 0.01, %v901_v30  ;;  %v6164_v35 = vrot.slane %v3908_v40, 1  ;;  %v6165_v52 = vrot.slane %v3815_v25, 1  ;;  %v869_v27 = vadd.f32 %v853_v20, %v771_v31  ;;  %v3256_v23 = vld [vmem:[%s3624_s24 + $0xb8] sm:$0xff] }
  0x63   : > { %v1031_v7 = vand.u32 2147483647, %v1015_v49  ;;  %v1161_v22 = vand.u32 2147483647, %v1145_v34  ;;  %v723_v3 = vmul.f32 %v3240_v42, %v4036_v6  ;;  %v1113_v10 = vand.u32 2147483647, %v1097_v38 }
  0x64   : > { %v4118_v1 = vsel %vm1553_vm0, %v6165_v52, %v6164_v35  ;;  %v658_v61 = vand.u32 2147483647, %v642_v43  ;;  %v805_v12 = vmul.f32 %v3272_v21, %v4077_v28  ;;  %v886_v62 = vsub.f32 %v3240_v42, %v3272_v21  ;;  %v3288_v9 = vld [vmem:[%s3629_s29 + $0xb8] sm:$0xff]  ;;  %v4158_v34 = vld [vmem:[%s3586_s14 + $0x50] sm:$0xff]  ;;  %v4173_v43 = vld [vmem:[%s3586_s14 + $0x68] sm:$0xff] }
  0x65   : > { %6166 = vst [vmem:[#allocation45_spill] sm:$0xff] %v4118_v1  ;;  %v530_v48 = vand.u32 2147483647, %v514_v32  ;;  %v610_v45 = vand.u32 2147483647, %v594_v15  ;;  %v4126_v5 = vmul.f32 %v4108_v36, %v4036_v6  ;;  %v4129_v47 = vld [vmem:[%s3624_s24 + $0x138] sm:$0xff]  ;;  %v4133_v38 = vmul.f32 %v4111_v16, %v4077_v28 }
  0x66   : > { %1625 = vrot.lane.b32.xlu1 %v4118_v1, %s3509_s21  ;;  %v6167_v32 = vsub.f32 %v3994_v56, %v4039_v0  ;;  %v4143_v30 = vadd.f32 %v4071_v24, %v624_v4  ;;  %v4145_v54 = vadd.f32 %v916_v57, %v868_v19  ;;  %v4148_v17 = vld [vmem:[%s3629_s29 + $0x138] sm:$0xff]  ;;  %v6171_v31 = vrot.slane %v3990_v11, 1  ;;  %6174 = vst [vmem:[#allocation50_spill] sm:$0xff] %v4158_v34  ;;  %v4170_v19 = vld [vmem:[%s3586_s14 + $0x60] sm:$0xff]  ;;  %v4176_v42 = vld [vmem:[%s3586_s14 + $0x70] sm:$0xff] }
  0x67   : > { %v6172_v20 = vrot.slane %v3911_v46, 1  ;;  %v4161_v0 = vld [vmem:[%s3586_s14 + $0x58] sm:$0xff]  ;;  %v4163_v56 = vadd.f32 %v1176_v14, %v1128_v44  ;;  %v4165_v57 = vadd.f32 %v673_v13, %v625_v18  ;;  %v4167_v24 = vadd.f32 %v917_v33, %v869_v27  ;;  %6179 = vst [vmem:[#allocation55_spill] sm:$0xff] %v4170_v19  ;;  %6180 = vst [vmem:[#allocation56_spill] sm:$0xff] %v4173_v43  ;;  %v4179_v15 = vld [vmem:[%s3598_s17 + $0x60] sm:$0xff] }
  0x68   : > { %v4140_v58 = vand.u32 2147483647, %v6167_v32  ;;  %6169 = vst [vmem:[#allocation47_spill] sm:$0xff] %v4143_v30  ;;  %6170 = vst [vmem:[#allocation48_spill] sm:$0xff] %v4145_v54  ;;  %v756_v4 = vsub.f32 %v723_v3, %v3256_v23  ;;  %v4182_v21 = vld [vmem:[%s3598_s17 + $0x68] sm:$0xff]  ;;  %v4185_v44 = vld [vmem:[%s3598_s17 + $0x70] sm:$0xff]  ;;  %v4187_v14 = vadd.f32 %v1113_v10, %v1031_v7  ;;  %v838_v33 = vsub.f32 %v805_v12, %v3288_v9 }
  0x69   : > { %v4155_v49 = vsel %vm1553_vm0, %v6172_v20, %v6171_v31  ;;  %6175 = vst [vmem:[#allocation51_spill] sm:$0xff] %v4161_v0  ;;  %6176 = vst [vmem:[#allocation52_spill] sm:$0xff] %v4163_v56  ;;  %v4189_v18 = vmul.f32 0.01, %v1161_v22  ;;  %v4191_v13 = vmul.f32 0.01, %v658_v61  ;;  %v4202_v3 = vadd.f32 %v610_v45, %v530_v48 }
  0x6a   : > { %6168 = vst [vmem:[#allocation46_spill] sm:$0xff] %v4140_v58  ;;  %6173 = vst [vmem:[#allocation49_spill] sm:$0xff] %v4155_v49  ;;  %v4194_v35 = vld [vmem:[%s3586_s14 + $0x78] sm:$0xff]  ;;  %v4197_v52 = vld [vmem:[%s3603_s20 + $0x50] sm:$0xff]  ;;  %v902_v23 = vand.u32 2147483647, %v886_v62  ;;  %v1016_v7 = vsub.f32 %v4126_v5, %v4129_v47  ;;  %v1098_v22 = vsub.f32 %v4133_v38, %v4148_v17  ;;  %1629 = vrot.lane.b32.xlu1 %v4155_v49, %s3509_s21 }
  0x6b   : > { %6177 = vst [vmem:[#allocation53_spill] sm:$0xff] %v4165_v57  ;;  %6178 = vst [vmem:[#allocation54_spill] sm:$0xff] %v4167_v24  ;;  %v4200_v27 = vld [vmem:[%s3603_s20 + $0x58] sm:$0xff]  ;;  %v4211_v10 = vld [vmem:[%s3603_s20 + $0x60] sm:$0xff]  ;;  %v6185_v62 = vrot.slane %v4005_v41, 1  ;;  %v487_v9 = vmul.f32 %v4179_v15, %v3908_v40  ;;  %v488_v5 = vmul.f32 %v4182_v21, %v3911_v46  ;;  %v489_v47 = vmul.f32 %v4185_v44, %v3990_v11 }
  0x6c   : > { %6181 = vst [vmem:[#allocation57_spill] sm:$0xff] %v4176_v42  ;;  %6182 = vst [vmem:[#allocation58_spill] sm:$0xff] %v4187_v14  ;;  %v4214_v61 = vld [vmem:[%s3603_s20 + $0x68] sm:$0xff]  ;;  %v4217_v12 = vld [vmem:[%s3603_s20 + $0x70] sm:$0xff]  ;;  %v772_v17 = vand.u32 2147483647, %v756_v4  ;;  %v1146_v31 = vsub.f32 %v4108_v36, %v4111_v16  ;;  %v565_v37 = vmul.f32 %v4197_v52, %v4158_v34  ;;  %v566_v1 = vmul.f32 %v4200_v27, %v4161_v0 }
  0x6d   : > { %6183 = vst [vmem:[#allocation59_spill] sm:$0xff] %v4189_v18  ;;  %6184 = vst [vmem:[#allocation60_spill] sm:$0xff] %v4194_v35  ;;  %v4222_v48 = vsel %vm1553_vm0, %v6185_v62, 0.0  ;;  %v4225_v45 = vld [vmem:[%s3598_s17 + $0x78] sm:$0xff]  ;;  %v503_v20 = vld [vmem:[%s3624_s24 + $0x60] sm:$0xff]  ;;  %v567_v4 = vmul.f32 %v4211_v10, %v4170_v19  ;;  %v568_v36 = vmul.f32 %v4214_v61, %v4173_v43  ;;  %v569_v16 = vmul.f32 %v4217_v12, %v4176_v42 }
  0x6e   : > { %6186 = vst [vmem:[#allocation61_spill] sm:$0xff] %v4222_v48  ;;  %v502_v38 = vld [vmem:[%s3624_s24 + $0x58] sm:$0xff]  ;;  %v504_v62 = vld [vmem:[%s3624_s24 + $0x68] sm:$0xff]  ;;  %v505_v49 = vld [vmem:[%s3624_s24 + $0x70] sm:$0xff]  ;;  %v854_v28 = vand.u32 2147483647, %v838_v33  ;;  %1633 = vrot.lane.b32.xlu1 %v4222_v48, %s3509_s21  ;;  %v490_v33 = vmul.f32 %v4225_v45, %v4005_v41  ;;  %v519_v2 = vsub.f32 %v487_v9, %v503_v20 }
  0x6f   : > { %v4235_v32 = vld [vmem:[%s3603_s20 + $0x78] sm:$0xff]  ;;  %v580_v56 = vld [vmem:[%s3629_s29 + $0x48] sm:$0xff]  ;;  %v581_v18 = vld [vmem:[%s3629_s29 + $0x50] sm:$0xff]  ;;  %v4255_v24 = vmul.f32 0.01, %v902_v23  ;;  %v518_v57 = vsub.f32 %v3986_v60, %v502_v38  ;;  %v520_v23 = vsub.f32 %v488_v5, %v504_v62 }
  0x70   : > { %v582_v14 = vld [vmem:[%s3629_s29 + $0x58] sm:$0xff]  ;;  %v570_v25 = vmul.f32 %v4235_v32, %v4194_v35  ;;  %v583_v6 = vld [vmem:[%s3629_s29 + $0x60] sm:$0xff]  ;;  %v584_v54 = vld [vmem:[%s3629_s29 + $0x68] sm:$0xff]  ;;  %v1032_v58 = vand.u32 2147483647, %v1016_v7  ;;  %v596_v48 = vsub.f32 %v3822_v26, %v580_v56  ;;  %v597_v19 = vsub.f32 %v565_v37, %v581_v18 }
  0x71   : > { %6187 = vst [vmem:[#allocation62_spill] sm:$0xff] %v4255_v24  ;;  %v585_v30 = vld [vmem:[%s3629_s29 + $0x70] sm:$0xff]  ;;  %v506_v59 = vld [vmem:[%s3624_s24 + $0x78] sm:$0xff]  ;;  %v521_v24 = vsub.f32 %v489_v47, %v505_v49  ;;  %v1114_v43 = vand.u32 2147483647, %v1098_v22  ;;  %v598_v63 = vsub.f32 %v566_v1, %v582_v14  ;;  %v599_v60 = vsub.f32 %v567_v4, %v583_v6  ;;  %v3474_v41 = vld [vmem:[%s3569_s10] sm:$0xff] }
  0x72   : > { %v586_v42 = vld [vmem:[%s3629_s29 + $0x78] sm:$0xff]  ;;  %v1162_v0 = vand.u32 2147483647, %v1146_v31  ;;  %v600_v38 = vsub.f32 %v568_v36, %v584_v54  ;;  %v601_v34 = vsub.f32 %v569_v16, %v585_v30  ;;  %v4270_v35 = vadd.f32 %v854_v28, %v772_v17  ;;  %1727 = vrot.lane.b32.xlu1 %v3474_v41, %s3509_s21  ;;  %v3475_v56 = vld [vmem:[%s3569_s10 + $0x8] sm:$0xff]  ;;  %v4337_v20 = vld [vmem:[%s3603_s20 + $0xe0] sm:$0xff] }
  0x73   : > { %v522_v7 = vsub.f32 %v490_v33, %v506_v59  ;;  %v534_v11 = vand.u32 2147483647, %v518_v57  ;;  %v602_v9 = vsub.f32 %v570_v25, %v586_v42  ;;  %v535_v5 = vand.u32 2147483647, %v519_v2  ;;  %v4340_v62 = vld [vmem:[%s3603_s20 + $0xe8] sm:$0xff]  ;;  %v6191_v16 = vld [vmem:[#allocation32_spill] sm:$0xff] }
  0x74   : > { %v536_v49 = vand.u32 2147483647, %v520_v23  ;;  %v537_v22 = vand.u32 2147483647, %v521_v24  ;;  %v645_v26 = vsub.f32 %v3898_v50, %v4197_v52  ;;  %v612_v37 = vand.u32 2147483647, %v596_v48 }
  0x75   : > { %v613_v1 = vand.u32 2147483647, %v597_v19  ;;  %v614_v6 = vand.u32 2147483647, %v598_v63  ;;  %v646_v28 = vsub.f32 %v3950_v55, %v4200_v27  ;;  %v615_v30 = vand.u32 2147483647, %v599_v60 }
  0x76   : > { %v616_v54 = vand.u32 2147483647, %v600_v38  ;;  %v617_v41 = vand.u32 2147483647, %v601_v34  ;;  %v647_v25 = vsub.f32 %v4179_v15, %v4211_v10  ;;  %v538_v2 = vand.u32 2147483647, %v522_v7  ;;  %1729 = vrot.lane.b32.xlu1 %v3475_v56, %s3509_s21 }
  0x77   : > { %v618_v59 = vand.u32 2147483647, %v602_v9  ;;  %v648_v50 = vsub.f32 %v4182_v21, %v4214_v61  ;;  %v649_v63 = vsub.f32 %v4185_v44, %v4217_v12  ;;  %v4286_v55 = vadd.f32 %v1114_v43, %v1032_v58  ;;  %v4293_v19 = vld [vmem:[%s3598_s17 + $0xe0] sm:$0xff]  ;;  %v4302_v43 = vld [vmem:[%s3598_s17 + $0xe8] sm:$0xff]  ;;  %v4308_v44 = vld [vmem:[%s3598_s17 + $0xf8] sm:$0xff] }
  0x78   : > { %v4288_v34 = vmul.f32 0.01, %v1162_v0  ;;  %v650_v57 = vsub.f32 %v4225_v45, %v4235_v32  ;;  %v661_v24 = vand.u32 2147483647, %v645_v26  ;;  %v628_v42 = vadd.f32 %v612_v37, %v3819_v51  ;;  %v4305_v0 = vld [vmem:[%s3598_s17 + $0xf0] sm:$0xff]  ;;  %v3260_v51 = vld [vmem:[%s3624_s24 + $0xd8] sm:$0xff] }
  0x79   : > { %6188 = vst [vmem:[#allocation63_spill] sm:$0xff] %v4286_v55  ;;  %v4297_v15 = vadd.f32 %v613_v1, %v4009_v53  ;;  %v4299_v21 = vadd.f32 %v614_v6, %v534_v11  ;;  %v662_v58 = vand.u32 2147483647, %v646_v28  ;;  %v4310_v14 = vadd.f32 %v615_v30, %v535_v5  ;;  %v4318_v11 = vld [vmem:[%s3603_s20 + $0xd0] sm:$0xff]  ;;  %v4321_v27 = vld [vmem:[%s3603_s20 + $0xd8] sm:$0xff]  ;;  %v3262_v33 = vld [vmem:[%s3624_s24 + $0xe8] sm:$0xff] }
  0x7a   : > { %6189 = vst [vmem:[#allocation64_spill] sm:$0xff] %v4288_v34  ;;  %v4312_v18 = vadd.f32 %v616_v54, %v536_v49  ;;  %v4314_v52 = vadd.f32 %v617_v41, %v537_v22  ;;  %v663_v53 = vand.u32 2147483647, %v647_v25  ;;  %v4323_v10 = vadd.f32 %v618_v59, %v538_v2  ;;  %v3476_v45 = vld [vmem:[%s3569_s10 + $0x10] sm:$0xff]  ;;  %v6192_v38 = vld [vmem:[#allocation33_spill] sm:$0xff]  ;;  %v6193_v5 = vld [vmem:[#allocation50_spill] sm:$0xff] }
  0x7b   : > { %v664_v61 = vand.u32 2147483647, %v648_v50  ;;  %v665_v12 = vand.u32 2147483647, %v649_v63  ;;  %v676_v48 = vmul.f32 0.01, %v3828_v29  ;;  %1731 = vrot.lane.b32.xlu1 %v3476_v45, %s3509_s21  ;;  %v4332_v17 = vadd.f32 %v4191_v13, %v4202_v3 }
  0x7c   : > { %6190 = vst [vmem:[#allocation65_spill] sm:$0xff] %v4323_v10  ;;  %v666_v47 = vand.u32 2147483647, %v650_v57  ;;  %v4328_v32 = vmul.f32 0.01, %v661_v24  ;;  %v728_v31 = vmul.f32 %v4293_v19, %v3908_v40  ;;  %v4346_v4 = vadd.f32 %v3849_v39, %v3876_v8  ;;  %v3261_v3 = vld [vmem:[%s3624_s24 + $0xe0] sm:$0xff] }
  0x7d   : > { %v4342_v29 = vmul.f32 0.01, %v662_v58  ;;  %v729_v36 = vmul.f32 %v4302_v43, %v3911_v46  ;;  %v730_v13 = vmul.f32 %v4305_v0, %v6191_v16  ;;  %v3263_v23 = vld [vmem:[%s3624_s24 + $0xf0] sm:$0xff]  ;;  %v4355_v60 = vmul.f32 0.01, %v663_v53  ;;  %v3264_v39 = vld [vmem:[%s3624_s24 + $0xf8] sm:$0xff] }
  0x7e   : > { %v731_v7 = vmul.f32 %v4308_v44, %v6192_v38  ;;  %v3279_v8 = vld [vmem:[%s3603_s20 + $0xf0] sm:$0xff]  ;;  %v4362_v9 = vld [vmem:[%s3603_s20 + $0xf8] sm:$0xff]  ;;  %v808_v49 = vmul.f32 %v4318_v11, %v6193_v5  ;;  %v6194_v22 = vld [vmem:[#allocation51_spill] sm:$0xff]  ;;  %v4368_v37 = vmul.f32 0.01, %v664_v61  ;;  %v4382_v57 = vadd.f32 %v676_v48, %v628_v42 }
  0x7f   : > { %v809_v26 = vmul.f32 %v4321_v27, %v6194_v22  ;;  %v6195_v1 = vld [vmem:[#allocation35_spill] sm:$0xff]  ;;  %v6197_v54 = vld [vmem:[#allocation56_spill] sm:$0xff]  ;;  %v3292_v59 = vld [vmem:[%s3629_s29 + $0xd8] sm:$0xff]  ;;  %v681_v63 = vmul.f32 0.01, %v665_v12  ;;  %v761_v24 = vsub.f32 %v728_v31, %v3261_v3  ;;  %v763_v61 = vsub.f32 %v730_v13, %v3263_v23 }
  0x80   : > { %v760_v6 = vsub.f32 %v6195_v1, %v3260_v51  ;;  %v6196_v28 = vld [vmem:[#allocation55_spill] sm:$0xff]  ;;  %v811_v41 = vmul.f32 %v4340_v62, %v6197_v54  ;;  %v3291_v2 = vld [vmem:[%s3629_s29 + $0xd0] sm:$0xff]  ;;  %v3477_v50 = vld [vmem:[%s3569_s10 + $0x18] sm:$0xff]  ;;  %v4380_v56 = vmul.f32 0.01, %v666_v47  ;;  %v762_v51 = vsub.f32 %v729_v36, %v3262_v33 }
  0x81   : > { %v810_v30 = vmul.f32 %v4337_v20, %v6196_v28  ;;  %v3290_v25 = vld [vmem:[%s3629_s29 + $0xc8] sm:$0xff]  ;;  %1733 = vrot.lane.b32.xlu1 %v3477_v50, %s3509_s21  ;;  %v3293_v58 = vld [vmem:[%s3629_s29 + $0xe0] sm:$0xff]  ;;  %v6199_v45 = vld [vmem:[#allocation57_spill] sm:$0xff]  ;;  %v764_v55 = vsub.f32 %v731_v7, %v3264_v39  ;;  %v841_v12 = vsub.f32 %v808_v49, %v3291_v2  ;;  %v842_v47 = vsub.f32 %v809_v26, %v3292_v59 }
  0x82   : > { %6198 = vst [vmem:[#allocation32_spill] sm:$0xff] %v4380_v56  ;;  %v3294_v53 = vld [vmem:[%s3629_s29 + $0xe8] sm:$0xff]  ;;  %v812_v1 = vmul.f32 %v3279_v8, %v6199_v45  ;;  %v6200_v10 = vld [vmem:[#allocation60_spill] sm:$0xff]  ;;  %v3296_v28 = vld [vmem:[%s3629_s29 + $0xf8] sm:$0xff]  ;;  %v776_v56 = vand.u32 2147483647, %v760_v6  ;;  %v891_v7 = vsub.f32 %v4293_v19, %v4337_v20 }
  0x83   : > { %v813_v34 = vmul.f32 %v4362_v9, %v6200_v10  ;;  %v3295_v54 = vld [vmem:[%s3629_s29 + $0xf0] sm:$0xff]  ;;  %v6201_v38 = vld [vmem:[#allocation17_spill] sm:$0xff]  ;;  %v843_v42 = vsub.f32 %v810_v30, %v3293_v58  ;;  %v844_v48 = vsub.f32 %v811_v41, %v3294_v53  ;;  %v6203_v36 = vld [vmem:[#allocation6_spill] sm:$0xff]  ;;  %v777_v13 = vand.u32 2147483647, %v761_v24 }
  0x84   : > { %v840_v50 = vsub.f32 %v6201_v38, %v3290_v25  ;;  %v6202_v31 = vld [vmem:[#allocation25_spill] sm:$0xff]  ;;  %v6204_v33 = vld [vmem:[#allocation27_spill] sm:$0xff]  ;;  %v892_v38 = vsub.f32 %v4302_v43, %v4340_v62  ;;  %v778_v39 = vand.u32 2147483647, %v762_v51  ;;  %v779_v49 = vand.u32 2147483647, %v763_v61 }
  0x85   : > { %v889_v3 = vsub.f32 %v6202_v31, %v4318_v11  ;;  %1735 = vrot.lane.b32.xlu1 %v6203_v36, %s3509_s21  ;;  %v890_v23 = vsub.f32 %v6204_v33, %v4321_v27  ;;  %v845_v26 = vsub.f32 %v812_v1, %v3295_v54  ;;  %v846_v6 = vsub.f32 %v813_v34, %v3296_v28  ;;  %v6205_v19 = vld [vmem:[#allocation12_spill] sm:$0xff]  ;;  %v6206_v58 = vld [vmem:[#allocation18_spill] sm:$0xff]  ;;  %v4430_v36 = vld [vmem:[%s3598_s17 + $0x158] sm:$0xff] }
  0x86   : > { %v856_v30 = vand.u32 2147483647, %v840_v50  ;;  %v857_v41 = vand.u32 2147483647, %v841_v12  ;;  %v858_v11 = vand.u32 2147483647, %v842_v47  ;;  %v893_v25 = vsub.f32 %v4305_v0, %v3279_v8 }
  0x87   : > { %v859_v2 = vand.u32 2147483647, %v843_v42  ;;  %v860_v59 = vand.u32 2147483647, %v844_v48  ;;  %v894_v27 = vsub.f32 %v4308_v44, %v4362_v9  ;;  %v905_v24 = vand.u32 2147483647, %v889_v3 }
  0x88   : > { %v693_v43 = vadd.f32 %v4328_v32, %v4297_v15  ;;  %v906_v20 = vand.u32 2147483647, %v890_v23  ;;  %v907_v62 = vand.u32 2147483647, %v891_v7  ;;  %v908_v34 = vand.u32 2147483647, %v892_v38 }
  0x89   : > { %1737 = vrot.lane.b32.xlu1 %v6205_v19, %s3509_s21  ;;  %v4411_v28 = vadd.f32 %v4342_v29, %v4299_v21  ;;  %v780_v0 = vand.u32 2147483647, %v764_v55  ;;  %v861_v8 = vand.u32 2147483647, %v845_v26  ;;  %v862_v54 = vand.u32 2147483647, %v846_v6 }
  0x8a   : > { %v872_v53 = vadd.f32 %v856_v30, %v6206_v58  ;;  %v6207_v44 = vld [vmem:[#allocation46_spill] sm:$0xff]  ;;  %v874_v51 = vadd.f32 %v858_v11, %v776_v56  ;;  %v909_v61 = vand.u32 2147483647, %v893_v25  ;;  %v875_v1 = vadd.f32 %v859_v2, %v777_v13  ;;  %v6208_v15 = vld [vmem:[#allocation21_spill] sm:$0xff]  ;;  %v6209_v47 = vld [vmem:[#allocation19_spill] sm:$0xff] }
  0x8b   : > { %v873_v9 = vadd.f32 %v857_v41, %v6207_v44  ;;  %v910_v50 = vand.u32 2147483647, %v894_v27  ;;  %v920_v32 = vmul.f32 0.01, %v6208_v15  ;;  %v921_v12 = vmul.f32 0.01, %v905_v24 }
  0x8c   : > { %v876_v55 = vadd.f32 %v860_v59, %v778_v39  ;;  %v922_v21 = vmul.f32 0.01, %v906_v20  ;;  %v923_v29 = vmul.f32 0.01, %v907_v62  ;;  %v924_v42 = vmul.f32 0.01, %v908_v34 }
  0x8d   : > { %1739 = vrot.lane.b32.xlu1 %v6209_v47, %s3509_s21  ;;  %v4420_v48 = vadd.f32 %v4355_v60, %v4310_v14  ;;  %v4424_v56 = vadd.f32 %v4368_v37, %v4312_v18  ;;  %v4427_v31 = vadd.f32 %v681_v63, %v4314_v52  ;;  %v877_v3 = vadd.f32 %v861_v8, %v779_v49  ;;  %v6210_v23 = vld [vmem:[#allocation62_spill] sm:$0xff]  ;;  %v6211_v60 = vld [vmem:[#allocation29_spill] sm:$0xff]  ;;  %v4442_v37 = vld [vmem:[%s3598_s17 + $0x168] sm:$0xff] }
  0x8e   : > { %v4432_v13 = vadd.f32 %v862_v54, %v780_v0  ;;  %v925_v33 = vmul.f32 0.01, %v909_v61  ;;  %v934_v14 = vadd.f32 %v6210_v23, %v4270_v35  ;;  %v6212_v7 = vld [vmem:[#allocation22_spill] sm:$0xff]  ;;  %v4445_v52 = vld [vmem:[%s3598_s17 + $0x170] sm:$0xff]  ;;  %v4447_v63 = vmul.f32 0.01, %v910_v50 }
  0x8f   : > { %v935_v38 = vadd.f32 %v6212_v7, %v6211_v60  ;;  %v4439_v18 = vld [vmem:[%s3598_s17 + $0x160] sm:$0xff]  ;;  %v936_v39 = vadd.f32 %v920_v32, %v872_v53  ;;  %v937_v49 = vadd.f32 %v921_v12, %v873_v9  ;;  %v6213_v26 = vld [vmem:[#allocation47_spill] sm:$0xff]  ;;  %v6214_v6 = vld [vmem:[#allocation48_spill] sm:$0xff]  ;;  %v938_v25 = vadd.f32 %v922_v21, %v874_v51 }
  0x90   : > { %v4451_v30 = vadd.f32 %v6214_v6, %v6213_v26  ;;  %v3323_v35 = vld [vmem:[%s3624_s24 + $0x150] sm:$0xff]  ;;  %v4455_v41 = vld [vmem:[%s3603_s20 + $0x148] sm:$0xff]  ;;  %v4459_v2 = vadd.f32 %v923_v29, %v875_v1  ;;  %v4461_v59 = vadd.f32 %v924_v42, %v876_v55  ;;  %v4464_v27 = vld [vmem:[%s3598_s17 + $0x178] sm:$0xff]  ;;  %v988_v8 = vmul.f32 %v4439_v18, %v3908_v40  ;;  %s4872_s17 = scalar_lea.vmem %s6017_s8, %s3445_s13 }
  0x91   : > { %v6215_v11 = vld [vmem:[#allocation39_spill] sm:$0xff]  ;;  %v6216_v24 = vld [vmem:[#allocation10_spill] sm:$0xff]  ;;  %v4469_v20 = vld [vmem:[%s3603_s20 + $0x150] sm:$0xff]  ;;  %v989_v54 = vmul.f32 %v4442_v37, %v3911_v46  ;;  %v990_v58 = vmul.f32 %v4445_v52, %v6191_v16  ;;  %v4486_v51 = vadd.f32 %v925_v33, %v877_v3  ;;  %v4489_v61 = vadd.f32 %v934_v14, %v4332_v17 }
  0x92   : > { %1741 = vrot.lane.b32.xlu1 %v6215_v11, %s3509_s21  ;;  %v987_v19 = vmul.f32 %v4430_v36, %v6216_v24  ;;  %v6217_v62 = vld [vmem:[#allocation53_spill] sm:$0xff]  ;;  %v6218_v34 = vld [vmem:[#allocation54_spill] sm:$0xff]  ;;  %v3326_v50 = vld [vmem:[%s3624_s24 + $0x168] sm:$0xff]  ;;  %v4498_v47 = vadd.f32 %v935_v38, %v4346_v4  ;;  %v4501_v55 = vadd.f32 %v936_v39, %v4382_v57  ;;  %v4503_v21 = vadd.f32 %v937_v49, %v693_v43 }
  0x93   : > { %v4473_v0 = vadd.f32 %v6218_v34, %v6217_v62  ;;  %v3324_v53 = vld [vmem:[%s3624_s24 + $0x158] sm:$0xff]  ;;  %v3353_v9 = vld [vmem:[%s3629_s29 + $0x140] sm:$0xff]  ;;  %v3327_v46 = vld [vmem:[%s3624_s24 + $0x170] sm:$0xff]  ;;  %v1068_v42 = vmul.f32 %v4469_v20, %v6193_v5  ;;  %v4517_v4 = vadd.f32 %v938_v25, %v4411_v28  ;;  %v1022_v26 = vsub.f32 %v989_v54, %v3326_v50 }
  0x94   : > { %v4483_v44 = vld [vmem:[%s3603_s20 + $0x158] sm:$0xff]  ;;  %v3325_v1 = vld [vmem:[%s3624_s24 + $0x160] sm:$0xff]  ;;  %v6220_v12 = vld [vmem:[#allocation8_spill] sm:$0xff]  ;;  %v1020_v57 = vsub.f32 %v987_v19, %v3324_v53  ;;  %v1023_v6 = vsub.f32 %v990_v58, %v3327_v46 }
  0x95   : > { %v6219_v15 = vld [vmem:[#allocation37_spill] sm:$0xff]  ;;  %v1067_v16 = vmul.f32 %v4455_v41, %v6220_v12  ;;  %v4506_v17 = vld [vmem:[%s3603_s20 + $0x160] sm:$0xff]  ;;  %v4509_v29 = vld [vmem:[%s3603_s20 + $0x168] sm:$0xff]  ;;  %v1069_v14 = vmul.f32 %v4483_v44, %v6194_v22  ;;  %v1021_v28 = vsub.f32 %v988_v8, %v3325_v1 }
  0x96   : > { %v1019_v32 = vsub.f32 %v6219_v15, %v3323_v35  ;;  %v3354_v3 = vld [vmem:[%s3629_s29 + $0x148] sm:$0xff]  ;;  %v4520_v23 = vld [vmem:[%s3603_s20 + $0x170] sm:$0xff]  ;;  %v4523_v43 = vld [vmem:[%s3603_s20 + $0x178] sm:$0xff] }
  0x97   : > { %v3478_v33 = vld [vmem:[%s3569_s10 + $0x48] sm:$0xff]  ;;  %v3355_v60 = vld [vmem:[%s3629_s29 + $0x150] sm:$0xff]  ;;  %v6222_v39 = vld [vmem:[#allocation33_spill] sm:$0xff]  ;;  %v1100_v53 = vsub.f32 %v1067_v16, %v3354_v3  ;;  %v4545_v8 = vmul.f32 %v4523_v43, %v6200_v10 }
  0x98   : > { %1745 = vrot.lane.b32.xlu1 %v3478_v33, %s3509_s21  ;;  %v6221_v7 = vld [vmem:[#allocation23_spill] sm:$0xff]  ;;  %v4531_v49 = vmul.f32 %v4464_v27, %v6222_v39  ;;  %v3356_v35 = vld [vmem:[%s3629_s29 + $0x158] sm:$0xff]  ;;  %v1035_v25 = vand.u32 2147483647, %v1019_v32  ;;  %v6224_v62 = vld [vmem:[#allocation56_spill] sm:$0xff]  ;;  %v1101_v1 = vsub.f32 %v1068_v42, %v3355_v60 }
  0x99   : > { %v1099_v38 = vsub.f32 %v6221_v7, %v3353_v9  ;;  %v4535_v11 = vld [vmem:[%s3624_s24 + $0x178] sm:$0xff]  ;;  %v6223_v24 = vld [vmem:[#allocation55_spill] sm:$0xff]  ;;  %v1071_v34 = vmul.f32 %v4509_v29, %v6224_v62  ;;  %v1072_v9 = vmul.f32 %v4520_v23, %v6199_v45  ;;  %v3357_v54 = vld [vmem:[%s3629_s29 + $0x160] sm:$0xff]  ;;  %v1036_v32 = vand.u32 2147483647, %v1020_v57 }
  0x9a   : > { %v1070_v19 = vmul.f32 %v4506_v17, %v6223_v24  ;;  %v3358_v58 = vld [vmem:[%s3629_s29 + $0x168] sm:$0xff]  ;;  %v6225_v50 = vld [vmem:[#allocation16_spill] sm:$0xff]  ;;  %v4555_v33 = vld [vmem:[%s3629_s29 + $0x178] sm:$0xff]  ;;  %v1102_v16 = vsub.f32 %v1069_v14, %v3356_v35  ;;  %v1024_v45 = vsub.f32 %v4531_v49, %v4535_v11  ;;  %v1037_v42 = vand.u32 2147483647, %v1021_v28 }
  0x9b   : > { %v1148_v46 = vsub.f32 %v6225_v50, %v4455_v41  ;;  %v3479_v15 = vld [vmem:[%s3569_s10 + $0x50] sm:$0xff]  ;;  %v1115_v3 = vand.u32 2147483647, %v1099_v38  ;;  %v1038_v60 = vand.u32 2147483647, %v1022_v26  ;;  %v1104_v50 = vsub.f32 %v1071_v34, %v3358_v58  ;;  %v6227_v28 = vld [vmem:[#allocation26_spill] sm:$0xff] }
  0x9c   : > { %1747 = vrot.lane.b32.xlu1 %v3479_v15, %s3509_s21  ;;  %v3359_v12 = vld [vmem:[%s3629_s29 + $0x170] sm:$0xff]  ;;  %v4561_v62 = vand.u32 2147483647, %v1023_v6  ;;  %v1103_v41 = vsub.f32 %v1070_v19, %v3357_v54  ;;  %v1116_v15 = vand.u32 2147483647, %v1100_v53  ;;  %v1150_v57 = vsub.f32 %v4430_v36, %v4483_v44  ;;  %v6228_v19 = vld [vmem:[#allocation31_spill] sm:$0xff] }
  0x9d   : > { %v6226_v7 = vld [vmem:[#allocation28_spill] sm:$0xff]  ;;  %v1105_v24 = vsub.f32 %v1072_v9, %v3359_v12  ;;  %v1106_v14 = vsub.f32 %v4545_v8, %v4555_v33  ;;  %v1117_v38 = vand.u32 2147483647, %v1101_v1  ;;  %v1164_v35 = vand.u32 2147483647, %v1148_v46  ;;  %v6229_v53 = vld [vmem:[#allocation58_spill] sm:$0xff] }
  0x9e   : > { %v1149_v10 = vsub.f32 %v6226_v7, %v4469_v20  ;;  %v3480_v20 = vld [vmem:[%s3569_s10 + $0x58] sm:$0xff]  ;;  %v1118_v49 = vand.u32 2147483647, %v1102_v16  ;;  %v1131_v26 = vadd.f32 %v1115_v3, %v6227_v28  ;;  %v1151_v6 = vsub.f32 %v4439_v18, %v4506_v17  ;;  %v6230_v36 = vld [vmem:[#allocation59_spill] sm:$0xff]  ;;  %v6231_v9 = vld [vmem:[#allocation36_spill] sm:$0xff] }
  0x9f   : > { %v1179_v34 = vmul.f32 0.01, %v6228_v19  ;;  %v1193_v44 = vadd.f32 %v6230_v36, %v6229_v53  ;;  %v6232_v54 = vld [vmem:[#allocation34_spill] sm:$0xff]  ;;  %v6233_v58 = vld [vmem:[#allocation9_spill] sm:$0xff]  ;;  %v6234_v1 = vld [vmem:[#allocation11_spill] sm:$0xff]  ;;  %v1152_v3 = vsub.f32 %v4442_v37, %v4509_v29 }
  0xa0   : > { %1749 = vrot.lane.b32.xlu1 %v3480_v20, %s3509_s21  ;;  %v1165_v11 = vand.u32 2147483647, %v1149_v10  ;;  %v1207_v8 = vadd.f32 %v6232_v54, %v6231_v9  ;;  %v1220_v46 = vadd.f32 %v6234_v1, %v6233_v58  ;;  %v1119_v12 = vand.u32 2147483647, %v1103_v41  ;;  %v6235_v33 = vld [vmem:[#allocation30_spill] sm:$0xff]  ;;  %v6236_v10 = vld [vmem:[#allocation63_spill] sm:$0xff] }
  0xa1   : > { %v1132_v16 = vadd.f32 %v1116_v15, %v6235_v33  ;;  %v1166_v7 = vand.u32 2147483647, %v1150_v57  ;;  %v1180_v18 = vmul.f32 0.01, %v1164_v35  ;;  %v6237_v17 = vld [vmem:[#allocation64_spill] sm:$0xff]  ;;  %v6239_v53 = vld [vmem:[#allocation13_spill] sm:$0xff]  ;;  %v1133_v41 = vadd.f32 %v1117_v38, %v1035_v25 }
  0xa2   : > { %v1194_v20 = vadd.f32 %v6237_v17, %v6236_v10  ;;  %v6238_v28 = vld [vmem:[#allocation52_spill] sm:$0xff]  ;;  %v1221_v36 = vadd.f32 %v1220_v46, %v6239_v53  ;;  %v1120_v9 = vand.u32 2147483647, %v1104_v50  ;;  %v1153_v15 = vsub.f32 %v4445_v52, %v4520_v23  ;;  %v3481_v52 = vld [vmem:[%s3569_s10 + $0x68] sm:$0xff]  ;;  %v6240_v17 = vld [vmem:[#allocation65_spill] sm:$0xff] }
  0xa3   : > { %v1208_v19 = vadd.f32 %v6238_v28, %v4451_v30  ;;  %v1167_v37 = vand.u32 2147483647, %v1151_v6  ;;  %v1181_v29 = vmul.f32 0.01, %v1165_v11  ;;  %v1195_v57 = vadd.f32 %v1179_v34, %v1131_v26  ;;  %v4598_v6 = vld [vmem:[%s3586_s14] sm:$0xff] }
  0xa4   : > { %1751 = vrot.lane.b32.xlu1 %v3908_v40, %s3509_s21  ;;  %v1209_v35 = vadd.f32 %v1193_v44, %v4473_v0  ;;  %v1222_v54 = vadd.f32 %v1221_v36, %v1207_v8  ;;  %v1121_v30 = vand.u32 2147483647, %v1105_v24  ;;  %v1134_v58 = vadd.f32 %v1118_v49, %v1036_v32  ;;  %v4602_v24 = vld [vmem:[%s3586_s14 + $0x8] sm:$0xff] }
  0xa5   : > { %v1154_v1 = vsub.f32 %v4464_v27, %v4523_v43  ;;  %v1168_v40 = vand.u32 2147483647, %v1152_v3  ;;  %v1182_v50 = vmul.f32 0.01, %v1166_v7  ;;  %v1196_v46 = vadd.f32 %v1180_v18, %v1132_v16 }
  0xa6   : > { %v1210_v25 = vadd.f32 %v1194_v20, %v4489_v61  ;;  %v1223_v38 = vadd.f32 %v1222_v54, %v1208_v19  ;;  %v1135_v23 = vadd.f32 %v1119_v12, %v1037_v42  ;;  %v1169_v26 = vand.u32 2147483647, %v1153_v15  ;;  %v1606_v15 = vpop.permute.xlu1 %1605  ;;  %v4644_v54 = vld [vmem:[%s3586_s14 + $0x20] sm:$0xff] }
  0xa7   : > { %v1930_v0 = vrot.slane %v4598_v6, 1  ;;  %v1931_v32 = vrot.slane %v4602_v24, 1  ;;  %v1183_v27 = vmul.f32 0.01, %v1167_v37  ;;  %v1197_v43 = vadd.f32 %v1181_v29, %v1133_v41 }
  0xa8   : > { %1753 = vrot.lane.b32.xlu1 %v3481_v52, %s3509_s21  ;;  %v1211_v49 = vadd.f32 %v1195_v57, %v4498_v47  ;;  %v1224_v61 = vadd.f32 %v1223_v38, %v1209_v35  ;;  %v1040_v11 = vand.u32 2147483647, %v1024_v45  ;;  %v1122_v34 = vand.u32 2147483647, %v1106_v14  ;;  %v4616_v45 = vld [vmem:[%s3586_s14 + $0x10] sm:$0xff] }
  0xa9   : > { %v1136_v44 = vadd.f32 %v1120_v9, %v1038_v60  ;;  %v1170_v8 = vand.u32 2147483647, %v1154_v1  ;;  %v1184_v42 = vmul.f32 0.01, %v1168_v40  ;;  %v1198_v12 = vadd.f32 %v1182_v50, %v1134_v58  ;;  %v4633_v9 = vld [vmem:[%s3586_s14 + $0x18] sm:$0xff] }
  0xaa   : > { %v1212_v33 = vadd.f32 %v1196_v46, %v4501_v55  ;;  %v1225_v16 = vadd.f32 %v1224_v61, %v1210_v25  ;;  %v955_v3 = vadd.f32 %v4459_v2, %v4420_v48  ;;  %v1137_v7 = vadd.f32 %v1121_v30, %v4561_v62  ;;  %v1608_v40 = vpop.permute.xlu1 %1607  ;;  %v4653_v46 = vld [vmem:[%s3586_s14 + $0x28] sm:$0xff] }
  0xab   : > { %v4613_v47 = vsel %vm1553_vm0, %v1930_v0, %v1931_v32  ;;  %v1933_v60 = vrot.slane %v4616_v45, 1  ;;  %v1185_v14 = vmul.f32 0.01, %v1169_v26  ;;  %v1199_v18 = vadd.f32 %v1183_v27, %v1135_v23  ;;  %v6242_v26 = vld [vmem:[#allocation38_spill] sm:$0xff] }
  0xac   : > { %1757 = vrot.lane.b32.xlu1 %v6222_v39, %s3509_s21  ;;  %v1213_v55 = vadd.f32 %v1197_v43, %v4503_v21  ;;  %v1226_v10 = vadd.f32 %v1225_v16, %v1211_v49  ;;  %v6241_v39 = vld [vmem:[#allocation32_spill] sm:$0xff]  ;;  %v942_v48 = vadd.f32 %v4447_v63, %v4432_v13  ;;  %v956_v2 = vadd.f32 %v4461_v59, %v4424_v56  ;;  %v6243_v49 = vld [vmem:[#allocation42_spill] sm:$0xff]  ;;  %v4685_v16 = vld [vmem:[%s3586_s14 + $0x48] sm:$0xff] }
  0xad   : > { %v698_v20 = vadd.f32 %v6241_v39, %v6240_v17  ;;  %v1138_v62 = vadd.f32 %v1122_v34, %v1040_v11  ;;  %v1186_v28 = vmul.f32 0.01, %v1170_v8  ;;  %v1200_v19 = vadd.f32 %v1184_v42, %v1136_v44  ;;  %v1604_v11 = vpop.permute.xlu0 %1603  ;;  %v4676_v8 = vld [vmem:[%s3586_s14 + $0x40] sm:$0xff]  ;;  %v6244_v17 = vld [vmem:[#allocation55_spill] sm:$0xff] }
  0xae   : > { %v1214_v53 = vadd.f32 %v1198_v12, %v4517_v4  ;;  %v1227_v36 = vadd.f32 %v1226_v10, %v1212_v33  ;;  %v4630_v21 = vsel %vm1553_vm0, %v1931_v32, %v1933_v60  ;;  %v1935_v13 = vrot.slane %v4633_v9, 1  ;;  %v1610_v32 = vpop.permute.xlu1 %1609 }
  0xaf   : > { %v957_v56 = vadd.f32 %v4486_v51, %v4427_v31  ;;  %v1201_v63 = vadd.f32 %v1185_v14, %v1137_v7  ;;  %v1215_v59 = vadd.f32 %v1199_v18, %v955_v3  ;;  %v958_v4 = vadd.f32 %v942_v48, %v698_v20 }
  0xb0   : > { %1979 = vrot.lane.b32.xlu1 %v4613_v47, %s3509_s21  ;;  %v1228_v41 = vadd.f32 %v1227_v36, %v1213_v55  ;;  %v1202_v37 = vadd.f32 %v1186_v28, %v1138_v62  ;;  %v1216_v29 = vadd.f32 %v1200_v19, %v956_v2  ;;  %v4641_v35 = vsel %vm1553_vm0, %v1933_v60, %v1935_v13  ;;  %v3490_v55 = vld [vmem:[%s3569_s10 + $0x40] sm:$0xff]  ;;  %v6245_v2 = vld [vmem:[#allocation56_spill] sm:$0xff] }
  0xb1   : > { %v1937_v30 = vrot.slane %v4644_v54, 1  ;;  %v1217_v31 = vadd.f32 %v1201_v63, %v957_v56  ;;  %v1939_v25 = vrot.slane %v4653_v46, 1  ;;  %v1941_v0 = vrot.slane %v6242_v26, 1  ;;  %v1620_v33 = vpop.permute.xlu0 %1619 }
  0xb2   : > { %v1229_v57 = vadd.f32 %v1228_v41, %v1214_v53  ;;  %v1218_v58 = vadd.f32 %v1202_v37, %v958_v4  ;;  %v1943_v61 = vrot.slane %v6243_v49, 1  ;;  %v1945_v42 = vrot.slane %v4676_v8, 1  ;;  %v6246_v4 = vld [vmem:[#allocation57_spill] sm:$0xff]  ;;  %v6247_v37 = vld [vmem:[#allocation2_spill] sm:$0xff] }
  0xb3   : > { %v4650_v50 = vsel %vm1553_vm0, %v1935_v13, %v1937_v30  ;;  %v4659_v23 = vsel %vm1553_vm0, %v1937_v30, %v1939_v25  ;;  %v4665_v27 = vsel %vm1553_vm0, %v1939_v25, %v1941_v0  ;;  %v1947_v3 = vrot.slane %v4685_v16, 1 }
  0xb4   : > { %1981 = vrot.lane.b32.xlu1 %v4630_v21, %s3509_s21  ;;  %v1230_v51 = vadd.f32 %v1229_v57, %v1215_v59  ;;  %v4671_v34 = vsel %vm1553_vm0, %v1941_v0, %v1943_v61  ;;  %v4680_v12 = vsel %vm1553_vm0, %v1943_v61, %v1945_v42  ;;  %v1949_v7 = vrot.slane %v6193_v5, 1  ;;  %v3491_v5 = vld [vmem:[%s3569_s10 + $0x70] sm:$0xff]  ;;  %v6252_v61 = vld [vmem:[#allocation14_spill] sm:$0xff] }
  0xb5   : > { %v1612_v43 = vpop.permute.xlu1 %1611  ;;  %v1951_v18 = vrot.slane %v6194_v22, 1  ;;  %v1953_v39 = vrot.slane %v6244_v17, 1  ;;  %v1624_v20 = vpop.permute.xlu0 %1623  ;;  %v1955_v62 = vrot.slane %v6245_v2, 1  ;;  %v1653_v28 = vsel %vm1651_vm1, %v1606_v15, 0.0  ;;  %v6248_v57 = vld [vmem:[#allocation4_spill] sm:$0xff]  ;;  %v6256_v2 = vld [vmem:[#allocation7_spill] sm:$0xff] }
  0xb6   : > { %v1231_v1 = vadd.f32 %v1230_v51, %v1216_v29  ;;  %v4690_v14 = vsel %vm1553_vm0, %v1947_v3, %v1949_v7  ;;  %v1654_v19 = vsel %vm1651_vm1, %v1608_v40, 0.0  ;;  %v1652_v13 = vsel %vm1651_vm1, %v1604_v11, 0.0 }
  0xb7   : > { %v4698_v10 = vsel %vm1553_vm0, %v1949_v7, %v1951_v18  ;;  %v4706_v22 = vsel %vm1553_vm0, %v1951_v18, %v1953_v39  ;;  %v1656_v63 = vsel %vm1651_vm1, %v1612_v43, 0.0  ;;  %v1662_v59 = vsel %vm1651_vm1, %v1624_v20, 0.0  ;;  %v6251_v43 = vld [vmem:[#allocation15_spill] sm:$0xff]  ;;  %v6255_v20 = vld [vmem:[#allocation24_spill] sm:$0xff] }
  0xb8   : > { %1983 = vrot.lane.b32.xlu1 %v4641_v35, %s3509_s21  ;;  %v1232_v38 = vadd.f32 %v1231_v1, %v1217_v31  ;;  %v4718_v41 = vsel %vm1553_vm0, %v1953_v39, %v1955_v62  ;;  %v1957_v15 = vrot.slane %v6246_v4, 1  ;;  %v1669_v29 = vsub.f32 %v1653_v28, %v6247_v37  ;;  %v6249_v31 = vld [vmem:[#allocation41_spill] sm:$0xff]  ;;  %v6250_v1 = vld [vmem:[#allocation3_spill] sm:$0xff] }
  0xb9   : > { %v1670_v30 = vsub.f32 %v1654_v19, %v6248_v57  ;;  %v1668_v40 = vsub.f32 %v1652_v13, %v6250_v1  ;;  %v1660_v25 = vsel %vm1651_vm1, %v1620_v33, 0.0  ;;  %v4729_v26 = vsel %vm1553_vm0, %v1945_v42, %v1947_v3  ;;  %v6253_v18 = vld [vmem:[#allocation43_spill] sm:$0xff]  ;;  %v6257_v19 = vld [vmem:[#allocation5_spill] sm:$0xff] }
  0xba   : > { %v1233_v52 = vadd.f32 %v1232_v38, %v1218_v58  ;;  %v1655_v0 = vsel %vm1651_vm1, %v1610_v32, 0.0  ;;  %v1672_v49 = vsub.f32 %v1656_v63, %v6251_v43  ;;  %v1678_v11 = vsub.f32 %v1662_v59, %v6252_v61  ;;  %v6254_v32 = vld [vmem:[#allocation60_spill] sm:$0xff]  ;;  %v6258_v63 = vld [vmem:[#allocation45_spill] sm:$0xff] }
  0xbb   : > { %v4742_v42 = vsel %vm1553_vm0, %v1955_v62, %v1957_v15  ;;  %v1959_v3 = vrot.slane %v6254_v32, 1  ;;  %v1686_v39 = vand.u32 2147483647, %v1670_v30  ;;  %v1671_v28 = vsub.f32 %v1655_v0, %v6256_v2  ;;  %v6259_v62 = vld [vmem:[#allocation44_spill] sm:$0xff] }
  0xbc   : > { %1985 = vrot.lane.b32.xlu1 %v4650_v50, %s3509_s21  ;;  %1234 = vadd.xlane.f32.xlu0 %v1233_v52  ;;  %v1684_v37 = vand.u32 2147483647, %v1668_v40  ;;  %v1688_v57 = vand.u32 2147483647, %v1672_v49  ;;  %v6261_v40 = vld [vmem:[#allocation49_spill] sm:$0xff] }
  0xbd   : > { %v4756_v1 = vsel %vm1553_vm0, %v1959_v3, 0.0  ;;  %v1687_v49 = vand.u32 2147483647, %v1671_v28 }
  0xbf   : > { %v1614_v44 = vpop.permute.xlu1 %1613  ;;  %v1628_v56 = vpop.permute.xlu0 %1627 }
  0xc0   : > { %1987 = vrot.lane.b32.xlu1 %v4659_v23, %s3509_s21  ;;  %v1657_v38 = vsel %vm1651_vm1, %v1614_v44, 0.0  ;;  %v1664_v30 = vsel %vm1651_vm1, %v1628_v56, 0.0 }
  0xc4   : > { %1989 = vrot.lane.b32.xlu1 %v4665_v27, %s3509_s21 }
  0xc8   : > { %1991 = vrot.lane.b32.xlu1 %v4671_v34, %s3509_s21  ;;  %v1632_v7 = vpop.permute.xlu0 %1631 }
  0xc9   : > { %v1666_v13 = vsel %vm1651_vm1, %v1632_v7, 0.0 }
  0xcb   : > { %v1616_v60 = vpop.permute.xlu1 %1615 }
  0xcc   : > { %1993 = vrot.lane.b32.xlu1 %v4680_v12, %s3509_s21  ;;  %v1658_v53 = vsel %vm1651_vm1, %v1616_v60, 0.0 }
  0xcd   : > { %v1674_v51 = vsub.f32 %v1658_v53, %v6249_v31  ;;  %v1676_v53 = vsub.f32 %v1660_v25, %v6257_v19 }
  0xcf   : > { %v1692_v61 = vand.u32 2147483647, %v1676_v53 }
  0xd0   : > { %1997 = vrot.lane.b32.xlu1 %v4690_v14, %s3509_s21  ;;  %v1618_v48 = vpop.permute.xlu1 %1617 }
  0xd1   : > { %v1659_v58 = vsel %vm1651_vm1, %v1618_v48, 0.0  ;;  %v1673_v48 = vsub.f32 %v1657_v38, %v6255_v20  ;;  %v6263_v20 = vld [vmem:[#allocation61_spill] sm:$0xff] }
  0xd2   : > { %1743 = vrot.lane.b32.xlu0 %v3490_v55, %s3509_s21  ;;  %v1675_v33 = vsub.f32 %v1659_v58, %v6253_v18  ;;  %v1685_v55 = vand.u32 2147483647, %v1669_v29  ;;  %v1694_v29 = vand.u32 2147483647, %v1678_v11  ;;  %v1700_v18 = vmax.f32.f32 %v1684_v37, %v1688_v57 }
  0xd3   : > { %v1689_v25 = vand.u32 2147483647, %v1673_v48 }
  0xd4   : > { %1999 = vrot.lane.b32.xlu1 %v4698_v10, %s3509_s21  ;;  %v1622_v36 = vpop.permute.xlu1 %1621 }
  0xd5   : > { %v1661_v44 = vsel %vm1651_vm1, %v1622_v36, 0.0  ;;  %v1701_v48 = vmax.f32.f32 %v1685_v55, %v1689_v25  ;;  %v3496_v25 = vld [vmem:[%s3586_s14 + $0x68] sm:$0xff] }
  0xd6   : > { %1755 = vrot.lane.b32.xlu0 %v3491_v5, %s3509_s21  ;;  %v1690_v5 = vand.u32 2147483647, %v1674_v51  ;;  %v1677_v31 = vsub.f32 %v1661_v44, %v6259_v62  ;;  %v1691_v51 = vand.u32 2147483647, %v1675_v33  ;;  %v6262_v44 = vld [vmem:[#allocation20_spill] sm:$0xff] }
  0xd7   : > { %v1680_v32 = vsub.f32 %v1664_v30, %v6262_v44 }
  0xd8   : > { %2001 = vrot.lane.b32.xlu1 %v4706_v22, %s3509_s21  ;;  %v1626_v52 = vpop.permute.xlu1 %1625  ;;  %v1702_v38 = vmax.f32.f32 %v1686_v39, %v1690_v5  ;;  %v1693_v11 = vand.u32 2147483647, %v1677_v31  ;;  %v1703_v33 = vmax.f32.f32 %v1687_v49, %v1691_v51  ;;  %v3495_v51 = vld [vmem:[%s3586_s14 + $0x58] sm:$0xff] }
  0xd9   : > { %v1663_v60 = vsel %vm1651_vm1, %v1626_v52, 0.0  ;;  %v6260_v52 = vld [vmem:[#allocation40_spill] sm:$0xff] }
  0xda   : > { %v1679_v36 = vsub.f32 %v1663_v60, %v6258_v63  ;;  %v1682_v0 = vsub.f32 %v1666_v13, %v6260_v52  ;;  %v1706_v5 = vmax.f32.f32 %v1702_v38, %v1694_v29  ;;  %v1704_v13 = vmax.f32.f32 %v1700_v18, %v1692_v61  ;;  %v3497_v52 = vld [vmem:[%s3586_s14 + $0x70] sm:$0xff] }
  0xdb   : > { %v1696_v63 = vand.u32 2147483647, %v1680_v32 }
  0xdc   : > { %2003 = vrot.lane.b32.xlu1 %v4718_v41, %s3509_s21  ;;  %v1630_v59 = vpop.permute.xlu1 %1629  ;;  %v1695_v7 = vand.u32 2147483647, %v1679_v36  ;;  %v1698_v2 = vand.u32 2147483647, %v1682_v0  ;;  %v1705_v36 = vmax.f32.f32 %v1701_v48, %v1693_v11 }
  0xdd   : > { %v1665_v58 = vsel %vm1651_vm1, %v1630_v59, 0.0  ;;  %v1708_v62 = vmax.f32.f32 %v1704_v13, %v1696_v63 }
  0xde   : > { %v1681_v43 = vsub.f32 %v1665_v58, %v6261_v40  ;;  %v1707_v28 = vmax.f32.f32 %v1703_v33, %v1695_v7  ;;  %v1710_v37 = vmax.f32.f32 %v1706_v5, %v1698_v2 }
  0xe0   : > { %2005 = vrot.lane.b32.xlu1 %v4742_v42, %s3509_s21  ;;  %v1634_v60 = vpop.permute.xlu1 %1633  ;;  %v1697_v19 = vand.u32 2147483647, %v1681_v43 }
  0xe1   : > { %v1667_v56 = vsel %vm1651_vm1, %v1634_v60, 0.0 }
  0xe2   : > { %v1683_v39 = vsub.f32 %v1667_v56, %v6263_v20  ;;  %v1709_v57 = vmax.f32.f32 %v1705_v36, %v1697_v19 }
  0xe4   : > { %2009 = vrot.lane.b32.xlu1 %v4756_v1, %s3509_s21  ;;  %v1699_v53 = vand.u32 2147483647, %v1683_v39  ;;  %v1712_v55 = vmax.f32.f32 %v1708_v62, %v1709_v57  ;;  %v1728_v29 = vpop.permute.xlu1 %1727 }
  0xe5   : > { %v1775_v7 = vsel %vm1651_vm1, %v1728_v29, 0.0 }
  0xe6   : > { %v1711_v59 = vmax.f32.f32 %v1707_v28, %v1699_v53  ;;  %v1807_v56 = vrot.slane %v1775_v7, 1 }
  0xe8   : > { %2102 = vrot.lane.b32.xlu1 %v4598_v6, %s3509_s21  ;;  %v1713_v31 = vmax.f32.f32 %v1710_v37, %v1711_v59  ;;  %v4774_v6 = vsel %vm1553_vm0, %v1957_v15, %v1959_v3  ;;  %v1730_v30 = vpop.permute.xlu1 %1729  ;;  %v3493_v15 = vld [vmem:[%s3586_s14 + $0x38] sm:$0xff]  ;;  %v3494_v3 = vld [vmem:[%s3586_s14 + $0x50] sm:$0xff] }
  0xe9   : > { %v1776_v49 = vsel %vm1651_vm1, %v1730_v30, 0.0 }
  0xea   : > { %v1714_v58 = vmax.f32.f32 %v1712_v55, %v1713_v31  ;;  %v1808_v32 = vrot.slane %v1776_v49, 1 }
  0xec   : > { %2104 = vrot.lane.b32.xlu1 %v4602_v24, %s3509_s21  ;;  %v1809_v19 = vsel %vm1553_vm0, %v1807_v56, %v1808_v32 }
  0xed   : > { %v1732_v24 = vpop.permute.xlu1 %1731 }
  0xf0   : > { %2106 = vrot.lane.b32.xlu1 %v4616_v45, %s3509_s21  ;;  %v3492_v45 = vld [vmem:[%s3586_s14 + $0x30] sm:$0xff] }
  0xf3   : > { %v1734_v4 = vpop.permute.xlu1 %1733 }
  0xf4   : > { %2108 = vrot.lane.b32.xlu1 %v4633_v9, %s3509_s21  ;;  %v1778_v18 = vsel %vm1651_vm1, %v1734_v4, 0.0 }
  0xf5   : > { %1715 = vmax.xlane.f32.xlu0 %v1714_v58  ;;  %v1812_v39 = vrot.slane %v1778_v18, 1  ;;  %v1855_v58 = vsub.f32 %v1809_v19, %v1775_v7 }
  0xf7   : > { %v1736_v9 = vpop.permute.xlu1 %1735 }
  0xf8   : > { %2110 = vrot.lane.b32.xlu1 %v4644_v54, %s3509_s21  ;;  %v1779_v44 = vsel %vm1651_vm1, %v1736_v9, 0.0 }
  0xf9   : > { %v1814_v48 = vrot.slane %v1779_v44, 1 }
  0xfb   : > { %v1738_v54 = vpop.permute.xlu1 %1737  ;;  %v1815_v29 = vsel %vm1553_vm0, %v1812_v39, %v1814_v48 }
  0xfc   : > { %2112 = vrot.lane.b32.xlu1 %v4653_v46, %s3509_s21  ;;  %v1780_v61 = vsel %vm1651_vm1, %v1738_v54, 0.0 }
  0xfd   : > { %v1816_v11 = vrot.slane %v1780_v61, 1 }
  0xff   : > { %v1740_v46 = vpop.permute.xlu1 %1739  ;;  %v1817_v28 = vsel %vm1553_vm0, %v1814_v48, %v1816_v11 }
 0x100   : > { %2114 = vrot.lane.b32.xlu1 %v3492_v45, %s3509_s21  ;;  %v1781_v33 = vsel %vm1651_vm1, %v1740_v46, 0.0  ;;  %v1859_v30 = vsub.f32 %v1817_v28, %v1779_v44 }
 0x101   : > { %v1818_v53 = vrot.slane %v1781_v33, 1 }
 0x103   : > { %v1819_v45 = vsel %vm1553_vm0, %v1816_v11, %v1818_v53 }
 0x104   : > { %2116 = vrot.lane.b32.xlu1 %v3493_v15, %s3509_s21  ;;  %v1742_v38 = vpop.permute.xlu1 %1741  ;;  %v1860_v7 = vsub.f32 %v1819_v45, %v1780_v61 }
 0x105   : > { %v4806_v5 = vsel %vm1651_vm1, %v1742_v38, 0.0  ;;  %v1858_v38 = vsub.f32 %v1815_v29, %v1778_v18 }
 0x106   : > { %v1820_v63 = vrot.slane %v4806_v5, 1 }
 0x107   : > { %v1874_v18 = vand.u32 2147483647, %v1858_v38 }
 0x108   : > { %2120 = vrot.lane.b32.xlu1 %v4685_v16, %s3509_s21  ;;  %v1821_v46 = vsel %vm1553_vm0, %v1818_v53, %v1820_v63  ;;  %v1876_v53 = vand.u32 2147483647, %v1860_v7 }
 0x109   : > { %v1861_v44 = vsub.f32 %v1821_v46, %v1781_v33 }
 0x10a   : > { %v1746_v16 = vpop.permute.xlu1 %1745 }
 0x10b   : > { %v1784_v36 = vsel %vm1651_vm1, %v1746_v16, 0.0 }
 0x10c   : > { %2122 = vrot.lane.b32.xlu1 %v3494_v3, %s3509_s21  ;;  %v1824_v4 = vrot.slane %v1784_v36, 1 }
 0x10e   : > { %v1748_v0 = vpop.permute.xlu1 %1747 }
 0x10f   : > { %v4809_v2 = vsel %vm1651_vm1, %v1748_v0, 0.0 }
 0x110   : > { %2124 = vrot.lane.b32.xlu1 %v3495_v51, %s3509_s21  ;;  %v1826_v31 = vrot.slane %v4809_v2, 1 }
 0x112   : > { %v1750_v40 = vpop.permute.xlu1 %1749  ;;  %v1827_v16 = vsel %vm1553_vm0, %v1824_v4, %v1826_v31 }
 0x113   : > { %v1786_v59 = vsel %vm1651_vm1, %v1750_v40, 0.0  ;;  %v1871_v40 = vand.u32 2147483647, %v1855_v58 }
 0x114   : > { %2126 = vrot.lane.b32.xlu1 %v6244_v17, %s3509_s21  ;;  %v1777_v17 = vsel %vm1651_vm1, %v1732_v24, 0.0  ;;  %v1828_v15 = vrot.slane %v1786_v59, 1 }
 0x115   : > { %v1810_v20 = vrot.slane %v1777_v17, 1 }
 0x116   : > { %v1752_v43 = vpop.permute.xlu1 %1751 }
 0x117   : > { %v1787_v37 = vsel %vm1651_vm1, %v1752_v43, 0.0  ;;  %v1811_v57 = vsel %vm1553_vm0, %v1808_v32, %v1810_v20  ;;  %v1813_v62 = vsel %vm1553_vm0, %v1810_v20, %v1812_v39  ;;  %v1875_v43 = vand.u32 2147483647, %v1859_v30 }
 0x118   : > { %2128 = vrot.lane.b32.xlu1 %v3496_v25, %s3509_s21  ;;  %v1830_v9 = vrot.slane %v1787_v37, 1  ;;  %v1856_v3 = vsub.f32 %v1811_v57, %v1776_v49  ;;  %v1857_v54 = vsub.f32 %v1813_v62, %v1777_v17  ;;  %v1829_v32 = vsel %vm1553_vm0, %v1826_v31, %v1828_v15 }
 0x119   : > { %v1864_v20 = vsub.f32 %v1827_v16, %v1784_v36  ;;  %v1865_v33 = vsub.f32 %v1829_v32, %v4809_v2  ;;  %v1877_v57 = vand.u32 2147483647, %v1861_v44  ;;  %v1887_v58 = vmax.f32.f32 %v1871_v40, %v1875_v43 }
 0x11a   : > { %v1754_v60 = vpop.permute.xlu1 %1753  ;;  %v1831_v49 = vsel %vm1553_vm0, %v1828_v15, %v1830_v9  ;;  %v1872_v17 = vand.u32 2147483647, %v1856_v3  ;;  %v1873_v11 = vand.u32 2147483647, %v1857_v54 }
 0x11b   : > { %v4821_v55 = vsel %vm1651_vm1, %v1754_v60, 0.0  ;;  %v1880_v30 = vand.u32 2147483647, %v1864_v20  ;;  %v1881_v46 = vand.u32 2147483647, %v1865_v33 }
 0x11c   : > { %2130 = vrot.lane.b32.xlu1 %v3497_v52, %s3509_s21  ;;  %v1832_v25 = vrot.slane %v4821_v55, 1  ;;  %v1888_v38 = vmax.f32.f32 %v1872_v17, %v1876_v53 }
 0x11e   : > { %v1758_v13 = vpop.permute.xlu1 %1757  ;;  %v1833_v39 = vsel %vm1553_vm0, %v1830_v9, %v1832_v25  ;;  %v1892_v32 = vmax.f32.f32 %v1888_v38, %v1880_v30  ;;  %v1246_v30 = vld [vmem:[%s3624_s24 + $0x8] sm:$0xff]  ;;  %v1247_v38 = vld [vmem:[%s3624_s24 + $0x10] sm:$0xff] }
 0x11f   : > { %v1790_v24 = vsel %vm1651_vm1, %v1758_v13, 0.0  ;;  %v1866_v13 = vsub.f32 %v1831_v49, %v1786_v59  ;;  %v1867_v31 = vsub.f32 %v1833_v39, %v1787_v37 }
 0x120   : > { %v1836_v0 = vrot.slane %v1790_v24, 1 }
 0x121   : > { %v1882_v2 = vand.u32 2147483647, %v1866_v13  ;;  %v1883_v40 = vand.u32 2147483647, %v1867_v31 }
 0x122   : > { %v1854_v28 = vsel %vm1553_vm0, %v1836_v0, 0.0  ;;  %v4852_v31 = vpop.permute.xlu1 %1979 }
 0x123   : > { %v1870_v15 = vsub.f32 %v1854_v28, %v1790_v24  ;;  %v1889_v24 = vmax.f32.f32 %v1873_v11, %v1877_v57 }
 0x125   : > { %v1886_v43 = vand.u32 2147483647, %v1870_v15  ;;  %v1893_v49 = vmax.f32.f32 %v1889_v24, %v1881_v46  ;;  %v3377_v46 = vld [vmem:[%s3624_s24 + $0x100] sm:$0xff] }
 0x145   : > { %v1235_v51 = vpop.xlane.xlu0 %1234 }
 0x146   : > { %v1236_v52 = vrot.slane %v1235_v51, 4 }
 0x148   : > { %v1237_v60 = vadd.f32 %v1236_v52, %v1235_v51 }
 0x149   : > { %v1744_v56 = vpop.permute.xlu0 %1743 }
 0x14a   : > { %v1783_v48 = vsel %vm1651_vm1, %v1744_v56, 0.0  ;;  %v1238_v19 = vrot.slane %v1237_v60, 2 }
 0x14b   : > { %v1822_v61 = vrot.slane %v1783_v48, 1 }
 0x14c   : > { %v1239_v62 = vadd.f32 %v1238_v19, %v1237_v60 }
 0x14d   : > { %v1823_v29 = vsel %vm1553_vm0, %v1820_v63, %v1822_v61  ;;  %v1825_v36 = vsel %vm1553_vm0, %v1822_v61, %v1824_v4  ;;  %v1756_v45 = vpop.permute.xlu0 %1755 }
 0x14e   : > { %v1862_v9 = vsub.f32 %v1823_v29, %v4806_v5  ;;  %v1863_v3 = vsub.f32 %v1825_v36, %v1783_v48  ;;  %v1789_v54 = vsel %vm1651_vm1, %v1756_v45, 0.0  ;;  %v1240_v51 = vrot.slane %v1239_v62, 1  ;;  %v1245_v36 = vld [vmem:[%s3624_s24] sm:$0xff] }
 0x14f   : > { %v1834_v59 = vrot.slane %v1789_v54, 1  ;;  %v3361_v45 = vld [vmem:[%s3624_s24 + $0x80] sm:$0xff]  ;;  %v1261_v15 = vmul.f32 0.299, %v1245_v36  ;;  %v3367_v36 = vld [vmem:[%s3624_s24 + $0xb0] sm:$0xff] }
 0x150   : > { %v1878_v52 = vand.u32 2147483647, %v1862_v9  ;;  %v1879_v37 = vand.u32 2147483647, %v1863_v3  ;;  %v1241_v16 = vadd.f32 %v1240_v51, %v1239_v62  ;;  %v1262_v9 = vmul.f32 0.299, %v1246_v30 }
 0x151   : > { %v1835_v63 = vsel %vm1553_vm0, %v1832_v25, %v1834_v59  ;;  %v1837_v4 = vsel %vm1553_vm0, %v1834_v59, %v1836_v0  ;;  %v3362_v3 = vld [vmem:[%s3624_s24 + $0x88] sm:$0xff]  ;;  %v1341_v59 = vmul.f32 0.114, %v3377_v46  ;;  %v3383_v30 = vld [vmem:[%s3624_s24 + $0x130] sm:$0xff]  ;;  %v3384_v46 = vld [vmem:[%s3624_s24 + $0x138] sm:$0xff] }
 0x152   : > { %v1868_v5 = vsub.f32 %v1835_v63, %v4821_v55  ;;  %3447 = vpush %v1241_v16  ;;  %v1890_v7 = vmax.f32.f32 %v1874_v18, %v1878_v52  ;;  %v1869_v60 = vsub.f32 %v1837_v4, %v1789_v54  ;;  %v1891_v44 = vmax.f32.f32 %v1887_v58, %v1879_v37  ;;  %v4854_v58 = vpop.permute.xlu1 %1981  ;;  %v3363_v52 = vld [vmem:[%s3624_s24 + $0x90] sm:$0xff] }
 0x153   : > { %v1293_v54 = vmul.f32 0.587, %v3361_v45  ;;  %v1294_v51 = vmul.f32 0.587, %v3362_v3  ;;  %v1263_v63 = vmul.f32 0.299, %v1247_v38 }
 0x154   : > { %v1894_v17 = vmax.f32.f32 %v1890_v7, %v1882_v2  ;;  %v1884_v56 = vand.u32 2147483647, %v1868_v5  ;;  %v1885_v20 = vand.u32 2147483647, %v1869_v60  ;;  %v1895_v39 = vmax.f32.f32 %v1891_v44, %v1883_v40  ;;  %v3378_v2 = vld [vmem:[%s3624_s24 + $0x108] sm:$0xff]  ;;  %v3379_v4 = vld [vmem:[%s3624_s24 + $0x110] sm:$0xff] }
 0x155   : > { %v1309_v37 = vadd.f32 %v1293_v54, %v1261_v15  ;;  %v1310_v16 = vadd.f32 %v1294_v51, %v1262_v9  ;;  %v1342_v40 = vmul.f32 0.114, %v3378_v2  ;;  %v1295_v24 = vmul.f32 0.587, %v3363_v52  ;;  %v3364_v7 = vld [vmem:[%s3624_s24 + $0x98] sm:$0xff] }
 0x156   : > { %v1898_v48 = vmax.f32.f32 %v1894_v17, %v1886_v43  ;;  %v1896_v25 = vmax.f32.f32 %v1892_v32, %v1884_v56  ;;  %v1897_v19 = vmax.f32.f32 %v1893_v49, %v1885_v20  ;;  %v4856_v29 = vpop.permute.xlu1 %1983  ;;  %v1248_v43 = vld [vmem:[%s3624_s24 + $0x18] sm:$0xff]  ;;  %v1343_v5 = vmul.f32 0.114, %v3379_v4  ;;  %v1249_v56 = vld [vmem:[%s3624_s24 + $0x20] sm:$0xff] }
 0x157   : > { %v4877_v44 = vadd.f32 %v1341_v59, %v1309_v37  ;;  %v4879_v32 = vadd.f32 %v1342_v40, %v1310_v16  ;;  %v1264_v49 = vmul.f32 0.299, %v1248_v43  ;;  %v3380_v17 = vld [vmem:[%s3624_s24 + $0x118] sm:$0xff]  ;;  %v3365_v20 = vld [vmem:[%s3624_s24 + $0xa0] sm:$0xff]  ;;  %v1299_v15 = vmul.f32 0.587, %v3367_v36 }
 0x158   : > { %v1899_v0 = vmax.f32.f32 %v1895_v39, %v1896_v25  ;;  %v1900_v28 = vmax.f32.f32 %v1897_v19, %v1898_v48  ;;  %v1311_v39 = vadd.f32 %v1295_v24, %v1263_v63  ;;  %v1296_v48 = vmul.f32 0.587, %v3364_v7  ;;  %v1252_v54 = vld [vmem:[%s3624_s24 + $0x38] sm:$0xff]  ;;  %v1253_v40 = vld [vmem:[%s3624_s24 + $0x40] sm:$0xff]  ;;  %v3371_v36 = vld [vmem:[%s3624_s24 + $0xd0] sm:$0xff] }
 0x159   : > { %v1344_v25 = vmul.f32 0.114, %v3380_v17  ;;  %v1265_v19 = vmul.f32 0.299, %v1249_v56  ;;  %1501 = vst [vmem:[%s4872_s17] sm:$0xff] %v4877_v44  ;;  %1502 = vst [vmem:[%s4872_s17 + $0x8] sm:$0xff] %v4879_v32  ;;  %v3368_v51 = vld [vmem:[%s3624_s24 + $0xb8] sm:$0xff] }
 0x15a   : > { %v1901_v11 = vmax.f32.f32 %v1899_v0, %v1900_v28  ;;  %v4875_v60 = vpop.permute.xlu1 %1985  ;;  %v1297_v0 = vmul.f32 0.587, %v3365_v20  ;;  %v3381_v28 = vld [vmem:[%s3624_s24 + $0x120] sm:$0xff]  ;;  %v1347_v9 = vmul.f32 0.114, %v3383_v30  ;;  %v1250_v56 = vld [vmem:[%s3624_s24 + $0x28] sm:$0xff] }
 0x15b   : > { %v1268_v59 = vmul.f32 0.299, %v1252_v54  ;;  %v1300_v38 = vmul.f32 0.587, %v3368_v51  ;;  %v1348_v37 = vmul.f32 0.114, %v3384_v46 }
 0x15c   : > { %1902 = vmax.xlane.f32.xlu0 %v1901_v11  ;;  %v4889_v11 = vadd.f32 %v1343_v5, %v1311_v39  ;;  %v3369_v63 = vld [vmem:[%s3624_s24 + $0xc0] sm:$0xff]  ;;  %v1269_v24 = vmul.f32 0.299, %v1253_v40  ;;  %v3366_v20 = vld [vmem:[%s3624_s24 + $0xa8] sm:$0xff]  ;;  %v3387_v30 = vld [vmem:[%s3624_s24 + $0x150] sm:$0xff] }
 0x15d   : > { %v1316_v16 = vadd.f32 %v1300_v38, %v1268_v59  ;;  %v3385_v4 = vld [vmem:[%s3624_s24 + $0x140] sm:$0xff]  ;;  %v1301_v5 = vmul.f32 0.587, %v3369_v63  ;;  %v3382_v39 = vld [vmem:[%s3624_s24 + $0x128] sm:$0xff] }
 0x15e   : > { %1503 = vst [vmem:[%s4872_s17 + $0x10] sm:$0xff] %v4889_v11  ;;  %v1349_v7 = vmul.f32 0.114, %v3385_v4  ;;  %v1257_v54 = vld [vmem:[%s3624_s24 + $0x60] sm:$0xff]  ;;  %v1374_v4 = vld [vmem:[%s3629_s29 + $0x8] sm:$0xff] }
 0x15f   : > { %v4920_v43 = vadd.f32 %v1348_v37, %v1316_v16  ;;  %v3373_v51 = vld [vmem:[%s3624_s24 + $0xe0] sm:$0xff]  ;;  %v1273_v38 = vmul.f32 0.299, %v1257_v54 }
 0x160   : > { %v3389_v46 = vld [vmem:[%s3624_s24 + $0x160] sm:$0xff]  ;;  %v1305_v37 = vmul.f32 0.587, %v3373_v51 }
 0x161   : > { %1508 = vst [vmem:[%s4872_s17 + $0x38] sm:$0xff] %v4920_v43  ;;  %v1353_v40 = vmul.f32 0.114, %v3389_v46 }
 0x162   : > { %v1321_v63 = vadd.f32 %v1305_v37, %v1273_v38  ;;  %v1378_v37 = vld [vmem:[%s3629_s29 + $0x28] sm:$0xff] }
 0x172   : > { %1995 = vrot.lane.b32.xlu0 %v4729_v26, %s3509_s21 }
 0x176   : > { %2007 = vrot.lane.b32.xlu0 %v4774_v6, %s3509_s21 }
 0x17e   : > { %v1716_v55 = vpop.xlane.xlu0 %1715 }
 0x17f   : > { %v1717_v18 = vrot.slane %v1716_v55, 4 }
 0x181   : > { %v1718_v53 = vmax.f32 %v1716_v55, %v1717_v18  ;;  %v1312_v55 = vadd.f32 %v1296_v48, %v1264_v49  ;;  %v1313_v18 = vadd.f32 %v1297_v0, %v1265_v19  ;;  %v1317_v49 = vadd.f32 %v1301_v5, %v1269_v24  ;;  %v3394_v24 = vld [vmem:[%s3629_s29 + $0x88] sm:$0xff] }
 0x182   : > { %v1298_v19 = vmul.f32 0.587, %v3366_v20  ;;  %v1346_v0 = vmul.f32 0.114, %v3382_v39  ;;  %v3410_v5 = vld [vmem:[%s3629_s29 + $0x108] sm:$0xff]  ;;  %v2027_v39 = vsel %vm1651_vm1, %v4852_v31, 0.0 }
 0x183   : > { %s3448_s12 = spop %3447  ;;  %v1719_v61 = vrot.slane %v1718_v53, 2  ;;  %v4927_v48 = vadd.f32 %v1349_v7, %v1317_v49  ;;  %v4950_v7 = vadd.f32 %v1353_v40, %v1321_v63  ;;  %v1390_v49 = vmul.f32 0.299, %v1374_v4  ;;  %v3398_v40 = vld [vmem:[%s3629_s29 + $0xa8] sm:$0xff] }
 0x184   : > { %v1243_v33 = vstv %s3448_s12  ;;  %v1470_v20 = vmul.f32 0.114, %v3410_v5 }
 0x185   : > { %1244 = vst [vmem:[%s417_s11] sm:$0xff] %v1243_v33  ;;  %v1720_v13 = vmax.f32 %v1718_v53, %v1719_v61  ;;  %v1345_v53 = vmul.f32 0.114, %v3381_v28  ;;  %v4893_v61 = vadd.f32 %v1344_v25, %v1312_v55  ;;  %v4895_v33 = vpop.permute.xlu1 %1987  ;;  %v1266_v25 = vmul.f32 0.299, %v1250_v56  ;;  %1509 = vst [vmem:[%s4872_s17 + $0x40] sm:$0xff] %v4927_v48 }
 0x186   : > { %v1422_v56 = vmul.f32 0.587, %v3394_v24  ;;  %1513 = vst [vmem:[%s4872_s17 + $0x60] sm:$0xff] %v4950_v7 }
 0x187   : > { %v1721_v57 = vrot.slane %v1720_v13, 1  ;;  %1504 = vst [vmem:[%s4872_s17 + $0x18] sm:$0xff] %v4893_v61  ;;  %v1314_v28 = vadd.f32 %v1298_v19, %v1266_v25  ;;  %v2028_v19 = vsel %vm1651_vm1, %v4854_v58, 0.0  ;;  %v2030_v58 = vsel %vm1651_vm1, %v4875_v60, 0.0 }
 0x188   : > { %v1438_v25 = vadd.f32 %v1422_v56, %v1390_v49  ;;  %v2044_v54 = vsub.f32 %v2028_v19, %v4630_v21  ;;  %v2031_v21 = vsel %vm1651_vm1, %v4895_v33, 0.0  ;;  %v1394_v60 = vmul.f32 0.299, %v1378_v37 }
 0x189   : > { %v1722_v62 = vmax.f32 %v1720_v13, %v1721_v57  ;;  %v4897_v13 = vadd.f32 %v1345_v53, %v1313_v18  ;;  %v4903_v57 = vpop.permute.xlu1 %1989  ;;  %v4931_v55 = vadd.f32 %v1346_v0, %v1314_v28  ;;  %v1376_v28 = vld [vmem:[%s3629_s29 + $0x18] sm:$0xff] }
 0x18a   : > { %v1392_v31 = vmul.f32 0.299, %v1376_v28  ;;  %v2060_v49 = vand.u32 2147483647, %v2044_v54  ;;  %v1380_v28 = vld [vmem:[%s3629_s29 + $0x38] sm:$0xff] }
 0x18b   : > { %3449 = vpush %v1722_v62  ;;  %1505 = vst [vmem:[%s4872_s17 + $0x20] sm:$0xff] %v4897_v13  ;;  %v1251_v62 = vld [vmem:[%s3624_s24 + $0x30] sm:$0xff] }
 0x18c   : > { %v1267_v45 = vmul.f32 0.299, %v1251_v62  ;;  %1506 = vst [vmem:[%s4872_s17 + $0x28] sm:$0xff] %v4931_v55  ;;  %v1255_v62 = vld [vmem:[%s3624_s24 + $0x50] sm:$0xff] }
 0x18d   : > { %v4913_v52 = vpop.permute.xlu1 %1991 }
 0x18e   : > { %v1315_v3 = vadd.f32 %v1299_v15, %v1267_v45  ;;  %v1271_v45 = vmul.f32 0.299, %v1255_v62  ;;  %v1303_v15 = vmul.f32 0.587, %v3371_v36  ;;  %v3396_v62 = vld [vmem:[%s3629_s29 + $0x98] sm:$0xff]  ;;  %v2033_v56 = vsel %vm1651_vm1, %v4913_v52, 0.0 }
 0x18f   : > { %v3412_v36 = vld [vmem:[%s3629_s29 + $0x118] sm:$0xff] }
 0x190   : > { %v4911_v2 = vadd.f32 %v1347_v9, %v1315_v3  ;;  %v1351_v9 = vmul.f32 0.114, %v3387_v30  ;;  %v1319_v3 = vadd.f32 %v1303_v15, %v1271_v45  ;;  %v2032_v30 = vsel %vm1651_vm1, %v4903_v57, 0.0 }
 0x191   : > { %v1994_v17 = vpop.permute.xlu1 %1993  ;;  %v4963_v45 = vadd.f32 %v1470_v20, %v1438_v25  ;;  %v1424_v15 = vmul.f32 0.587, %v3396_v62  ;;  %v2029_v57 = vsel %vm1651_vm1, %v4856_v29, 0.0  ;;  %v2048_v38 = vsub.f32 %v2032_v30, %v4665_v27  ;;  %v3416_v62 = vld [vmem:[%s3629_s29 + $0x138] sm:$0xff] }
 0x192   : > { %1507 = vst [vmem:[%s4872_s17 + $0x30] sm:$0xff] %v4911_v2  ;;  %v4943_v59 = vadd.f32 %v1351_v9, %v1319_v3  ;;  %v2043_v9 = vsub.f32 %v2027_v39, %v4613_v47  ;;  %v1472_v3 = vmul.f32 0.114, %v3412_v36  ;;  %v2034_v51 = vsel %vm1651_vm1, %v1994_v17, 0.0  ;;  %v3414_v47 = vld [vmem:[%s3629_s29 + $0x128] sm:$0xff] }
 0x193   : > { %3426 = vst [vmem:[%s4872_s17 + $0x88] sm:$0xff] %v4963_v45  ;;  %v1440_v46 = vadd.f32 %v1424_v15, %v1392_v31  ;;  %v1426_v17 = vmul.f32 0.587, %v3398_v40  ;;  %v2046_v29 = vsub.f32 %v2030_v58, %v4650_v50  ;;  %v2050_v27 = vsub.f32 %v2034_v51, %v4680_v12  ;;  %v3400_v12 = vld [vmem:[%s3629_s29 + $0xb8] sm:$0xff] }
 0x194   : > { %1511 = vst [vmem:[%s4872_s17 + $0x50] sm:$0xff] %v4943_v59  ;;  %v4982_v4 = vand.u32 2147483647, %v2043_v9  ;;  %v1474_v5 = vmul.f32 0.114, %v3414_v47  ;;  %v2045_v39 = vsub.f32 %v2029_v57, %v4641_v35  ;;  %v2047_v25 = vsub.f32 %v2031_v21, %v4659_v23 }
 0x195   : > { %v1998_v18 = vpop.permute.xlu1 %1997  ;;  %v4980_v63 = vadd.f32 %v1472_v3, %v1440_v46  ;;  %v1442_v20 = vadd.f32 %v1426_v17, %v1394_v60  ;;  %v2064_v19 = vand.u32 2147483647, %v2048_v38  ;;  %v1396_v30 = vmul.f32 0.299, %v1380_v28 }
 0x196   : > { %v2036_v33 = vsel %vm1651_vm1, %v1998_v18, 0.0  ;;  %v1428_v52 = vmul.f32 0.587, %v3400_v12  ;;  %v1476_v31 = vmul.f32 0.114, %v3416_v62  ;;  %v2049_v15 = vsub.f32 %v2033_v56, %v4671_v34 }
 0x197   : > { %3428 = vst [vmem:[%s4872_s17 + $0x98] sm:$0xff] %v4980_v63  ;;  %v4997_v36 = vadd.f32 %v1474_v5, %v1442_v20  ;;  %v2062_v18 = vand.u32 2147483647, %v2046_v29  ;;  %v2066_v9 = vand.u32 2147483647, %v2050_v27  ;;  %v2052_v35 = vsub.f32 %v2036_v33, %v4690_v14 }
 0x198   : > { %v1444_v51 = vadd.f32 %v1428_v52, %v1396_v30  ;;  %v2061_v46 = vand.u32 2147483647, %v2045_v39  ;;  %v2063_v57 = vand.u32 2147483647, %v2047_v25  ;;  %v2076_v38 = vmax.f32.f32 %v2060_v49, %v2064_v19 }
 0x199   : > { %v4935_v53 = vpop.permute.xlu1 %1999  ;;  %3430 = vst [vmem:[%s4872_s17 + $0xa8] sm:$0xff] %v4997_v36  ;;  %v2078_v21 = vmax.f32.f32 %v2062_v18, %v2066_v9 }
 0x19a   : > { %v5009_v47 = vadd.f32 %v1476_v31, %v1444_v51  ;;  %v2075_v33 = vmax.f32.f32 %v4982_v4, %v2063_v57  ;;  %v3386_v51 = vld [vmem:[%s3624_s24 + $0x148] sm:$0xff] }
 0x19b   : > { %v1350_v57 = vmul.f32 0.114, %v3386_v51  ;;  %v3409_v51 = vld [vmem:[%s3629_s29 + $0x100] sm:$0xff] }
 0x19c   : > { %3432 = vst [vmem:[%s4872_s17 + $0xb8] sm:$0xff] %v5009_v47 }
 0x19d   : > { %v2002_v16 = vpop.permute.xlu1 %2001 }
 0x19e   : > { %v2038_v50 = vsel %vm1651_vm1, %v2002_v16, 0.0  ;;  %v2037_v16 = vsel %vm1651_vm1, %v4935_v53, 0.0  ;;  %v2065_v53 = vand.u32 2147483647, %v2049_v15 }
 0x19f   : > { %v2054_v54 = vsub.f32 %v2038_v50, %v4706_v22  ;;  %v2068_v22 = vand.u32 2147483647, %v2052_v35  ;;  %v2053_v60 = vsub.f32 %v2037_v16, %v4698_v10 }
 0x1a0   : > { %v2077_v39 = vmax.f32.f32 %v2061_v46, %v2065_v53 }
 0x1a1   : > { %v2004_v0 = vpop.permute.xlu1 %2003  ;;  %v2070_v29 = vand.u32 2147483647, %v2054_v54  ;;  %v2080_v10 = vmax.f32.f32 %v2076_v38, %v2068_v22  ;;  %v2069_v25 = vand.u32 2147483647, %v2053_v60  ;;  %v1254_v54 = vld [vmem:[%s3624_s24 + $0x48] sm:$0xff]  ;;  %v1256_v60 = vld [vmem:[%s3624_s24 + $0x58] sm:$0xff] }
 0x1a2   : > { %v2039_v34 = vsel %vm1651_vm1, %v2004_v0, 0.0  ;;  %v1270_v46 = vmul.f32 0.299, %v1254_v54  ;;  %v6073_v54 = vrot.slane %v4911_v2, 1 }
 0x1a3   : > { %v2055_v27 = vsub.f32 %v2039_v34, %v4718_v41  ;;  %v2082_v41 = vmax.f32.f32 %v2078_v21, %v2070_v29  ;;  %v2081_v52 = vmax.f32.f32 %v2077_v39, %v2069_v25  ;;  %v2308_v21 = vrot.slane %v4889_v11, 1  ;;  %v1258_v39 = vld [vmem:[%s3624_s24 + $0x68] sm:$0xff] }
 0x1a4   : > { %v1272_v29 = vmul.f32 0.299, %v1256_v60  ;;  %v3390_v25 = vld [vmem:[%s3624_s24 + $0x168] sm:$0xff] }
 0x1a5   : > { %v2006_v24 = vpop.permute.xlu1 %2005  ;;  %v2071_v28 = vand.u32 2147483647, %v2055_v27 }
 0x1a6   : > { %v2040_v37 = vsel %vm1651_vm1, %v2006_v24, 0.0 }
 0x1a7   : > { %v2056_v0 = vsub.f32 %v2040_v37, %v4742_v42  ;;  %v2305_v37 = vrot.slane %v4877_v44, 1 }
 0x1a9   : > { %v2010_v3 = vpop.permute.xlu1 %2009  ;;  %v2072_v30 = vand.u32 2147483647, %v2056_v0  ;;  %v3388_v0 = vld [vmem:[%s3624_s24 + $0x158] sm:$0xff] }
 0x1aa   : > { %v2042_v14 = vsel %vm1651_vm1, %v2010_v3, 0.0 }
 0x1ab   : > { %v2058_v24 = vsub.f32 %v2042_v14, %v4756_v1  ;;  %v2084_v15 = vmax.f32.f32 %v2080_v10, %v2072_v30  ;;  %v2306_v14 = vrot.slane %v4879_v32, 1  ;;  %v3374_v10 = vld [vmem:[%s3624_s24 + $0xe8] sm:$0xff]  ;;  %v3376_v30 = vld [vmem:[%s3624_s24 + $0xf8] sm:$0xff] }
 0x1ad   : > { %v2074_v42 = vand.u32 2147483647, %v2058_v24  ;;  %v5036_v53 = vsel %vm1553_vm0, %v2305_v37, %v2306_v14  ;;  %v5042_v22 = vsel %vm1553_vm0, %v2306_v14, %v2308_v21  ;;  %v6074_v37 = vrot.slane %v4920_v43, 1 }
 0x1ae   : > { %v2320_v14 = vrot.slane %v4927_v48, 1 }
 0x1af   : > { %v2086_v9 = vmax.f32.f32 %v2082_v41, %v2074_v42  ;;  %v1306_v41 = vmul.f32 0.587, %v3374_v10 }
 0x1e5   : > { %v1903_v23 = vpop.xlane.xlu0 %1902 }
 0x1e6   : > { %v1904_v58 = vrot.slane %v1903_v23, 4 }
 0x1e8   : > { %v1905_v40 = vmax.f32 %v1903_v23, %v1904_v58  ;;  %v3370_v58 = vld [vmem:[%s3624_s24 + $0xc8] sm:$0xff] }
 0x1e9   : > { %v1996_v17 = vpop.permute.xlu0 %1995 }
 0x1ea   : > { %v1906_v5 = vrot.slane %v1905_v40, 2  ;;  %v2035_v49 = vsel %vm1651_vm1, %v1996_v17, 0.0  ;;  %v3372_v17 = vld [vmem:[%s3624_s24 + $0xd8] sm:$0xff] }
 0x1eb   : > { %v2051_v56 = vsub.f32 %v2035_v49, %v4729_v26  ;;  %v1304_v27 = vmul.f32 0.587, %v3372_v17  ;;  %v2312_v49 = vrot.slane %v4897_v13, 1 }
 0x1ec   : > { %v1907_v20 = vmax.f32 %v1905_v40, %v1906_v5  ;;  %v3498_v40 = vld [vmem:[%s3586_s14 + $0x78] sm:$0xff]  ;;  %s3450_s14 = spop %3449 }
 0x1ed   : > { %v2067_v19 = vand.u32 2147483647, %v2051_v56  ;;  %v2008_v50 = vpop.permute.xlu0 %2007  ;;  %v1320_v24 = vadd.f32 %v1304_v27, %v1272_v29  ;;  %v1352_v56 = vmul.f32 0.114, %v3388_v0  ;;  %v1379_v0 = vld [vmem:[%s3629_s29 + $0x30] sm:$0xff] }
 0x1ee   : > { %v2041_v12 = vsel %vm1651_vm1, %v2008_v50, 0.0  ;;  %v1908_v62 = vrot.slane %v1907_v20, 1  ;;  %v1274_v50 = vmul.f32 0.299, %v1258_v39  ;;  %v1395_v10 = vmul.f32 0.299, %v1379_v0 }
 0x1ef   : > { %v2079_v1 = vmax.f32.f32 %v2075_v33, %v2067_v19  ;;  %v2057_v26 = vsub.f32 %v2041_v12, %v4774_v6  ;;  %v1302_v6 = vmul.f32 0.587, %v3370_v58  ;;  %v5056_v33 = vadd.f32 %v1352_v56, %v1320_v24  ;;  %v5072_v19 = vpop.permute.xlu1 %2102  ;;  %v3393_v58 = vld [vmem:[%s3629_s29 + $0x80] sm:$0xff]  ;;  %v3399_v24 = vld [vmem:[%s3629_s29 + $0xb0] sm:$0xff] }
 0x1f0   : > { %v1909_v4 = vmax.f32 %v1907_v20, %v1908_v62  ;;  %v1322_v12 = vadd.f32 %v1306_v41, %v1274_v50  ;;  %v1260_v62 = vld [vmem:[%s3624_s24 + $0x78] sm:$0xff]  ;;  %v2324_v41 = vrot.slane %v4943_v59, 1 }
 0x1f1   : > { %v2073_v31 = vand.u32 2147483647, %v2057_v26  ;;  %v2083_v18 = vmax.f32.f32 %v2079_v1, %v2071_v28  ;;  %v1318_v38 = vadd.f32 %v1302_v6, %v1270_v46  ;;  %1512 = vst [vmem:[%s4872_s17 + $0x58] sm:$0xff] %v5056_v33  ;;  %v1354_v28 = vmul.f32 0.114, %v3390_v25 }
 0x1f2   : > { %3451 = vpush %v1909_v4  ;;  %v1276_v42 = vmul.f32 0.299, %v1260_v62  ;;  %v1308_v1 = vmul.f32 0.587, %v3376_v30  ;;  %v1427_v25 = vmul.f32 0.587, %v3399_v24 }
 0x1f3   : > { %v2085_v35 = vmax.f32.f32 %v2081_v52, %v2073_v31  ;;  %v2087_v3 = vmax.f32.f32 %v2083_v18, %v2084_v15  ;;  %v5025_v34 = vadd.f32 %v1350_v57, %v1318_v38  ;;  %v2314_v31 = vrot.slane %v4931_v55, 1  ;;  %v3395_v15 = vld [vmem:[%s3629_s29 + $0x90] sm:$0xff]  ;;  %v1373_v55 = vld [vmem:[%s3629_s29] sm:$0xff] }
 0x1f4   : > { %v1324_v4 = vadd.f32 %v1308_v1, %v1276_v42  ;;  %v1389_v6 = vmul.f32 0.299, %v1373_v55  ;;  %v1421_v57 = vmul.f32 0.587, %v3393_v58  ;;  %v1469_v38 = vmul.f32 0.114, %v3409_v51 }
 0x1f5   : > { %v2088_v23 = vmax.f32.f32 %v2085_v35, %v2086_v9  ;;  %1510 = vst [vmem:[%s4872_s17 + $0x48] sm:$0xff] %v5025_v34  ;;  %v3411_v9 = vld [vmem:[%s3629_s29 + $0x110] sm:$0xff]  ;;  %v5130_v56 = vsel %vm1553_vm0, %v2314_v31, %v6073_v54  ;;  %v2322_v50 = vrot.slane %v5025_v34, 1  ;;  %v1381_v30 = vld [vmem:[%s3629_s29 + $0x40] sm:$0xff]  ;;  %v1443_v42 = vadd.f32 %v1427_v25, %v1395_v10 }
 0x1f6   : > { %v1437_v29 = vadd.f32 %v1421_v57, %v1389_v6  ;;  %6265 = vst [vmem:[#allocation51_spill] sm:$0xff] %v5130_v56  ;;  %v3415_v62 = vld [vmem:[%s3629_s29 + $0x130] sm:$0xff]  ;;  %v1385_v6 = vld [vmem:[%s3629_s29 + $0x60] sm:$0xff] }
 0x1f7   : > { %v2089_v16 = vmax.f32.f32 %v2087_v3, %v2088_v23  ;;  %v1423_v3 = vmul.f32 0.587, %v3395_v15  ;;  %v1471_v23 = vmul.f32 0.114, %v3411_v9  ;;  %v1475_v1 = vmul.f32 0.114, %v3415_v62 }
 0x1f8   : > { %v3417_v15 = vld [vmem:[%s3629_s29 + $0x140] sm:$0xff]  ;;  %v1383_v9 = vld [vmem:[%s3629_s29 + $0x50] sm:$0xff] }
 0x1f9   : > { %2090 = vmax.xlane.f32.xlu0 %v2089_v16  ;;  %v5108_v16 = vsel %vm1553_vm0, %v2312_v49, %v2314_v31  ;;  %v5148_v31 = vsel %vm1553_vm0, %v6074_v37, %v2320_v14  ;;  %v1477_v58 = vmul.f32 0.114, %v3417_v15  ;;  %v1399_v51 = vmul.f32 0.299, %v1383_v9  ;;  %v3375_v10 = vld [vmem:[%s3624_s24 + $0xf0] sm:$0xff] }
 0x1fa   : > { %6264 = vst [vmem:[#allocation50_spill] sm:$0xff] %v5108_v16  ;;  %6266 = vst [vmem:[#allocation35_spill] sm:$0xff] %v5148_v31  ;;  %v3391_v25 = vld [vmem:[%s3624_s24 + $0x170] sm:$0xff] }
 0x20f   : > { %2118 = vrot.lane.b32.xlu0 %v4676_v8, %s3509_s21  ;;  %v2310_v8 = vrot.slane %v4893_v61, 1 }
 0x211   : > { %v5050_v5 = vsel %vm1553_vm0, %v2308_v21, %v2310_v8  ;;  %v5059_v20 = vsel %vm1553_vm0, %v2310_v8, %v2312_v49  ;;  %v3397_v21 = vld [vmem:[%s3629_s29 + $0xa0] sm:$0xff] }
 0x212   : > { %v3413_v8 = vld [vmem:[%s3629_s29 + $0x120] sm:$0xff]  ;;  %v1425_v49 = vmul.f32 0.587, %v3397_v21 }
 0x213   : > { %2132 = vrot.lane.b32.xlu0 %v3498_v40, %s3509_s21  ;;  %v1377_v40 = vld [vmem:[%s3629_s29 + $0x20] sm:$0xff]  ;;  %v1473_v39 = vmul.f32 0.114, %v3413_v8 }
 0x214   : > { %v1393_v27 = vmul.f32 0.299, %v1377_v40  ;;  %v3405_v21 = vld [vmem:[%s3629_s29 + $0xe0] sm:$0xff] }
 0x217   : > { %2354 = vrot.lane.b32.xlu0 %v5036_v53, %s3509_s21 }
 0x21b   : > { %2356 = vrot.lane.b32.xlu0 %v5042_v22, %s3509_s21 }
 0x21f   : > { %2358 = vrot.lane.b32.xlu0 %v5050_v5, %s3509_s21 }
 0x223   : > { %2360 = vrot.lane.b32.xlu0 %v5059_v20, %s3509_s21  ;;  %s3452_s18 = spop %3451 }
 0x227   : > { %2477 = vrot.lane.b32.xlu0 %v4877_v44, %s3509_s21  ;;  %v3392_v44 = vld [vmem:[%s3624_s24 + $0x178] sm:$0xff] }
 0x228   : > { %v1356_v26 = vmul.f32 0.114, %v3392_v44  ;;  %v3401_v44 = vld [vmem:[%s3629_s29 + $0xc0] sm:$0xff] }
 0x22a   : > { %v5089_v52 = vadd.f32 %v1356_v26, %v1324_v4  ;;  %v1397_v26 = vmul.f32 0.299, %v1381_v30  ;;  %v1429_v4 = vmul.f32 0.587, %v3401_v44  ;;  %v1307_v44 = vmul.f32 0.587, %v3375_v10 }
 0x22b   : > { %2479 = vrot.lane.b32.xlu0 %v4879_v32, %s3509_s21  ;;  %v5081_v32 = vadd.f32 %v1354_v28, %v1322_v12  ;;  %v5136_v28 = vadd.f32 %v1469_v38, %v1437_v29  ;;  %v1441_v12 = vadd.f32 %v1425_v49, %v1393_v27  ;;  %v1401_v29 = vmul.f32 0.299, %v1385_v6  ;;  %v3421_v49 = vld [vmem:[%s3629_s29 + $0x160] sm:$0xff]  ;;  %v3402_v6 = vld [vmem:[%s3629_s29 + $0xc8] sm:$0xff]  ;;  %v1384_v10 = vld [vmem:[%s3629_s29 + $0x58] sm:$0xff] }
 0x22c   : > { %1516 = vst [vmem:[%s4872_s17 + $0x78] sm:$0xff] %v5089_v52  ;;  %v1445_v55 = vadd.f32 %v1429_v4, %v1397_v26  ;;  %v1433_v27 = vmul.f32 0.587, %v3405_v21  ;;  %v1481_v24 = vmul.f32 0.114, %v3421_v49 }
 0x22d   : > { %1514 = vst [vmem:[%s4872_s17 + $0x68] sm:$0xff] %v5081_v32  ;;  %3425 = vst [vmem:[%s4872_s17 + $0x80] sm:$0xff] %v5136_v28 }
 0x22e   : > { %v5175_v8 = vadd.f32 %v1477_v58, %v1445_v55 }
 0x22f   : > { %2481 = vrot.lane.b32.xlu0 %v4889_v11, %s3509_s21  ;;  %v5083_v11 = vpop.permute.xlu1 %2104 }
 0x230   : > { %3433 = vst [vmem:[%s4872_s17 + $0xc0] sm:$0xff] %v5175_v8 }
 0x233   : > { %2483 = vrot.lane.b32.xlu0 %v4893_v61, %s3509_s21  ;;  %v5093_v61 = vpop.permute.xlu1 %2106 }
 0x237   : > { %2485 = vrot.lane.b32.xlu0 %v4897_v13, %s3509_s21  ;;  %v5100_v18 = vpop.permute.xlu1 %2108  ;;  %v1375_v13 = vld [vmem:[%s3629_s29 + $0x10] sm:$0xff] }
 0x238   : > { %v1391_v35 = vmul.f32 0.299, %v1375_v13  ;;  %v5152_v13 = vadd.f32 %v1473_v39, %v1441_v12  ;;  %v1259_v39 = vld [vmem:[%s3624_s24 + $0x70] sm:$0xff]  ;;  %v1449_v12 = vadd.f32 %v1433_v27, %v1401_v29  ;;  %v1430_v27 = vmul.f32 0.587, %v3402_v6 }
 0x239   : > { %v1275_v62 = vmul.f32 0.299, %v1259_v39 }
 0x23a   : > { %v1439_v46 = vadd.f32 %v1423_v3, %v1391_v35  ;;  %v3403_v35 = vld [vmem:[%s3629_s29 + $0xd0] sm:$0xff]  ;;  %v5162_v3 = vsel %vm1553_vm0, %v2322_v50, %v2324_v41  ;;  %3429 = vst [vmem:[%s4872_s17 + $0xa0] sm:$0xff] %v5152_v13 }
 0x23b   : > { %2489 = vrot.lane.b32.xlu0 %v4911_v2, %s3509_s21  ;;  %v5119_v60 = vpop.permute.xlu1 %2110  ;;  %v1431_v38 = vmul.f32 0.587, %v3403_v35  ;;  %v1323_v4 = vadd.f32 %v1307_v44, %v1275_v62  ;;  %v6080_v35 = vrot.slane %v4980_v63, 1 }
 0x23c   : > { %v5123_v17 = vadd.f32 %v1471_v23, %v1439_v46  ;;  %v5164_v23 = vadd.f32 %v1475_v1, %v1443_v42  ;;  %v3419_v46 = vld [vmem:[%s3629_s29 + $0x150] sm:$0xff]  ;;  %v1355_v42 = vmul.f32 0.114, %v3391_v25  ;;  %v5187_v1 = vadd.f32 %v1481_v24, %v1449_v12  ;;  %v3404_v25 = vld [vmem:[%s3629_s29 + $0xd8] sm:$0xff] }
 0x23d   : > { %v1479_v40 = vmul.f32 0.114, %v3419_v46  ;;  %v1447_v0 = vadd.f32 %v1431_v38, %v1399_v51  ;;  %v6078_v51 = vrot.slane %v4997_v36, 1  ;;  %v1382_v46 = vld [vmem:[%s3629_s29 + $0x48] sm:$0xff]  ;;  %v6077_v24 = vrot.slane %v5009_v47, 1  ;;  %v3420_v12 = vld [vmem:[%s3629_s29 + $0x158] sm:$0xff] }
 0x23e   : > { %3427 = vst [vmem:[%s4872_s17 + $0x90] sm:$0xff] %v5123_v17  ;;  %3431 = vst [vmem:[%s4872_s17 + $0xb0] sm:$0xff] %v5164_v23  ;;  %v5195_v15 = vadd.f32 %v1355_v42, %v1323_v4  ;;  %v6082_v9 = vrot.slane %v5123_v17, 1  ;;  %v3418_v38 = vld [vmem:[%s3629_s29 + $0x148] sm:$0xff]  ;;  %v1398_v29 = vmul.f32 0.299, %v1382_v46 }
 0x23f   : > { %2491 = vrot.lane.b32.xlu0 %v4920_v43, %s3509_s21  ;;  %v5168_v57 = vpop.permute.xlu1 %2112  ;;  %v5185_v30 = vadd.f32 %v1479_v40, %v1447_v0  ;;  %3437 = vst [vmem:[%s4872_s17 + $0xe0] sm:$0xff] %v5187_v1  ;;  %v1478_v49 = vmul.f32 0.114, %v3418_v38  ;;  %v6079_v0 = vrot.slane %v5164_v23, 1  ;;  %v1400_v42 = vmul.f32 0.299, %v1384_v10 }
 0x240   : > { %1515 = vst [vmem:[%s4872_s17 + $0x70] sm:$0xff] %v5195_v15  ;;  %v5208_v58 = vsel %vm1553_vm0, %v6082_v9, %v6080_v35  ;;  %v1446_v39 = vadd.f32 %v1430_v27, %v1398_v29  ;;  %v1432_v4 = vmul.f32 0.587, %v3404_v25  ;;  %v1480_v46 = vmul.f32 0.114, %v3420_v12  ;;  %v1387_v35 = vld [vmem:[%s3629_s29 + $0x70] sm:$0xff] }
 0x241   : > { %3435 = vst [vmem:[%s4872_s17 + $0xd0] sm:$0xff] %v5185_v30  ;;  %6267 = vst [vmem:[#allocation17_spill] sm:$0xff] %v5208_v58  ;;  %v5236_v62 = vsel %vm1553_vm0, %v6079_v0, %v6077_v24  ;;  %v5253_v27 = vsel %vm1553_vm0, %v2320_v14, %v2322_v50  ;;  %v5278_v50 = vsel %vm1651_vm1, %v5072_v19, 0.0  ;;  %v6075_v25 = vrot.slane %v5089_v52, 1 }
 0x242   : > { %6269 = vst [vmem:[#allocation6_spill] sm:$0xff] %v5236_v62  ;;  %v5240_v44 = vadd.f32 %v1478_v49, %v1446_v39  ;;  %v1448_v38 = vadd.f32 %v1432_v4, %v1400_v42  ;;  %6270 = vst [vmem:[#allocation27_spill] sm:$0xff] %v5253_v27  ;;  %v6072_v49 = vrot.slane %v5056_v33, 1  ;;  %v5294_v42 = vsel %vm1651_vm1, %v5100_v18, 0.0  ;;  %v3423_v18 = vld [vmem:[%s3629_s29 + $0x170] sm:$0xff] }
 0x243   : > { %2493 = vrot.lane.b32.xlu0 %v4927_v48, %s3509_s21  ;;  %v2115_v26 = vpop.permute.xlu1 %2114  ;;  %v5271_v48 = vsel %vm1651_vm1, %v5093_v61, 0.0  ;;  %v6076_v61 = vrot.slane %v5195_v15, 1  ;;  %v2187_v37 = vrot.slane %v5294_v42, 1 }
 0x244   : > { %3434 = vst [vmem:[%s4872_s17 + $0xc8] sm:$0xff] %v5240_v44  ;;  %v5246_v29 = vadd.f32 %v1480_v46, %v1448_v38  ;;  %v5267_v10 = vsel %vm1553_vm0, %v2324_v41, %v6072_v49  ;;  %v5274_v14 = vsel %vm1651_vm1, %v2115_v26, 0.0  ;;  %v5286_v41 = vsel %vm1651_vm1, %v5168_v57, 0.0 }
 0x245   : > { %6271 = vst [vmem:[#allocation12_spill] sm:$0xff] %v5267_v10  ;;  %v2185_v26 = vrot.slane %v5271_v48, 1  ;;  %v2193_v12 = vrot.slane %v5274_v14, 1  ;;  %v2182_v57 = vrot.slane %v5278_v50, 1  ;;  %v2191_v46 = vrot.slane %v5286_v41, 1 }
 0x246   : > { %3436 = vst [vmem:[%s4872_s17 + $0xd8] sm:$0xff] %v5246_v29  ;;  %v6088_v38 = vrot.slane %v5175_v8, 1  ;;  %v6087_v49 = vrot.slane %v5240_v44, 1 }
 0x247   : > { %2362 = vrot.lane.b32.xlu0 %v5108_v16, %s3509_s21  ;;  %v2117_v55 = vpop.permute.xlu1 %2116 }
 0x248   : > { %v5318_v24 = vsel %vm1651_vm1, %v2117_v55, 0.0 }
 0x24b   : > { %2364 = vrot.lane.b32.xlu0 %v5130_v56, %s3509_s21  ;;  %v2121_v21 = vpop.permute.xlu1 %2120  ;;  %v6275_v56 = vrot.slane %v4963_v45, 1 }
 0x24f   : > { %2368 = vrot.lane.b32.xlu0 %v5148_v31, %s3509_s21  ;;  %v2123_v6 = vpop.permute.xlu1 %2122  ;;  %v6274_v31 = vrot.slane %v5123_v17, 1 }
 0x250   : > { %v5324_v0 = vsel %vm1651_vm1, %v2123_v6, 0.0 }
 0x253   : > { %2497 = vrot.lane.b32.xlu0 %v4943_v59, %s3509_s21  ;;  %v5258_v39 = vpop.permute.xlu1 %2124  ;;  %v2151_v59 = vsel %vm1651_vm1, %v5083_v11, 0.0  ;;  %v5301_v11 = vsel %vm1553_vm0, %v6076_v61, %v6075_v25  ;;  %v5314_v25 = vsel %vm1651_vm1, %v5119_v60, 0.0  ;;  %v2194_v61 = vsel %vm1553_vm0, %v2191_v46, %v2193_v12 }
 0x254   : > { %6272 = vst [vmem:[#allocation18_spill] sm:$0xff] %v5301_v11  ;;  %v2183_v4 = vrot.slane %v2151_v59, 1  ;;  %v5334_v60 = vsel %vm1553_vm0, %v6088_v38, %v6087_v49  ;;  %v5346_v49 = vsel %vm1553_vm0, %v6275_v56, %v6274_v31  ;;  %v2188_v38 = vsel %vm1553_vm0, %v2185_v26, %v2187_v37  ;;  %v3406_v56 = vld [vmem:[%s3629_s29 + $0xe8] sm:$0xff] }
 0x255   : > { %6273 = vst [vmem:[#allocation46_spill] sm:$0xff] %v5334_v60  ;;  %6276 = vst [vmem:[#allocation21_spill] sm:$0xff] %v5346_v49  ;;  %v2235_v16 = vsub.f32 %v2194_v61, %v5286_v41  ;;  %v1386_v60 = vld [vmem:[%s3629_s29 + $0x68] sm:$0xff]  ;;  %v2232_v11 = vsub.f32 %v2188_v38, %v5271_v48  ;;  %v5394_v38 = vsel %vm1651_vm1, %v5258_v39, 0.0 }
 0x256   : > { %v2186_v54 = vsel %vm1553_vm0, %v2183_v4, %v2185_v26  ;;  %v5337_v9 = vsel %vm1553_vm0, %v2182_v57, %v2183_v4  ;;  %v6093_v57 = vrot.slane %v5185_v30, 1  ;;  %v6092_v4 = vrot.slane %v5246_v29, 1  ;;  %v3422_v31 = vld [vmem:[%s3629_s29 + $0x168] sm:$0xff] }
 0x257   : > { %2501 = vrot.lane.b32.xlu0 %v4950_v7, %s3509_s21  ;;  %v6081_v7 = vrot.slane %v5152_v13, 1  ;;  %v2127_v19 = vpop.permute.xlu1 %2126  ;;  %v1402_v61 = vmul.f32 0.299, %v1386_v60 }
 0x258   : > { %v5364_v26 = vsel %vm1553_vm0, %v6093_v57, %v6092_v4  ;;  %v6278_v4 = vrot.slane %v5152_v13, 1  ;;  %v6279_v57 = vrot.slane %v4980_v63, 1 }
 0x259   : > { %v5222_v40 = vsel %vm1553_vm0, %v6081_v7, %v6078_v51  ;;  %v5321_v51 = vsel %vm1651_vm1, %v2121_v21, 0.0  ;;  %v3407_v7 = vld [vmem:[%s3629_s29 + $0xf0] sm:$0xff]  ;;  %v1403_v21 = vmul.f32 0.299, %v1387_v35  ;;  %6277 = vst [vmem:[#allocation19_spill] sm:$0xff] %v5364_v26 }
 0x25a   : > { %6268 = vst [vmem:[#allocation25_spill] sm:$0xff] %v5222_v40  ;;  %v1435_v6 = vmul.f32 0.587, %v3407_v7 }
 0x25b   : > { %2854 = vrot.lane.b32.xlu0 %v4963_v45, %s3509_s21  ;;  %v2129_v55 = vpop.permute.xlu1 %2128 }
 0x25c   : > { %v1451_v7 = vadd.f32 %v1435_v6, %v1403_v21  ;;  %v1434_v21 = vmul.f32 0.587, %v3406_v56  ;;  %v1482_v6 = vmul.f32 0.114, %v3422_v31  ;;  %v6281_v56 = vrot.slane %v5318_v24, 1 }
 0x25d   : > { %v2163_v39 = vsel %vm1651_vm1, %v2129_v55, 0.0  ;;  %v5423_v55 = vand.u32 2147483647, %v2232_v11  ;;  %v6286_v11 = vrot.slane %v5175_v8, 1 }
 0x25e   : > { %v2196_v31 = vsel %vm1553_vm0, %v2193_v12, %v6281_v56  ;;  %v3408_v12 = vld [vmem:[%s3629_s29 + $0xf8] sm:$0xff] }
 0x25f   : > { %2858 = vrot.lane.b32.xlu0 %v4980_v63, %s3509_s21 }
 0x263   : > { %2862 = vrot.lane.b32.xlu0 %v4997_v36, %s3509_s21 }
 0x267   : > { %2866 = vrot.lane.b32.xlu0 %v5009_v47, %s3509_s21 }
 0x26b   : > { %2370 = vrot.lane.b32.xlu0 %v5253_v27, %s3509_s21  ;;  %v2231_v27 = vsub.f32 %v2186_v54, %v2151_v59  ;;  %v2189_v54 = vrot.slane %v5314_v25, 1  ;;  %v2230_v59 = vsub.f32 %v5337_v9, %v5278_v50  ;;  %v2131_v9 = vpop.permute.xlu1 %2130  ;;  %v6282_v50 = vrot.slane %v5321_v51, 1 }
 0x26c   : > { %v5409_v56 = vsel %vm1651_vm1, %v2131_v9, 0.0 }
 0x26d   : > { %v5372_v35 = vand.u32 2147483647, %v2231_v27  ;;  %v2190_v60 = vsel %vm1553_vm0, %v2187_v37, %v2189_v54  ;;  %v1450_v27 = vadd.f32 %v1434_v21, %v1402_v61  ;;  %v2192_v48 = vsel %vm1553_vm0, %v2189_v54, %v2191_v46  ;;  %v1388_v37 = vld [vmem:[%s3629_s29 + $0x78] sm:$0xff] }
 0x26e   : > { %v1404_v46 = vmul.f32 0.299, %v1388_v37  ;;  %v1436_v54 = vmul.f32 0.587, %v3408_v12  ;;  %v2236_v21 = vsub.f32 %v2196_v31, %v5274_v14  ;;  %v2233_v31 = vsub.f32 %v2190_v60, %v5294_v42 }
 0x26f   : > { %2374 = vrot.lane.b32.xlu0 %v5267_v10, %s3509_s21  ;;  %v1483_v10 = vmul.f32 0.114, %v3423_v18  ;;  %v2201_v18 = vrot.slane %v5324_v0, 1  ;;  %v2234_v9 = vsub.f32 %v2192_v48, %v5314_v25  ;;  %v6287_v42 = vrot.slane %v5009_v47, 1 }
 0x270   : > { %v1452_v14 = vadd.f32 %v1436_v54, %v1404_v46  ;;  %v2252_v46 = vand.u32 2147483647, %v2236_v21 }
 0x271   : > { %v5368_v41 = vadd.f32 %v1483_v10, %v1451_v7  ;;  %v5380_v10 = vsel %vm1553_vm0, %v6279_v57, %v6278_v4  ;;  %v2251_v7 = vand.u32 2147483647, %v2235_v16  ;;  %v2202_v63 = vsel %vm1553_vm0, %v6282_v50, %v2201_v18  ;;  %v3424_v57 = vld [vmem:[%s3629_s29 + $0x178] sm:$0xff] }
 0x272   : > { %6280 = vst [vmem:[#allocation62_spill] sm:$0xff] %v5380_v10  ;;  %v5397_v16 = vsel %vm1651_vm1, %v2127_v19, 0.0  ;;  %v5404_v4 = vadd.f32 %v1482_v6, %v1450_v27  ;;  %v1484_v61 = vmul.f32 0.114, %v3424_v57  ;;  %v6283_v19 = vrot.slane %v5164_v23, 1 }
 0x273   : > { %2503 = vrot.lane.b32.xlu0 %v5081_v32, %s3509_s21  ;;  %3439 = vst [vmem:[%s4872_s17 + $0xf0] sm:$0xff] %v5368_v41  ;;  %v6284_v50 = vrot.slane %v4997_v36, 1  ;;  %v2239_v6 = vsub.f32 %v2202_v63, %v5321_v51  ;;  %v2203_v27 = vrot.slane %v5394_v38, 1  ;;  %v2205_v37 = vrot.slane %v5397_v16, 1 }
 0x274   : > { %3438 = vst [vmem:[%s4872_s17 + $0xe8] sm:$0xff] %v5404_v4  ;;  %v2263_v36 = vmax.f32.f32 %v5372_v35, %v2251_v7  ;;  %v2207_v57 = vrot.slane %v2163_v39, 1  ;;  %v2209_v63 = vrot.slane %v5409_v56, 1  ;;  %v5438_v25 = vsel %vm1553_vm0, %v6287_v42, %v6286_v11 }
 0x275   : > { %6288 = vst [vmem:[#allocation22_spill] sm:$0xff] %v5438_v25  ;;  %v6097_v35 = vrot.slane %v5404_v4, 1  ;;  %v6096_v60 = vrot.slane %v5368_v41, 1  ;;  %v2255_v7 = vand.u32 2147483647, %v2239_v6  ;;  %v2204_v48 = vsel %vm1553_vm0, %v2201_v18, %v2203_v27 }
 0x276   : > { %v2206_v54 = vsel %vm1553_vm0, %v2203_v27, %v2205_v37  ;;  %v2210_v6 = vsel %vm1553_vm0, %v2207_v57, %v2209_v63  ;;  %v2249_v27 = vand.u32 2147483647, %v2233_v31  ;;  %v2250_v42 = vand.u32 2147483647, %v2234_v9 }
 0x277   : > { %2507 = vrot.lane.b32.xlu0 %v5089_v52, %s3509_s21  ;;  %v5451_v47 = vsel %vm1553_vm0, %v6097_v35, %v6096_v60  ;;  %v2264_v60 = vmax.f32.f32 %v5423_v55, %v2252_v46  ;;  %v2267_v35 = vmax.f32.f32 %v2263_v36, %v2255_v7  ;;  %v2330_v36 = vrot.slane %v5081_v32, 1 }
 0x278   : > { %6289 = vst [vmem:[#allocation47_spill] sm:$0xff] %v5451_v47  ;;  %v6290_v47 = vrot.slane %v5318_v24, 1 }
 0x27b   : > { %2731 = vrot.lane.b32.xlu0 %v5346_v49, %s3509_s21  ;;  %v5416_v49 = vsel %vm1553_vm0, %v6284_v50, %v6283_v19  ;;  %v5431_v50 = vadd.f32 %v1484_v61, %v1452_v14  ;;  %v2246_v61 = vand.u32 2147483647, %v2230_v59  ;;  %v2208_v14 = vsel %vm1553_vm0, %v2205_v37, %v2207_v57 }
 0x27c   : > { %6285 = vst [vmem:[#allocation29_spill] sm:$0xff] %v5416_v49  ;;  %v2240_v59 = vsub.f32 %v2204_v48, %v5324_v0  ;;  %v2242_v37 = vsub.f32 %v2208_v14, %v5397_v16  ;;  %v2243_v57 = vsub.f32 %v2210_v6, %v2163_v39 }
 0x27d   : > { %3440 = vst [vmem:[%s4872_s17 + $0xf8] sm:$0xff] %v5431_v50  ;;  %v2262_v46 = vmax.f32.f32 %v2246_v61, %v2250_v42 }
 0x27f   : > { %2735 = vrot.lane.b32.xlu0 %v5380_v10, %s3509_s21 }
 0x282   : > { %v2091_v12 = vpop.xlane.xlu0 %2090 }
 0x283   : > { %v2092_v19 = vrot.slane %v2091_v12, 4  ;;  %2739 = vrot.lane.b32.xlu0 %v5416_v49, %s3509_s21 }
 0x285   : > { %v2093_v10 = vmax.f32 %v2091_v12, %v2092_v19  ;;  %v2241_v12 = vsub.f32 %v2206_v54, %v5394_v38 }
 0x286   : > { %v2119_v21 = vpop.permute.xlu0 %2118 }
 0x287   : > { %v2094_v11 = vrot.slane %v2093_v10, 2  ;;  %v2158_v18 = vsel %vm1651_vm1, %v2119_v21, 0.0  ;;  %2743 = vrot.lane.b32.xlu0 %v5438_v25, %s3509_s21  ;;  %v6291_v25 = vrot.slane %v5321_v51, 1  ;;  %v2257_v16 = vand.u32 2147483647, %v2241_v12 }
 0x288   : > { %v2197_v19 = vrot.slane %v2158_v18, 1 }
 0x289   : > { %v2095_v49 = vmax.f32 %v2093_v10, %v2094_v11  ;;  %v2256_v10 = vand.u32 2147483647, %v2240_v59 }
 0x28a   : > { %v2198_v21 = vsel %vm1553_vm0, %v6290_v47, %v2197_v19  ;;  %v2200_v31 = vsel %vm1553_vm0, %v2197_v19, %v6291_v25  ;;  %v2133_v0 = vpop.permute.xlu0 %2132  ;;  %v2258_v25 = vand.u32 2147483647, %v2242_v37  ;;  %v2259_v47 = vand.u32 2147483647, %v2243_v57 }
 0x28b   : > { %v2237_v38 = vsub.f32 %v2198_v21, %v5318_v24  ;;  %v2238_v48 = vsub.f32 %v2200_v31, %v2158_v18  ;;  %v2165_v9 = vsel %vm1651_vm1, %v2133_v0, 0.0  ;;  %v2096_v55 = vrot.slane %v2095_v49, 1  ;;  %2872 = vrot.lane.b32.xlu0 %v5185_v30, %s3509_s21 }
 0x28c   : > { %v2211_v39 = vrot.slane %v2165_v9, 1  ;;  %v2268_v12 = vmax.f32.f32 %v2264_v60, %v2256_v10  ;;  %v2271_v31 = vmax.f32.f32 %v2267_v35, %v2259_v47  ;;  %v2703_v47 = vrot.slane %v5187_v1, 1 }
 0x28d   : > { %v2253_v7 = vand.u32 2147483647, %v2237_v38  ;;  %v2254_v51 = vand.u32 2147483647, %v2238_v48  ;;  %v2097_v54 = vmax.f32 %v2095_v49, %v2096_v55  ;;  %v6292_v49 = vrot.slane %v5195_v15, 1 }
 0x28e   : > { %v2212_v24 = vsel %vm1553_vm0, %v2209_v63, %v2211_v39  ;;  %v2229_v14 = vsel %vm1553_vm0, %v2211_v39, 0.0  ;;  %v2355_v6 = vpop.permute.xlu0 %2354 }
 0x28f   : > { %v2266_v11 = vmax.f32.f32 %v2262_v46, %v2254_v51  ;;  %v2265_v18 = vmax.f32.f32 %v2249_v27, %v2253_v7  ;;  %v2244_v19 = vsub.f32 %v2212_v24, %v5409_v56  ;;  %v2245_v59 = vsub.f32 %v2229_v14, %v2165_v9  ;;  %3453 = vpush %v2097_v54 }
 0x290   : > { %v2402_v21 = vsel %vm1651_vm1, %v2355_v6, 0.0  ;;  %2876 = vrot.lane.b32.xlu0 %v5187_v1, %s3509_s21  ;;  %v5484_v63 = vsel %vm1553_vm0, %v2330_v36, %v6292_v49 }
 0x291   : > { %v2270_v61 = vmax.f32.f32 %v2266_v11, %v2258_v25  ;;  %v2269_v42 = vmax.f32.f32 %v2265_v18, %v2257_v16  ;;  %v2260_v27 = vand.u32 2147483647, %v2244_v19  ;;  %v2261_v37 = vand.u32 2147483647, %v2245_v59 }
 0x292   : > { %v2418_v56 = vsub.f32 %v2402_v21, %v5036_v53  ;;  %v2357_v57 = vpop.permute.xlu0 %2356  ;;  %v6293_v16 = vrot.slane %v5089_v52, 1  ;;  %v6295_v25 = vrot.slane %v5240_v44, 1 }
 0x293   : > { %v2273_v60 = vmax.f32.f32 %v2269_v42, %v2261_v37  ;;  %v2272_v0 = vmax.f32.f32 %v2268_v12, %v2260_v27  ;;  %v2403_v38 = vsel %vm1651_vm1, %v2357_v57, 0.0  ;;  %v2274_v55 = vmax.f32.f32 %v2270_v61, %v2271_v31 }
 0x294   : > { %v2434_v48 = vand.u32 2147483647, %v2418_v56  ;;  %v2419_v9 = vsub.f32 %v2403_v38, %v5042_v22  ;;  %2380 = vrot.lane.b32.xlu0 %v5484_v63, %s3509_s21  ;;  %v5494_v39 = vsel %vm1553_vm0, %v6293_v16, 0.0  ;;  %v6294_v22 = vrot.slane %v5185_v30, 1 }
 0x295   : > { %v2275_v10 = vmax.f32.f32 %v2272_v0, %v2273_v60  ;;  %v6297_v30 = vrot.slane %v5246_v29, 1  ;;  %v6299_v42 = vrot.slane %v5404_v4, 1  ;;  %v2709_v37 = vrot.slane %v5431_v50, 1 }
 0x296   : > { %v2435_v53 = vand.u32 2147483647, %v2419_v9  ;;  %v2359_v46 = vpop.permute.xlu0 %2358  ;;  %v5505_v52 = vsel %vm1553_vm0, %v6295_v25, %v6294_v22  ;;  %v6301_v38 = vrot.slane %v5368_v41, 1  ;;  %v3499_v9 = vld [vmem:[%s4872_s17 + $0x28] sm:$0xff]  ;;  %v6303_v16 = vrot.slane %v4920_v43, 1 }
 0x297   : > { %v2276_v7 = vmax.f32.f32 %v2274_v55, %v2275_v10  ;;  %v2404_v35 = vsel %vm1651_vm1, %v2359_v46, 0.0  ;;  %6296 = vst [vmem:[#allocation48_spill] sm:$0xff] %v5505_v52  ;;  %v5517_v18 = vsel %vm1553_vm0, %v6297_v30, %v2703_v47  ;;  %v5538_v27 = vsel %vm1553_vm0, %v2703_v47, %v6299_v42 }
 0x298   : > { %v2450_v51 = vmax.f32.f32 %v2434_v48, %v2435_v53  ;;  %v2420_v54 = vsub.f32 %v2404_v35, %v5050_v5  ;;  %2384 = vrot.lane.b32.xlu0 %v5494_v39, %s3509_s21  ;;  %6298 = vst [vmem:[#allocation39_spill] sm:$0xff] %v5517_v18  ;;  %6300 = vst [vmem:[#allocation10_spill] sm:$0xff] %v5538_v27  ;;  %v5557_v48 = vsel %vm1553_vm0, %v6301_v38, %v2709_v37 }
 0x299   : > { %2277 = vmax.xlane.f32.xlu1 %v2276_v7  ;;  %6302 = vst [vmem:[#allocation53_spill] sm:$0xff] %v5557_v48  ;;  %v6304_v53 = vrot.slane %v4911_v2, 1 }
 0x29a   : > { %v2436_v24 = vand.u32 2147483647, %v2420_v54  ;;  %v2361_v14 = vpop.permute.xlu0 %2360 }
 0x29b   : > { %v2405_v6 = vsel %vm1651_vm1, %v2361_v14, 0.0  ;;  %v5569_v46 = vsel %vm1553_vm0, %v6304_v53, %v6303_v16  ;;  %v6305_v14 = vrot.slane %v5056_v33, 1 }
 0x29c   : > { %v5509_v11 = vmax.f32.f32 %v2436_v24, %v2450_v51  ;;  %v2421_v5 = vsub.f32 %v2405_v6, %v5059_v20  ;;  %2747 = vrot.lane.b32.xlu0 %v5505_v52, %s3509_s21 }
 0x29e   : > { %v5519_v19 = vand.u32 2147483647, %v2421_v5  ;;  %v2478_v59 = vpop.permute.xlu0 %2477 }
 0x29f   : > { %v5522_v1 = vsel %vm1651_vm1, %v2478_v59, 0.0  ;;  %v6309_v59 = vld [vmem:[#allocation18_spill] sm:$0xff] }
 0x2a0   : > { %2751 = vrot.lane.b32.xlu0 %v5517_v18, %s3509_s21  ;;  %v2557_v20 = vrot.slane %v5522_v1, 1 }
 0x2a2   : > { %v2480_v21 = vpop.permute.xlu0 %2479 }
 0x2a3   : > { %v5530_v49 = vsel %vm1651_vm1, %v2480_v21, 0.0  ;;  %v5673_v21 = vsel %vm1553_vm0, %v2709_v37, 0.0 }
 0x2a4   : > { %v2558_v61 = vrot.slane %v5530_v49, 1  ;;  %2880 = vrot.lane.b32.xlu0 %v5368_v41, %s3509_s21  ;;  %6312 = vst [vmem:[#allocation8_spill] sm:$0xff] %v5673_v21 }
 0x2a6   : > { %v5542_v56 = vsel %vm1553_vm0, %v2557_v20, %v2558_v61  ;;  %v2482_v57 = vpop.permute.xlu0 %2481 }
 0x2a7   : > { %v2605_v60 = vsub.f32 %v5542_v56, %v5522_v1  ;;  %v5547_v31 = vsel %vm1651_vm1, %v2482_v57, 0.0 }
 0x2a8   : > { %v2560_v0 = vrot.slane %v5547_v31, 1  ;;  %2753 = vrot.lane.b32.xlu0 %v5538_v27, %s3509_s21 }
 0x2aa   : > { %2487 = vrot.lane.b32.xlu1 %v3499_v9, %s3509_s21  ;;  %v5562_v55 = vsel %vm1553_vm0, %v2558_v61, %v2560_v0  ;;  %v2484_v10 = vpop.permute.xlu0 %2483 }
 0x2ab   : > { %v5572_v7 = vsel %vm1651_vm1, %v2484_v10, 0.0 }
 0x2ac   : > { %v2562_v35 = vrot.slane %v5572_v7, 1  ;;  %2757 = vrot.lane.b32.xlu0 %v5557_v48, %s3509_s21 }
 0x2ae   : > { %2366 = vrot.lane.b32.xlu1 %v5569_v46, %s3509_s21  ;;  %v5582_v2 = vsel %vm1553_vm0, %v2560_v0, %v2562_v35  ;;  %v2486_v43 = vpop.permute.xlu0 %2485 }
 0x2af   : > { %v5587_v54 = vsel %vm1651_vm1, %v2486_v43, 0.0 }
 0x2b0   : > { %v2564_v22 = vrot.slane %v5587_v54, 1 }
 0x2b2   : > { %2495 = vrot.lane.b32.xlu1 %v5025_v34, %s3509_s21  ;;  %v5593_v25 = vsel %vm1553_vm0, %v2562_v35, %v2564_v22  ;;  %v3500_v34 = vld [vmem:[%s4872_s17 + $0x60] sm:$0xff] }
 0x2b3   : > { %v2328_v24 = vrot.slane %v3500_v34, 1 }
 0x2b5   : > { %v5615_v6 = vsel %vm1553_vm0, %v6305_v14, %v2328_v24 }
 0x2b6   : > { %2499 = vrot.lane.b32.xlu1 %v5056_v33, %s3509_s21 }
 0x2ba   : > { %2852 = vrot.lane.b32.xlu1 %v5136_v28, %s3509_s21 }
 0x2be   : > { %2856 = vrot.lane.b32.xlu1 %v5123_v17, %s3509_s21  ;;  %v2680_v17 = vrot.slane %v5136_v28, 1 }
 0x2c0   : > { %s3454_s19 = spop %3453 }
 0x2c2   : > { %2860 = vrot.lane.b32.xlu1 %v5152_v13, %s3509_s21  ;;  %v6306_v13 = vrot.slane %v4963_v45, 1 }
 0x2c6   : > { %2864 = vrot.lane.b32.xlu1 %v5164_v23, %s3509_s21  ;;  %v5625_v23 = vsel %vm1553_vm0, %v2680_v17, %v6306_v13  ;;  %v5696_v13 = vand.u32 2147483647, %v2605_v60 }
 0x2c7   : > { %6307 = vst [vmem:[#allocation54_spill] sm:$0xff] %v5625_v23 }
 0x2ca   : > { %2868 = vrot.lane.b32.xlu1 %v5175_v8, %s3509_s21  ;;  %v2490_v8 = vpop.permute.xlu0 %2489 }
 0x2cb   : > { %v5703_v12 = vsel %vm1651_vm1, %v2490_v8, 0.0 }
 0x2cc   : > { %v6103_v56 = vrot.slane %v5703_v12, 1 }
 0x2ce   : > { %2372 = vrot.lane.b32.xlu1 %v5162_v3, %s3509_s21  ;;  %v2492_v33 = vpop.permute.xlu0 %2491 }
 0x2d2   : > { %2376 = vrot.lane.b32.xlu1 %v5615_v6, %s3509_s21  ;;  %v5633_v28 = vpop.permute.xlu0 %2493 }
 0x2d6   : > { %2505 = vrot.lane.b32.xlu1 %v5195_v15, %s3509_s21  ;;  %v5637_v45 = vpop.permute.xlu0 %2362  ;;  %v5646_v15 = vsel %vm1553_vm0, %v2328_v24, %v2330_v36  ;;  %v6311_v36 = vld [vmem:[#allocation47_spill] sm:$0xff] }
 0x2d7   : > { %6308 = vst [vmem:[#allocation37_spill] sm:$0xff] %v5646_v15 }
 0x2da   : > { %2729 = vrot.lane.b32.xlu1 %v5625_v23, %s3509_s21  ;;  %v5648_v5 = vpop.permute.xlu0 %2364 }
 0x2de   : > { %2733 = vrot.lane.b32.xlu1 %v5208_v58, %s3509_s21  ;;  %v5652_v30 = vpop.permute.xlu0 %2368 }
 0x2e2   : > { %2737 = vrot.lane.b32.xlu1 %v5222_v40, %s3509_s21  ;;  %v5658_v20 = vpop.permute.xlu0 %2497 }
 0x2e6   : > { %2741 = vrot.lane.b32.xlu1 %v5236_v62, %s3509_s21  ;;  %v5662_v32 = vpop.permute.xlu0 %2501 }
 0x2e7   : > { %v5761_v48 = vsel %vm1651_vm1, %v5662_v32, 0.0 }
 0x2ea   : > { %2870 = vrot.lane.b32.xlu1 %v5240_v44, %s3509_s21  ;;  %v6310_v44 = vld [vmem:[#allocation46_spill] sm:$0xff] }
 0x2ee   : > { %2874 = vrot.lane.b32.xlu1 %v5246_v29, %s3509_s21  ;;  %v2855_v29 = vpop.permute.xlu0 %2854 }
 0x2ef   : > { %v2901_v1 = vsel %vm1651_vm1, %v2855_v29, 0.0 }
 0x2f2   : > { %2378 = vrot.lane.b32.xlu1 %v5646_v15, %s3509_s21  ;;  %v2859_v61 = vpop.permute.xlu0 %2858 }
 0x2f6   : > { %2382 = vrot.lane.b32.xlu1 %v6309_v59, %s3509_s21  ;;  %v2863_v42 = vpop.permute.xlu0 %2862 }
 0x2f7   : > { %v2905_v41 = vsel %vm1651_vm1, %v2863_v42, 0.0 }
 0x2fa   : > { %2745 = vrot.lane.b32.xlu1 %v6310_v44, %s3509_s21  ;;  %v2867_v57 = vpop.permute.xlu0 %2866 }
 0x2fe   : > { %2749 = vrot.lane.b32.xlu1 %v5364_v26, %s3509_s21  ;;  %v5677_v0 = vpop.permute.xlu0 %2370 }
 0x302   : > { %2878 = vrot.lane.b32.xlu1 %v5404_v4, %s3509_s21  ;;  %v5679_v16 = vpop.permute.xlu0 %2374 }
 0x306   : > { %2882 = vrot.lane.b32.xlu1 %v5431_v50, %s3509_s21  ;;  %v5690_v24 = vpop.permute.xlu0 %2503 }
 0x30a   : > { %2755 = vrot.lane.b32.xlu1 %v6311_v36, %s3509_s21  ;;  %v5731_v36 = vsel %vm1651_vm1, %v5633_v28, 0.0  ;;  %v2406_v28 = vsel %vm1651_vm1, %v5637_v45, 0.0 }
 0x30e   : > { %2759 = vrot.lane.b32.xlu1 %v5673_v21, %s3509_s21 }
 0x322   : > { %v2278_v4 = vpop.xlane.xlu1 %2277 }
 0x323   : > { %v2279_v38 = vrot.slane %v2278_v4, 4 }
 0x325   : > { %v2280_v9 = vmax.f32 %v2278_v4, %v2279_v38 }
 0x326   : > { %v2488_v10 = vpop.permute.xlu1 %2487 }
 0x327   : > { %v2281_v53 = vrot.slane %v2280_v9, 2  ;;  %v5682_v50 = vsel %vm1651_vm1, %v2488_v10, 0.0 }
 0x328   : > { %v6101_v37 = vrot.slane %v5682_v50, 1 }
 0x329   : > { %v2282_v35 = vmax.f32 %v2280_v9, %v2281_v53 }
 0x32a   : > { %v2567_v43 = vsel %vm1553_vm0, %v2564_v22, %v6101_v37  ;;  %v5688_v34 = vpop.permute.xlu1 %2366  ;;  %v2508_v22 = vpop.permute.xlu0 %2507 }
 0x32b   : > { %v2609_v14 = vsub.f32 %v2567_v43, %v5587_v54  ;;  %v2283_v17 = vrot.slane %v2282_v35, 1  ;;  %v5706_v54 = vsel %vm1651_vm1, %v2492_v33, 0.0 }
 0x32c   : > { %v6104_v60 = vrot.slane %v5706_v54, 1 }
 0x32d   : > { %v5698_v4 = vand.u32 2147483647, %v2609_v14  ;;  %v2284_v38 = vmax.f32 %v2282_v35, %v2283_v17  ;;  %v2933_v14 = vrot.slane %v2901_v1, 1  ;;  %v5714_v17 = vsel %vm1651_vm1, %v2859_v61, 0.0 }
 0x32e   : > { %v2496_v9 = vpop.permute.xlu1 %2495  ;;  %v5711_v35 = vpop.permute.xlu0 %2731  ;;  %v2571_v33 = vsel %vm1553_vm0, %v6103_v56, %v6104_v60  ;;  %v2937_v29 = vrot.slane %v5714_v17, 1  ;;  %v2941_v56 = vrot.slane %v2905_v41, 1 }
 0x32f   : > { %3455 = vpush %v2284_v38  ;;  %v2611_v21 = vsub.f32 %v2571_v33, %v5703_v12  ;;  %v6313_v33 = vsub.f32 %v5582_v2, %v5547_v31 }
 0x331   : > { %v5740_v62 = vand.u32 2147483647, %v6313_v33  ;;  %v5753_v31 = vand.u32 2147483647, %v2611_v21  ;;  %v6314_v33 = vld [vmem:[#allocation50_spill] sm:$0xff] }
 0x332   : > { %v2500_v53 = vpop.permute.xlu1 %2499  ;;  %v5726_v51 = vpop.permute.xlu0 %2735 }
 0x333   : > { %v2536_v21 = vsel %vm1651_vm1, %v2500_v53, 0.0 }
 0x336   : > { %v2853_v43 = vpop.permute.xlu1 %2852 }
 0x337   : > { %v2900_v38 = vsel %vm1651_vm1, %v2853_v43, 0.0 }
 0x338   : > { %v2932_v8 = vrot.slane %v2900_v38, 1 }
 0x33a   : > { %v2857_v10 = vpop.permute.xlu1 %2856  ;;  %v2934_v47 = vsel %vm1553_vm0, %v2932_v8, %v2933_v14  ;;  %v2907_v8 = vsel %vm1651_vm1, %v2867_v57, 0.0 }
 0x33b   : > { %v2902_v37 = vsel %vm1651_vm1, %v2857_v10, 0.0  ;;  %v2980_v61 = vsub.f32 %v2934_v47, %v2900_v38  ;;  %v2945_v57 = vrot.slane %v2907_v8, 1 }
 0x33c   : > { %v2935_v43 = vrot.slane %v2902_v37, 1 }
 0x33e   : > { %v2936_v60 = vsel %vm1553_vm0, %v2933_v14, %v2935_v43  ;;  %v2938_v26 = vsel %vm1553_vm0, %v2935_v43, %v2937_v29  ;;  %v2861_v42 = vpop.permute.xlu1 %2860  ;;  %v5746_v14 = vsel %vm1651_vm1, %v5658_v20, 0.0  ;;  %v2572_v43 = vrot.slane %v5731_v36, 1 }
 0x33f   : > { %v2981_v44 = vsub.f32 %v2936_v60, %v2901_v1  ;;  %v2982_v10 = vsub.f32 %v2938_v26, %v2902_v37  ;;  %v2904_v47 = vsel %vm1651_vm1, %v2861_v42, 0.0  ;;  %v5749_v1 = vpop.permute.xlu0 %2739  ;;  %v2422_v20 = vsub.f32 %v2406_v28, %v6314_v33 }
 0x340   : > { %v2939_v38 = vrot.slane %v2904_v47, 1  ;;  %v2576_v40 = vrot.slane %v5746_v14, 1  ;;  %v5776_v28 = vsel %vm1651_vm1, %v2508_v22, 0.0 }
 0x341   : > { %v5786_v33 = vand.u32 2147483647, %v2981_v44  ;;  %v5794_v23 = vand.u32 2147483647, %v2982_v10  ;;  %v2586_v44 = vrot.slane %v5776_v28, 1  ;;  %v6318_v10 = vrot.slane %v5682_v50, 1 }
 0x342   : > { %v2940_v26 = vsel %vm1553_vm0, %v2937_v29, %v2939_v38  ;;  %v2942_v37 = vsel %vm1553_vm0, %v2939_v38, %v2941_v56  ;;  %v2865_v60 = vpop.permute.xlu1 %2864  ;;  %v5764_v29 = vsel %vm1651_vm1, %v2496_v9, 0.0  ;;  %v5767_v38 = vand.u32 2147483647, %v2980_v61 }
 0x343   : > { %v2983_v2 = vsub.f32 %v2940_v26, %v5714_v17  ;;  %v2984_v42 = vsub.f32 %v2942_v37, %v2904_v47  ;;  %v2906_v45 = vsel %vm1651_vm1, %v2865_v60, 0.0  ;;  %v5773_v47 = vsel %vm1651_vm1, %v5690_v24, 0.0  ;;  %v5788_v22 = vpop.permute.xlu0 %2743 }
 0x344   : > { %v2943_v58 = vrot.slane %v2906_v45, 1  ;;  %v2578_v24 = vrot.slane %v2536_v21, 1  ;;  %6315 = vst [vmem:[#allocation23_spill] sm:$0xff] %v5788_v22  ;;  %v2438_v15 = vand.u32 2147483647, %v2422_v20 }
 0x345   : > { %v5769_v17 = vand.u32 2147483647, %v2984_v42  ;;  %v2574_v42 = vrot.slane %v5764_v29, 1  ;;  %v5822_v22 = vand.u32 2147483647, %v2983_v2 }
 0x346   : > { %v2944_v32 = vsel %vm1553_vm0, %v2941_v56, %v2943_v58  ;;  %v2946_v26 = vsel %vm1553_vm0, %v2943_v58, %v2945_v57  ;;  %v2869_v37 = vpop.permute.xlu1 %2868  ;;  %v6316_v58 = vrot.slane %v5706_v54, 1 }
 0x347   : > { %v2985_v53 = vsub.f32 %v2944_v32, %v2905_v41  ;;  %v2986_v61 = vsub.f32 %v2946_v26, %v2906_v45  ;;  %v5783_v60 = vsel %vm1651_vm1, %v2869_v37, 0.0  ;;  %v2580_v32 = vrot.slane %v5761_v48, 1 }
 0x348   : > { %v6115_v56 = vrot.slane %v5783_v60, 1  ;;  %v2573_v27 = vsel %vm1553_vm0, %v6316_v58, %v2572_v43  ;;  %v2582_v26 = vrot.slane %v5773_v47, 1  ;;  %v6317_v58 = vrot.slane %v5703_v12, 1 }
 0x349   : > { %v5796_v41 = vand.u32 2147483647, %v2985_v53  ;;  %v5798_v45 = vand.u32 2147483647, %v2986_v61  ;;  %v2612_v59 = vsub.f32 %v2573_v27, %v5706_v54  ;;  %v2407_v12 = vsel %vm1651_vm1, %v5648_v5, 0.0  ;;  %v5830_v54 = vpop.permute.xlu0 %2872 }
 0x34a   : > { %v2948_v37 = vsel %vm1553_vm0, %v2945_v57, %v6115_v56  ;;  %v5806_v9 = vpop.permute.xlu1 %2372  ;;  %v2569_v53 = vsel %vm1553_vm0, %v6318_v10, %v6317_v58  ;;  %v2575_v57 = vsel %vm1553_vm0, %v2572_v43, %v2574_v42  ;;  %v2581_v56 = vsel %vm1553_vm0, %v2578_v24, %v2580_v32 }
 0x34b   : > { %v2987_v18 = vsub.f32 %v2948_v37, %v2907_v8  ;;  %v3013_v52 = vmax.f32.f32 %v5786_v33, %v5796_v41  ;;  %v2610_v10 = vsub.f32 %v2569_v53, %v5682_v50  ;;  %v2583_v8 = vsel %vm1553_vm0, %v2580_v32, %v2582_v26 }
 0x34c   : > { %v2577_v37 = vsel %vm1553_vm0, %v2574_v42, %v2576_v40  ;;  %v2579_v27 = vsel %vm1553_vm0, %v2576_v40, %v2578_v24  ;;  %v2613_v20 = vsub.f32 %v2575_v57, %v5731_v36  ;;  %v2604_v5 = vsel %vm1553_vm0, %v2586_v44, 0.0  ;;  %v6320_v42 = vld [vmem:[#allocation51_spill] sm:$0xff] }
 0x34d   : > { %v5824_v58 = vand.u32 2147483647, %v2987_v18  ;;  %v2616_v2 = vsub.f32 %v2581_v56, %v2536_v21  ;;  %v6319_v50 = vsub.f32 %v5593_v25, %v5572_v7  ;;  %v2628_v53 = vand.u32 2147483647, %v2612_v59 }
 0x34e   : > { %v5832_v43 = vpop.permute.xlu1 %2376  ;;  %v2423_v61 = vsub.f32 %v2407_v12, %v6320_v42  ;;  %v2409_v40 = vsel %vm1651_vm1, %v5652_v30, 0.0  ;;  %v2617_v24 = vsub.f32 %v2583_v8, %v5761_v48  ;;  %v2614_v36 = vsub.f32 %v2577_v37, %v5764_v29  ;;  %v6323_v37 = vld [vmem:[#allocation35_spill] sm:$0xff] }
 0x34f   : > { %v2624_v32 = vand.u32 2147483647, %v6319_v50  ;;  %v2615_v57 = vsub.f32 %v2579_v27, %v5746_v14  ;;  %v6321_v21 = vsub.f32 %v5562_v55, %v5530_v49  ;;  %v2626_v18 = vand.u32 2147483647, %v2610_v10  ;;  %v5860_v55 = vpop.permute.xlu0 %2876 }
 0x350   : > { %v2620_v7 = vsub.f32 %v2604_v5, %v5776_v28  ;;  %v2639_v59 = vmax.f32.f32 %v5740_v62, %v5753_v31  ;;  %v6322_v30 = vmax.f32.f32 %v5519_v19, %v5509_v11  ;;  %v2629_v48 = vand.u32 2147483647, %v2613_v20 }
 0x351   : > { %v2622_v56 = vand.u32 2147483647, %v6321_v21  ;;  %v2632_v8 = vand.u32 2147483647, %v2616_v2  ;;  %v2439_v14 = vand.u32 2147483647, %v2423_v61  ;;  %v2425_v27 = vsub.f32 %v2409_v40, %v6323_v37 }
 0x352   : > { %v2506_v25 = vpop.permute.xlu1 %2505  ;;  %v2454_v12 = vmax.f32.f32 %v2438_v15, %v6322_v30  ;;  %v2410_v49 = vsel %vm1651_vm1, %v5677_v0, 0.0  ;;  %v2633_v10 = vand.u32 2147483647, %v2617_v24  ;;  %v2630_v5 = vand.u32 2147483647, %v2614_v36 }
 0x353   : > { %v2539_v29 = vsel %vm1651_vm1, %v2506_v25, 0.0  ;;  %v2631_v62 = vand.u32 2147483647, %v2615_v57  ;;  %v2640_v31 = vmax.f32.f32 %v2624_v32, %v2628_v53  ;;  %v2638_v50 = vmax.f32.f32 %v2622_v56, %v2626_v18  ;;  %v6325_v57 = vld [vmem:[#allocation27_spill] sm:$0xff] }
 0x354   : > { %v2584_v28 = vrot.slane %v2539_v29, 1  ;;  %v2636_v11 = vand.u32 2147483647, %v2620_v7  ;;  %v6324_v61 = vmax.f32.f32 %v5696_v13, %v5698_v4  ;;  %v2452_v24 = vmax.f32.f32 %v2439_v14, %v2454_v12  ;;  %v2381_v13 = vpop.permute.xlu0 %2380 }
 0x355   : > { %v2644_v0 = vmax.f32.f32 %v2640_v31, %v2632_v8  ;;  %v2441_v36 = vand.u32 2147483647, %v2425_v27  ;;  %v2426_v32 = vsub.f32 %v2410_v49, %v6325_v57  ;;  %v2412_v18 = vsel %vm1651_vm1, %v5679_v16, 0.0  ;;  %v6326_v8 = vld [vmem:[#allocation12_spill] sm:$0xff] }
 0x356   : > { %v2585_v19 = vsel %vm1553_vm0, %v2582_v26, %v2584_v28  ;;  %v2587_v15 = vsel %vm1553_vm0, %v2584_v28, %v2586_v44  ;;  %v5864_v20 = vpop.permute.xlu1 %2729  ;;  %v2641_v2 = vmax.f32.f32 %v6324_v61, %v2629_v48  ;;  %v2642_v26 = vmax.f32.f32 %v2638_v50, %v2630_v5 }
 0x357   : > { %v2618_v42 = vsub.f32 %v2585_v19, %v5773_v47  ;;  %v2619_v40 = vsub.f32 %v2587_v15, %v2539_v29  ;;  %v2643_v21 = vmax.f32.f32 %v2639_v59, %v2631_v62  ;;  %v2408_v56 = vsel %vm1651_vm1, %v5688_v34, 0.0 }
 0x358   : > { %v2648_v7 = vmax.f32.f32 %v2644_v0, %v2636_v11  ;;  %v2645_v25 = vmax.f32.f32 %v2641_v2, %v2633_v10  ;;  %v2455_v12 = vmax.f32.f32 %v2441_v36, %v2452_v24  ;;  %v2442_v48 = vand.u32 2147483647, %v2426_v32  ;;  %v2385_v10 = vpop.permute.xlu0 %2384 }
 0x359   : > { %v2634_v53 = vand.u32 2147483647, %v2618_v42  ;;  %v2635_v44 = vand.u32 2147483647, %v2619_v40  ;;  %v2428_v29 = vsub.f32 %v2412_v18, %v6326_v8  ;;  %v2411_v16 = vsel %vm1651_vm1, %v5806_v9, 0.0  ;;  %v6330_v8 = vld [vmem:[#allocation29_spill] sm:$0xff] }
 0x35a   : > { %v5875_v4 = vpop.permute.xlu1 %2733  ;;  %v2424_v59 = vsub.f32 %v2408_v56, %v5569_v46  ;;  %v2459_v49 = vmax.f32.f32 %v2455_v12, %v2442_v48  ;;  %v2427_v5 = vsub.f32 %v2411_v16, %v5162_v3  ;;  %v2415_v62 = vsel %vm1651_vm1, %v2381_v13, 0.0  ;;  %v6331_v16 = vld [vmem:[#allocation23_spill] sm:$0xff] }
 0x35b   : > { %v2647_v47 = vmax.f32.f32 %v2643_v21, %v2635_v44  ;;  %v2646_v30 = vmax.f32.f32 %v2642_v26, %v2634_v53  ;;  %v2444_v28 = vand.u32 2147483647, %v2428_v29  ;;  %v2431_v19 = vsub.f32 %v2415_v62, %v5484_v63 }
 0x35c   : > { %v2440_v31 = vand.u32 2147483647, %v2424_v59  ;;  %v2443_v9 = vand.u32 2147483647, %v2427_v5  ;;  %v2748_v15 = vpop.permute.xlu0 %2747  ;;  %v2413_v46 = vsel %vm1651_vm1, %v5832_v43, 0.0  ;;  %v2417_v36 = vsel %vm1651_vm1, %v2385_v10, 0.0 }
 0x35d   : > { %v2649_v14 = vmax.f32.f32 %v2645_v25, %v2646_v30  ;;  %v2650_v37 = vmax.f32.f32 %v2647_v47, %v2648_v7  ;;  %v2457_v11 = vmax.f32.f32 %v2444_v28, %v2459_v49  ;;  %v2447_v42 = vand.u32 2147483647, %v2431_v19  ;;  %v6329_v30 = vld [vmem:[#allocation21_spill] sm:$0xff]  ;;  %v6333_v28 = vld [vmem:[#allocation62_spill] sm:$0xff] }
 0x35e   : > { %v5881_v27 = vpop.permute.xlu1 %2737  ;;  %v2429_v40 = vsub.f32 %v2413_v46, %v5615_v6  ;;  %v6327_v63 = vrot.slane %v5783_v60, 1  ;;  %v2433_v44 = vsub.f32 %v2417_v36, %v5494_v39  ;;  %v2778_v21 = vsel %vm1651_vm1, %v5711_v35, 0.0 }
 0x35f   : > { %v2651_v34 = vmax.f32.f32 %v2649_v14, %v2650_v37  ;;  %v2461_v61 = vmax.f32.f32 %v2457_v11, %v2440_v31  ;;  %v2782_v56 = vsel %vm1651_vm1, %v5749_v1, 0.0  ;;  %v6328_v47 = vmax.f32.f32 %v5767_v38, %v5769_v17  ;;  %v6332_v14 = vld [vmem:[#allocation37_spill] sm:$0xff]  ;;  %v6335_v31 = vld [vmem:[#allocation18_spill] sm:$0xff] }
 0x360   : > { %v2752_v57 = vpop.permute.xlu0 %2751  ;;  %v2445_v53 = vand.u32 2147483647, %v2429_v40  ;;  %v2449_v48 = vand.u32 2147483647, %v2433_v44  ;;  %v2780_v35 = vsel %vm1651_vm1, %v5726_v51, 0.0  ;;  %v2798_v29 = vsub.f32 %v2782_v56, %v6330_v8  ;;  %v6334_v51 = vld [vmem:[#allocation22_spill] sm:$0xff]  ;;  %s3456_s20 = spop %3455 }
 0x361   : > { %2652 = vmax.xlane.f32.xlu1 %v2651_v34  ;;  %v2458_v3 = vmax.f32.f32 %v2443_v9, %v2461_v61  ;;  %v2784_v1 = vsel %vm1651_vm1, %v6331_v16, 0.0  ;;  %v2786_v38 = vsel %vm1651_vm1, %v2748_v15, 0.0  ;;  %v5921_v59 = vsel %vm1651_vm1, %v5830_v54, 0.0  ;;  %v6336_v61 = vld [vmem:[#allocation48_spill] sm:$0xff]  ;;  %v6337_v56 = vld [vmem:[#allocation39_spill] sm:$0xff] }
 0x362   : > { %v5885_v50 = vpop.permute.xlu1 %2741  ;;  %v2796_v5 = vsub.f32 %v2780_v35, %v6333_v28  ;;  %v2800_v10 = vsub.f32 %v2784_v1, %v6334_v51  ;;  %v2814_v46 = vand.u32 2147483647, %v2798_v29  ;;  %v2802_v15 = vsub.f32 %v2786_v38, %v6336_v61  ;;  %v6341_v51 = vld [vmem:[#allocation53_spill] sm:$0xff]  ;;  %v6343_v61 = vld [vmem:[#allocation6_spill] sm:$0xff] }
 0x363   : > { %v2456_v26 = vmax.f32.f32 %v2447_v42, %v2458_v3  ;;  %v2912_v36 = vsel %vm1651_vm1, %v5860_v55, 0.0  ;;  %v2777_v44 = vsel %vm1651_vm1, %v5864_v20, 0.0  ;;  %v6347_v41 = vmax.f32.f32 %v5794_v23, %v5798_v45  ;;  %v6349_v45 = vld [vmem:[#allocation8_spill] sm:$0xff] }
 0x364   : > { %v2881_v7 = vpop.permute.xlu0 %2880 }
 0x365   : > { %v2460_v12 = vmax.f32.f32 %v2456_v26, %v2445_v53 }
 0x366   : > { %v2871_v2 = vpop.permute.xlu1 %2870 }
 0x367   : > { %v5891_v0 = vsel %vm1651_vm1, %v2871_v2, 0.0  ;;  %v2462_v62 = vmax.f32.f32 %v2449_v48, %v2460_v12  ;;  %v2951_v2 = vrot.slane %v5921_v59, 1  ;;  %v6338_v48 = vld [vmem:[#allocation54_spill] sm:$0xff] }
 0x368   : > { %v2949_v24 = vrot.slane %v5891_v0, 1  ;;  %v2754_v9 = vpop.permute.xlu0 %2753  ;;  %v2793_v20 = vsub.f32 %v2777_v44, %v6338_v48 }
 0x36a   : > { %v2950_v32 = vsel %vm1553_vm0, %v6327_v63, %v2949_v24  ;;  %v2875_v18 = vpop.permute.xlu1 %2874  ;;  %v2788_v63 = vsel %vm1651_vm1, %v2752_v57, 0.0  ;;  %v2914_v57 = vsel %vm1651_vm1, %v2881_v7, 0.0  ;;  %v2809_v28 = vand.u32 2147483647, %v2793_v20 }
 0x36b   : > { %v2988_v43 = vsub.f32 %v2950_v32, %v5783_v60  ;;  %v2794_v60 = vsub.f32 %v2778_v21, %v6329_v30  ;;  %v2911_v54 = vsel %vm1651_vm1, %v2875_v18, 0.0  ;;  %v5933_v32 = vand.u32 2147483647, %v2796_v5 }
 0x36c   : > { %v2818_v21 = vand.u32 2147483647, %v2802_v15  ;;  %v2955_v18 = vrot.slane %v2912_v36, 1  ;;  %v2758_v55 = vpop.permute.xlu0 %2757  ;;  %v2959_v1 = vrot.slane %v2914_v57, 1 }
 0x36d   : > { %v3004_v6 = vand.u32 2147483647, %v2988_v43  ;;  %v2810_v19 = vand.u32 2147483647, %v2794_v60  ;;  %v5935_v43 = vand.u32 2147483647, %v2800_v10 }
 0x36e   : > { %v2379_v13 = vpop.permute.xlu1 %2378  ;;  %v5943_v60 = vsel %vm1651_vm1, %v2754_v9, 0.0  ;;  %v5955_v29 = vsel %vm1651_vm1, %v2758_v55, 0.0 }
 0x36f   : > { %v5908_v25 = vmax.f32.f32 %v6328_v47, %v3004_v6  ;;  %v2414_v39 = vsel %vm1651_vm1, %v2379_v13, 0.0  ;;  %v2826_v53 = vmax.f32.f32 %v2810_v19, %v2814_v46  ;;  %v2953_v6 = vrot.slane %v2911_v54, 1  ;;  %v6342_v46 = vld [vmem:[#allocation25_spill] sm:$0xff] }
 0x370   : > { %v2430_v37 = vsub.f32 %v2414_v39, %v6332_v14  ;;  %v2804_v13 = vsub.f32 %v2788_v63, %v6337_v56  ;;  %v2952_v47 = vsel %vm1553_vm0, %v2949_v24, %v2951_v2  ;;  %v2828_v12 = vmax.f32.f32 %v5933_v32, %v5935_v43  ;;  %v6339_v14 = vld [vmem:[#allocation10_spill] sm:$0xff] }
 0x371   : > { %v2779_v39 = vsel %vm1651_vm1, %v5875_v4, 0.0  ;;  %v5950_v35 = vmax.f32.f32 %v2826_v53, %v2818_v21  ;;  %v2989_v24 = vsub.f32 %v2952_v47, %v5891_v0  ;;  %v2954_v8 = vsel %vm1553_vm0, %v2951_v2, %v2953_v6 }
 0x372   : > { %v2383_v17 = vpop.permute.xlu1 %2382  ;;  %v2446_v34 = vand.u32 2147483647, %v2430_v37  ;;  %v5957_v7 = vand.u32 2147483647, %v2804_v13  ;;  %v2956_v16 = vsel %vm1553_vm0, %v2953_v6, %v2955_v18  ;;  %v2805_v37 = vsub.f32 %v5943_v60, %v6339_v14  ;;  %v6346_v14 = vld [vmem:[#allocation47_spill] sm:$0xff] }
 0x373   : > { %v2416_v49 = vsel %vm1651_vm1, %v2383_v17, 0.0  ;;  %v6340_v17 = vld [vmem:[#allocation17_spill] sm:$0xff]  ;;  %v2783_v0 = vsel %vm1651_vm1, %v5885_v50, 0.0  ;;  %v2990_v5 = vsub.f32 %v2954_v8, %v5921_v59  ;;  %v2807_v10 = vsub.f32 %v5955_v29, %v6341_v51 }
 0x374   : > { %v2432_v11 = vsub.f32 %v2416_v49, %v6335_v31  ;;  %v2463_v3 = vmax.f32.f32 %v2446_v34, %v2462_v62  ;;  %v2795_v4 = vsub.f32 %v2779_v39, %v6340_v17  ;;  %v2781_v34 = vsel %vm1651_vm1, %v5881_v27, 0.0 }
 0x375   : > { %v3005_v31 = vand.u32 2147483647, %v2989_v24  ;;  %v2797_v27 = vsub.f32 %v2781_v34, %v6342_v46  ;;  %v2799_v15 = vsub.f32 %v2783_v0, %v6343_v61  ;;  %v3006_v53 = vand.u32 2147483647, %v2990_v5 }
 0x376   : > { %v2448_v42 = vand.u32 2147483647, %v2432_v11  ;;  %v2746_v40 = vpop.permute.xlu1 %2745  ;;  %v2991_v11 = vsub.f32 %v2956_v16, %v2911_v54  ;;  %v2811_v59 = vand.u32 2147483647, %v2795_v4  ;;  %v6344_v54 = vld [vmem:[#allocation46_spill] sm:$0xff] }
 0x377   : > { %v2785_v9 = vsel %vm1651_vm1, %v2746_v40, 0.0  ;;  %v6345_v40 = vld [vmem:[#allocation19_spill] sm:$0xff]  ;;  %v3017_v56 = vmax.f32.f32 %v3013_v52, %v3005_v31  ;;  %v2815_v55 = vand.u32 2147483647, %v2799_v15  ;;  %v2823_v23 = vand.u32 2147483647, %v2807_v10 }
 0x378   : > { %v2464_v26 = vmax.f32.f32 %v2448_v42, %v2463_v3  ;;  %v2801_v44 = vsub.f32 %v2785_v9, %v6344_v54  ;;  %v3007_v13 = vand.u32 2147483647, %v2991_v11 }
 0x379   : > { %v2827_v0 = vmax.f32.f32 %v2811_v59, %v2815_v55 }
 0x37a   : > { %v2750_v30 = vpop.permute.xlu1 %2749  ;;  %2465 = vmax.xlane.f32.xlu0 %v2464_v26  ;;  %v2817_v29 = vand.u32 2147483647, %v2801_v44 }
 0x37b   : > { %v2787_v19 = vsel %vm1651_vm1, %v2750_v30, 0.0  ;;  %v2813_v30 = vand.u32 2147483647, %v2797_v27 }
 0x37c   : > { %v2803_v21 = vsub.f32 %v2787_v19, %v6345_v40 }
 0x37e   : > { %v2879_v38 = vpop.permute.xlu1 %2878  ;;  %v2819_v16 = vand.u32 2147483647, %v2803_v21 }
 0x37f   : > { %v2913_v49 = vsel %vm1651_vm1, %v2879_v38, 0.0  ;;  %v3018_v38 = vmax.f32.f32 %v6347_v41, %v3006_v53 }
 0x380   : > { %v2957_v62 = vrot.slane %v2913_v49, 1  ;;  %v2831_v19 = vmax.f32.f32 %v2827_v0, %v2819_v16 }
 0x382   : > { %v2958_v50 = vsel %vm1553_vm0, %v2955_v18, %v2957_v62  ;;  %v2960_v2 = vsel %vm1553_vm0, %v2957_v62, %v2959_v1  ;;  %v2883_v3 = vpop.permute.xlu1 %2882  ;;  %v2821_v62 = vand.u32 2147483647, %v2805_v37  ;;  %v2835_v15 = vmax.f32.f32 %v2831_v19, %v2823_v23 }
 0x383   : > { %v2992_v42 = vsub.f32 %v2958_v50, %v2912_v36  ;;  %v2993_v63 = vsub.f32 %v2960_v2, %v2913_v49  ;;  %v2915_v26 = vsel %vm1651_vm1, %v2883_v3, 0.0 }
 0x384   : > { %v2961_v6 = vrot.slane %v2915_v26, 1 }
 0x385   : > { %v3008_v18 = vand.u32 2147483647, %v2992_v42  ;;  %v3009_v47 = vand.u32 2147483647, %v2993_v63 }
 0x386   : > { %v2962_v36 = vsel %vm1553_vm0, %v2959_v1, %v2961_v6  ;;  %v2979_v60 = vsel %vm1553_vm0, %v2961_v6, 0.0  ;;  %v2756_v48 = vpop.permute.xlu1 %2755  ;;  %v6348_v1 = vmax.f32.f32 %v5822_v22, %v5824_v58  ;;  %v2832_v22 = vmax.f32.f32 %v2828_v12, %v5957_v7 }
 0x387   : > { %v3021_v20 = vmax.f32.f32 %v3017_v56, %v3009_v47  ;;  %v2994_v39 = vsub.f32 %v2962_v36, %v2914_v57  ;;  %v2995_v24 = vsub.f32 %v2979_v60, %v2915_v26  ;;  %v2790_v8 = vsel %vm1651_vm1, %v2756_v48, 0.0 }
 0x388   : > { %v2806_v33 = vsub.f32 %v2790_v8, %v6346_v14  ;;  %v3020_v52 = vmax.f32.f32 %v5908_v25, %v3008_v18  ;;  %v3019_v17 = vmax.f32.f32 %v6348_v1, %v3007_v13  ;;  %v2825_v57 = vmax.f32.f32 %v2809_v28, %v2813_v30 }
 0x389   : > { %v3010_v4 = vand.u32 2147483647, %v2994_v39  ;;  %v3011_v34 = vand.u32 2147483647, %v2995_v24  ;;  %v1724_v14 = vstv %s3450_s14 }
 0x38a   : > { %v2822_v49 = vand.u32 2147483647, %v2806_v33  ;;  %v2760_v5 = vpop.permute.xlu1 %2759  ;;  %v3024_v51 = vmax.f32.f32 %v3020_v52, %v3021_v20  ;;  %v2829_v9 = vmax.f32.f32 %v2825_v57, %v2817_v29  ;;  %v1534_v29 = vlaneseq }
 0x38b   : > { %v3023_v31 = vmax.f32.f32 %v3019_v17, %v3011_v34  ;;  %v2792_v11 = vsel %vm1651_vm1, %v2760_v5, 0.0  ;;  %v3022_v25 = vmax.f32.f32 %v3018_v38, %v3010_v4  ;;  %v1911_v33 = vstv %s3452_s18 }
 0x38c   : > { %v2808_v46 = vsub.f32 %v2792_v11, %v6349_v45  ;;  %v2834_v58 = vmax.f32.f32 %v5950_v35, %v2822_v49  ;;  %v2833_v37 = vmax.f32.f32 %v2829_v9, %v2821_v62  ;;  %v1535_v16 = vshrl.u32 %v1534_v29, 7 }
 0x38d   : > { %v3025_v27 = vmax.f32.f32 %v3022_v25, %v3023_v31  ;;  %v2099_v52 = vstv %s3454_s19  ;;  %v2286_v38 = vstv %s3456_s20 }
 0x38e   : > { %v2824_v28 = vand.u32 2147483647, %v2808_v46  ;;  %v2837_v2 = vmax.f32.f32 %v2833_v37, %v2834_v58  ;;  %vm1536_vm2 = vcmp.eq.s32.totalorder %v1535_v16, 0  ;;  %vm1726_vm3 = vcmp.eq.s32.totalorder %v1535_v16, 1 }
 0x38f   : > { %v3026_v61 = vmax.f32.f32 %v3024_v51, %v3025_v27  ;;  %vm1913_vm4 = vcmp.eq.s32.totalorder %v1535_v16, 2  ;;  %v1725_v41 = vsel %vm1536_vm2, %v1724_v14, 0.0  ;;  %vm2101_vm5 = vcmp.eq.s32.totalorder %v1535_v16, 3 }
 0x390   : > { %v2836_v50 = vmax.f32.f32 %v2832_v22, %v2824_v28  ;;  %v1912_v1 = vsel %vm1726_vm3, %v1911_v33, %v1725_v41  ;;  %vm2288_vm6 = vcmp.eq.s32.totalorder %v1535_v16, 4  ;;  %vm2476_vm7 = vcmp.eq.s32.totalorder %v1535_v16, 5 }
 0x391   : > { %v2100_v4 = vsel %vm1913_vm4, %v2099_v52, %v1912_v1  ;;  %vm2663_vm8 = vcmp.eq.s32.totalorder %v1535_v16, 6  ;;  %vm2851_vm9 = vcmp.eq.s32.totalorder %v1535_v16, 7 }
 0x392   : > { %v2838_v3 = vmax.f32.f32 %v2835_v15, %v2836_v50  ;;  %v2287_v34 = vsel %vm2101_vm5, %v2286_v38, %v2100_v4 }
 0x394   : > { %v2839_v59 = vmax.f32.f32 %v2837_v2, %v2838_v3 }
 0x396   : > { %2840 = vmax.xlane.f32.xlu0 %v2839_v59 }
 0x39a   : > { %3027 = vmax.xlane.f32.xlu0 %v3026_v61 }
 0x3ea   : > { %v2653_v10 = vpop.xlane.xlu1 %2652 }
 0x3eb   : > { %v2654_v42 = vrot.slane %v2653_v10, 4 }
 0x3ed   : > { %v2655_v63 = vmax.f32 %v2653_v10, %v2654_v42 }
 0x3ef   : > { %v2656_v26 = vrot.slane %v2655_v63, 2 }
 0x3f1   : > { %v2657_v43 = vmax.f32 %v2655_v63, %v2656_v26 }
 0x3f3   : > { %v2658_v7 = vrot.slane %v2657_v43, 1 }
 0x3f5   : > { %v2659_v21 = vmax.f32 %v2657_v43, %v2658_v7 }
 0x403   : > { %v2466_v53 = vpop.xlane.xlu0 %2465 }
 0x404   : > { %v2467_v54 = vrot.slane %v2466_v53, 4 }
 0x406   : > { %v2468_v32 = vmax.f32 %v2466_v53, %v2467_v54 }
 0x408   : > { %v2469_v12 = vrot.slane %v2468_v32, 2 }
 0x40a   : > { %v2470_v35 = vmax.f32 %v2468_v32, %v2469_v12 }
 0x40c   : > { %v2471_v44 = vrot.slane %v2470_v35, 1 }
 0x40e   : > { %v2472_v40 = vmax.f32 %v2470_v35, %v2471_v44 }
 0x410   : > { %3457 = vpush %v2472_v40 }
 0x411   : > { %3459 = vpush %v2659_v21 }
 0x41f   : > { %v2841_v6 = vpop.xlane.xlu0 %2840 }
 0x420   : > { %v2842_v56 = vrot.slane %v2841_v6, 4 }
 0x422   : > { %v2843_v13 = vmax.f32 %v2841_v6, %v2842_v56 }
 0x423   : > { %v3028_v18 = vpop.xlane.xlu0 %3027 }
 0x424   : > { %v2844_v47 = vrot.slane %v2843_v13, 2  ;;  %v3029_v30 = vrot.slane %v3028_v18, 4 }
 0x426   : > { %v3030_v55 = vmax.f32 %v3028_v18, %v3029_v30  ;;  %v2845_v36 = vmax.f32 %v2843_v13, %v2844_v47 }
 0x428   : > { %v3031_v60 = vrot.slane %v3030_v55, 2  ;;  %v2846_v48 = vrot.slane %v2845_v36, 1 }
 0x42a   : > { %v3032_v20 = vmax.f32 %v3030_v55, %v3031_v60  ;;  %v2847_v39 = vmax.f32 %v2845_v36, %v2846_v48 }
 0x42c   : > { %3461 = vpush %v2847_v39  ;;  %v3033_v24 = vrot.slane %v3032_v20, 1 }
 0x42e   : > { %v3034_v8 = vmax.f32 %v3032_v20, %v3033_v24 }
 0x430   : > { %3463 = vpush %v3034_v8 }
 0x441   : > { %s3458_s21 = spop %3457 }
 0x442   : > { %v2474_v17 = vstv %s3458_s21  ;;  %s3460_s22 = spop %3459 }
 0x443   : > { %v2475_v57 = vsel %vm2288_vm6, %v2474_v17, %v2287_v34  ;;  %v2661_v0 = vstv %s3460_s22 }
 0x444   : > { %v2662_v5 = vsel %vm2476_vm7, %v2661_v0, %v2475_v57 }
 0x45d   : > { %s3462_s23 = spop %3461 }
 0x45e   : > { %v2849_v49 = vstv %s3462_s23 }
 0x45f   : > { %v2850_v51 = vsel %vm2663_vm8, %v2849_v49, %v2662_v5 }
 0x461   : > { %s3464_s29 = spop %3463 }
 0x462   : > { %v3036_v62 = vstv %s3464_s29 }
 0x463   : > { %v3037_v31 = vsel %vm2851_vm9, %v3036_v62, %v2850_v51 }
 0x464   : > { %3038 = vst [vmem:[%s421_s26] sm:$0xff] %v3037_v31 }
 0x465 PF: > { %s19_s27 = sadd.s32 1, %s3507_s27  }
 0x466   : > { %p16_p4 = scmp.ge.s32.totalorder %s19_s27, 4  }
 0x468   :  { %18 = sbr.rel (!%p16_p4) target bundleno = 1 (0x1), region = 122 }

</bundles_post_ra>
